<compile_context>
chip_gen: v6e
topology: v6e:2x2x1
jax: 0.10.0
libtpu: 0.0.40
codegen_flags: <defaults>
</compile_context>

<pallas_src>
import functools

import jax
import jax.numpy as jnp
from jax.experimental import pallas as pl
from jax.experimental.pallas import tpu as pltpu

BN_EPS = 1e-5
K = 5                # conv kernel size
S = 3                # conv stride
H0 = 84              # input spatial size
H0P = 90             # H0 padded up to a multiple of 9 (residue-major row layout)
H1, H2, H3 = 27, 8, 2
C1, C2, C3 = 16, 32, 32


def _vmem_spec():
    return pl.BlockSpec(memory_space=pltpu.MemorySpace.VMEM)


def _compiler_params():
    # v5e/v6e: 128 MiB physical VMEM -> ~100 MiB limit; v7x: 64 MiB -> ~48 MiB.
    try:
        cap = int(getattr(pltpu.get_tpu_info(), "vmem_capacity_bytes",
                          64 * 1024 * 1024))
        limit = min(cap - 16 * 1024 * 1024, 100 * 1024 * 1024)
        limit = max(limit, 32 * 1024 * 1024)
    except Exception:            # conservative fallback (worked previously)
        limit = 48 * 1024 * 1024
    return pltpu.CompilerParams(vmem_limit_bytes=limit)


# ----------------------------------------------------------------------------
# In-kernel helpers
# ----------------------------------------------------------------------------
def _bn_relu(parts, g, gt, gamma, beta, group):
    """Training-mode BatchNorm (one-pass stats, biased variance) + ReLU.

    parts: list of 2-D f32 blocks whose columns are (spatial, channel) with
    channel fastest.  Per-channel statistics are pooled over all rows of all
    parts and over the `group` spatial positions sharing a channel (the 0/1
    matrices g: (group*C, C) and gt: (C, group*C) do the pooling/broadcast).
    """
    rows = sum(int(p.shape[0]) for p in parts)
    inv_count = 1.0 / float(rows * group)
    s = jnp.sum(parts[0], axis=0, keepdims=True)
    ss = jnp.sum(parts[0] * parts[0], axis=0, keepdims=True)
    for p in parts[1:]:
        s = s + jnp.sum(p, axis=0, keepdims=True)
        ss = ss + jnp.sum(p * p, axis=0, keepdims=True)
    mean_c = jnp.dot(s, g, preferred_element_type=jnp.float32) * inv_count
    ex2_c = jnp.dot(ss, g, preferred_element_type=jnp.float32) * inv_count
    var_c = ex2_c - mean_c * mean_c                       # biased variance
    scale_c = gamma * jax.lax.rsqrt(var_c + BN_EPS)
    shift_c = beta - mean_c * scale_c
    scale_f = jnp.dot(scale_c, gt, preferred_element_type=jnp.float32)
    shift_f = jnp.dot(shift_c, gt, preferred_element_type=jnp.float32)
    return [jnp.maximum(p * scale_f + shift_f, 0.0) for p in parts]


def _convnet_kernel(a0_ref, w1_ref, w2_ref, w3_ref, wfc_ref, bfc_ref,
                    g1_ref, gt1_ref, gamma1_ref, beta1_ref,
                    g2_ref, gt2_ref, gamma2_ref, beta2_ref,
                    g3_ref, gt3_ref, gamma3_ref, beta3_ref,
                    o_ref, *, n, cin):
    f32 = jnp.float32
    wc0 = H0 * cin                 # input row width, (w, c_in) with c fastest
    rows_per_group = H0P // 9      # 10 rows per residue group in the input layout

    # ---------------- conv1 -------------------------------------------------
    # Input rows are stored residue-major (h0 mod 9); conv1 output rows are
    # produced grouped by (h1 mod 3).  For output row h1 = 3*q + g and tap kh,
    # the input row is 9*q + m with m = 3*g + kh, i.e. element (q + m//9) of
    # residue group (m % 9) -> every window is a contiguous 9-row slice.
    lhs = {}
    for m in range(3 * (3 - 1) + K):                       # m in [0, 10]
        r0, dq = m % 9, m // 9
        win = a0_ref[:, pl.ds(rows_per_group * r0 + dq, 9), :]   # (n, 9, wc0) bf16
        lhs[m] = win.reshape(n * 9, wc0)
    y1 = []                                                # residue groups g = 0,1,2
    for g in range(3):
        acc = jnp.dot(lhs[3 * g], w1_ref[0], preferred_element_type=f32)
        for kh in range(1, K):
            acc = acc + jnp.dot(lhs[3 * g + kh], w1_ref[kh],
                                preferred_element_type=f32)
        y1.append(acc)                                     # (n*9, 27*16) f32
    a1 = _bn_relu(y1, g1_ref[...], gt1_ref[...],
                  gamma1_ref[...], beta1_ref[...], group=H1)
    a1 = [p.astype(jnp.bfloat16).reshape(n, 9, H1 * C1) for p in a1]

    # ---------------- conv2 -------------------------------------------------
    # Window row h1 = 3*ho2 + kh lives in residue group (kh % 3) at positions
    # [kh//3 : kh//3 + 8] -> contiguous slices again.
    y2 = None
    for kh in range(K):
        g, dq = kh % 3, kh // 3
        win = a1[g][:, dq:dq + H2, :].reshape(n * H2, H1 * C1)
        t = jnp.dot(win, w2_ref[kh], preferred_element_type=f32)
        y2 = t if y2 is None else y2 + t                   # (n*8, 8*32) f32
    a2 = _bn_relu([y2], g2_ref[...], gt2_ref[...],
                  gamma2_ref[...], beta2_ref[...], group=H2)[0]
    a2 = a2.astype(jnp.bfloat16).reshape(n, H2, H2 * C2)   # (n, 8, 256)

    # ---------------- conv3 + BN3 + ReLU ------------------------------------
    parts = []
    for ho in range(H3):
        acc = None
        for kh in range(K):
            row = a2[:, S * ho + kh, :]                    # (n, 256) bf16
            t = jnp.dot(row, w3_ref[kh], preferred_element_type=f32)
            acc = t if acc is None else acc + t            # (n, 2*32)
        parts.append(acc)
    y3 = jnp.concatenate(parts, axis=1)                    # (n, 128), cols (ho, wo, c)
    h = _bn_relu([y3], g3_ref[...], gt3_ref[...],
                 gamma3_ref[...], beta3_ref[...], group=H3 * H3)[0]

    # ---------------- fc1 (lane-dense 128-wide padded output) ---------------
    o_ref[...] = (jnp.dot(h.astype(jnp.bfloat16), wfc_ref[...],
                          preferred_element_type=f32) + bfc_ref[...])


# ----------------------------------------------------------------------------
# One-time parameter packing (host side)
# ----------------------------------------------------------------------------
def _w_select(w_in, w_out):
    # E[w, wo, kw] = 1 iff w == S*wo + kw   (W-direction im2col selection)
    w_idx = jnp.arange(w_in)[:, None, None]
    wo_idx = jnp.arange(w_out)[None, :, None]
    kw_idx = jnp.arange(K)[None, None, :]
    return (w_idx == S * wo_idx + kw_idx).astype(jnp.float32)


def _fold_conv_weight(wt, w_in, w_out):
    """(C_out, C_in, K, K) -> (K, w_in*C_in, w_out*C_out) per-kh GEMM weights.

    Row order (w, c_in), column order (wo, c_out), channel fastest.  The
    W-direction im2col is baked into the weight; the H direction is handled
    in-kernel by accumulating the K per-kh GEMMs over contiguous row windows.
    """
    e = _w_select(w_in, w_out)                             # (w_in, w_out, K)
    big = jnp.einsum("wuk,oihk->hwiuo", e, wt)             # (K, w_in, Cin, w_out, Cout)
    cout, cin = wt.shape[0], wt.shape[1]
    return big.reshape(K, w_in * cin, w_out * cout)


def _group_mats(c, group):
    g = jnp.tile(jnp.eye(c, dtype=jnp.float32), (group, 1))   # (group*c, c)
    return g, g.T


def init_params(key, representation_size=32, input_channels=1):
    """PyTorch-equivalent raw parameters (Conv2d / BatchNorm2d / Linear defaults)."""
    ks = jax.random.split(key, 8)

    def conv(kw, kb, cin, cout):
        fan_in = cin * K * K
        bound = 1.0 / jnp.sqrt(fan_in)
        w = jax.random.uniform(kw, (cout, cin, K, K), jnp.float32, -bound, bound)
        b = jax.random.uniform(kb, (cout,), jnp.float32, -bound, bound)
        return w, b

    p = {}
    p["conv1_w"], p["conv1_b"] = conv(ks[0], ks[1], input_channels, C1)
    p["conv2_w"], p["conv2_b"] = conv(ks[2], ks[3], C1, C2)
    p["conv3_w"], p["conv3_b"] = conv(ks[4], ks[5], C2, C3)
    for i, c in ((1, C1), (2, C2), (3, C3)):
        p[f"bn{i}_g"] = jnp.ones((c,), jnp.float32)
        p[f"bn{i}_b"] = jnp.zeros((c,), jnp.float32)
    bound = 1.0 / jnp.sqrt(128.0)
    p["fc1_w"] = jax.random.uniform(ks[6], (representation_size, 128), jnp.float32,
                                    -bound, bound)
    p["fc1_b"] = jax.random.uniform(ks[7], (representation_size,), jnp.float32,
                                    -bound, bound)
    return p


def prepare_params(p, representation_size):
    """Pack PyTorch-layout params into the Pallas kernel operands."""
    kp = {}
    kp["w1"] = _fold_conv_weight(p["conv1_w"], H0, H1).astype(jnp.bfloat16)
    kp["w2"] = _fold_conv_weight(p["conv2_w"], H1, H2).astype(jnp.bfloat16)
    kp["w3"] = _fold_conv_weight(p["conv3_w"], H2, H3).astype(jnp.bfloat16)
    for i, (c, grp) in ((1, (C1, H1)), (2, (C2, H2)), (3, (C3, H3 * H3))):
        g, gt = _group_mats(c, grp)
        kp[f"g{i}"], kp[f"gt{i}"] = g, gt
        kp[f"gamma{i}"] = p[f"bn{i}_g"].reshape(1, c)
        kp[f"beta{i}"] = p[f"bn{i}_b"].reshape(1, c)
    # fc1 rows permuted from the PyTorch NCHW flatten order (c*4 + ho*2 + wo)
    # to the kernel's (ho, wo, c) column order, then zero-padded to a
    # lane-dense 128-wide output (sliced back to representation_size outside).
    rep = representation_size
    out_pad = max(128, ((rep + 127) // 128) * 128)
    perm = jnp.array([c * (H3 * H3) + ho * H3 + wo
                      for ho in range(H3) for wo in range(H3) for c in range(C3)],
                     dtype=jnp.int32)
    wfc = jnp.zeros((H3 * H3 * C3, out_pad), jnp.float32)
    wfc = wfc.at[:, :rep].set(p["fc1_w"].T[perm])
    bfc = jnp.zeros((1, out_pad), jnp.float32).at[:, :rep].set(p["fc1_b"][None, :])
    kp["wfc"] = wfc.astype(jnp.bfloat16)
    kp["bfc"] = bfc
    # NOTE: conv biases (p["conv*_b"]) are intentionally unused: they are
    # cancelled exactly by the training-mode BatchNorm mean subtraction.
    return kp


# ----------------------------------------------------------------------------
# Forward pass
# ----------------------------------------------------------------------------
@functools.partial(jax.jit, static_argnames=("representation_size", "input_channels"))
def convnet_forward(x, kp, representation_size, input_channels=1):
    # Like PyTorch: view(-1, C, 84, 84)
    x = x.reshape(-1, input_channels, H0, H0).astype(jnp.float32)
    n = x.shape[0]
    wc0 = H0 * input_channels
    # channels-last rows=(h), cols=(w, c); pad H to 90 and reorder rows to the
    # residue-major (h mod 9) layout the kernel expects.  This pad+transpose is
    # the only host-side data movement (same size as the input; padded rows are
    # never read by the kernel).
    a0 = x.transpose(0, 2, 3, 1).reshape(n, H0, wc0)
    a0 = jnp.pad(a0, ((0, 0), (0, H0P - H0), (0, 0)))
    a0r = (a0.reshape(n, H0P // 9, 9, wc0)
             .transpose(0, 2, 1, 3)
             .reshape(n, H0P, wc0)
             .astype(jnp.bfloat16))

    out_pad = kp["wfc"].shape[1]
    out = pl.pallas_call(
        functools.partial(_convnet_kernel, n=n, cin=input_channels),
        out_shape=jax.ShapeDtypeStruct((n, out_pad), jnp.float32),
        in_specs=[_vmem_spec()] * 18,
        out_specs=_vmem_spec(),
        compiler_params=_compiler_params(),
    )(a0r, kp["w1"], kp["w2"], kp["w3"], kp["wfc"], kp["bfc"],
      kp["g1"], kp["gt1"], kp["gamma1"], kp["beta1"],
      kp["g2"], kp["gt2"], kp["gamma2"], kp["beta2"],
      kp["g3"], kp["gt3"], kp["gamma3"], kp["beta3"])
    return out[:, :representation_size]


if __name__ == "__main__":
    key = jax.random.PRNGKey(0)
    k_in, k_par = jax.random.split(key)

    representation_size = 32
    raw_params = init_params(k_par, representation_size=representation_size,
                             input_channels=1)
    kernel_params = prepare_params(raw_params, representation_size)

    x = jax.random.normal(k_in, (2, 1, 84, 84), jnp.float32)

    out = convnet_forward(x, kernel_params,
                          representation_size=representation_size,
                          input_channels=1)
    out = jax.block_until_ready(out)
    assert out.shape == (2, representation_size), out.shape
    print("KERNEL_OK")
</pallas_src>

<mosaic_0001>
module attributes {stable_mosaic.version = 11 : i64} {
  func.func @_convnet_kernel(%arg0: memref<2x90x84xbf16, #tpu.memory_space<vmem>>, %arg1: memref<5x84x432xbf16, #tpu.memory_space<vmem>>, %arg2: memref<5x432x256xbf16, #tpu.memory_space<vmem>>, %arg3: memref<5x256x64xbf16, #tpu.memory_space<vmem>>, %arg4: memref<128x128xbf16, #tpu.memory_space<vmem>>, %arg5: memref<1x128xf32, #tpu.memory_space<vmem>>, %arg6: memref<432x16xf32, #tpu.memory_space<vmem>>, %arg7: memref<16x432xf32, #tpu.memory_space<vmem>>, %arg8: memref<1x16xf32, #tpu.memory_space<vmem>>, %arg9: memref<1x16xf32, #tpu.memory_space<vmem>>, %arg10: memref<256x32xf32, #tpu.memory_space<vmem>>, %arg11: memref<32x256xf32, #tpu.memory_space<vmem>>, %arg12: memref<1x32xf32, #tpu.memory_space<vmem>>, %arg13: memref<1x32xf32, #tpu.memory_space<vmem>>, %arg14: memref<128x32xf32, #tpu.memory_space<vmem>>, %arg15: memref<32x128xf32, #tpu.memory_space<vmem>>, %arg16: memref<1x32xf32, #tpu.memory_space<vmem>>, %arg17: memref<1x32xf32, #tpu.memory_space<vmem>>, %arg18: memref<2x128xf32, #tpu.memory_space<vmem>>) attributes {dimension_semantics = [], scalar_prefetch = 0 : i64, scratch_operands = 0 : i64, tpu.core_type = #tpu.core_type<tc>} {
    %c0 = arith.constant 0 : index
    %c0_0 = arith.constant 0 : index
    %c0_1 = arith.constant 0 : index
    %0 = vector.load %arg0[%c0, %c0_0, %c0_1] : memref<2x90x84xbf16, #tpu.memory_space<vmem>>, vector<2x9x84xbf16>
    %1 = vector.shape_cast %0 : vector<2x9x84xbf16> to vector<18x84xbf16>
    %c0_2 = arith.constant 0 : index
    %c10 = arith.constant 10 : index
    %c0_3 = arith.constant 0 : index
    %2 = vector.load %arg0[%c0_2, %c10, %c0_3] : memref<2x90x84xbf16, #tpu.memory_space<vmem>>, vector<2x9x84xbf16>
    %3 = vector.shape_cast %2 : vector<2x9x84xbf16> to vector<18x84xbf16>
    %c0_4 = arith.constant 0 : index
    %c20 = arith.constant 20 : index
    %c0_5 = arith.constant 0 : index
    %4 = vector.load %arg0[%c0_4, %c20, %c0_5] : memref<2x90x84xbf16, #tpu.memory_space<vmem>>, vector<2x9x84xbf16>
    %5 = vector.shape_cast %4 : vector<2x9x84xbf16> to vector<18x84xbf16>
    %c0_6 = arith.constant 0 : index
    %c30 = arith.constant 30 : index
    %c0_7 = arith.constant 0 : index
    %6 = vector.load %arg0[%c0_6, %c30, %c0_7] : memref<2x90x84xbf16, #tpu.memory_space<vmem>>, vector<2x9x84xbf16>
    %7 = vector.shape_cast %6 : vector<2x9x84xbf16> to vector<18x84xbf16>
    %c0_8 = arith.constant 0 : index
    %c40 = arith.constant 40 : index
    %c0_9 = arith.constant 0 : index
    %8 = vector.load %arg0[%c0_8, %c40, %c0_9] : memref<2x90x84xbf16, #tpu.memory_space<vmem>>, vector<2x9x84xbf16>
    %9 = vector.shape_cast %8 : vector<2x9x84xbf16> to vector<18x84xbf16>
    %c0_10 = arith.constant 0 : index
    %c50 = arith.constant 50 : index
    %c0_11 = arith.constant 0 : index
    %10 = vector.load %arg0[%c0_10, %c50, %c0_11] : memref<2x90x84xbf16, #tpu.memory_space<vmem>>, vector<2x9x84xbf16>
    %11 = vector.shape_cast %10 : vector<2x9x84xbf16> to vector<18x84xbf16>
    %c0_12 = arith.constant 0 : index
    %c60 = arith.constant 60 : index
    %c0_13 = arith.constant 0 : index
    %12 = vector.load %arg0[%c0_12, %c60, %c0_13] : memref<2x90x84xbf16, #tpu.memory_space<vmem>>, vector<2x9x84xbf16>
    %13 = vector.shape_cast %12 : vector<2x9x84xbf16> to vector<18x84xbf16>
    %c0_14 = arith.constant 0 : index
    %c70 = arith.constant 70 : index
    %c0_15 = arith.constant 0 : index
    %14 = vector.load %arg0[%c0_14, %c70, %c0_15] : memref<2x90x84xbf16, #tpu.memory_space<vmem>>, vector<2x9x84xbf16>
    %15 = vector.shape_cast %14 : vector<2x9x84xbf16> to vector<18x84xbf16>
    %c0_16 = arith.constant 0 : index
    %c80 = arith.constant 80 : index
    %c0_17 = arith.constant 0 : index
    %16 = vector.load %arg0[%c0_16, %c80, %c0_17] : memref<2x90x84xbf16, #tpu.memory_space<vmem>>, vector<2x9x84xbf16>
    %17 = vector.shape_cast %16 : vector<2x9x84xbf16> to vector<18x84xbf16>
    %c0_18 = arith.constant 0 : index
    %c1 = arith.constant 1 : index
    %c0_19 = arith.constant 0 : index
    %18 = vector.load %arg0[%c0_18, %c1, %c0_19] : memref<2x90x84xbf16, #tpu.memory_space<vmem>>, vector<2x9x84xbf16>
    %19 = vector.shape_cast %18 : vector<2x9x84xbf16> to vector<18x84xbf16>
    %c0_20 = arith.constant 0 : index
    %c11 = arith.constant 11 : index
    %c0_21 = arith.constant 0 : index
    %20 = vector.load %arg0[%c0_20, %c11, %c0_21] : memref<2x90x84xbf16, #tpu.memory_space<vmem>>, vector<2x9x84xbf16>
    %21 = vector.shape_cast %20 : vector<2x9x84xbf16> to vector<18x84xbf16>
    %c0_22 = arith.constant 0 : index
    %c0_23 = arith.constant 0 : index
    %c0_24 = arith.constant 0 : index
    %22 = vector.load %arg1[%c0_22, %c0_23, %c0_24] : memref<5x84x432xbf16, #tpu.memory_space<vmem>>, vector<1x84x432xbf16>
    %23 = vector.shape_cast %22 : vector<1x84x432xbf16> to vector<84x432xbf16>
    %cst = arith.constant dense<0.000000e+00> : vector<18x432xf32>
    %24 = tpu.matmul %1, %23, %cst {dimension_numbers = #tpu.dot_dimension_numbers<[1], [0], [0], [1], [0, 0, 1, 1], [], []>} : vector<18x84xbf16>, vector<84x432xbf16>, vector<18x432xf32> -> vector<18x432xf32>
    %c1_25 = arith.constant 1 : index
    %c0_26 = arith.constant 0 : index
    %c0_27 = arith.constant 0 : index
    %25 = vector.load %arg1[%c1_25, %c0_26, %c0_27] : memref<5x84x432xbf16, #tpu.memory_space<vmem>>, vector<1x84x432xbf16>
    %26 = vector.shape_cast %25 : vector<1x84x432xbf16> to vector<84x432xbf16>
    %cst_28 = arith.constant dense<0.000000e+00> : vector<18x432xf32>
    %27 = tpu.matmul %3, %26, %cst_28 {dimension_numbers = #tpu.dot_dimension_numbers<[1], [0], [0], [1], [0, 0, 1, 1], [], []>} : vector<18x84xbf16>, vector<84x432xbf16>, vector<18x432xf32> -> vector<18x432xf32>
    %28 = arith.addf %24, %27 : vector<18x432xf32>
    %c2 = arith.constant 2 : index
    %c0_29 = arith.constant 0 : index
    %c0_30 = arith.constant 0 : index
    %29 = vector.load %arg1[%c2, %c0_29, %c0_30] : memref<5x84x432xbf16, #tpu.memory_space<vmem>>, vector<1x84x432xbf16>
    %30 = vector.shape_cast %29 : vector<1x84x432xbf16> to vector<84x432xbf16>
    %cst_31 = arith.constant dense<0.000000e+00> : vector<18x432xf32>
    %31 = tpu.matmul %5, %30, %cst_31 {dimension_numbers = #tpu.dot_dimension_numbers<[1], [0], [0], [1], [0, 0, 1, 1], [], []>} : vector<18x84xbf16>, vector<84x432xbf16>, vector<18x432xf32> -> vector<18x432xf32>
    %32 = arith.addf %28, %31 : vector<18x432xf32>
    %c3 = arith.constant 3 : index
    %c0_32 = arith.constant 0 : index
    %c0_33 = arith.constant 0 : index
    %33 = vector.load %arg1[%c3, %c0_32, %c0_33] : memref<5x84x432xbf16, #tpu.memory_space<vmem>>, vector<1x84x432xbf16>
    %34 = vector.shape_cast %33 : vector<1x84x432xbf16> to vector<84x432xbf16>
    %cst_34 = arith.constant dense<0.000000e+00> : vector<18x432xf32>
    %35 = tpu.matmul %7, %34, %cst_34 {dimension_numbers = #tpu.dot_dimension_numbers<[1], [0], [0], [1], [0, 0, 1, 1], [], []>} : vector<18x84xbf16>, vector<84x432xbf16>, vector<18x432xf32> -> vector<18x432xf32>
    %36 = arith.addf %32, %35 : vector<18x432xf32>
    %c4 = arith.constant 4 : index
    %c0_35 = arith.constant 0 : index
    %c0_36 = arith.constant 0 : index
    %37 = vector.load %arg1[%c4, %c0_35, %c0_36] : memref<5x84x432xbf16, #tpu.memory_space<vmem>>, vector<1x84x432xbf16>
    %38 = vector.shape_cast %37 : vector<1x84x432xbf16> to vector<84x432xbf16>
    %cst_37 = arith.constant dense<0.000000e+00> : vector<18x432xf32>
    %39 = tpu.matmul %9, %38, %cst_37 {dimension_numbers = #tpu.dot_dimension_numbers<[1], [0], [0], [1], [0, 0, 1, 1], [], []>} : vector<18x84xbf16>, vector<84x432xbf16>, vector<18x432xf32> -> vector<18x432xf32>
    %40 = arith.addf %36, %39 : vector<18x432xf32>
    %c0_38 = arith.constant 0 : index
    %c0_39 = arith.constant 0 : index
    %c0_40 = arith.constant 0 : index
    %41 = vector.load %arg1[%c0_38, %c0_39, %c0_40] : memref<5x84x432xbf16, #tpu.memory_space<vmem>>, vector<1x84x432xbf16>
    %42 = vector.shape_cast %41 : vector<1x84x432xbf16> to vector<84x432xbf16>
    %cst_41 = arith.constant dense<0.000000e+00> : vector<18x432xf32>
    %43 = tpu.matmul %7, %42, %cst_41 {dimension_numbers = #tpu.dot_dimension_numbers<[1], [0], [0], [1], [0, 0, 1, 1], [], []>} : vector<18x84xbf16>, vector<84x432xbf16>, vector<18x432xf32> -> vector<18x432xf32>
    %c1_42 = arith.constant 1 : index
    %c0_43 = arith.constant 0 : index
    %c0_44 = arith.constant 0 : index
    %44 = vector.load %arg1[%c1_42, %c0_43, %c0_44] : memref<5x84x432xbf16, #tpu.memory_space<vmem>>, vector<1x84x432xbf16>
    %45 = vector.shape_cast %44 : vector<1x84x432xbf16> to vector<84x432xbf16>
    %cst_45 = arith.constant dense<0.000000e+00> : vector<18x432xf32>
    %46 = tpu.matmul %9, %45, %cst_45 {dimension_numbers = #tpu.dot_dimension_numbers<[1], [0], [0], [1], [0, 0, 1, 1], [], []>} : vector<18x84xbf16>, vector<84x432xbf16>, vector<18x432xf32> -> vector<18x432xf32>
    %47 = arith.addf %43, %46 : vector<18x432xf32>
    %c2_46 = arith.constant 2 : index
    %c0_47 = arith.constant 0 : index
    %c0_48 = arith.constant 0 : index
    %48 = vector.load %arg1[%c2_46, %c0_47, %c0_48] : memref<5x84x432xbf16, #tpu.memory_space<vmem>>, vector<1x84x432xbf16>
    %49 = vector.shape_cast %48 : vector<1x84x432xbf16> to vector<84x432xbf16>
    %cst_49 = arith.constant dense<0.000000e+00> : vector<18x432xf32>
    %50 = tpu.matmul %11, %49, %cst_49 {dimension_numbers = #tpu.dot_dimension_numbers<[1], [0], [0], [1], [0, 0, 1, 1], [], []>} : vector<18x84xbf16>, vector<84x432xbf16>, vector<18x432xf32> -> vector<18x432xf32>
    %51 = arith.addf %47, %50 : vector<18x432xf32>
    %c3_50 = arith.constant 3 : index
    %c0_51 = arith.constant 0 : index
    %c0_52 = arith.constant 0 : index
    %52 = vector.load %arg1[%c3_50, %c0_51, %c0_52] : memref<5x84x432xbf16, #tpu.memory_space<vmem>>, vector<1x84x432xbf16>
    %53 = vector.shape_cast %52 : vector<1x84x432xbf16> to vector<84x432xbf16>
    %cst_53 = arith.constant dense<0.000000e+00> : vector<18x432xf32>
    %54 = tpu.matmul %13, %53, %cst_53 {dimension_numbers = #tpu.dot_dimension_numbers<[1], [0], [0], [1], [0, 0, 1, 1], [], []>} : vector<18x84xbf16>, vector<84x432xbf16>, vector<18x432xf32> -> vector<18x432xf32>
    %55 = arith.addf %51, %54 : vector<18x432xf32>
    %c4_54 = arith.constant 4 : index
    %c0_55 = arith.constant 0 : index
    %c0_56 = arith.constant 0 : index
    %56 = vector.load %arg1[%c4_54, %c0_55, %c0_56] : memref<5x84x432xbf16, #tpu.memory_space<vmem>>, vector<1x84x432xbf16>
    %57 = vector.shape_cast %56 : vector<1x84x432xbf16> to vector<84x432xbf16>
    %cst_57 = arith.constant dense<0.000000e+00> : vector<18x432xf32>
    %58 = tpu.matmul %15, %57, %cst_57 {dimension_numbers = #tpu.dot_dimension_numbers<[1], [0], [0], [1], [0, 0, 1, 1], [], []>} : vector<18x84xbf16>, vector<84x432xbf16>, vector<18x432xf32> -> vector<18x432xf32>
    %59 = arith.addf %55, %58 : vector<18x432xf32>
    %c0_58 = arith.constant 0 : index
    %c0_59 = arith.constant 0 : index
    %c0_60 = arith.constant 0 : index
    %60 = vector.load %arg1[%c0_58, %c0_59, %c0_60] : memref<5x84x432xbf16, #tpu.memory_space<vmem>>, vector<1x84x432xbf16>
    %61 = vector.shape_cast %60 : vector<1x84x432xbf16> to vector<84x432xbf16>
    %cst_61 = arith.constant dense<0.000000e+00> : vector<18x432xf32>
    %62 = tpu.matmul %13, %61, %cst_61 {dimension_numbers = #tpu.dot_dimension_numbers<[1], [0], [0], [1], [0, 0, 1, 1], [], []>} : vector<18x84xbf16>, vector<84x432xbf16>, vector<18x432xf32> -> vector<18x432xf32>
    %c1_62 = arith.constant 1 : index
    %c0_63 = arith.constant 0 : index
    %c0_64 = arith.constant 0 : index
    %63 = vector.load %arg1[%c1_62, %c0_63, %c0_64] : memref<5x84x432xbf16, #tpu.memory_space<vmem>>, vector<1x84x432xbf16>
    %64 = vector.shape_cast %63 : vector<1x84x432xbf16> to vector<84x432xbf16>
    %cst_65 = arith.constant dense<0.000000e+00> : vector<18x432xf32>
    %65 = tpu.matmul %15, %64, %cst_65 {dimension_numbers = #tpu.dot_dimension_numbers<[1], [0], [0], [1], [0, 0, 1, 1], [], []>} : vector<18x84xbf16>, vector<84x432xbf16>, vector<18x432xf32> -> vector<18x432xf32>
    %66 = arith.addf %62, %65 : vector<18x432xf32>
    %c2_66 = arith.constant 2 : index
    %c0_67 = arith.constant 0 : index
    %c0_68 = arith.constant 0 : index
    %67 = vector.load %arg1[%c2_66, %c0_67, %c0_68] : memref<5x84x432xbf16, #tpu.memory_space<vmem>>, vector<1x84x432xbf16>
    %68 = vector.shape_cast %67 : vector<1x84x432xbf16> to vector<84x432xbf16>
    %cst_69 = arith.constant dense<0.000000e+00> : vector<18x432xf32>
    %69 = tpu.matmul %17, %68, %cst_69 {dimension_numbers = #tpu.dot_dimension_numbers<[1], [0], [0], [1], [0, 0, 1, 1], [], []>} : vector<18x84xbf16>, vector<84x432xbf16>, vector<18x432xf32> -> vector<18x432xf32>
    %70 = arith.addf %66, %69 : vector<18x432xf32>
    %c3_70 = arith.constant 3 : index
    %c0_71 = arith.constant 0 : index
    %c0_72 = arith.constant 0 : index
    %71 = vector.load %arg1[%c3_70, %c0_71, %c0_72] : memref<5x84x432xbf16, #tpu.memory_space<vmem>>, vector<1x84x432xbf16>
    %72 = vector.shape_cast %71 : vector<1x84x432xbf16> to vector<84x432xbf16>
    %cst_73 = arith.constant dense<0.000000e+00> : vector<18x432xf32>
    %73 = tpu.matmul %19, %72, %cst_73 {dimension_numbers = #tpu.dot_dimension_numbers<[1], [0], [0], [1], [0, 0, 1, 1], [], []>} : vector<18x84xbf16>, vector<84x432xbf16>, vector<18x432xf32> -> vector<18x432xf32>
    %74 = arith.addf %70, %73 : vector<18x432xf32>
    %c4_74 = arith.constant 4 : index
    %c0_75 = arith.constant 0 : index
    %c0_76 = arith.constant 0 : index
    %75 = vector.load %arg1[%c4_74, %c0_75, %c0_76] : memref<5x84x432xbf16, #tpu.memory_space<vmem>>, vector<1x84x432xbf16>
    %76 = vector.shape_cast %75 : vector<1x84x432xbf16> to vector<84x432xbf16>
    %cst_77 = arith.constant dense<0.000000e+00> : vector<18x432xf32>
    %77 = tpu.matmul %21, %76, %cst_77 {dimension_numbers = #tpu.dot_dimension_numbers<[1], [0], [0], [1], [0, 0, 1, 1], [], []>} : vector<18x84xbf16>, vector<84x432xbf16>, vector<18x432xf32> -> vector<18x432xf32>
    %78 = arith.addf %74, %77 : vector<18x432xf32>
    %c0_78 = arith.constant 0 : index
    %c0_79 = arith.constant 0 : index
    %79 = vector.load %arg6[%c0_78, %c0_79] : memref<432x16xf32, #tpu.memory_space<vmem>>, vector<432x16xf32>
    %c0_80 = arith.constant 0 : index
    %c0_81 = arith.constant 0 : index
    %80 = vector.load %arg7[%c0_80, %c0_81] : memref<16x432xf32, #tpu.memory_space<vmem>>, vector<16x432xf32>
    %c0_82 = arith.constant 0 : index
    %c0_83 = arith.constant 0 : index
    %81 = vector.load %arg8[%c0_82, %c0_83] : memref<1x16xf32, #tpu.memory_space<vmem>>, vector<1x16xf32>
    %c0_84 = arith.constant 0 : index
    %c0_85 = arith.constant 0 : index
    %82 = vector.load %arg9[%c0_84, %c0_85] : memref<1x16xf32, #tpu.memory_space<vmem>>, vector<1x16xf32>
    %cst_86 = arith.constant dense<0.000000e+00> : vector<432xf32>
    %83 = vector.multi_reduction <add>, %40, %cst_86 [0] : vector<18x432xf32> to vector<432xf32>
    %84 = vector.shape_cast %83 : vector<432xf32> to vector<1x432xf32>
    %85 = arith.mulf %40, %40 : vector<18x432xf32>
    %cst_87 = arith.constant dense<0.000000e+00> : vector<432xf32>
    %86 = vector.multi_reduction <add>, %85, %cst_87 [0] : vector<18x432xf32> to vector<432xf32>
    %87 = vector.shape_cast %86 : vector<432xf32> to vector<1x432xf32>
    %cst_88 = arith.constant dense<0.000000e+00> : vector<432xf32>
    %88 = vector.multi_reduction <add>, %59, %cst_88 [0] : vector<18x432xf32> to vector<432xf32>
    %89 = vector.shape_cast %88 : vector<432xf32> to vector<1x432xf32>
    %90 = arith.addf %84, %89 : vector<1x432xf32>
    %91 = arith.mulf %59, %59 : vector<18x432xf32>
    %cst_89 = arith.constant dense<0.000000e+00> : vector<432xf32>
    %92 = vector.multi_reduction <add>, %91, %cst_89 [0] : vector<18x432xf32> to vector<432xf32>
    %93 = vector.shape_cast %92 : vector<432xf32> to vector<1x432xf32>
    %94 = arith.addf %87, %93 : vector<1x432xf32>
    %cst_90 = arith.constant dense<0.000000e+00> : vector<432xf32>
    %95 = vector.multi_reduction <add>, %78, %cst_90 [0] : vector<18x432xf32> to vector<432xf32>
    %96 = vector.shape_cast %95 : vector<432xf32> to vector<1x432xf32>
    %97 = arith.addf %90, %96 : vector<1x432xf32>
    %98 = arith.mulf %78, %78 : vector<18x432xf32>
    %cst_91 = arith.constant dense<0.000000e+00> : vector<432xf32>
    %99 = vector.multi_reduction <add>, %98, %cst_91 [0] : vector<18x432xf32> to vector<432xf32>
    %100 = vector.shape_cast %99 : vector<432xf32> to vector<1x432xf32>
    %101 = arith.addf %94, %100 : vector<1x432xf32>
    %cst_92 = arith.constant dense<0.000000e+00> : vector<1x16xf32>
    %102 = tpu.matmul %97, %79, %cst_92 {dimension_numbers = #tpu.dot_dimension_numbers<[1], [0], [0], [1], [0, 0, 1, 1], [], []>} : vector<1x432xf32>, vector<432x16xf32>, vector<1x16xf32> -> vector<1x16xf32>
    %cst_93 = arith.constant 6.85871055E-4 : f32
    %103 = vector.broadcast %cst_93 : f32 to vector<1x16xf32>
    %104 = arith.mulf %102, %103 : vector<1x16xf32>
    %cst_94 = arith.constant dense<0.000000e+00> : vector<1x16xf32>
    %105 = tpu.matmul %101, %79, %cst_94 {dimension_numbers = #tpu.dot_dimension_numbers<[1], [0], [0], [1], [0, 0, 1, 1], [], []>} : vector<1x432xf32>, vector<432x16xf32>, vector<1x16xf32> -> vector<1x16xf32>
    %cst_95 = arith.constant 6.85871055E-4 : f32
    %106 = vector.broadcast %cst_95 : f32 to vector<1x16xf32>
    %107 = arith.mulf %105, %106 : vector<1x16xf32>
    %108 = arith.mulf %104, %104 : vector<1x16xf32>
    %109 = arith.subf %107, %108 : vector<1x16xf32>
    %cst_96 = arith.constant 9.99999974E-6 : f32
    %110 = vector.broadcast %cst_96 : f32 to vector<1x16xf32>
    %111 = arith.addf %109, %110 : vector<1x16xf32>
    %112 = math.rsqrt %111 : vector<1x16xf32>
    %113 = arith.mulf %81, %112 : vector<1x16xf32>
    %114 = arith.mulf %104, %113 : vector<1x16xf32>
    %115 = arith.subf %82, %114 : vector<1x16xf32>
    %cst_97 = arith.constant dense<0.000000e+00> : vector<1x432xf32>
    %116 = tpu.matmul %113, %80, %cst_97 {dimension_numbers = #tpu.dot_dimension_numbers<[1], [0], [0], [1], [0, 0, 1, 1], [], []>} : vector<1x16xf32>, vector<16x432xf32>, vector<1x432xf32> -> vector<1x432xf32>
    %cst_98 = arith.constant dense<0.000000e+00> : vector<1x432xf32>
    %117 = tpu.matmul %115, %80, %cst_98 {dimension_numbers = #tpu.dot_dimension_numbers<[1], [0], [0], [1], [0, 0, 1, 1], [], []>} : vector<1x16xf32>, vector<16x432xf32>, vector<1x432xf32> -> vector<1x432xf32>
    %118 = vector.broadcast %116 : vector<1x432xf32> to vector<18x432xf32>
    %119 = arith.mulf %40, %118 : vector<18x432xf32>
    %120 = vector.broadcast %117 : vector<1x432xf32> to vector<18x432xf32>
    %121 = arith.addf %119, %120 : vector<18x432xf32>
    %cst_99 = arith.constant 0.000000e+00 : f32
    %122 = vector.broadcast %cst_99 : f32 to vector<18x432xf32>
    %123 = arith.maximumf %121, %122 : vector<18x432xf32>
    %124 = vector.broadcast %116 : vector<1x432xf32> to vector<18x432xf32>
    %125 = arith.mulf %59, %124 : vector<18x432xf32>
    %126 = vector.broadcast %117 : vector<1x432xf32> to vector<18x432xf32>
    %127 = arith.addf %125, %126 : vector<18x432xf32>
    %cst_100 = arith.constant 0.000000e+00 : f32
    %128 = vector.broadcast %cst_100 : f32 to vector<18x432xf32>
    %129 = arith.maximumf %127, %128 : vector<18x432xf32>
    %130 = vector.broadcast %116 : vector<1x432xf32> to vector<18x432xf32>
    %131 = arith.mulf %78, %130 : vector<18x432xf32>
    %132 = vector.broadcast %117 : vector<1x432xf32> to vector<18x432xf32>
    %133 = arith.addf %131, %132 : vector<18x432xf32>
    %cst_101 = arith.constant 0.000000e+00 : f32
    %134 = vector.broadcast %cst_101 : f32 to vector<18x432xf32>
    %135 = arith.maximumf %133, %134 : vector<18x432xf32>
    %136 = arith.truncf %123 : vector<18x432xf32> to vector<18x432xbf16>
    %137 = vector.shape_cast %136 : vector<18x432xbf16> to vector<2x9x432xbf16>
    %138 = arith.truncf %129 : vector<18x432xf32> to vector<18x432xbf16>
    %139 = vector.shape_cast %138 : vector<18x432xbf16> to vector<2x9x432xbf16>
    %140 = arith.truncf %135 : vector<18x432xf32> to vector<18x432xbf16>
    %141 = vector.shape_cast %140 : vector<18x432xbf16> to vector<2x9x432xbf16>
    %142 = vector.extract_strided_slice %137 {offsets = [0, 0, 0], sizes = [2, 8, 432], strides = [1, 1, 1]} : vector<2x9x432xbf16> to vector<2x8x432xbf16>
    %143 = vector.shape_cast %142 : vector<2x8x432xbf16> to vector<16x432xbf16>
    %c0_102 = arith.constant 0 : index
    %c0_103 = arith.constant 0 : index
    %c0_104 = arith.constant 0 : index
    %144 = vector.load %arg2[%c0_102, %c0_103, %c0_104] : memref<5x432x256xbf16, #tpu.memory_space<vmem>>, vector<1x432x256xbf16>
    %145 = vector.shape_cast %144 : vector<1x432x256xbf16> to vector<432x256xbf16>
    %cst_105 = arith.constant dense<0.000000e+00> : vector<16x256xf32>
    %146 = tpu.matmul %143, %145, %cst_105 {dimension_numbers = #tpu.dot_dimension_numbers<[1], [0], [0], [1], [0, 0, 1, 1], [], []>} : vector<16x432xbf16>, vector<432x256xbf16>, vector<16x256xf32> -> vector<16x256xf32>
    %147 = vector.extract_strided_slice %139 {offsets = [0, 0, 0], sizes = [2, 8, 432], strides = [1, 1, 1]} : vector<2x9x432xbf16> to vector<2x8x432xbf16>
    %148 = vector.shape_cast %147 : vector<2x8x432xbf16> to vector<16x432xbf16>
    %c1_106 = arith.constant 1 : index
    %c0_107 = arith.constant 0 : index
    %c0_108 = arith.constant 0 : index
    %149 = vector.load %arg2[%c1_106, %c0_107, %c0_108] : memref<5x432x256xbf16, #tpu.memory_space<vmem>>, vector<1x432x256xbf16>
    %150 = vector.shape_cast %149 : vector<1x432x256xbf16> to vector<432x256xbf16>
    %cst_109 = arith.constant dense<0.000000e+00> : vector<16x256xf32>
    %151 = tpu.matmul %148, %150, %cst_109 {dimension_numbers = #tpu.dot_dimension_numbers<[1], [0], [0], [1], [0, 0, 1, 1], [], []>} : vector<16x432xbf16>, vector<432x256xbf16>, vector<16x256xf32> -> vector<16x256xf32>
    %152 = arith.addf %146, %151 : vector<16x256xf32>
    %153 = vector.extract_strided_slice %141 {offsets = [0, 0, 0], sizes = [2, 8, 432], strides = [1, 1, 1]} : vector<2x9x432xbf16> to vector<2x8x432xbf16>
    %154 = vector.shape_cast %153 : vector<2x8x432xbf16> to vector<16x432xbf16>
    %c2_110 = arith.constant 2 : index
    %c0_111 = arith.constant 0 : index
    %c0_112 = arith.constant 0 : index
    %155 = vector.load %arg2[%c2_110, %c0_111, %c0_112] : memref<5x432x256xbf16, #tpu.memory_space<vmem>>, vector<1x432x256xbf16>
    %156 = vector.shape_cast %155 : vector<1x432x256xbf16> to vector<432x256xbf16>
    %cst_113 = arith.constant dense<0.000000e+00> : vector<16x256xf32>
    %157 = tpu.matmul %154, %156, %cst_113 {dimension_numbers = #tpu.dot_dimension_numbers<[1], [0], [0], [1], [0, 0, 1, 1], [], []>} : vector<16x432xbf16>, vector<432x256xbf16>, vector<16x256xf32> -> vector<16x256xf32>
    %158 = arith.addf %152, %157 : vector<16x256xf32>
    %159 = vector.extract_strided_slice %137 {offsets = [0, 1, 0], sizes = [2, 8, 432], strides = [1, 1, 1]} : vector<2x9x432xbf16> to vector<2x8x432xbf16>
    %160 = vector.shape_cast %159 : vector<2x8x432xbf16> to vector<16x432xbf16>
    %c3_114 = arith.constant 3 : index
    %c0_115 = arith.constant 0 : index
    %c0_116 = arith.constant 0 : index
    %161 = vector.load %arg2[%c3_114, %c0_115, %c0_116] : memref<5x432x256xbf16, #tpu.memory_space<vmem>>, vector<1x432x256xbf16>
    %162 = vector.shape_cast %161 : vector<1x432x256xbf16> to vector<432x256xbf16>
    %cst_117 = arith.constant dense<0.000000e+00> : vector<16x256xf32>
    %163 = tpu.matmul %160, %162, %cst_117 {dimension_numbers = #tpu.dot_dimension_numbers<[1], [0], [0], [1], [0, 0, 1, 1], [], []>} : vector<16x432xbf16>, vector<432x256xbf16>, vector<16x256xf32> -> vector<16x256xf32>
    %164 = arith.addf %158, %163 : vector<16x256xf32>
    %165 = vector.extract_strided_slice %139 {offsets = [0, 1, 0], sizes = [2, 8, 432], strides = [1, 1, 1]} : vector<2x9x432xbf16> to vector<2x8x432xbf16>
    %166 = vector.shape_cast %165 : vector<2x8x432xbf16> to vector<16x432xbf16>
    %c4_118 = arith.constant 4 : index
    %c0_119 = arith.constant 0 : index
    %c0_120 = arith.constant 0 : index
    %167 = vector.load %arg2[%c4_118, %c0_119, %c0_120] : memref<5x432x256xbf16, #tpu.memory_space<vmem>>, vector<1x432x256xbf16>
    %168 = vector.shape_cast %167 : vector<1x432x256xbf16> to vector<432x256xbf16>
    %cst_121 = arith.constant dense<0.000000e+00> : vector<16x256xf32>
    %169 = tpu.matmul %166, %168, %cst_121 {dimension_numbers = #tpu.dot_dimension_numbers<[1], [0], [0], [1], [0, 0, 1, 1], [], []>} : vector<16x432xbf16>, vector<432x256xbf16>, vector<16x256xf32> -> vector<16x256xf32>
    %170 = arith.addf %164, %169 : vector<16x256xf32>
    %c0_122 = arith.constant 0 : index
    %c0_123 = arith.constant 0 : index
    %171 = vector.load %arg10[%c0_122, %c0_123] : memref<256x32xf32, #tpu.memory_space<vmem>>, vector<256x32xf32>
    %c0_124 = arith.constant 0 : index
    %c0_125 = arith.constant 0 : index
    %172 = vector.load %arg11[%c0_124, %c0_125] : memref<32x256xf32, #tpu.memory_space<vmem>>, vector<32x256xf32>
    %c0_126 = arith.constant 0 : index
    %c0_127 = arith.constant 0 : index
    %173 = vector.load %arg12[%c0_126, %c0_127] : memref<1x32xf32, #tpu.memory_space<vmem>>, vector<1x32xf32>
    %c0_128 = arith.constant 0 : index
    %c0_129 = arith.constant 0 : index
    %174 = vector.load %arg13[%c0_128, %c0_129] : memref<1x32xf32, #tpu.memory_space<vmem>>, vector<1x32xf32>
    %cst_130 = arith.constant dense<0.000000e+00> : vector<256xf32>
    %175 = vector.multi_reduction <add>, %170, %cst_130 [0] : vector<16x256xf32> to vector<256xf32>
    %176 = vector.shape_cast %175 : vector<256xf32> to vector<1x256xf32>
    %177 = arith.mulf %170, %170 : vector<16x256xf32>
    %cst_131 = arith.constant dense<0.000000e+00> : vector<256xf32>
    %178 = vector.multi_reduction <add>, %177, %cst_131 [0] : vector<16x256xf32> to vector<256xf32>
    %179 = vector.shape_cast %178 : vector<256xf32> to vector<1x256xf32>
    %cst_132 = arith.constant dense<0.000000e+00> : vector<1x32xf32>
    %180 = tpu.matmul %176, %171, %cst_132 {dimension_numbers = #tpu.dot_dimension_numbers<[1], [0], [0], [1], [0, 0, 1, 1], [], []>} : vector<1x256xf32>, vector<256x32xf32>, vector<1x32xf32> -> vector<1x32xf32>
    %cst_133 = arith.constant 7.812500e-03 : f32
    %181 = vector.broadcast %cst_133 : f32 to vector<1x32xf32>
    %182 = arith.mulf %180, %181 : vector<1x32xf32>
    %cst_134 = arith.constant dense<0.000000e+00> : vector<1x32xf32>
    %183 = tpu.matmul %179, %171, %cst_134 {dimension_numbers = #tpu.dot_dimension_numbers<[1], [0], [0], [1], [0, 0, 1, 1], [], []>} : vector<1x256xf32>, vector<256x32xf32>, vector<1x32xf32> -> vector<1x32xf32>
    %cst_135 = arith.constant 7.812500e-03 : f32
    %184 = vector.broadcast %cst_135 : f32 to vector<1x32xf32>
    %185 = arith.mulf %183, %184 : vector<1x32xf32>
    %186 = arith.mulf %182, %182 : vector<1x32xf32>
    %187 = arith.subf %185, %186 : vector<1x32xf32>
    %cst_136 = arith.constant 9.99999974E-6 : f32
    %188 = vector.broadcast %cst_136 : f32 to vector<1x32xf32>
    %189 = arith.addf %187, %188 : vector<1x32xf32>
    %190 = math.rsqrt %189 : vector<1x32xf32>
    %191 = arith.mulf %173, %190 : vector<1x32xf32>
    %192 = arith.mulf %182, %191 : vector<1x32xf32>
    %193 = arith.subf %174, %192 : vector<1x32xf32>
    %cst_137 = arith.constant dense<0.000000e+00> : vector<1x256xf32>
    %194 = tpu.matmul %191, %172, %cst_137 {dimension_numbers = #tpu.dot_dimension_numbers<[1], [0], [0], [1], [0, 0, 1, 1], [], []>} : vector<1x32xf32>, vector<32x256xf32>, vector<1x256xf32> -> vector<1x256xf32>
    %cst_138 = arith.constant dense<0.000000e+00> : vector<1x256xf32>
    %195 = tpu.matmul %193, %172, %cst_138 {dimension_numbers = #tpu.dot_dimension_numbers<[1], [0], [0], [1], [0, 0, 1, 1], [], []>} : vector<1x32xf32>, vector<32x256xf32>, vector<1x256xf32> -> vector<1x256xf32>
    %196 = vector.broadcast %194 : vector<1x256xf32> to vector<16x256xf32>
    %197 = arith.mulf %170, %196 : vector<16x256xf32>
    %198 = vector.broadcast %195 : vector<1x256xf32> to vector<16x256xf32>
    %199 = arith.addf %197, %198 : vector<16x256xf32>
    %cst_139 = arith.constant 0.000000e+00 : f32
    %200 = vector.broadcast %cst_139 : f32 to vector<16x256xf32>
    %201 = arith.maximumf %199, %200 : vector<16x256xf32>
    %202 = arith.truncf %201 : vector<16x256xf32> to vector<16x256xbf16>
    %203 = vector.shape_cast %202 : vector<16x256xbf16> to vector<2x8x256xbf16>
    %204 = vector.extract_strided_slice %203 {offsets = [0, 0, 0], sizes = [2, 1, 256], strides = [1, 1, 1]} : vector<2x8x256xbf16> to vector<2x1x256xbf16>
    %205 = vector.shape_cast %204 : vector<2x1x256xbf16> to vector<2x256xbf16>
    %c0_140 = arith.constant 0 : index
    %c0_141 = arith.constant 0 : index
    %c0_142 = arith.constant 0 : index
    %206 = vector.load %arg3[%c0_140, %c0_141, %c0_142] : memref<5x256x64xbf16, #tpu.memory_space<vmem>>, vector<1x256x64xbf16>
    %207 = vector.shape_cast %206 : vector<1x256x64xbf16> to vector<256x64xbf16>
    %cst_143 = arith.constant dense<0.000000e+00> : vector<2x64xf32>
    %208 = tpu.matmul %205, %207, %cst_143 {dimension_numbers = #tpu.dot_dimension_numbers<[1], [0], [0], [1], [0, 0, 1, 1], [], []>} : vector<2x256xbf16>, vector<256x64xbf16>, vector<2x64xf32> -> vector<2x64xf32>
    %209 = vector.extract_strided_slice %203 {offsets = [0, 1, 0], sizes = [2, 1, 256], strides = [1, 1, 1]} : vector<2x8x256xbf16> to vector<2x1x256xbf16>
    %210 = vector.shape_cast %209 : vector<2x1x256xbf16> to vector<2x256xbf16>
    %c1_144 = arith.constant 1 : index
    %c0_145 = arith.constant 0 : index
    %c0_146 = arith.constant 0 : index
    %211 = vector.load %arg3[%c1_144, %c0_145, %c0_146] : memref<5x256x64xbf16, #tpu.memory_space<vmem>>, vector<1x256x64xbf16>
    %212 = vector.shape_cast %211 : vector<1x256x64xbf16> to vector<256x64xbf16>
    %cst_147 = arith.constant dense<0.000000e+00> : vector<2x64xf32>
    %213 = tpu.matmul %210, %212, %cst_147 {dimension_numbers = #tpu.dot_dimension_numbers<[1], [0], [0], [1], [0, 0, 1, 1], [], []>} : vector<2x256xbf16>, vector<256x64xbf16>, vector<2x64xf32> -> vector<2x64xf32>
    %214 = arith.addf %208, %213 : vector<2x64xf32>
    %215 = vector.extract_strided_slice %203 {offsets = [0, 2, 0], sizes = [2, 1, 256], strides = [1, 1, 1]} : vector<2x8x256xbf16> to vector<2x1x256xbf16>
    %216 = vector.shape_cast %215 : vector<2x1x256xbf16> to vector<2x256xbf16>
    %c2_148 = arith.constant 2 : index
    %c0_149 = arith.constant 0 : index
    %c0_150 = arith.constant 0 : index
    %217 = vector.load %arg3[%c2_148, %c0_149, %c0_150] : memref<5x256x64xbf16, #tpu.memory_space<vmem>>, vector<1x256x64xbf16>
    %218 = vector.shape_cast %217 : vector<1x256x64xbf16> to vector<256x64xbf16>
    %cst_151 = arith.constant dense<0.000000e+00> : vector<2x64xf32>
    %219 = tpu.matmul %216, %218, %cst_151 {dimension_numbers = #tpu.dot_dimension_numbers<[1], [0], [0], [1], [0, 0, 1, 1], [], []>} : vector<2x256xbf16>, vector<256x64xbf16>, vector<2x64xf32> -> vector<2x64xf32>
    %220 = arith.addf %214, %219 : vector<2x64xf32>
    %221 = vector.extract_strided_slice %203 {offsets = [0, 3, 0], sizes = [2, 1, 256], strides = [1, 1, 1]} : vector<2x8x256xbf16> to vector<2x1x256xbf16>
    %222 = vector.shape_cast %221 : vector<2x1x256xbf16> to vector<2x256xbf16>
    %c3_152 = arith.constant 3 : index
    %c0_153 = arith.constant 0 : index
    %c0_154 = arith.constant 0 : index
    %223 = vector.load %arg3[%c3_152, %c0_153, %c0_154] : memref<5x256x64xbf16, #tpu.memory_space<vmem>>, vector<1x256x64xbf16>
    %224 = vector.shape_cast %223 : vector<1x256x64xbf16> to vector<256x64xbf16>
    %cst_155 = arith.constant dense<0.000000e+00> : vector<2x64xf32>
    %225 = tpu.matmul %222, %224, %cst_155 {dimension_numbers = #tpu.dot_dimension_numbers<[1], [0], [0], [1], [0, 0, 1, 1], [], []>} : vector<2x256xbf16>, vector<256x64xbf16>, vector<2x64xf32> -> vector<2x64xf32>
    %226 = arith.addf %220, %225 : vector<2x64xf32>
    %227 = vector.extract_strided_slice %203 {offsets = [0, 4, 0], sizes = [2, 1, 256], strides = [1, 1, 1]} : vector<2x8x256xbf16> to vector<2x1x256xbf16>
    %228 = vector.shape_cast %227 : vector<2x1x256xbf16> to vector<2x256xbf16>
    %c4_156 = arith.constant 4 : index
    %c0_157 = arith.constant 0 : index
    %c0_158 = arith.constant 0 : index
    %229 = vector.load %arg3[%c4_156, %c0_157, %c0_158] : memref<5x256x64xbf16, #tpu.memory_space<vmem>>, vector<1x256x64xbf16>
    %230 = vector.shape_cast %229 : vector<1x256x64xbf16> to vector<256x64xbf16>
    %cst_159 = arith.constant dense<0.000000e+00> : vector<2x64xf32>
    %231 = tpu.matmul %228, %230, %cst_159 {dimension_numbers = #tpu.dot_dimension_numbers<[1], [0], [0], [1], [0, 0, 1, 1], [], []>} : vector<2x256xbf16>, vector<256x64xbf16>, vector<2x64xf32> -> vector<2x64xf32>
    %232 = arith.addf %226, %231 : vector<2x64xf32>
    %233 = vector.extract_strided_slice %203 {offsets = [0, 3, 0], sizes = [2, 1, 256], strides = [1, 1, 1]} : vector<2x8x256xbf16> to vector<2x1x256xbf16>
    %234 = vector.shape_cast %233 : vector<2x1x256xbf16> to vector<2x256xbf16>
    %c0_160 = arith.constant 0 : index
    %c0_161 = arith.constant 0 : index
    %c0_162 = arith.constant 0 : index
    %235 = vector.load %arg3[%c0_160, %c0_161, %c0_162] : memref<5x256x64xbf16, #tpu.memory_space<vmem>>, vector<1x256x64xbf16>
    %236 = vector.shape_cast %235 : vector<1x256x64xbf16> to vector<256x64xbf16>
    %cst_163 = arith.constant dense<0.000000e+00> : vector<2x64xf32>
    %237 = tpu.matmul %234, %236, %cst_163 {dimension_numbers = #tpu.dot_dimension_numbers<[1], [0], [0], [1], [0, 0, 1, 1], [], []>} : vector<2x256xbf16>, vector<256x64xbf16>, vector<2x64xf32> -> vector<2x64xf32>
    %238 = vector.extract_strided_slice %203 {offsets = [0, 4, 0], sizes = [2, 1, 256], strides = [1, 1, 1]} : vector<2x8x256xbf16> to vector<2x1x256xbf16>
    %239 = vector.shape_cast %238 : vector<2x1x256xbf16> to vector<2x256xbf16>
    %c1_164 = arith.constant 1 : index
    %c0_165 = arith.constant 0 : index
    %c0_166 = arith.constant 0 : index
    %240 = vector.load %arg3[%c1_164, %c0_165, %c0_166] : memref<5x256x64xbf16, #tpu.memory_space<vmem>>, vector<1x256x64xbf16>
    %241 = vector.shape_cast %240 : vector<1x256x64xbf16> to vector<256x64xbf16>
    %cst_167 = arith.constant dense<0.000000e+00> : vector<2x64xf32>
    %242 = tpu.matmul %239, %241, %cst_167 {dimension_numbers = #tpu.dot_dimension_numbers<[1], [0], [0], [1], [0, 0, 1, 1], [], []>} : vector<2x256xbf16>, vector<256x64xbf16>, vector<2x64xf32> -> vector<2x64xf32>
    %243 = arith.addf %237, %242 : vector<2x64xf32>
    %244 = vector.extract_strided_slice %203 {offsets = [0, 5, 0], sizes = [2, 1, 256], strides = [1, 1, 1]} : vector<2x8x256xbf16> to vector<2x1x256xbf16>
    %245 = vector.shape_cast %244 : vector<2x1x256xbf16> to vector<2x256xbf16>
    %c2_168 = arith.constant 2 : index
    %c0_169 = arith.constant 0 : index
    %c0_170 = arith.constant 0 : index
    %246 = vector.load %arg3[%c2_168, %c0_169, %c0_170] : memref<5x256x64xbf16, #tpu.memory_space<vmem>>, vector<1x256x64xbf16>
    %247 = vector.shape_cast %246 : vector<1x256x64xbf16> to vector<256x64xbf16>
    %cst_171 = arith.constant dense<0.000000e+00> : vector<2x64xf32>
    %248 = tpu.matmul %245, %247, %cst_171 {dimension_numbers = #tpu.dot_dimension_numbers<[1], [0], [0], [1], [0, 0, 1, 1], [], []>} : vector<2x256xbf16>, vector<256x64xbf16>, vector<2x64xf32> -> vector<2x64xf32>
    %249 = arith.addf %243, %248 : vector<2x64xf32>
    %250 = vector.extract_strided_slice %203 {offsets = [0, 6, 0], sizes = [2, 1, 256], strides = [1, 1, 1]} : vector<2x8x256xbf16> to vector<2x1x256xbf16>
    %251 = vector.shape_cast %250 : vector<2x1x256xbf16> to vector<2x256xbf16>
    %c3_172 = arith.constant 3 : index
    %c0_173 = arith.constant 0 : index
    %c0_174 = arith.constant 0 : index
    %252 = vector.load %arg3[%c3_172, %c0_173, %c0_174] : memref<5x256x64xbf16, #tpu.memory_space<vmem>>, vector<1x256x64xbf16>
    %253 = vector.shape_cast %252 : vector<1x256x64xbf16> to vector<256x64xbf16>
    %cst_175 = arith.constant dense<0.000000e+00> : vector<2x64xf32>
    %254 = tpu.matmul %251, %253, %cst_175 {dimension_numbers = #tpu.dot_dimension_numbers<[1], [0], [0], [1], [0, 0, 1, 1], [], []>} : vector<2x256xbf16>, vector<256x64xbf16>, vector<2x64xf32> -> vector<2x64xf32>
    %255 = arith.addf %249, %254 : vector<2x64xf32>
    %256 = vector.extract_strided_slice %203 {offsets = [0, 7, 0], sizes = [2, 1, 256], strides = [1, 1, 1]} : vector<2x8x256xbf16> to vector<2x1x256xbf16>
    %257 = vector.shape_cast %256 : vector<2x1x256xbf16> to vector<2x256xbf16>
    %c4_176 = arith.constant 4 : index
    %c0_177 = arith.constant 0 : index
    %c0_178 = arith.constant 0 : index
    %258 = vector.load %arg3[%c4_176, %c0_177, %c0_178] : memref<5x256x64xbf16, #tpu.memory_space<vmem>>, vector<1x256x64xbf16>
    %259 = vector.shape_cast %258 : vector<1x256x64xbf16> to vector<256x64xbf16>
    %cst_179 = arith.constant dense<0.000000e+00> : vector<2x64xf32>
    %260 = tpu.matmul %257, %259, %cst_179 {dimension_numbers = #tpu.dot_dimension_numbers<[1], [0], [0], [1], [0, 0, 1, 1], [], []>} : vector<2x256xbf16>, vector<256x64xbf16>, vector<2x64xf32> -> vector<2x64xf32>
    %261 = arith.addf %255, %260 : vector<2x64xf32>
    %262 = tpu.concatenate %232, %261 in 1 : vector<2x64xf32>, vector<2x64xf32> -> vector<2x128xf32>
    %c0_180 = arith.constant 0 : index
    %c0_181 = arith.constant 0 : index
    %263 = vector.load %arg14[%c0_180, %c0_181] : memref<128x32xf32, #tpu.memory_space<vmem>>, vector<128x32xf32>
    %c0_182 = arith.constant 0 : index
    %c0_183 = arith.constant 0 : index
    %264 = vector.load %arg15[%c0_182, %c0_183] : memref<32x128xf32, #tpu.memory_space<vmem>>, vector<32x128xf32>
    %c0_184 = arith.constant 0 : index
    %c0_185 = arith.constant 0 : index
    %265 = vector.load %arg16[%c0_184, %c0_185] : memref<1x32xf32, #tpu.memory_space<vmem>>, vector<1x32xf32>
    %c0_186 = arith.constant 0 : index
    %c0_187 = arith.constant 0 : index
    %266 = vector.load %arg17[%c0_186, %c0_187] : memref<1x32xf32, #tpu.memory_space<vmem>>, vector<1x32xf32>
    %cst_188 = arith.constant dense<0.000000e+00> : vector<128xf32>
    %267 = vector.multi_reduction <add>, %262, %cst_188 [0] : vector<2x128xf32> to vector<128xf32>
    %268 = vector.shape_cast %267 : vector<128xf32> to vector<1x128xf32>
    %269 = arith.mulf %262, %262 : vector<2x128xf32>
    %cst_189 = arith.constant dense<0.000000e+00> : vector<128xf32>
    %270 = vector.multi_reduction <add>, %269, %cst_189 [0] : vector<2x128xf32> to vector<128xf32>
    %271 = vector.shape_cast %270 : vector<128xf32> to vector<1x128xf32>
    %cst_190 = arith.constant dense<0.000000e+00> : vector<1x32xf32>
    %272 = tpu.matmul %268, %263, %cst_190 {dimension_numbers = #tpu.dot_dimension_numbers<[1], [0], [0], [1], [0, 0, 1, 1], [], []>} : vector<1x128xf32>, vector<128x32xf32>, vector<1x32xf32> -> vector<1x32xf32>
    %cst_191 = arith.constant 1.250000e-01 : f32
    %273 = vector.broadcast %cst_191 : f32 to vector<1x32xf32>
    %274 = arith.mulf %272, %273 : vector<1x32xf32>
    %cst_192 = arith.constant dense<0.000000e+00> : vector<1x32xf32>
    %275 = tpu.matmul %271, %263, %cst_192 {dimension_numbers = #tpu.dot_dimension_numbers<[1], [0], [0], [1], [0, 0, 1, 1], [], []>} : vector<1x128xf32>, vector<128x32xf32>, vector<1x32xf32> -> vector<1x32xf32>
    %cst_193 = arith.constant 1.250000e-01 : f32
    %276 = vector.broadcast %cst_193 : f32 to vector<1x32xf32>
    %277 = arith.mulf %275, %276 : vector<1x32xf32>
    %278 = arith.mulf %274, %274 : vector<1x32xf32>
    %279 = arith.subf %277, %278 : vector<1x32xf32>
    %cst_194 = arith.constant 9.99999974E-6 : f32
    %280 = vector.broadcast %cst_194 : f32 to vector<1x32xf32>
    %281 = arith.addf %279, %280 : vector<1x32xf32>
    %282 = math.rsqrt %281 : vector<1x32xf32>
    %283 = arith.mulf %265, %282 : vector<1x32xf32>
    %284 = arith.mulf %274, %283 : vector<1x32xf32>
    %285 = arith.subf %266, %284 : vector<1x32xf32>
    %cst_195 = arith.constant dense<0.000000e+00> : vector<1x128xf32>
    %286 = tpu.matmul %283, %264, %cst_195 {dimension_numbers = #tpu.dot_dimension_numbers<[1], [0], [0], [1], [0, 0, 1, 1], [], []>} : vector<1x32xf32>, vector<32x128xf32>, vector<1x128xf32> -> vector<1x128xf32>
    %cst_196 = arith.constant dense<0.000000e+00> : vector<1x128xf32>
    %287 = tpu.matmul %285, %264, %cst_196 {dimension_numbers = #tpu.dot_dimension_numbers<[1], [0], [0], [1], [0, 0, 1, 1], [], []>} : vector<1x32xf32>, vector<32x128xf32>, vector<1x128xf32> -> vector<1x128xf32>
    %288 = vector.broadcast %286 : vector<1x128xf32> to vector<2x128xf32>
    %289 = arith.mulf %262, %288 : vector<2x128xf32>
    %290 = vector.broadcast %287 : vector<1x128xf32> to vector<2x128xf32>
    %291 = arith.addf %289, %290 : vector<2x128xf32>
    %cst_197 = arith.constant 0.000000e+00 : f32
    %292 = vector.broadcast %cst_197 : f32 to vector<2x128xf32>
    %293 = arith.maximumf %291, %292 : vector<2x128xf32>
    %294 = arith.truncf %293 : vector<2x128xf32> to vector<2x128xbf16>
    %c0_198 = arith.constant 0 : index
    %c0_199 = arith.constant 0 : index
    %295 = vector.load %arg4[%c0_198, %c0_199] : memref<128x128xbf16, #tpu.memory_space<vmem>>, vector<128x128xbf16>
    %cst_200 = arith.constant dense<0.000000e+00> : vector<2x128xf32>
    %296 = tpu.matmul %294, %295, %cst_200 {dimension_numbers = #tpu.dot_dimension_numbers<[1], [0], [0], [1], [0, 0, 1, 1], [], []>} : vector<2x128xbf16>, vector<128x128xbf16>, vector<2x128xf32> -> vector<2x128xf32>
    %c0_201 = arith.constant 0 : index
    %c0_202 = arith.constant 0 : index
    %297 = vector.load %arg5[%c0_201, %c0_202] : memref<1x128xf32, #tpu.memory_space<vmem>>, vector<1x128xf32>
    %298 = vector.broadcast %297 : vector<1x128xf32> to vector<2x128xf32>
    %299 = arith.addf %296, %298 : vector<2x128xf32>
    %c0_203 = arith.constant 0 : index
    %c0_204 = arith.constant 0 : index
    %300 = vector.load %arg18[%c0_203, %c0_204] : memref<2x128xf32, #tpu.memory_space<vmem>>, vector<2x128xf32>
    tpu.vector_store %arg18[%c0_203, %c0_204], %299 {strides = array<i32>} : memref<2x128xf32, #tpu.memory_space<vmem>>, vector<2x128xf32>,
    return
  }
}

</mosaic_0001>

<bundles_post_ra>
// kernel: convnet_forward.1
= control target key start
LH: loop header
LB: loop body
LE: loop exit
PB: predicated region body
PF: predicated region fallthrough
CT: control target
= control target key end

     0   :  { %s17043_s0 = inlined_call_operand.vmem [shape: bf16[2,90,84], index: 0, kind: input, shape index: {}]   ;;  %s17044_s1 = inlined_call_operand.hbm [shape: bf16[5,84,432], index: 1, kind: input, shape index: {}]   ;;  %s17045_s2 = inlined_call_operand.vmem [shape: bf16[5,432,256], index: 2, kind: input, shape index: {}]   ;;  %s17046_s3 = inlined_call_operand.vmem [shape: bf16[5,256,64], index: 3, kind: input, shape index: {}]   ;;  %s17047_s4 = inlined_call_operand.vmem [shape: bf16[128,128], index: 4, kind: input, shape index: {}]   ;;  %s17048_s5 = inlined_call_operand.vmem [shape: f32[1,128], index: 5, kind: input, shape index: {}]   ;;  %s17049_s6 = inlined_call_operand.vmem [shape: f32[432,16], index: 6, kind: input, shape index: {}]   ;;  %s17050_s7 = inlined_call_operand.vmem [shape: f32[16,432], index: 7, kind: input, shape index: {}]   ;;  %s17051_s8 = inlined_call_operand.vmem [shape: f32[1,16], index: 8, kind: input, shape index: {}]   ;;  %s17052_s9 = inlined_call_operand.vmem [shape: f32[1,16], index: 9, kind: input, shape index: {}]   ;;  %s17053_s10 = inlined_call_operand.vmem [shape: f32[256,32], index: 10, kind: input, shape index: {}]   ;;  %s17054_s11 = inlined_call_operand.vmem [shape: f32[32,256], index: 11, kind: input, shape index: {}]   ;;  %s17055_s12 = inlined_call_operand.vmem [shape: f32[1,32], index: 12, kind: input, shape index: {}]   ;;  %s17056_s13 = inlined_call_operand.vmem [shape: f32[1,32], index: 13, kind: input, shape index: {}]   ;;  %s17057_s14 = inlined_call_operand.vmem [shape: f32[128,32], index: 14, kind: input, shape index: {}]   ;;  %s17058_s15 = inlined_call_operand.vmem [shape: f32[32,128], index: 15, kind: input, shape index: {}]   ;;  %s17059_s16 = inlined_call_operand.vmem [shape: f32[1,32], index: 16, kind: input, shape index: {}]   ;;  %s17060_s17 = inlined_call_operand.vmem [shape: f32[1,32], index: 17, kind: input, shape index: {}]   ;;  %s17061_s18 = inlined_call_operand.hbm [shape: f32[2,128], index: 18, kind: output, shape index: {}]  }
   0x1   :  { %17205 = sst [smem:[#allocation82_spill]] %s17043_s0 }
   0x2   :  { %17206 = sst [smem:[#allocation83_spill]] %s17044_s1 }
   0x3   :  { %17207 = sst [smem:[#allocation84_spill]] %s17045_s2 }
   0x4   :  { %23 = vsyncpa [#allocation3], 0 }
   0x5   :  { %24 = vsyncpa [#allocation4], 0  ;;  %s12699_s27 = smov [#allocation2]  }
   0x6   :  { %s32_s28 = sshll.u32 %s12699_s27, 4  ;;  %s33_s28 = int_to_ptr.vmem [resolvable:$true] %s32_s28 }
   0x7   :  { %s12663_s29 = scalar_lea.vmem %s33_s28, 14080  ;;  %p12668_p1 = scmp.lt.s32.totalorder %s33_s28, %s33_s28 }
   0x8   :  { %p12664_p0 = scmp.ne.s32.totalorder %s33_s28, %s12663_s29  ;;  %p12669_p2 = scmp.lt.s32.totalorder %s12663_s29, %s12663_s29 }
   0xa   :  { %p12670_p3 = por %p12669_p2, %p12668_p1 }
   0xc   :  { %p12671_p4 = pnand %p12670_p3, %p12664_p0 }
   0xe   :  { %12674 = shalt.err (!%p12671_p4)
}
   0xf   :  { %s12700_s30 = smov 256   ;;  %s12701_s0 = smov 16  }
  0x10   :  { %s17208_s20 = sld [smem:[#allocation83_spill]] }
  0x16   :  { %38 = dma.hbm_to_vmem [thread:$0]  %s17208_s20, 14080, %s33_s28, [#allocation3], %s12700_s30, %s12700_s30, %s12701_s0  }
  0x17   :  { %12695 = dma.done.wait [#allocation3], 14080  }
  0x18   :  { %12696 = vsyncadd [#allocation3], 4294953216  ;;  %v17064_v0 = vmov 0   ;;  %v1116_v1 = vld [vmem:[#allocation2 + $0x150] sm:$0x33]  ;;  %vm1307_vm0 = vcmask 1041408   ;;  %v94_v17 = vlaneseq }
  0x19   :  { %1352 = vmatprep.mubr.bf16.mxu1 %v17064_v0  ;;  %1654 = vmatprep.mubr.bf16.mxu0 %v17064_v0  ;;  %v1093_v2 = vld [vmem:[#allocation2 + $0xa0] sm:$0x33]  ;;  %v12808_v3 = vcombine.high %v1116_v1, %v1116_v1  ;;  %v10300_v5 = vcombine.low %v1116_v1, %v1116_v1  ;;  %v12703_v15 = vmov 1966171168   ;;  %s17211_s2 = sld [smem:[#allocation82_spill]]  ;;  %vm1300_vm1 = vcmask 687104  }
  0x1a   :  { %v12810_v4 = vcombine.high %v1093_v2, %v1093_v2  ;;  %v10336_v6 = vcombine.low %v1093_v2, %v1093_v2  ;;  %v11849_v7 = vld [vmem:[#allocation2 + $0x134] ss:$16 sps:$4 sm:$0xff]   ;;  %v11853_v11 = vld [vmem:[#allocation2 + $0x130] ss:$16 sps:$4 sm:$0xff]   ;;  %v92_v16 = vunpack.c.l.s4 %v12703_v15  ;;  %v12824_v23 = vshrl.u32 %v94_v17, 7  ;;  %s17460_s28 = sld [smem:[#allocation84_spill]] }
  0x1b   :  { %v11851_v8 = vld [vmem:[#allocation2 + $0x84] ss:$16 sps:$4 sm:$0xff]   ;;  %10304 = vmatprep.subr.msk.bf16.mxu1 %vm1307_vm0, %v12808_v3  ;;  %v12817_v9 = vsel %vm1307_vm0, %v10300_v5, 0  ;;  %v11854_v12 = vld [vmem:[#allocation2 + $0x80] ss:$16 sps:$4 sm:$0xff]   ;;  %vm4386_vm2 = vcmask 392192  }
  0x1c   :  { %10340 = vmatprep.subr.msk.bf16.mxu0 %vm1307_vm0, %v12810_v4  ;;  %v12820_v10 = vsel %vm1307_vm0, %v10336_v6, 0  ;;  %1325 = vmatpush1.bf16.msra.mxu1 %v12817_v9  ;;  %v11855_v13 = vld [vmem:[#allocation2 + $0x114] ss:$16 sps:$4 sm:$0xff]   ;;  %v11859_v18 = vld [vmem:[#allocation2 + $0x110] ss:$16 sps:$4 sm:$0xff]   ;;  %v93_v22 = vunpack.c.0.s8 %v92_v16  ;;  %17209 = vst [vmem:[#allocation8_spill] sm:$0xff] %v12824_v23 }
  0x1d   :  { %1627 = vmatpush1.bf16.msra.mxu0 %v12820_v10  ;;  %1326 = vmatprep.subr.bf16.mxu1 %v11849_v7  ;;  %v11857_v14 = vld [vmem:[#allocation2 + $0x64] ss:$16 sps:$4 sm:$0xff]   ;;  %v11860_v19 = vld [vmem:[#allocation2 + $0x60] ss:$16 sps:$4 sm:$0xff]   ;;  %v12832_v32 = vld [vmem:[#allocation2 + $0x158] sm:$0x33] }
  0x1e   :  { %1628 = vmatprep.subr.bf16.mxu0 %v11851_v8  ;;  %v11861_v20 = vld [vmem:[#allocation2 + $0xf4] ss:$16 sps:$4 sm:$0xff]   ;;  %v11865_v24 = vld [vmem:[#allocation2 + $0xf0] ss:$16 sps:$4 sm:$0xff]   ;;  %v12827_v28 = vsub.s32 %v93_v22, %v12824_v23  ;;  %v12840_v38 = vcombine.high %v12832_v32, %v12832_v32  ;;  %vm4390_vm3 = vcmask 386048   ;;  %vm4936_vm4 = vcmask 130048  }
  0x1f   :  { %v11863_v21 = vld [vmem:[#allocation2 + $0x44] ss:$16 sps:$4 sm:$0xff]   ;;  %v11866_v25 = vld [vmem:[#allocation2 + $0x40] ss:$16 sps:$4 sm:$0xff]   ;;  %vm8442_vm5 = vcmask 261120   ;;  %vm8701_vm6 = vcmask 1041409  }
  0x20   :  { %1327 = vmatpush1.bf16.msra.mxu1 %v11853_v11  ;;  %v11867_v26 = vld [vmem:[#allocation2 + $0xd4] ss:$16 sps:$4 sm:$0xff]   ;;  %17210 = vst [vmem:[#allocation9_spill] sm:$0xff] %v12827_v28  ;;  %v11871_v29 = vld [vmem:[#allocation2 + $0xd0] ss:$16 sps:$4 sm:$0xff]   ;;  %vm12706_vm7 = vmmov 0  }
  0x21   :  { %1629 = vmatpush1.bf16.msra.mxu0 %v11854_v12  ;;  %1328 = vmatprep.subr.bf16.mxu1 %v11855_v13  ;;  %v11869_v27 = vld [vmem:[#allocation2 + $0x24] ss:$16 sps:$4 sm:$0xff]   ;;  %v11872_v30 = vld [vmem:[#allocation2 + $0x20] ss:$16 sps:$4 sm:$0xff]   ;;  %vm9766_vm8 = vcmask 523264  }
  0x22   :  { %1630 = vmatprep.subr.bf16.mxu0 %v11857_v14  ;;  %v10243_v31 = vld.sshfl [vmem:[%s17211_s2 + $0x4] sm:$0x32 pattern:$0x75316420]  ;;  %v12842_v39 = vld [vmem:[#allocation2 + $0x200] sm:$0x33] }
  0x23   :  { %v11873_v33 = vld [vmem:[#allocation2 + $0xb4] ss:$16 sps:$4 sm:$0xff]   ;;  %v10244_v35 = vld.sshfl [vmem:[%s17211_s2 + $0x8] sm:$0x11 pattern:$0x75316420]  ;;  %v192_v36 = vcombine.high %v10243_v31, %v10243_v31  ;;  %v199_v37 = vrot.slane %v10243_v31, %v12827_v28  ;;  %v12850_v43 = vcombine.high %v12842_v39, %v12842_v39 }
  0x24   :  { %1329 = vmatpush1.bf16.msra.mxu1 %v11859_v18  ;;  %v11875_v34 = vld [vmem:[#allocation2 + $0x4] ss:$16 sps:$4 sm:$0xff]   ;;  %v216_v41 = vcombine.high %v10244_v35, %v10244_v35  ;;  %v223_v42 = vrot.slane %v10244_v35, %v12827_v28  ;;  %v12855_v44 = vld.sshfl [vmem:[%s17211_s2 + $0x38] sm:$0x11 pattern:$0x75316420] }
  0x25   :  { %1631 = vmatpush1.bf16.msra.mxu0 %v11860_v19  ;;  %1330 = vmatprep.subr.bf16.mxu1 %v11861_v20  ;;  %v10245_v40 = vld.sshfl [vmem:[%s17211_s2 + $0x34] sm:$0x32 pattern:$0x75316420]  ;;  %v206_v45 = vrot.slane %v192_v36, %v12827_v28  ;;  %v207_v46 = vcombine.high %v199_v37, %v199_v37  ;;  %v12862_v50 = vrot.slane %v12855_v44, %v12827_v28  ;;  %v11877_v52 = vld [vmem:[#allocation2 + $0xb0] ss:$16 sps:$4 sm:$0xff]  }
  0x26   :  { %1632 = vmatprep.subr.bf16.mxu0 %v11863_v21  ;;  %v238_v47 = vcombine.high %v10245_v40, %v10245_v40  ;;  %v230_v48 = vrot.slane %v216_v41, %v12827_v28  ;;  %v245_v49 = vrot.slane %v10245_v40, %v12827_v28  ;;  %v284_v51 = vunpack.i.h.s16 %v223_v42  ;;  %v11878_v57 = vld [vmem:[#allocation2] ss:$16 sps:$4 sm:$0xff]   ;;  %v10240_v12 = vld.sshfl [vmem:[%s17211_s2 + $0x4] sm:$0x1 pattern:$0x75316420] }
  0x27   :  { %v208_v53 = vcombine.high %v206_v45, %v206_v45  ;;  %v278_v55 = vunpack.i.h.s16 %v206_v45  ;;  %v280_v56 = vunpack.i.h.s16 %v207_v46  ;;  %v1127_v60 = vcombine.low %v206_v45, %v207_v46  ;;  %v10239_v5 = vld.sshfl [vmem:[%s17211_s2] sm:$0x33 pattern:$0x75316420]  ;;  %v12537_v23 = vld [vmem:[#allocation2 + $0x1e4] ss:$16 sps:$4 sm:$0xff]  }
  0x28   :  { %1331 = vmatpush1.bf16.msra.mxu1 %v11865_v24  ;;  %v252_v54 = vrot.slane %v238_v47, %v12827_v28  ;;  %v12865_v58 = vcombine.high %v245_v49, %v245_v49  ;;  %v1071_v59 = vunpack.i.h.s16 %v230_v48  ;;  %v12867_v61 = vpack.i.b16 %v230_v48, %v284_v51  ;;  %v10241_v17 = vld.sshfl [vmem:[%s17211_s2 + $0x30] sm:$0x33 pattern:$0x75316420] }
  0x29   :  { %1633 = vmatpush1.bf16.msra.mxu0 %v11866_v25  ;;  %1332 = vmatprep.subr.bf16.mxu1 %v11867_v26  ;;  %v282_v63 = vunpack.i.h.s16 %v208_v53  ;;  %v1128_v7 = vcombine.low %v208_v53, %v223_v42  ;;  %v1137_v8 = vrot.slane %v1127_v60, %v12827_v28  ;;  %v12876_v11 = vpack.i.b16 %v207_v46, %v278_v55 }
  0x2a   :  { %1634 = vmatprep.subr.bf16.mxu0 %v11869_v27  ;;  %v12869_v62 = vcombine.high %v252_v54, %v252_v54  ;;  %v287_v1 = vunpack.i.h.s16 %v252_v54  ;;  %v10275_v2 = vpack.i.b16 %v252_v54, %v230_v48  ;;  %v289_v6 = vunpack.i.h.s16 %v12865_v58 }
  0x2b   :  { %v12883_v15 = vpack.i.b16 %v208_v53, %v280_v56  ;;  %v12885_v16 = vpack.i.b16 %v223_v42, %v282_v63  ;;  %v1144_v19 = vrot.slane %v1128_v7, %v12827_v28  ;;  %v90_v24 = vcombine.high %v10239_v5, %v10239_v5 }
  0x2c   :  { %1333 = vmatpush1.bf16.msra.mxu1 %v11871_v29  ;;  %v291_v13 = vunpack.i.h.s16 %v12869_v62  ;;  %v10276_v14 = vpack.i.b16 %v12865_v58, %v287_v1  ;;  %v10277_v18 = vpack.i.b16 %v12869_v62, %v289_v6  ;;  %v12892_v20 = vpack.i.b16 %v287_v1, %v1071_v59 }
  0x2d   :  { %1635 = vmatpush1.bf16.msra.mxu0 %v11872_v30  ;;  %1334 = vmatprep.subr.bf16.mxu1 %v11873_v33  ;;  %v12898_v25 = vrot.slane %v10239_v5, %v12827_v28  ;;  %v1159_v26 = vcombine.low %v1137_v8, %v1144_v19  ;;  %v12903_v29 = vrot.slane %v10240_v12, %v12827_v28  ;;  %v293_v8 = vunpack.i.h.s16 %v12862_v50  ;;  %v11883_v19 = vld [vmem:[#allocation2 + $0x138] ss:$16 sps:$4 sm:$0xff]  }
  0x2e   :  { %1636 = vmatprep.subr.bf16.mxu0 %v11875_v34  ;;  %v10278_v21 = vpack.i.b16 %v12862_v50, %v291_v13  ;;  %v1129_v22 = vcombine.low %v10275_v2, %v10276_v14  ;;  %v128_v30 = vcombine.high %v10241_v17, %v10241_v17  ;;  %v12909_v34 = vrot.slane %v90_v24, %v12827_v28  ;;  %v10242_v2 = vld.sshfl [vmem:[%s17211_s2 + $0x34] sm:$0x1 pattern:$0x75316420] }
  0x2f   :  { %v12912_v35 = vrot.slane %v10241_v17, %v12827_v28  ;;  %v1069_v37 = vunpack.i.h.s16 %v12903_v29  ;;  %v10302_v45 = vcombine.low %v12832_v32, %v12832_v32  ;;  %v10372_v1 = vcombine.low %v12842_v39, %v12842_v39  ;;  %v11885_v39 = vld [vmem:[#allocation2 + $0x13c] ss:$16 sps:$4 sm:$0xff]   ;;  %v10247_v17 = vld.sshfl [vmem:[%s17211_s2 + $0x8] sm:$0x22 pattern:$0x75316420] }
  0x30   :  { %1335 = vmatpush1.bf16.msra.mxu1 %v11877_v52  ;;  %v1130_v31 = vcombine.low %v10277_v18, %v10278_v21  ;;  %v1151_v33 = vrot.slane %v1129_v22, %v12827_v28  ;;  %v12915_v36 = vrot.slane %v128_v30, %v12827_v28  ;;  %v1431_v49 = vcombine.low %v12898_v25, %v12909_v34  ;;  %v10248_v24 = vld.sshfl [vmem:[%s17211_s2 + $0xc] sm:$0x13 pattern:$0x75316420] }
  0x31   :  { %1637 = vmatpush1.bf16.msra.mxu0 %v11878_v57  ;;  %10307 = vmatprep.subr.msk.bf16.mxu1 %vm1307_vm0, %v12840_v38  ;;  %v143_v41 = vcombine.high %v12912_v35, %v12912_v35  ;;  %v169_v42 = vunpack.i.h.s16 %v12912_v35  ;;  %v10310_v48 = vpack.i.b16 %v12912_v35, %v12903_v29  ;;  %v1167_v52 = vrot.slane %v1159_v26, %v12827_v28 }
  0x32   :  { %10376 = vmatprep.subr.msk.bf16.mxu0 %vm1307_vm0, %v12850_v43  ;;  %v1158_v40 = vrot.slane %v1130_v31, %v12827_v28  ;;  %v144_v46 = vcombine.high %v12915_v36, %v12915_v36  ;;  %v171_v47 = vunpack.i.h.s16 %v12915_v36  ;;  %v10315_v32 = vcombine.high %v12898_v25, %v12909_v34  ;;  %v10249_v31 = vld.sshfl [vmem:[%s17211_s2 + $0x38] sm:$0x22 pattern:$0x75316420] }
  0x33   :  { %v173_v53 = vunpack.i.h.s16 %v143_v41  ;;  %v10311_v54 = vpack.i.b16 %v12915_v36, %v169_v42  ;;  %v1441_v56 = vrot.slane %v1431_v49, %v12827_v28  ;;  %v12936_v57 = vpack.i.b16 %v169_v42, %v1069_v37  ;;  %v10250_v37 = vld.sshfl [vmem:[%s17211_s2 + $0x3c] sm:$0x13 pattern:$0x75316420] }
  0x34   :  { %v1160_v51 = vcombine.low %v1151_v33, %v1158_v40  ;;  %v10312_v55 = vpack.i.b16 %v143_v41, %v171_v47  ;;  %v1448_v5 = vrot.slane %v10315_v32, %v12827_v28  ;;  %v12946_v6 = vsel %vm1307_vm0, %v10302_v45, 0  ;;  %v11891_v45 = vld [vmem:[#allocation2 + $0x11c] ss:$16 sps:$4 sm:$0xff]  }
  0x35   :  { %v10313_v60 = vpack.i.b16 %v144_v46, %v173_v53  ;;  %v1433_v63 = vcombine.low %v10310_v48, %v10311_v54  ;;  %v262_v7 = vcombine.high %v12855_v44, %v12855_v44  ;;  %v12961_v22 = vrot.slane %v10242_v2, %v12827_v28  ;;  %v11888_v54 = vld [vmem:[#allocation2 + $0x1e4] ss:$16 sps:$4 sm:$0xff]  }
  0x36   :  { %v1174_v59 = vrot.slane %v1160_v51, %v12827_v28  ;;  %v1463_v18 = vcombine.low %v1441_v56, %v1448_v5  ;;  %v175_v44 = vunpack.i.h.s16 %v144_v46  ;;  %v12970_v30 = vsel %vm1307_vm0, %v10372_v1, 0 }
  0x37   :  { %v1434_v13 = vcombine.low %v10312_v55, %v10313_v60  ;;  %v1455_v14 = vrot.slane %v1433_v63, %v12827_v28  ;;  %v12958_v21 = vrot.slane %v262_v7, %v12827_v28  ;;  %17213 = vst [vmem:[#allocation11_spill] sm:$0xff] %v12961_v22  ;;  %v310_v40 = vcombine.high %v10247_v17, %v10247_v17  ;;  %v11897_v7 = vld [vmem:[#allocation2 + $0xfc] ss:$16 sps:$4 sm:$0xff]  }
  0x38   :  { %v12951_v12 = vcombine.low %v1167_v52, %v1174_v59  ;;  %v1471_v42 = vrot.slane %v1463_v18, %v12827_v28  ;;  %v334_v46 = vcombine.high %v10248_v24, %v10248_v24  ;;  %v341_v47 = vrot.slane %v10248_v24, %v12827_v28  ;;  %v11889_v59 = vld [vmem:[#allocation2 + $0x118] ss:$16 sps:$4 sm:$0xff]   ;;  %v11894_v24 = vld [vmem:[#allocation2 + $0x1c4] ss:$16 sps:$4 sm:$0xff]  }
  0x39   :  { %17212 = vst [vmem:[#allocation10_spill] sm:$0xff] %v12958_v21  ;;  %v1462_v26 = vrot.slane %v1434_v13, %v12827_v28  ;;  %v10279_v33 = vpack.i.b16 %v12958_v21, %v293_v8  ;;  %v10314_v49 = vpack.i.b16 %v12961_v22, %v175_v44  ;;  %v357_v51 = vcombine.high %v10249_v31, %v10249_v31 }
  0x3a   :  { %10305 = vmatmul.mubr.msk.bf16.vlgmr.msra.gmra.mxu1 %vm1300_vm1, %v12951_v12  ;;  %v364_v52 = vrot.slane %v10249_v31, %v12827_v28  ;;  %v349_v55 = vcombine.high %v341_v47, %v341_v47  ;;  %v381_v32 = vcombine.high %v10250_v37, %v10250_v37  ;;  %v12988_v56 = vrot.slane %v10250_v37, %v12827_v28  ;;  %v11895_v31 = vld [vmem:[#allocation2 + $0xf8] ss:$16 sps:$4 sm:$0xff]  }
  0x3b   :  { %1376 = vmatpush1.bf16.msra.mxu1 %v12946_v6  ;;  %1362 = vmatprep.mubr.bf16.mxu1 %v17064_v0  ;;  %v1464_v41 = vcombine.low %v1455_v14, %v1462_v26  ;;  %v1182_v48 = vrot.slane %v10279_v33, %v12827_v28  ;;  %v317_v63 = vrot.slane %v10247_v17, %v12827_v28  ;;  %v11886_v17 = vld [vmem:[#allocation2 + $0x1e0] ss:$16 sps:$4 sm:$0xff]  }
  0x3c   :  { %1377 = vmatprep.subr.bf16.mxu1 %v11885_v39  ;;  %v371_v1 = vrot.slane %v357_v51, %v12827_v28  ;;  %v372_v2 = vcombine.high %v364_v52, %v364_v52  ;;  %v324_v8 = vrot.slane %v310_v40, %v12827_v28  ;;  %v12999_v13 = vrot.slane %v381_v32, %v12827_v28  ;;  %v11892_v51 = vld [vmem:[#allocation2 + $0x1c0] ss:$16 sps:$4 sm:$0xff]   ;;  %v11901_v52 = vld [vmem:[#allocation2 + $0xd8] ss:$16 sps:$4 sm:$0xff]  }
  0x3d   :  { %v1478_v53 = vrot.slane %v1464_v41, %v12827_v28  ;;  %v12991_v60 = vrot.slane %v1182_v48, %v12827_v28  ;;  %v411_v14 = vunpack.i.h.s16 %v12988_v56  ;;  %v348_v39 = vrot.slane %v334_v46, %v12827_v28  ;;  %v11903_v41 = vld [vmem:[#allocation2 + $0xdc] ss:$16 sps:$4 sm:$0xff]  }
  0x3e   :  { %v373_v18 = vcombine.high %v371_v1, %v371_v1  ;;  %v10346_v44 = vpack.i.b16 %v372_v2, %v349_v55  ;;  %v1486_v26 = vrot.slane %v10314_v49, %v12827_v28  ;;  %v11909_v55 = vld [vmem:[#allocation2 + $0xbc] ss:$16 sps:$4 sm:$0xff]  }
  0x3f   :  { %1378 = vmatpush1.bf16.msra.mxu1 %v11883_v19  ;;  %v12995_v5 = vcombine.low %v1471_v42, %v1478_v53  ;;  %v407_v19 = vunpack.i.h.s16 %v372_v2  ;;  %v10349_v40 = vpack.i.b16 %v12999_v13, %v411_v14  ;;  %v10351_v42 = vcombine.high %v317_v63, %v324_v8  ;;  %v1094_v32 = vld [vmem:[#allocation2 + $0xa8] sm:$0x33]  ;;  %v10252_v14 = vld.sshfl [vmem:[%s17211_s2 + $0x10] sm:$0x33 pattern:$0x75316420] }
  0x40   :  { %1379 = vmatprep.subr.bf16.mxu1 %v11891_v45  ;;  %v409_v33 = vunpack.i.h.s16 %v373_v18  ;;  %v1757_v46 = vcombine.low %v341_v47, %v348_v39  ;;  %v13014_v49 = vrot.slane %v1486_v26, %v12827_v28  ;;  %v11907_v8 = vld [vmem:[#allocation2 + $0xb8] ss:$16 sps:$4 sm:$0xff]  }
  0x41   :  { %10341 = vmatmul.mubr.msk.bf16.vlgmr.msra.gmra.mxu0 %vm1300_vm1, %v12995_v5  ;;  %v10347_v37 = vpack.i.b16 %v373_v18, %v407_v19  ;;  %v1766_v63 = vrot.slane %v10351_v42, %v12827_v28  ;;  %v10254_v18 = vld.sshfl [vmem:[%s17211_s2 + $0x40] sm:$0x33 pattern:$0x75316420]  ;;  %v11906_v19 = vld [vmem:[#allocation2 + $0x184] ss:$16 sps:$4 sm:$0xff]  }
  0x42   :  { %10306 = vmatmul.mubr.msk.bf16.gmra.mxu1 %vm1300_vm1, %v12991_v60  ;;  %1952 = vmatpush1.bf16.msra.mxu0 %v12970_v30  ;;  %v10348_v45 = vpack.i.b16 %v12988_v56, %v409_v33  ;;  %v1773_v1 = vrot.slane %v1757_v46, %v12827_v28  ;;  %v10251_v33 = vld.sshfl [vmem:[%s17211_s2 + $0xc] sm:$0x20 pattern:$0x75316420]  ;;  %v11912_v42 = vld [vmem:[#allocation2 + $0x164] ss:$16 sps:$4 sm:$0xff]  }
  0x43   :  { %1380 = vmatpush1.bf16.msra.mxu1 %v11889_v59  ;;  %1953 = vmatprep.subr.bf16.mxu0 %v11888_v54  ;;  %v1758_v48 = vcombine.low %v10346_v44, %v10347_v37  ;;  %v11900_v54 = vld [vmem:[#allocation2 + $0x1a4] ss:$16 sps:$4 sm:$0xff]   ;;  %v11898_v59 = vld [vmem:[#allocation2 + $0x1a0] ss:$16 sps:$4 sm:$0xff]   ;;  %v13031_v44 = vcombine.high %v1094_v32, %v1094_v32  ;;  %v11919_v46 = vld [vmem:[#allocation2 + $0x8c] ss:$16 sps:$4 sm:$0xff]  }
  0x44   :  { %1381 = vmatprep.subr.bf16.mxu1 %v11897_v7  ;;  %1664 = vmatprep.mubr.bf16.mxu0 %v17064_v0  ;;  %v1759_v53 = vcombine.low %v10348_v45, %v10349_v40  ;;  %v10253_v7 = vld.sshfl [vmem:[%s17211_s2 + $0x3c] sm:$0x20 pattern:$0x75316420]  ;;  %v486_v40 = vcombine.high %v10254_v18, %v10254_v18 }
  0x45   :  { %1403 = vmatprep.mubr.bf16.mxu1 %v17064_v0  ;;  %v1780_v47 = vrot.slane %v1758_v48, %v12827_v28  ;;  %v470_v39 = vcombine.high %v10253_v7, %v10253_v7  ;;  %v396_v48 = vcombine.high %v12988_v56, %v12988_v56  ;;  %v11917_v56 = vld [vmem:[#allocation2 + $0x88] ss:$16 sps:$4 sm:$0xff]   ;;  %v11925_v7 = vld [vmem:[#allocation2 + $0x6c] ss:$16 sps:$4 sm:$0xff]  }
  0x46   :  { %1954 = vmatpush1.bf16.msra.mxu0 %v11886_v17  ;;  %v1787_v2 = vrot.slane %v1759_v53, %v12827_v28  ;;  %v10338_v17 = vcombine.low %v1094_v32, %v1094_v32 }
  0x47   :  { %1382 = vmatpush1.bf16.msra.mxu1 %v11895_v31  ;;  %1955 = vmatprep.subr.bf16.mxu0 %v11894_v24  ;;  %v1788_v24 = vcombine.low %v1766_v63, %v1773_v1  ;;  %v446_v31 = vcombine.high %v10252_v14, %v10252_v14  ;;  %v477_v37 = vrot.slane %v470_v39, %v12827_v28 }
  0x48   :  { %1383 = vmatprep.subr.bf16.mxu1 %v11903_v41  ;;  %v1789_v26 = vcombine.low %v1780_v47, %v1787_v2  ;;  %v11904_v41 = vld [vmem:[#allocation2 + $0x180] ss:$16 sps:$4 sm:$0xff]   ;;  %v13041_v45 = vsel %vm1307_vm0, %v10338_v17, 0  ;;  %v493_v1 = vrot.slane %v10254_v18, %v12827_v28  ;;  %v13053_v47 = vrot.slane %v486_v40, %v12827_v28  ;;  %v11923_v40 = vld [vmem:[#allocation2 + $0x68] ss:$16 sps:$4 sm:$0xff]  }
  0x49   :  { %10342 = vmatmul.mubr.msk.bf16.gmra.mxu0 %vm1300_vm1, %v13014_v49  ;;  %17214 = vst [vmem:[#allocation12_spill] sm:$0xff] %v13041_v45  ;;  %v460_v32 = vrot.slane %v446_v31, %v12827_v28  ;;  %v478_v63 = vcombine.high %v477_v37, %v477_v37  ;;  %v453_v18 = vrot.slane %v10252_v14, %v12827_v28  ;;  %v11922_v37 = vld [vmem:[#allocation2 + $0x294] ss:$16 sps:$4 sm:$0xff]  }
  0x4a   :  { %1956 = vmatpush1.bf16.msra.mxu0 %v11892_v51  ;;  %1979 = vmatprep.mubr.bf16.mxu0 %v17064_v0  ;;  %v413_v51 = vunpack.i.h.s16 %v12999_v13  ;;  %v1803_v53 = vrot.slane %v1789_v26, %v12827_v28  ;;  %v13063_v17 = vcombine.high %v493_v1, %v493_v1  ;;  %v515_v26 = vunpack.i.h.s16 %v493_v1 }
  0x4b   :  { %1384 = vmatpush1.bf16.msra.mxu1 %v11901_v52  ;;  %1957 = vmatprep.subr.bf16.mxu0 %v11900_v54  ;;  %v1796_v52 = vrot.slane %v1788_v24, %v12827_v28  ;;  %v2082_v54 = vld [vmem:[#allocation2 + $0x2b0] sm:$0x33]  ;;  %v513_v24 = vunpack.i.h.s16 %v478_v63  ;;  %v517_v31 = vunpack.i.h.s16 %v13053_v47 }
  0x4c   :  { %1385 = vmatprep.subr.bf16.mxu1 %v11909_v55  ;;  %v430_v55 = vcombine.high %v10251_v33, %v10251_v33  ;;  %v13056_v13 = vcombine.high %v2082_v54, %v2082_v54  ;;  %v10407_v2 = vcombine.low %v2082_v54, %v2082_v54  ;;  %v11920_v54 = vld [vmem:[#allocation2 + $0x290] ss:$16 sps:$4 sm:$0xff]  }
  0x4d   :  { %v13058_v39 = vcombine.low %v1796_v52, %v1803_v53  ;;  %v10384_v52 = vpack.i.b16 %v13053_v47, %v515_v26  ;;  %v10385_v53 = vpack.i.b16 %v13063_v17, %v517_v31  ;;  %v1746_v26 = vld [vmem:[#allocation2 + $0x208] sm:$0x33]  ;;  %v11932_v31 = vld [vmem:[#allocation2 + $0x250] ss:$16 sps:$4 sm:$0xff]  }
  0x4e   :  { %1958 = vmatpush1.bf16.msra.mxu0 %v11898_v59  ;;  %v11910_v59 = vld [vmem:[#allocation2 + $0x160] ss:$16 sps:$4 sm:$0xff]   ;;  %v13069_v33 = vsel %vm1307_vm0, %v10407_v2, 0 }
  0x4f   :  { %1386 = vmatpush1.bf16.msra.mxu1 %v11907_v8  ;;  %1959 = vmatprep.subr.bf16.mxu0 %v11906_v19  ;;  %v10350_v8 = vpack.i.b16 %v396_v48, %v413_v51  ;;  %v462_v19 = vcombine.high %v460_v32, %v460_v32  ;;  %17215 = vst [vmem:[#allocation13_spill] sm:$0xff] %v13069_v33 }
  0x50   :  { %10343 = vmatprep.subr.msk.bf16.mxu1 %vm1307_vm0, %v13031_v44  ;;  %v10383_v51 = vpack.i.b16 %v493_v1, %v513_v24  ;;  %v11943_v24 = vld [vmem:[#allocation2 + $0xc] ss:$16 sps:$4 sm:$0xff]  }
  0x51   :  { %v1811_v14 = vrot.slane %v10350_v8, %v12827_v28  ;;  %v10382_v48 = vpack.i.b16 %v478_v63, %v462_v19  ;;  %v11926_v8 = vld [vmem:[#allocation2 + $0x270] ss:$16 sps:$4 sm:$0xff]   ;;  %v11935_v19 = vld [vmem:[#allocation2 + $0x28] ss:$16 sps:$4 sm:$0xff]  }
  0x52   :  { %10308 = vmatmul.mubr.msk.bf16.vlgmr.msra.gmra.mxu1 %vm1300_vm1, %v12951_v12  ;;  %1960 = vmatpush1.bf16.msra.mxu0 %v11904_v41  ;;  %v437_v12 = vrot.slane %v430_v55, %v12827_v28  ;;  %v11931_v41 = vld [vmem:[#allocation2 + $0x4c] ss:$16 sps:$4 sm:$0xff]   ;;  %v11928_v55 = vld [vmem:[#allocation2 + $0x274] ss:$16 sps:$4 sm:$0xff]  }
  0x53   :  { %1678 = vmatpush1.bf16.msra.mxu1 %v13041_v45  ;;  %1961 = vmatprep.subr.bf16.mxu0 %v11912_v42  ;;  %v13081_v63 = vrot.slane %v1811_v14, %v12827_v28  ;;  %v2095_v2 = vcombine.low %v10382_v48, %v10383_v51  ;;  %v10257_v14 = vld.sshfl [vmem:[%s17211_s2 + $0x44] sm:$0x33 pattern:$0x75316420]  ;;  %v11938_v48 = vld [vmem:[#allocation2 + $0x230] ss:$16 sps:$4 sm:$0xff]   ;;  %v13094_v51 = vcombine.high %v1746_v26, %v1746_v26 }
  0x54   :  { %1679 = vmatprep.subr.bf16.mxu1 %v11919_v46  ;;  %1413 = vmatprep.mubr.bf16.mxu1 %v17064_v0  ;;  %v438_v42 = vcombine.high %v437_v12, %v437_v12  ;;  %v461_v46 = vcombine.high %v453_v18, %v453_v18  ;;  %v11934_v12 = vld [vmem:[#allocation2 + $0x254] ss:$16 sps:$4 sm:$0xff]  }
  0x55   :  { %17216 = vst [vmem:[#allocation14_spill] sm:$0xff] %v13094_v51 }
  0x56   :  { %1962 = vmatpush1.bf16.msra.mxu0 %v11910_v59  ;;  %v11929_v59 = vld [vmem:[#allocation2 + $0x48] ss:$16 sps:$4 sm:$0xff]   ;;  %v2094_v1 = vcombine.low %v460_v32, %v461_v46  ;;  %v2117_v32 = vrot.slane %v2095_v2, %v12827_v28  ;;  %v10374_v46 = vcombine.low %v1746_v26, %v1746_v26  ;;  %v502_v2 = vcombine.high %v13053_v47, %v13053_v47 }
  0x57   :  { %1680 = vmatpush1.bf16.msra.mxu1 %v11917_v56  ;;  %10411 = vmatprep.subr.msk.bf16.mxu0 %vm1307_vm0, %v13056_v13  ;;  %v11937_v56 = vld [vmem:[#allocation2 + $0x2c] ss:$16 sps:$4 sm:$0xff]  }
  0x58   :  { %1681 = vmatprep.subr.bf16.mxu1 %v11925_v7  ;;  %v2096_v7 = vcombine.low %v10384_v52, %v10385_v53  ;;  %v11946_v52 = vld [vmem:[#allocation2 + $0x214] ss:$16 sps:$4 sm:$0xff]  }
  0x59   :  { %10377 = vmatmul.mubr.msk.bf16.vlgmr.msra.gmra.mxu0 %vm1300_vm1, %v13058_v39 }
  0x5a   :  { %10309 = vmatmul.mubr.msk.bf16.gmra.mxu1 %vm1300_vm1, %v12991_v60  ;;  %2289 = vmatpush1.bf16.msra.mxu0 %v13069_v33  ;;  %v2093_v60 = vcombine.low %v438_v42, %v453_v18  ;;  %v2110_v18 = vrot.slane %v2094_v1, %v12827_v28  ;;  %v11941_v42 = vld [vmem:[#allocation2 + $0x8] ss:$16 sps:$4 sm:$0xff]   ;;  %v11953_v1 = vld [vmem:[#allocation2 + $0x1ec] ss:$16 sps:$4 sm:$0xff]  }
  0x5b   :  { %1989 = vmatprep.mubr.bf16.mxu0 %v17064_v0  ;;  %2290 = vmatprep.subr.bf16.mxu0 %v11922_v37 }
  0x5c   :  { %1682 = vmatpush1.bf16.msra.mxu1 %v11923_v40  ;;  %1705 = vmatprep.mubr.bf16.mxu1 %v17064_v0  ;;  %v2103_v37 = vrot.slane %v2093_v60, %v12827_v28  ;;  %v2124_v40 = vrot.slane %v2096_v7, %v12827_v28  ;;  %v13098_v60 = vsel %vm1307_vm0, %v10374_v46, 0  ;;  %v519_v7 = vunpack.i.h.s16 %v13063_v17 }
  0x5d   :  { %1683 = vmatprep.subr.bf16.mxu1 %v11931_v41  ;;  %v11940_v41 = vld [vmem:[#allocation2 + $0x234] ss:$16 sps:$4 sm:$0xff]   ;;  %17217 = vst [vmem:[#allocation15_spill] sm:$0xff] %v13098_v60 }
  0x5e   :  { %2291 = vmatpush1.bf16.msra.mxu0 %v11920_v54  ;;  %v2125_v53 = vcombine.low %v2103_v37, %v2110_v18  ;;  %v2126_v54 = vcombine.low %v2117_v32, %v2124_v40  ;;  %v11944_v37 = vld [vmem:[#allocation2 + $0x210] ss:$16 sps:$4 sm:$0xff]   ;;  %v11951_v18 = vld [vmem:[#allocation2 + $0x1e8] ss:$16 sps:$4 sm:$0xff]   ;;  %v11959_v32 = vld [vmem:[#allocation2 + $0x1cc] ss:$16 sps:$4 sm:$0xff]   ;;  %v10386_v40 = vpack.i.b16 %v502_v2, %v519_v7 }
  0x5f   :  { %2292 = vmatprep.subr.bf16.mxu0 %v11928_v55  ;;  %v574_v55 = vcombine.high %v10257_v14, %v10257_v14  ;;  %v11965_v2 = vld [vmem:[#allocation2 + $0x1ac] ss:$16 sps:$4 sm:$0xff]  }
  0x60   :  { %1684 = vmatpush1.bf16.msra.mxu1 %v11929_v59  ;;  %v581_v59 = vrot.slane %v10257_v14, %v12827_v28 }
  0x61   :  { %1685 = vmatprep.subr.bf16.mxu1 %v11937_v56  ;;  %10378 = vmatmul.mubr.msk.bf16.gmra.mxu0 %vm1300_vm1, %v13081_v63  ;;  %v2419_v56 = vld [vmem:[#allocation2 + $0x360] sm:$0x33]  ;;  %v588_v26 = vrot.slane %v574_v55, %v12827_v28  ;;  %v11957_v55 = vld [vmem:[#allocation2 + $0x1c8] ss:$16 sps:$4 sm:$0xff]  }
  0x62   :  { %2293 = vmatpush1.bf16.msra.mxu0 %v11926_v8  ;;  %2316 = vmatprep.mubr.bf16.mxu0 %v17064_v0  ;;  %v10255_v8 = vld.sshfl [vmem:[%s17211_s2 + $0x14] sm:$0x33 pattern:$0x75316420]  ;;  %v13116_v47 = vcombine.high %v2419_v56, %v2419_v56  ;;  %v10443_v17 = vcombine.low %v2419_v56, %v2419_v56  ;;  %v11954_v56 = vld [vmem:[#allocation2 + $0x340] ss:$16 sps:$4 sm:$0xff]  }
  0x63   :  { %2294 = vmatprep.subr.bf16.mxu0 %v11934_v12  ;;  %v2133_v12 = vrot.slane %v2125_v53, %v12827_v28  ;;  %v536_v14 = vcombine.high %v10255_v8, %v10255_v8  ;;  %v11956_v53 = vld [vmem:[#allocation2 + $0x344] ss:$16 sps:$4 sm:$0xff]   ;;  %v543_v7 = vrot.slane %v10255_v8, %v12827_v28  ;;  %v11971_v8 = vld [vmem:[#allocation2 + $0x18c] ss:$16 sps:$4 sm:$0xff]  }
  0x64   :  { %1686 = vmatpush1.bf16.msra.mxu1 %v11935_v19  ;;  %v2140_v19 = vrot.slane %v2126_v54, %v12827_v28  ;;  %v13128_v54 = vsel %vm1307_vm0, %v10443_v17, 0 }
  0x65   :  { %1687 = vmatprep.subr.bf16.mxu1 %v11943_v24  ;;  %v10256_v24 = vld.sshfl [vmem:[%s17211_s2 + $0x18] sm:$0x1 pattern:$0x75316420] }
  0x66   :  { %2295 = vmatpush1.bf16.msra.mxu0 %v11932_v31  ;;  %v589_v31 = vcombine.high %v581_v59, %v581_v59  ;;  %v13121_v46 = vcombine.low %v2133_v12, %v2140_v19  ;;  %v550_v12 = vrot.slane %v536_v14, %v12827_v28  ;;  %v11962_v19 = vld [vmem:[#allocation2 + $0x324] ss:$16 sps:$4 sm:$0xff]  }
  0x67   :  { %2296 = vmatprep.subr.bf16.mxu0 %v11940_v41  ;;  %v566_v41 = vrot.slane %v10256_v24, %v12827_v28 }
  0x68   :  { %1688 = vmatpush1.bf16.msra.mxu1 %v11941_v42  ;;  %v615_v42 = vunpack.i.h.s16 %v581_v59 }
  0x69   :  { %10379 = vmatprep.subr.msk.bf16.mxu1 %vm1307_vm0, %v13094_v51  ;;  %v10417_v24 = vpack.i.b16 %v581_v59, %v566_v41 }
  0x6a   :  { %2297 = vmatpush1.bf16.msra.mxu0 %v11938_v48  ;;  %v13123_v48 = vcombine.high %v588_v26, %v588_v26 }
  0x6b   :  { %10344 = vmatmul.mubr.msk.bf16.vlgmr.msra.gmra.mxu1 %vm1300_vm1, %v12995_v5  ;;  %2298 = vmatprep.subr.bf16.mxu0 %v11946_v52  ;;  %v617_v5 = vunpack.i.h.s16 %v588_v26  ;;  %v619_v52 = vunpack.i.h.s16 %v589_v31 }
  0x6c   :  { %2003 = vmatpush1.bf16.msra.mxu1 %v13098_v60  ;;  %1715 = vmatprep.mubr.bf16.mxu1 %v17064_v0 }
  0x6d   :  { %2004 = vmatprep.subr.bf16.mxu1 %v11953_v1  ;;  %v2148_v1 = vrot.slane %v10386_v40, %v12827_v28  ;;  %v10419_v27 = vpack.i.b16 %v589_v31, %v617_v5  ;;  %v10420_v17 = vpack.i.b16 %v13123_v48, %v619_v52  ;;  %v2430_v40 = vcombine.low %v543_v7, %v550_v12  ;;  %v11977_v5 = vld [vmem:[#allocation2 + $0x16c] ss:$16 sps:$4 sm:$0xff]  }
  0x6e   :  { %2299 = vmatpush1.bf16.msra.mxu0 %v11944_v37  ;;  %v10418_v37 = vpack.i.b16 %v588_v26, %v615_v42  ;;  %v11968_v26 = vld [vmem:[#allocation2 + $0x304] ss:$16 sps:$4 sm:$0xff]   ;;  %v10422_v31 = vcombine.high %v543_v7, %v550_v12  ;;  %v11969_v42 = vld [vmem:[#allocation2 + $0x188] ss:$16 sps:$4 sm:$0xff]   ;;  %v11972_v7 = vld [vmem:[#allocation2 + $0x2e0] ss:$16 sps:$4 sm:$0xff]  }
  0x6f   :  { %10447 = vmatprep.subr.msk.bf16.mxu0 %vm1307_vm0, %v13116_v47  ;;  %v13142_v59 = vrot.slane %v2148_v1, %v12827_v28  ;;  %v2433_v41 = vcombine.low %v10419_v27, %v10420_v17  ;;  %v2083_v52 = vld [vmem:[#allocation2 + $0x2b8] sm:$0x33] }
  0x70   :  { %2005 = vmatpush1.bf16.msra.mxu1 %v11951_v18  ;;  %v11963_v18 = vld [vmem:[#allocation2 + $0x1a8] ss:$16 sps:$4 sm:$0xff]   ;;  %v2432_v14 = vcombine.low %v10417_v24, %v10418_v37  ;;  %v2447_v1 = vrot.slane %v10422_v31, %v12827_v28  ;;  %v10409_v12 = vcombine.low %v2083_v52, %v2083_v52  ;;  %v11980_v24 = vld [vmem:[#allocation2 + $0x2c4] ss:$16 sps:$4 sm:$0xff]   ;;  %v13154_v37 = vcombine.high %v2083_v52, %v2083_v52 }
  0x71   :  { %2006 = vmatprep.subr.bf16.mxu1 %v11959_v32  ;;  %10412 = vmatmul.mubr.msk.bf16.vlgmr.msra.gmra.mxu0 %vm1300_vm1, %v13121_v46  ;;  %v11960_v32 = vld [vmem:[#allocation2 + $0x320] ss:$16 sps:$4 sm:$0xff]   ;;  %v2461_v27 = vrot.slane %v2433_v41, %v12827_v28  ;;  %v621_v41 = vunpack.i.h.s16 %v13123_v48  ;;  %v11991_v48 = vld [vmem:[#allocation2 + $0x25c] ss:$16 sps:$4 sm:$0xff]  }
  0x72   :  { %2626 = vmatpush1.bf16.msra.mxu0 %v13128_v54  ;;  %2326 = vmatprep.mubr.bf16.mxu0 %v17064_v0  ;;  %17218 = vst [vmem:[#allocation16_spill] sm:$0xff] %v13154_v37 }
  0x73   :  { %2627 = vmatprep.subr.bf16.mxu0 %v11956_v53  ;;  %10345 = vmatmul.mubr.msk.bf16.gmra.mxu1 %vm1300_vm1, %v13014_v49  ;;  %v11966_v49 = vld [vmem:[#allocation2 + $0x300] ss:$16 sps:$4 sm:$0xff]   ;;  %v2440_v53 = vrot.slane %v2430_v40, %v12827_v28  ;;  %v13157_v40 = vsel %vm1307_vm0, %v10409_v12, 0  ;;  %v12516_v12 = vld [vmem:[#allocation2 + $0x114] ss:$16 sps:$4 sm:$0xff]  }
  0x74   :  { %2007 = vmatpush1.bf16.msra.mxu1 %v11957_v55  ;;  %2030 = vmatprep.mubr.bf16.mxu1 %v17064_v0  ;;  %v11974_v55 = vld [vmem:[#allocation2 + $0x2e4] ss:$16 sps:$4 sm:$0xff]   ;;  %17219 = vst [vmem:[#allocation17_spill] sm:$0xff] %v13157_v40 }
  0x75   :  { %2008 = vmatprep.subr.bf16.mxu1 %v11965_v2  ;;  %v2454_v2 = vrot.slane %v2432_v14, %v12827_v28  ;;  %v2462_v17 = vcombine.low %v2440_v53, %v2447_v1  ;;  %v11986_v53 = vld [vmem:[#allocation2 + $0x278] ss:$16 sps:$4 sm:$0xff]   ;;  %v12514_v1 = vld [vmem:[#allocation2 + $0x134] ss:$16 sps:$4 sm:$0xff]  }
  0x76   :  { %2628 = vmatpush1.bf16.msra.mxu0 %v11954_v56  ;;  %v11975_v56 = vld [vmem:[#allocation2 + $0x168] ss:$16 sps:$4 sm:$0xff]  }
  0x77   :  { %2629 = vmatprep.subr.bf16.mxu0 %v11962_v19  ;;  %v10258_v19 = vld.sshfl [vmem:[%s17211_s2 + $0x48] sm:$0x1 pattern:$0x75316420] }
  0x78   :  { %2009 = vmatpush1.bf16.msra.mxu1 %v11963_v18  ;;  %v2463_v18 = vcombine.low %v2454_v2, %v2461_v27  ;;  %v604_v14 = vrot.slane %v10258_v19, %v12827_v28  ;;  %v11994_v2 = vld [vmem:[#allocation2 + $0x23c] ss:$16 sps:$4 sm:$0xff]  }
  0x79   :  { %10413 = vmatmul.mubr.msk.bf16.gmra.mxu0 %vm1300_vm1, %v13142_v59  ;;  %2010 = vmatprep.subr.bf16.mxu1 %v11971_v8  ;;  %v11985_v8 = vld [vmem:[#allocation2 + $0x29c] ss:$16 sps:$4 sm:$0xff]  }
  0x7a   :  { %2630 = vmatpush1.bf16.msra.mxu0 %v11960_v32  ;;  %2653 = vmatprep.mubr.bf16.mxu0 %v17064_v0  ;;  %v11978_v32 = vld [vmem:[#allocation2 + $0x2c0] ss:$16 sps:$4 sm:$0xff]   ;;  %v2477_v31 = vrot.slane %v2463_v18, %v12827_v28  ;;  %v11997_v19 = vld [vmem:[#allocation2 + $0x21c] ss:$16 sps:$4 sm:$0xff]   ;;  %v12518_v18 = vld [vmem:[#allocation2 + $0xf4] ss:$16 sps:$4 sm:$0xff]  }
  0x7b   :  { %2631 = vmatprep.subr.bf16.mxu0 %v11968_v26  ;;  %v2470_v26 = vrot.slane %v2462_v17, %v12827_v28  ;;  %v11995_v17 = vld [vmem:[#allocation2 + $0x218] ss:$16 sps:$4 sm:$0xff]  }
  0x7c   :  { %2011 = vmatpush1.bf16.msra.mxu1 %v11969_v42  ;;  %v11983_v42 = vld [vmem:[#allocation2 + $0x298] ss:$16 sps:$4 sm:$0xff]  }
  0x7d   :  { %2012 = vmatprep.subr.bf16.mxu1 %v11977_v5  ;;  %v11988_v5 = vld [vmem:[#allocation2 + $0x27c] ss:$16 sps:$4 sm:$0xff]   ;;  %v13169_v52 = vcombine.low %v2470_v26, %v2477_v31  ;;  %v12519_v26 = vld [vmem:[#allocation2 + $0xf0] ss:$16 sps:$4 sm:$0xff]   ;;  %v12520_v31 = vld [vmem:[#allocation2 + $0xd4] ss:$16 sps:$4 sm:$0xff]  }
  0x7e   :  { %2632 = vmatpush1.bf16.msra.mxu0 %v11966_v49  ;;  %v10421_v49 = vpack.i.b16 %v604_v14, %v621_v41  ;;  %v12002_v14 = vld [vmem:[#allocation2 + $0x34c] ss:$16 sps:$4 sm:$0xff]  }
  0x7f   :  { %2633 = vmatprep.subr.bf16.mxu0 %v11974_v55  ;;  %v11989_v55 = vld [vmem:[#allocation2 + $0x258] ss:$16 sps:$4 sm:$0xff]  }
  0x80   :  { %2013 = vmatpush1.bf16.msra.mxu1 %v11975_v56  ;;  %v12515_v56 = vld [vmem:[#allocation2 + $0x130] ss:$16 sps:$4 sm:$0xff]  }
  0x81   :  { %10414 = vmatprep.subr.msk.bf16.mxu1 %vm1307_vm0, %v13154_v37 }
  0x82   :  { %2634 = vmatpush1.bf16.msra.mxu0 %v11972_v7  ;;  %v11992_v7 = vld [vmem:[#allocation2 + $0x238] ss:$16 sps:$4 sm:$0xff]  }
  0x83   :  { %2635 = vmatprep.subr.bf16.mxu0 %v11980_v24  ;;  %10380 = vmatmul.mubr.msk.bf16.vlgmr.msra.gmra.mxu1 %vm1300_vm1, %v13058_v39  ;;  %v2485_v39 = vrot.slane %v10421_v49, %v12827_v28  ;;  %v2420_v24 = vld [vmem:[#allocation2 + $0x368] sm:$0x33]  ;;  %v12522_v49 = vld [vmem:[#allocation2 + $0xb4] ss:$16 sps:$4 sm:$0xff]  }
  0x84   :  { %2340 = vmatpush1.bf16.msra.mxu1 %v13157_v40  ;;  %2040 = vmatprep.mubr.bf16.mxu1 %v17064_v0 }
  0x85   :  { %2341 = vmatprep.subr.bf16.mxu1 %v11985_v8  ;;  %v13182_v27 = vrot.slane %v2485_v39, %v12827_v28  ;;  %v13187_v8 = vcombine.high %v2420_v24, %v2420_v24  ;;  %v12003_v39 = vld [vmem:[#allocation2 + $0x328] ss:$16 sps:$4 sm:$0xff]  }
  0x86   :  { %2636 = vmatpush1.bf16.msra.mxu0 %v11978_v32  ;;  %v10445_v32 = vcombine.low %v2420_v24, %v2420_v24  ;;  %v12526_v24 = vld [vmem:[#allocation2 + $0x64] ss:$16 sps:$4 sm:$0xff]  }
  0x87   :  { %10453 = vmatprep.subr.msk.bf16.mxu0 %vm1307_vm0, %v12808_v3  ;;  %17220 = vst [vmem:[#allocation18_spill] sm:$0xff] %v13187_v8 }
  0x88   :  { %2342 = vmatpush1.bf16.msra.mxu1 %v11983_v42  ;;  %v13192_v41 = vsel %vm1307_vm0, %v10445_v32, 0  ;;  %v12521_v42 = vld [vmem:[#allocation2 + $0xd0] ss:$16 sps:$4 sm:$0xff]   ;;  %v12012_v32 = vld [vmem:[#allocation2 + $0x2c8] ss:$16 sps:$4 sm:$0xff]  }
  0x89   :  { %10448 = vmatmul.mubr.msk.bf16.vlgmr.msra.gmra.mxu0 %vm1300_vm1, %v13169_v52  ;;  %2343 = vmatprep.subr.bf16.mxu1 %v11988_v5  ;;  %17221 = vst [vmem:[#allocation19_spill] sm:$0xff] %v13192_v41  ;;  %v12000_v5 = vld [vmem:[#allocation2 + $0x348] ss:$16 sps:$4 sm:$0xff]  }
  0x8a   :  { %2740 = vmatpush1.bf16.msra.mxu0 %v12817_v9  ;;  %2663 = vmatprep.mubr.bf16.mxu0 %v17064_v0 }
  0x8b   :  { %2741 = vmatprep.subr.bf16.mxu0 %v12514_v1  ;;  %10381 = vmatmul.mubr.msk.bf16.gmra.mxu1 %vm1300_vm1, %v13081_v63  ;;  %v12517_v63 = vld [vmem:[#allocation2 + $0x110] ss:$16 sps:$4 sm:$0xff]   ;;  %v12006_v1 = vld [vmem:[#allocation2 + $0x308] ss:$16 sps:$4 sm:$0xff]  }
  0x8c   :  { %2344 = vmatpush1.bf16.msra.mxu1 %v11986_v53  ;;  %2367 = vmatprep.mubr.bf16.mxu1 %v17064_v0  ;;  %v12005_v53 = vld [vmem:[#allocation2 + $0x32c] ss:$16 sps:$4 sm:$0xff]  }
  0x8d   :  { %2345 = vmatprep.subr.bf16.mxu1 %v11991_v48  ;;  %v12523_v48 = vld [vmem:[#allocation2 + $0xb0] ss:$16 sps:$4 sm:$0xff]  }
  0x8e   :  { %2742 = vmatpush1.bf16.msra.mxu0 %v12515_v56  ;;  %v12011_v56 = vld [vmem:[#allocation2 + $0x2ec] ss:$16 sps:$4 sm:$0xff]  }
  0x8f   :  { %2743 = vmatprep.subr.bf16.mxu0 %v12516_v12  ;;  %v12525_v12 = vld [vmem:[#allocation2 + $0x80] ss:$16 sps:$4 sm:$0xff]  }
  0x90   :  { %2346 = vmatpush1.bf16.msra.mxu1 %v11989_v55  ;;  %v12008_v55 = vld [vmem:[#allocation2 + $0x30c] ss:$16 sps:$4 sm:$0xff]  }
  0x91   :  { %10449 = vmatmul.mubr.msk.bf16.gmra.mxu0 %vm1300_vm1, %v13182_v27  ;;  %2347 = vmatprep.subr.bf16.mxu1 %v11994_v2  ;;  %v12524_v2 = vld [vmem:[#allocation2 + $0x84] ss:$16 sps:$4 sm:$0xff]  }
  0x92   :  { %2744 = vmatpush1.bf16.msra.mxu0 %v12517_v63  ;;  %2767 = vmatprep.mubr.bf16.mxu0 %v17064_v0  ;;  %v12014_v63 = vld [vmem:[#allocation2 + $0x2cc] ss:$16 sps:$4 sm:$0xff]  }
  0x93   :  { %2745 = vmatprep.subr.bf16.mxu0 %v12518_v18  ;;  %v12527_v18 = vld [vmem:[#allocation2 + $0x60] ss:$16 sps:$4 sm:$0xff]  }
  0x94   :  { %2348 = vmatpush1.bf16.msra.mxu1 %v11992_v7  ;;  %v10261_v7 = vld.sshfl [vmem:[%s17211_s2 + $0x48] sm:$0x32 pattern:$0x75316420] }
  0x95   :  { %2349 = vmatprep.subr.bf16.mxu1 %v11997_v19  ;;  %v12009_v19 = vld [vmem:[#allocation2 + $0x2e8] ss:$16 sps:$4 sm:$0xff]  }
  0x96   :  { %2746 = vmatpush1.bf16.msra.mxu0 %v12519_v26  ;;  %v12528_v26 = vld [vmem:[#allocation2 + $0x44] ss:$16 sps:$4 sm:$0xff]  }
  0x97   :  { %2747 = vmatprep.subr.bf16.mxu0 %v12520_v31  ;;  %v10259_v31 = vld.sshfl [vmem:[%s17211_s2 + $0x18] sm:$0x32 pattern:$0x75316420] }
  0x98   :  { %2350 = vmatpush1.bf16.msra.mxu1 %v11995_v17  ;;  %v684_v17 = vcombine.high %v10261_v7, %v10261_v7 }
  0x99   :  { %10450 = vmatprep.subr.msk.bf16.mxu1 %vm1307_vm0, %v13187_v8 }
  0x9a   :  { %2748 = vmatpush1.bf16.msra.mxu0 %v12521_v42  ;;  %v691_v42 = vrot.slane %v10261_v7, %v12827_v28  ;;  %v12532_v7 = vld [vmem:[#allocation2 + $0x4] ss:$16 sps:$4 sm:$0xff]  }
  0x9b   :  { %2749 = vmatprep.subr.bf16.mxu0 %v12522_v49  ;;  %10415 = vmatmul.mubr.msk.bf16.vlgmr.msra.gmra.mxu1 %vm1300_vm1, %v13121_v46  ;;  %v12529_v49 = vld [vmem:[#allocation2 + $0x40] ss:$16 sps:$4 sm:$0xff]  }
  0x9c   :  { %2677 = vmatpush1.bf16.msra.mxu1 %v13192_v41  ;;  %2377 = vmatprep.mubr.bf16.mxu1 %v17064_v0 }
  0x9d   :  { %2678 = vmatprep.subr.bf16.mxu1 %v12002_v14  ;;  %v10260_v14 = vld.sshfl [vmem:[%s17211_s2 + $0x1c] sm:$0x11 pattern:$0x75316420] }
  0x9e   :  { %2750 = vmatpush1.bf16.msra.mxu0 %v12523_v48  ;;  %v13224_v48 = vld.sshfl [vmem:[%s17211_s2 + $0x4c] sm:$0x11 pattern:$0x75316420] }
  0x9f   :  { %10459 = vmatprep.subr.msk.bf16.mxu0 %vm1307_vm0, %v12810_v4 }
  0xa0   :  { %2679 = vmatpush1.bf16.msra.mxu1 %v12000_v5  ;;  %v698_v5 = vrot.slane %v684_v17, %v12827_v28  ;;  %v13237_v17 = vrot.slane %v13224_v48, %v12827_v28 }
  0xa1   :  { %10454 = vmatmul.mubr.msk.bf16.vlgmr.msra.gmra.mxu0 %vm1300_vm1, %v13169_v52  ;;  %2680 = vmatprep.subr.bf16.mxu1 %v12005_v53  ;;  %v12530_v53 = vld [vmem:[#allocation2 + $0x24] ss:$16 sps:$4 sm:$0xff]  }
  0xa2   :  { %2842 = vmatpush1.bf16.msra.mxu0 %v12820_v10  ;;  %2777 = vmatprep.mubr.bf16.mxu0 %v17064_v0 }
  0xa3   :  { %2843 = vmatprep.subr.bf16.mxu0 %v12524_v2  ;;  %10416 = vmatmul.mubr.msk.bf16.gmra.mxu1 %vm1300_vm1, %v13142_v59  ;;  %v700_v2 = vcombine.high %v698_v5, %v698_v5 }
  0xa4   :  { %2681 = vmatpush1.bf16.msra.mxu1 %v12003_v39  ;;  %2704 = vmatprep.mubr.bf16.mxu1 %v17064_v0  ;;  %v638_v39 = vcombine.high %v10259_v31, %v10259_v31 }
  0xa5   :  { %2682 = vmatprep.subr.bf16.mxu1 %v12008_v55  ;;  %v662_v55 = vcombine.high %v10260_v14, %v10260_v14 }
  0xa6   :  { %2844 = vmatpush1.bf16.msra.mxu0 %v12525_v12  ;;  %v645_v12 = vrot.slane %v10259_v31, %v12827_v28 }
  0xa7   :  { %2845 = vmatprep.subr.bf16.mxu0 %v12526_v24  ;;  %v676_v24 = vrot.slane %v662_v55, %v12827_v28 }
  0xa8   :  { %2683 = vmatpush1.bf16.msra.mxu1 %v12006_v1  ;;  %v699_v1 = vcombine.high %v691_v42, %v691_v42  ;;  %v12534_v42 = vld [vmem:[#allocation2] ss:$16 sps:$4 sm:$0xff]   ;;  %v653_v31 = vcombine.high %v645_v12, %v645_v12 }
  0xa9   :  { %2684 = vmatprep.subr.bf16.mxu1 %v12011_v56  ;;  %10455 = vmatmul.mubr.msk.bf16.gmra.mxu0 %vm1300_vm1, %v13182_v27  ;;  %v12531_v56 = vld [vmem:[#allocation2 + $0x20] ss:$16 sps:$4 sm:$0xff]   ;;  %v10465_v55 = vpack.i.b16 %v698_v5, %v676_v24 }
  0xaa   :  { %2846 = vmatpush1.bf16.msra.mxu0 %v12527_v18  ;;  %2869 = vmatprep.mubr.bf16.mxu0 %v17064_v0  ;;  %v733_v18 = vunpack.i.h.s16 %v698_v5 }
  0xab   :  { %2847 = vmatprep.subr.bf16.mxu0 %v12528_v26  ;;  %v737_v26 = vunpack.i.h.s16 %v700_v2 }
  0xac   :  { %2685 = vmatpush1.bf16.msra.mxu1 %v12009_v19  ;;  %v652_v19 = vrot.slane %v638_v39, %v12827_v28  ;;  %v669_v39 = vrot.slane %v10260_v14, %v12827_v28  ;;  %v12538_v14 = vld [vmem:[#allocation2 + $0x118] ss:$16 sps:$4 sm:$0xff]  }
  0xad   :  { %2686 = vmatprep.subr.bf16.mxu1 %v12014_v63  ;;  %v12533_v63 = vld [vmem:[#allocation2 + $0x13c] ss:$16 sps:$4 sm:$0xff]  }
  0xae   :  { %2848 = vmatpush1.bf16.msra.mxu0 %v12529_v49  ;;  %v12535_v49 = vld [vmem:[#allocation2 + $0x138] ss:$16 sps:$4 sm:$0xff]   ;;  %v2948_v5 = vcombine.low %v652_v19, %v653_v31 }
  0xaf   :  { %2849 = vmatprep.subr.bf16.mxu0 %v12530_v53  ;;  %v654_v53 = vcombine.high %v652_v19, %v652_v19 }
  0xb0   :  { %2687 = vmatpush1.bf16.msra.mxu1 %v12012_v32  ;;  %v735_v32 = vunpack.i.h.s16 %v699_v1 }
  0xb1   :  { %10456 = vmatprep.subr.msk.bf16.mxu1 %vm1307_vm0, %v12840_v38  ;;  %v2949_v12 = vcombine.low %v654_v53, %v669_v39  ;;  %v12544_v53 = vld [vmem:[#allocation2 + $0x1c0] ss:$16 sps:$4 sm:$0xff]  }
  0xb2   :  { %2850 = vmatpush1.bf16.msra.mxu0 %v12531_v56  ;;  %v12536_v56 = vld [vmem:[#allocation2 + $0x11c] ss:$16 sps:$4 sm:$0xff]   ;;  %v10264_v39 = vld.sshfl [vmem:[%s17211_s2 + $0x20] sm:$0x13 pattern:$0x75316420] }
  0xb3   :  { %2851 = vmatprep.subr.bf16.mxu0 %v12532_v7  ;;  %10451 = vmatmul.mubr.msk.bf16.vlgmr.msra.gmra.mxu1 %vm1300_vm1, %v13169_v52  ;;  %v10466_v7 = vpack.i.b16 %v699_v1, %v733_v18  ;;  %v10265_v1 = vld.sshfl [vmem:[%s17211_s2 + $0x4c] sm:$0x22 pattern:$0x75316420]  ;;  %v2965_v19 = vrot.slane %v2949_v12, %v12827_v28 }
  0xb4   :  { %2791 = vmatpush1.bf16.msra.mxu1 %v12946_v6  ;;  %2714 = vmatprep.mubr.bf16.mxu1 %v17064_v0  ;;  %v10468_v0 = vpack.i.b16 %v13237_v17, %v737_v26  ;;  %v12542_v26 = vld [vmem:[#allocation2 + $0xf8] ss:$16 sps:$4 sm:$0xff]   ;;  %v12547_v12 = vld [vmem:[#allocation2 + $0xbc] ss:$16 sps:$4 sm:$0xff]  }
  0xb5   :  { %2792 = vmatprep.subr.bf16.mxu1 %v12533_v63  ;;  %v10467_v63 = vpack.i.b16 %v700_v2, %v735_v32  ;;  %v12539_v2 = vld [vmem:[#allocation2 + $0xfc] ss:$16 sps:$4 sm:$0xff]   ;;  %v2950_v24 = vcombine.low %v10465_v55, %v10466_v7  ;;  %v12540_v32 = vld [vmem:[#allocation2 + $0x1e0] ss:$16 sps:$4 sm:$0xff]   ;;  %v12545_v55 = vld [vmem:[#allocation2 + $0x1a4] ss:$16 sps:$4 sm:$0xff]  }
  0xb6   :  { %2852 = vmatpush1.bf16.msra.mxu0 %v12534_v42  ;;  %v17222_v42 = vmov 0   ;;  %v10266_v7 = vld.sshfl [vmem:[%s17211_s2 + $0x50] sm:$0x13 pattern:$0x75316420] }
  0xb7   :  { %10470 = vmatprep.subr.msk.bf16.mxu0 %vm1307_vm0, %v12850_v43  ;;  %v2951_v18 = vcombine.low %v10467_v63, %v10468_v0  ;;  %v2972_v31 = vrot.slane %v2950_v24, %v12827_v28  ;;  %v12546_v63 = vld [vmem:[#allocation2 + $0xd8] ss:$16 sps:$4 sm:$0xff]  }
  0xb8   :  { %2793 = vmatpush1.bf16.msra.mxu1 %v12535_v49  ;;  %v2958_v49 = vrot.slane %v2948_v5, %v12827_v28  ;;  %v810_v5 = vrot.slane %v10265_v1, %v12827_v28 }
  0xb9   :  { %10460 = vmatmul.mubr.msk.bf16.vlgmr.msra.gmra.mxu0 %vm1300_vm1, %v13121_v46  ;;  %2794 = vmatprep.subr.bf16.mxu1 %v12536_v56  ;;  %v803_v56 = vcombine.high %v10265_v1, %v10265_v1  ;;  %v2979_v0 = vrot.slane %v2951_v18, %v12827_v28  ;;  %v12550_v1 = vld [vmem:[#allocation2 + $0xb8] ss:$16 sps:$4 sm:$0xff]  }
  0xba   :  { %3022 = vmatpush1.bf16.msra.mxu0 %v12970_v30  ;;  %2879 = vmatprep.mubr.bf16.mxu0 %v17222_v42  ;;  %v2980_v24 = vcombine.low %v2958_v49, %v2965_v19  ;;  %v827_v49 = vcombine.high %v10266_v7, %v10266_v7  ;;  %v13277_v19 = vrot.slane %v10266_v7, %v12827_v28 }
  0xbb   :  { %3023 = vmatprep.subr.bf16.mxu0 %v12537_v23  ;;  %10452 = vmatmul.mubr.msk.bf16.gmra.mxu1 %vm1300_vm1, %v13182_v27  ;;  %v12541_v23 = vld [vmem:[#allocation2 + $0x1c4] ss:$16 sps:$4 sm:$0xff]   ;;  %v2981_v18 = vcombine.low %v2972_v31, %v2979_v0 }
  0xbc   :  { %2795 = vmatpush1.bf16.msra.mxu1 %v12538_v14  ;;  %2818 = vmatprep.mubr.bf16.mxu1 %v17222_v42  ;;  %v12543_v14 = vld [vmem:[#allocation2 + $0xdc] ss:$16 sps:$4 sm:$0xff]  }
  0xbd   :  { %2796 = vmatprep.subr.bf16.mxu1 %v12539_v2  ;;  %v817_v2 = vrot.slane %v803_v56, %v12827_v28  ;;  %v818_v56 = vcombine.high %v810_v5, %v810_v5  ;;  %v2995_v31 = vrot.slane %v2981_v18, %v12827_v28  ;;  %v12551_v5 = vld [vmem:[#allocation2 + $0x180] ss:$16 sps:$4 sm:$0xff]  }
  0xbe   :  { %3024 = vmatpush1.bf16.msra.mxu0 %v12540_v32  ;;  %v708_v32 = vcombine.high %v13224_v48, %v13224_v48  ;;  %v2988_v48 = vrot.slane %v2980_v24, %v12827_v28 }
  0xbf   :  { %3025 = vmatprep.subr.bf16.mxu0 %v12541_v23  ;;  %v12548_v23 = vld [vmem:[#allocation2 + $0x1a0] ss:$16 sps:$4 sm:$0xff]   ;;  %v853_v18 = vunpack.i.h.s16 %v818_v56 }
  0xc0   :  { %2797 = vmatpush1.bf16.msra.mxu1 %v12542_v26  ;;  %v10263_v26 = vld.sshfl [vmem:[%s17211_s2 + $0x1c] sm:$0x22 pattern:$0x75316420]  ;;  %v722_v0 = vrot.slane %v708_v32, %v12827_v28 }
  0xc1   :  { %2798 = vmatprep.subr.bf16.mxu1 %v12543_v14  ;;  %10461 = vmatmul.mubr.msk.bf16.gmra.mxu0 %vm1300_vm1, %v13142_v59  ;;  %v12549_v14 = vld [vmem:[#allocation2 + $0x184] ss:$16 sps:$4 sm:$0xff]   ;;  %v756_v7 = vcombine.high %v10263_v26, %v10263_v26  ;;  %v763_v21 = vrot.slane %v10263_v26, %v12827_v28 }
  0xc2   :  { %3026 = vmatpush1.bf16.msra.mxu0 %v12544_v53  ;;  %3049 = vmatprep.mubr.bf16.mxu0 %v17222_v42  ;;  %v13274_v53 = vrot.slane %v10264_v39, %v12827_v28 }
  0xc3   :  { %3027 = vmatprep.subr.bf16.mxu0 %v12545_v55  ;;  %v819_v55 = vcombine.high %v817_v2, %v817_v2  ;;  %v12552_v2 = vld [vmem:[#allocation2 + $0x164] ss:$16 sps:$4 sm:$0xff]  }
  0xc4   :  { %2799 = vmatpush1.bf16.msra.mxu1 %v12546_v63  ;;  %v739_v63 = vunpack.i.h.s16 %v13237_v17  ;;  %v795_v24 = vcombine.high %v13274_v53, %v13274_v53  ;;  %v13294_v17 = vrot.slane %v827_v49, %v12827_v28  ;;  %v770_v49 = vrot.slane %v756_v7, %v12827_v28 }
  0xc5   :  { %2800 = vmatprep.subr.bf16.mxu1 %v12547_v12  ;;  %v106_v12 = vcombine.high %v12909_v34, %v12909_v34  ;;  %v855_v32 = vunpack.i.h.s16 %v819_v55  ;;  %v105_v7 = vcombine.high %v12898_v25, %v12898_v25 }
  0xc6   :  { %3028 = vmatpush1.bf16.msra.mxu0 %v12548_v23  ;;  %v780_v23 = vcombine.high %v10264_v39, %v10264_v39 }
  0xc7   :  { %3029 = vmatprep.subr.bf16.mxu0 %v12549_v14  ;;  %v857_v14 = vunpack.i.h.s16 %v13277_v19  ;;  %v166_v39 = vunpack.i.h.s16 %v106_v12 }
  0xc8   :  { %2801 = vmatpush1.bf16.msra.mxu1 %v12550_v1  ;;  %v13297_v1 = vcombine.low %v2988_v48, %v2995_v31  ;;  %v794_v22 = vrot.slane %v780_v23, %v12827_v28  ;;  %v10476_v48 = vpack.i.b16 %v818_v56, %v795_v24  ;;  %v10477_v31 = vpack.i.b16 %v819_v55, %v853_v18  ;;  %v13322_v55 = vld [vmem:[#allocation2 + $0x294] ss:$16 sps:$4 sm:$0xff]   ;;  %v10269_v18 = vld.sshfl [vmem:[%s17211_s2 + $0x50] sm:$0x20 pattern:$0x75316420] }
  0xc9   :  { %10462 = vmatprep.subr.msk.bf16.mxu1 %vm1307_vm0, %v13031_v44  ;;  %v10526_v23 = vpack.i.b16 %v12903_v29, %v166_v39  ;;  %v3922_v56 = vcombine.low %v12936_v57, %v12915_v36  ;;  %17223 = vst [vmem:[#allocation20_spill] sm:$0xff] %v13322_v55  ;;  %v10481_v24 = vcombine.high %v763_v21, %v770_v49  ;;  %v160_v29 = vunpack.i.h.s16 %v12898_v25  ;;  %v13337_v21 = vld [vmem:[#allocation2 + $0x4c] ss:$16 sps:$4 sm:$0xff]  }
  0xca   :  { %3030 = vmatpush1.bf16.msra.mxu0 %v12551_v5  ;;  %v12553_v5 = vld [vmem:[#allocation2 + $0x8c] ss:$16 sps:$4 sm:$0xff]   ;;  %v162_v57 = vunpack.i.h.s16 %v12909_v34  ;;  %v3142_v39 = vcombine.low %v10476_v48, %v10477_v31 }
  0xcb   :  { %3031 = vmatprep.subr.bf16.mxu0 %v12552_v2  ;;  %10457 = vmatmul.mubr.msk.bf16.vlgmr.msra.gmra.mxu1 %vm1300_vm1, %v13169_v52  ;;  %v10469_v52 = vpack.i.b16 %v722_v0, %v739_v63  ;;  %v12554_v2 = vld [vmem:[#allocation2 + $0x160] ss:$16 sps:$4 sm:$0xff]   ;;  %v10478_v0 = vpack.i.b16 %v13277_v19, %v855_v32  ;;  %v10479_v63 = vpack.i.b16 %v13294_v17, %v857_v14  ;;  %v164_v32 = vunpack.i.h.s16 %v105_v7  ;;  %v13332_v14 = vld [vmem:[#allocation2 + $0x68] ss:$16 sps:$4 sm:$0xff]  }
  0xcc   :  { %2893 = vmatpush1.bf16.msra.mxu1 %v13041_v45  ;;  %2828 = vmatprep.mubr.bf16.mxu1 %v17222_v42  ;;  %v13304_v45 = vld [vmem:[#allocation2 + $0x88] ss:$16 sps:$4 sm:$0xff]   ;;  %v10523_v25 = vpack.i.b16 %v12909_v34, %v160_v29  ;;  %v10524_v49 = vpack.i.b16 %v105_v7, %v162_v57  ;;  %v3150_v48 = vrot.slane %v10481_v24, %v12827_v28  ;;  %v10270_v34 = vld.sshfl [vmem:[%s17211_s2 + $0x54] sm:$0x33 pattern:$0x75316420] }
  0xcd   :  { %2894 = vmatprep.subr.bf16.mxu1 %v12553_v5  ;;  %v13311_v5 = vld [vmem:[#allocation2 + $0x6c] ss:$16 sps:$4 sm:$0xff]   ;;  %v3003_v26 = vrot.slane %v10469_v52, %v12827_v28  ;;  %v3141_v52 = vcombine.low %v13274_v53, %v794_v22  ;;  %v13350_v22 = vld.sshfl [vmem:[%s17211_s2 + $0x24] sm:$0x33 pattern:$0x75316420]  ;;  %v3164_v7 = vrot.slane %v3142_v39, %v12827_v28  ;;  %v916_v24 = vcombine.high %v10269_v18, %v10269_v18 }
  0xce   :  { %3032 = vmatpush1.bf16.msra.mxu0 %v12554_v2  ;;  %v13352_v53 = vld [vmem:[#allocation2 + $0x274] ss:$16 sps:$4 sm:$0xff]   ;;  %v13367_v57 = vld [vmem:[#allocation2 + $0x2c] ss:$16 sps:$4 sm:$0xff]   ;;  %v892_v39 = vcombine.high %v13350_v22, %v13350_v22 }
  0xcf   :  { %10482 = vmatprep.subr.msk.bf16.mxu0 %vm1307_vm0, %v13056_v13  ;;  %v13341_v2 = vrot.slane %v3003_v26, %v12827_v28  ;;  %v3157_v26 = vrot.slane %v3141_v52, %v12827_v28  ;;  %17224 = vst [vmem:[#allocation21_spill] sm:$0xff] %v13367_v57  ;;  %v10267_v18 = vld.sshfl [vmem:[%s17211_s2 + $0x20] sm:$0x20 pattern:$0x75316420] }
  0xd0   :  { %2895 = vmatpush1.bf16.msra.mxu1 %v13304_v45  ;;  %v13383_v52 = vld [vmem:[#allocation2 + $0x254] ss:$16 sps:$4 sm:$0xff]  }
  0xd1   :  { %10471 = vmatmul.mubr.msk.bf16.vlgmr.msra.gmra.mxu0 %vm1300_vm1, %v13297_v1  ;;  %2896 = vmatprep.subr.bf16.mxu1 %v13311_v5  ;;  %17226 = vst [vmem:[#allocation23_spill] sm:$0xff] %v13383_v52 }
  0xd2   :  { %3214 = vmatpush1.bf16.msra.mxu0 %v13069_v33  ;;  %3059 = vmatprep.mubr.bf16.mxu0 %v17222_v42  ;;  %v13344_v33 = vld [vmem:[#allocation2 + $0x290] ss:$16 sps:$4 sm:$0xff]  }
  0xd3   :  { %3215 = vmatprep.subr.bf16.mxu0 %v13322_v55  ;;  %10458 = vmatmul.mubr.msk.bf16.gmra.mxu1 %vm1300_vm1, %v13182_v27  ;;  %v3143_v27 = vcombine.low %v10478_v0, %v10479_v63  ;;  %v10525_v55 = vpack.i.b16 %v106_v12, %v164_v32  ;;  %v3920_v12 = vcombine.low %v10523_v25, %v10524_v49  ;;  %v13361_v63 = vld [vmem:[#allocation2 + $0x48] ss:$16 sps:$4 sm:$0xff]  }
  0xd4   :  { %2897 = vmatpush1.bf16.msra.mxu1 %v13332_v14  ;;  %2920 = vmatprep.mubr.bf16.mxu1 %v17222_v42  ;;  %v10527_v0 = vcombine.high %v12912_v35, %v12915_v36  ;;  %v923_v25 = vrot.slane %v916_v24, %v12827_v28  ;;  %v932_v49 = vcombine.high %v10270_v34, %v10270_v34 }
  0xd5   :  { %2898 = vmatprep.subr.bf16.mxu1 %v13337_v21  ;;  %v3921_v31 = vcombine.low %v10525_v55, %v10526_v23  ;;  %v3171_v29 = vrot.slane %v3143_v27, %v12827_v28  ;;  %v3930_v35 = vrot.slane %v3920_v12, %v12827_v28  ;;  %v3944_v23 = vrot.slane %v3922_v56, %v12827_v28  ;;  %v13375_v55 = vld [vmem:[#allocation2 + $0x270] ss:$16 sps:$4 sm:$0xff]   ;;  %v13388_v27 = vld [vmem:[#allocation2 + $0x28] ss:$16 sps:$4 sm:$0xff]  }
  0xd6   :  { %3216 = vmatpush1.bf16.msra.mxu0 %v13344_v33  ;;  %17225 = vst [vmem:[#allocation22_spill] sm:$0xff] %v13375_v55  ;;  %v3951_v32 = vrot.slane %v10527_v0, %v12827_v28  ;;  %v3172_v0 = vcombine.low %v3150_v48, %v3157_v26  ;;  %v876_v24 = vcombine.high %v10267_v18, %v10267_v18 }
  0xd7   :  { %3217 = vmatprep.subr.bf16.mxu0 %v13352_v53  ;;  %v3937_v36 = vrot.slane %v3921_v31, %v12827_v28  ;;  %v13392_v31 = vld [vmem:[#allocation2 + $0xc] ss:$16 sps:$4 sm:$0xff]   ;;  %v924_v48 = vcombine.high %v923_v25, %v923_v25  ;;  %v939_v26 = vrot.slane %v10270_v34, %v12827_v28  ;;  %v13420_v25 = vld [vmem:[#allocation2 + $0x230] ss:$16 sps:$4 sm:$0xff]   ;;  %v13423_v34 = vld [vmem:[#allocation2 + $0x214] ss:$16 sps:$4 sm:$0xff]  }
  0xd8   :  { %2899 = vmatpush1.bf16.msra.mxu1 %v13361_v63  ;;  %v3953_v12 = vcombine.low %v3944_v23, %v3951_v32  ;;  %v906_v23 = vrot.slane %v892_v39, %v12827_v28  ;;  %v13404_v32 = vld [vmem:[#allocation2 + $0x8] ss:$16 sps:$4 sm:$0xff]   ;;  %v842_v39 = vcombine.high %v13277_v19, %v13277_v19  ;;  %17228 = vst [vmem:[#allocation25_spill] sm:$0xff] %v13420_v25  ;;  %17229 = vst [vmem:[#allocation26_spill] sm:$0xff] %v13423_v34 }
  0xd9   :  { %2900 = vmatprep.subr.bf16.mxu1 %v13367_v57  ;;  %10472 = vmatmul.mubr.msk.bf16.gmra.mxu0 %vm1300_vm1, %v13341_v2  ;;  %v3952_v56 = vcombine.low %v3930_v35, %v3937_v36  ;;  %v13396_v57 = vld [vmem:[#allocation2 + $0x250] ss:$16 sps:$4 sm:$0xff]   ;;  %v13400_v36 = vld [vmem:[#allocation2 + $0x234] ss:$16 sps:$4 sm:$0xff]   ;;  %v13433_v19 = vcombine.high %v939_v26, %v939_v26 }
  0xda   :  { %3218 = vmatpush1.bf16.msra.mxu0 %v13375_v55  ;;  %3241 = vmatprep.mubr.bf16.mxu0 %v17222_v42  ;;  %v3173_v55 = vcombine.low %v3164_v7, %v3171_v29  ;;  %v3967_v35 = vrot.slane %v3953_v12, %v12827_v28  ;;  %v13409_v7 = vrot.slane %v932_v49, %v12827_v28  ;;  %v859_v12 = vunpack.i.h.s16 %v13294_v17 }
  0xdb   :  { %3219 = vmatprep.subr.bf16.mxu0 %v13383_v52  ;;  %v3960_v52 = vrot.slane %v3952_v56, %v12827_v28  ;;  %v3180_v56 = vrot.slane %v3172_v0, %v12827_v28  ;;  %v908_v49 = vcombine.high %v906_v23, %v906_v23  ;;  %v959_v17 = vunpack.i.h.s16 %v924_v48 }
  0xdc   :  { %2901 = vmatpush1.bf16.msra.mxu1 %v13388_v27  ;;  %v3187_v18 = vrot.slane %v3173_v55, %v12827_v28  ;;  %v899_v55 = vrot.slane %v13350_v22, %v12827_v28  ;;  %v961_v0 = vunpack.i.h.s16 %v939_v26 }
  0xdd   :  { %2902 = vmatprep.subr.bf16.mxu1 %v13392_v31  ;;  %v13411_v29 = vcombine.low %v3960_v52, %v3967_v35  ;;  %v883_v52 = vrot.slane %v876_v24, %v12827_v28  ;;  %v963_v35 = vunpack.i.h.s16 %v13409_v7  ;;  %v13441_v24 = vld [vmem:[#allocation2 + $0x210] ss:$16 sps:$4 sm:$0xff]  }
  0xde   :  { %3220 = vmatpush1.bf16.msra.mxu0 %v13396_v57 }
  0xdf   :  { %3221 = vmatprep.subr.bf16.mxu0 %v13400_v36  ;;  %17227 = vst [vmem:[#allocation24_spill] sm:$0xff] %v13411_v29  ;;  %v13436_v29 = vcombine.low %v3180_v56, %v3187_v18  ;;  %v884_v22 = vcombine.high %v883_v52, %v883_v52  ;;  %v10488_v56 = vpack.i.b16 %v924_v48, %v908_v49  ;;  %v13459_v52 = vld [vmem:[#allocation2 + $0x344] ss:$16 sps:$4 sm:$0xff]  }
  0xe0   :  { %2903 = vmatpush1.bf16.msra.mxu1 %v13404_v32  ;;  %v10489_v18 = vpack.i.b16 %v939_v26, %v959_v17  ;;  %17231 = vst [vmem:[#allocation28_spill] sm:$0xff] %v13459_v52  ;;  %v13464_v26 = vld [vmem:[#allocation2 + $0x1c8] ss:$16 sps:$4 sm:$0xff]  }
  0xe1   :  { %10473 = vmatprep.subr.msk.bf16.mxu1 %vm1307_vm0, %v13094_v51  ;;  %v10490_v51 = vpack.i.b16 %v13409_v7, %v961_v0  ;;  %v3332_v48 = vcombine.low %v884_v22, %v899_v55 }
  0xe2   :  { %3222 = vmatpush1.bf16.msra.mxu0 %v13420_v25  ;;  %v13446_v25 = vld [vmem:[#allocation2 + $0x1e8] ss:$16 sps:$4 sm:$0xff]   ;;  %v3334_v17 = vcombine.low %v10488_v56, %v10489_v18 }
  0xe3   :  { %3223 = vmatprep.subr.bf16.mxu0 %v13423_v34  ;;  %10463 = vmatmul.mubr.msk.bf16.vlgmr.msra.gmra.mxu1 %vm1300_vm1, %v13121_v46  ;;  %v13438_v34 = vld [vmem:[#allocation2 + $0x1ec] ss:$16 sps:$4 sm:$0xff]   ;;  %v10480_v46 = vpack.i.b16 %v842_v39, %v859_v12 }
  0xe4   :  { %3073 = vmatpush1.bf16.msra.mxu1 %v13098_v60  ;;  %2930 = vmatprep.mubr.bf16.mxu1 %v17222_v42  ;;  %17230 = vst [vmem:[#allocation27_spill] sm:$0xff] %v13438_v34  ;;  %v907_v60 = vcombine.high %v899_v55, %v899_v55  ;;  %v13453_v39 = vld [vmem:[#allocation2 + $0x1cc] ss:$16 sps:$4 sm:$0xff]   ;;  %v3342_v55 = vrot.slane %v3332_v48, %v12827_v28  ;;  %v13509_v48 = vld [vmem:[#allocation2 + $0x304] ss:$16 sps:$4 sm:$0xff]  }
  0xe5   :  { %3074 = vmatprep.subr.bf16.mxu1 %v13438_v34  ;;  %v10491_v34 = vpack.i.b16 %v13433_v19, %v963_v35  ;;  %v3195_v12 = vrot.slane %v10480_v46, %v12827_v28  ;;  %v13471_v46 = vld [vmem:[#allocation2 + $0x1ac] ss:$16 sps:$4 sm:$0xff]   ;;  %v3356_v56 = vrot.slane %v3334_v17, %v12827_v28  ;;  %17236 = vst [vmem:[#allocation32_spill] sm:$0xff] %v13509_v48  ;;  %v13512_v17 = vld [vmem:[#allocation2 + $0x188] ss:$16 sps:$4 sm:$0xff]  }
  0xe6   :  { %3224 = vmatpush1.bf16.msra.mxu0 %v13441_v24  ;;  %v3333_v49 = vcombine.low %v906_v23, %v907_v60  ;;  %v4112_v60 = vcombine.low %v12876_v11, %v12883_v15  ;;  %v4115_v23 = vcombine.low %v12869_v62, %v12862_v50  ;;  %v13495_v11 = vld [vmem:[#allocation2 + $0x18c] ss:$16 sps:$4 sm:$0xff]   ;;  %v17234_v62 = vcombine.low %v12892_v20, %v12865_v58 }
  0xe7   :  { %10493 = vmatprep.subr.msk.bf16.mxu0 %vm1307_vm0, %v13116_v47  ;;  %v3335_v0 = vcombine.low %v10490_v51, %v10491_v34  ;;  %v13469_v35 = vrot.slane %v3195_v12, %v12827_v28  ;;  %v4113_v51 = vcombine.low %v12885_v16, %v12867_v61  ;;  %v13486_v34 = vld [vmem:[#allocation2 + $0x1a8] ss:$16 sps:$4 sm:$0xff]   ;;  %17233 = vst [vmem:[#allocation30_spill] sm:$0xff] %v13495_v11  ;;  %v13504_v16 = vld [vmem:[#allocation2 + $0x320] ss:$16 sps:$4 sm:$0xff]   ;;  %17237 = vst [vmem:[#allocation33_spill] sm:$0xff] %v13512_v17 }
  0xe8   :  { %3075 = vmatpush1.bf16.msra.mxu1 %v13446_v25  ;;  %17232 = vst [vmem:[#allocation29_spill] sm:$0xff] %v13486_v34  ;;  %v3349_v22 = vrot.slane %v3333_v49, %v12827_v28  ;;  %v4122_v50 = vrot.slane %v4112_v60, %v12827_v28  ;;  %v4136_v15 = vrot.slane %v17234_v62, %v12827_v28  ;;  %17235 = vst [vmem:[#allocation31_spill] sm:$0xff] %v13504_v16  ;;  %v13515_v58 = vld [vmem:[#allocation2 + $0x16c] ss:$16 sps:$4 sm:$0xff]   ;;  %v13519_v62 = vld [vmem:[#allocation2 + $0x300] ss:$16 sps:$4 sm:$0xff]  }
  0xe9   :  { %10483 = vmatmul.mubr.msk.bf16.vlgmr.msra.gmra.mxu0 %vm1300_vm1, %v13436_v29  ;;  %3076 = vmatprep.subr.bf16.mxu1 %v13453_v39  ;;  %v3363_v18 = vrot.slane %v3335_v0, %v12827_v28  ;;  %v4129_v61 = vrot.slane %v4113_v51, %v12827_v28  ;;  %v4143_v12 = vrot.slane %v4115_v23, %v12827_v28 }
  0xea   :  { %3406 = vmatpush1.bf16.msra.mxu0 %v13128_v54  ;;  %3251 = vmatprep.mubr.bf16.mxu0 %v17222_v42  ;;  %17238 = vst [vmem:[#allocation34_spill] sm:$0xff] %v13515_v58  ;;  %v3364_v20 = vcombine.low %v3342_v55, %v3349_v22  ;;  %17239 = vst [vmem:[#allocation35_spill] sm:$0xff] %v13519_v62 }
  0xeb   :  { %3407 = vmatprep.subr.bf16.mxu0 %v13459_v52  ;;  %10464 = vmatmul.mubr.msk.bf16.gmra.mxu1 %vm1300_vm1, %v13142_v59  ;;  %v13474_v52 = vld [vmem:[#allocation2 + $0x340] ss:$16 sps:$4 sm:$0xff]   ;;  %v13477_v59 = vld [vmem:[#allocation2 + $0x324] ss:$16 sps:$4 sm:$0xff]   ;;  %v4144_v49 = vcombine.low %v4122_v50, %v4129_v61  ;;  %v4145_v0 = vcombine.low %v4136_v15, %v4143_v12  ;;  %v3365_v60 = vcombine.low %v3356_v56, %v3363_v18  ;;  %v13526_v61 = vld [vmem:[#allocation2 + $0x168] ss:$16 sps:$4 sm:$0xff]   ;;  %v965_v12 = vunpack.i.h.s16 %v13433_v19 }
  0xec   :  { %3077 = vmatpush1.bf16.msra.mxu1 %v13464_v26  ;;  %3100 = vmatprep.mubr.bf16.mxu1 %v17222_v42  ;;  %v13523_v50 = vld [vmem:[#allocation2 + $0x2e4] ss:$16 sps:$4 sm:$0xff]   ;;  %17241 = vst [vmem:[#allocation37_spill] sm:$0xff] %v13526_v61  ;;  %v3372_v22 = vrot.slane %v3364_v20, %v12827_v28  ;;  %v948_v18 = vcombine.high %v13409_v7, %v13409_v7  ;;  %v13552_v20 = vld [vmem:[#allocation2 + $0x29c] ss:$16 sps:$4 sm:$0xff]  }
  0xed   :  { %3078 = vmatprep.subr.bf16.mxu1 %v13471_v46  ;;  %v4152_v51 = vrot.slane %v4144_v49, %v12827_v28  ;;  %v4159_v23 = vrot.slane %v4145_v0, %v12827_v28  ;;  %17240 = vst [vmem:[#allocation36_spill] sm:$0xff] %v13523_v50  ;;  %v3379_v56 = vrot.slane %v3365_v60, %v12827_v28  ;;  %v13538_v49 = vld [vmem:[#allocation2 + $0x2e0] ss:$16 sps:$4 sm:$0xff]   ;;  %v13541_v0 = vld [vmem:[#allocation2 + $0x2c4] ss:$16 sps:$4 sm:$0xff]   ;;  %17245 = vst [vmem:[#allocation41_spill] sm:$0xff] %v13552_v20 }
  0xee   :  { %3408 = vmatpush1.bf16.msra.mxu0 %v13474_v52  ;;  %17243 = vst [vmem:[#allocation39_spill] sm:$0xff] %v13538_v49  ;;  %17244 = vst [vmem:[#allocation40_spill] sm:$0xff] %v13541_v0  ;;  %v10492_v60 = vpack.i.b16 %v948_v18, %v965_v12 }
  0xef   :  { %3409 = vmatprep.subr.bf16.mxu0 %v13477_v59  ;;  %v13529_v15 = vcombine.low %v4152_v51, %v4159_v23  ;;  %v13550_v7 = vcombine.low %v3372_v22, %v3379_v56  ;;  %v13555_v23 = vld [vmem:[#allocation2 + $0x2c0] ss:$16 sps:$4 sm:$0xff]   ;;  %v13567_v56 = vld [vmem:[#allocation2 + $0x27c] ss:$16 sps:$4 sm:$0xff]  }
  0xf0   :  { %3079 = vmatpush1.bf16.msra.mxu1 %v13486_v34  ;;  %17246 = vst [vmem:[#allocation42_spill] sm:$0xff] %v13555_v23  ;;  %17249 = vst [vmem:[#allocation45_spill] sm:$0xff] %v13567_v56  ;;  %v3387_v18 = vrot.slane %v10492_v60, %v12827_v28  ;;  %v13588_v60 = vld [vmem:[#allocation2 + $0x25c] ss:$16 sps:$4 sm:$0xff]  }
  0xf1   :  { %10484 = vmatmul.mubr.msk.bf16.gmra.mxu0 %vm1300_vm1, %v13469_v35  ;;  %3080 = vmatprep.subr.bf16.mxu1 %v13495_v11  ;;  %17242 = vst [vmem:[#allocation38_spill] sm:$0xff] %v13529_v15  ;;  %v13562_v15 = vld [vmem:[#allocation2 + $0x298] ss:$16 sps:$4 sm:$0xff]   ;;  %17251 = vst [vmem:[#allocation47_spill] sm:$0xff] %v13588_v60 }
  0xf2   :  { %3410 = vmatpush1.bf16.msra.mxu0 %v13504_v16  ;;  %3433 = vmatprep.mubr.bf16.mxu0 %v17222_v42  ;;  %17248 = vst [vmem:[#allocation44_spill] sm:$0xff] %v13562_v15 }
  0xf3   :  { %3411 = vmatprep.subr.bf16.mxu0 %v13509_v48  ;;  %v12635_v48 = vld [vmem:[#allocation2 + $0x138] ss:$16 sps:$4 sm:$0xff]  }
  0xf4   :  { %3081 = vmatpush1.bf16.msra.mxu1 %v13512_v17 }
  0xf5   :  { %3082 = vmatprep.subr.bf16.mxu1 %v13515_v58 }
  0xf6   :  { %3412 = vmatpush1.bf16.msra.mxu0 %v13519_v62 }
  0xf7   :  { %3413 = vmatprep.subr.bf16.mxu0 %v13523_v50  ;;  %v13672_v50 = vld [vmem:[#allocation2 + $0x2ec] ss:$16 sps:$4 sm:$0xff]  }
  0xf8   :  { %3083 = vmatpush1.bf16.msra.mxu1 %v13526_v61  ;;  %v13669_v61 = vld [vmem:[#allocation2 + $0x308] ss:$16 sps:$4 sm:$0xff]   ;;  %17266 = vst [vmem:[#allocation62_spill] sm:$0xff] %v13672_v50 }
  0xf9   :  { %10485 = vmatprep.subr.msk.bf16.mxu1 %vm1307_vm0, %v13154_v37  ;;  %17265 = vst [vmem:[#allocation61_spill] sm:$0xff] %v13669_v61 }
  0xfa   :  { %v1354_v55 = vpop.f32.mrf.mxu1  ;;  %3414 = vmatpush1.bf16.msra.mxu0 %v13538_v49  ;;  %v13600_v49 = vld [vmem:[#allocation2 + $0x23c] ss:$16 sps:$4 sm:$0xff]  }
  0xfb   :  { %3415 = vmatprep.subr.bf16.mxu0 %v13541_v0  ;;  %10474 = vmatmul.mubr.msk.bf16.vlgmr.msra.gmra.mxu1 %vm1300_vm1, %v13297_v1  ;;  %v13595_v0 = vld [vmem:[#allocation2 + $0x258] ss:$16 sps:$4 sm:$0xff]   ;;  %17254 = vst [vmem:[#allocation50_spill] sm:$0xff] %v13600_v49 }
  0xfc   :  { %v13546_v51 = vpop.f32.mrf.mxu1  ;;  %3265 = vmatpush1.bf16.msra.mxu1 %v13157_v40  ;;  %3110 = vmatprep.mubr.bf16.mxu1 %v17222_v42  ;;  %v12601_v40 = vld [vmem:[#allocation2 + $0x114] ss:$16 sps:$4 sm:$0xff]   ;;  %17253 = vst [vmem:[#allocation49_spill] sm:$0xff] %v13595_v0 }
  0xfd   :  { %3266 = vmatprep.subr.bf16.mxu1 %v13552_v20  ;;  %v13581_v20 = vld [vmem:[#allocation2 + $0x278] ss:$16 sps:$4 sm:$0xff]  }
  0xfe   :  { %v1358_v19 = vpop.f32.mrf.mxu1  ;;  %3416 = vmatpush1.bf16.msra.mxu0 %v13555_v23  ;;  %17250 = vst [vmem:[#allocation46_spill] sm:$0xff] %v13581_v20 }
  0xff   :  { %10499 = vmatprep.subr.msk.bf16.mxu0 %vm1307_vm0, %v12808_v3 }
 0x100   :  { %v13560_v1 = vpop.f32.mrf.mxu1  ;;  %3267 = vmatpush1.bf16.msra.mxu1 %v13562_v15 }
 0x101   :  { %17247 = vst [vmem:[#allocation43_spill] sm:$0xff] %v13560_v1  ;;  %v1656_v22 = vpop.f32.mrf.mxu0  ;;  %10494 = vmatmul.mubr.msk.bf16.vlgmr.msra.gmra.mxu0 %vm1300_vm1, %v13550_v7  ;;  %3268 = vmatprep.subr.bf16.mxu1 %v13567_v56  ;;  %v12597_v1 = vld [vmem:[#allocation2 + $0x134] ss:$16 sps:$4 sm:$0xff]  }
 0x102   :  { %v1364_v12 = vpop.f32.mrf.mxu1  ;;  %v13571_v23 = vadd.f32 %v1656_v22, %v1354_v55  ;;  %3520 = vmatpush1.bf16.msra.mxu0 %v12817_v9  ;;  %3443 = vmatprep.mubr.bf16.mxu0 %v17222_v42  ;;  %v13586_v9 = vrot.slane %v3387_v18, %v12827_v28 }
 0x103   :  { %v13575_v3 = vpop.f32.mrf.mxu0  ;;  %3521 = vmatprep.subr.bf16.mxu0 %v12597_v1  ;;  %10475 = vmatmul.mubr.msk.bf16.gmra.mxu1 %vm1300_vm1, %v13341_v2  ;;  %v12600_v2 = vld [vmem:[#allocation2 + $0x130] ss:$16 sps:$4 sm:$0xff]  }
 0x104   :  { %v13579_v15 = vpop.f32.mrf.mxu1  ;;  %3269 = vmatpush1.bf16.msra.mxu1 %v13581_v20  ;;  %3292 = vmatprep.mubr.bf16.mxu1 %v17222_v42  ;;  %v1659_v17 = vadd.f32 %v13575_v3, %v13546_v51 }
 0x105   :  { %v1660_v55 = vpop.f32.mrf.mxu0  ;;  %3270 = vmatprep.subr.bf16.mxu1 %v13588_v60  ;;  %v12621_v60 = vld [vmem:[#allocation2 + $0x64] ss:$16 sps:$4 sm:$0xff]  }
 0x106   :  { %v1368_v1 = vpop.f32.mrf.mxu1  ;;  %v13591_v22 = vadd.f32 %v1660_v55, %v1358_v19  ;;  %3522 = vmatpush1.bf16.msra.mxu0 %v12600_v2  ;;  %v12604_v19 = vld [vmem:[#allocation2 + $0x110] ss:$16 sps:$4 sm:$0xff]  }
 0x107   :  { %v13593_v56 = vpop.f32.mrf.mxu0  ;;  %3523 = vmatprep.subr.bf16.mxu0 %v12601_v40  ;;  %v12605_v40 = vld [vmem:[#allocation2 + $0xf4] ss:$16 sps:$4 sm:$0xff]   ;;  %v13608_v1 = vld [vmem:[#allocation2 + $0x238] ss:$16 sps:$4 sm:$0xff]  }
 0x108   :  { %17252 = vst [vmem:[#allocation48_spill] sm:$0xff] %v13593_v56  ;;  %v1369_v20 = vpop.f32.mrf.mxu1  ;;  %3271 = vmatpush1.bf16.msra.mxu1 %v13595_v0  ;;  %17255 = vst [vmem:[#allocation51_spill] sm:$0xff] %v13608_v1  ;;  %v13611_v56 = vld [vmem:[#allocation2 + $0x21c] ss:$16 sps:$4 sm:$0xff]  }
 0x109   :  { %10495 = vmatmul.mubr.msk.bf16.gmra.mxu0 %vm1300_vm1, %v13586_v9  ;;  %v1666_v18 = vpop.f32.mrf.mxu0  ;;  %3272 = vmatprep.subr.bf16.mxu1 %v13600_v49  ;;  %17256 = vst [vmem:[#allocation52_spill] sm:$0xff] %v13611_v56  ;;  %v12608_v49 = vld [vmem:[#allocation2 + $0xf0] ss:$16 sps:$4 sm:$0xff]  }
 0x10a   :  { %3524 = vmatpush1.bf16.msra.mxu0 %v12604_v19  ;;  %v13603_v55 = vadd.f32 %v1666_v18, %v1364_v12  ;;  %3547 = vmatprep.mubr.bf16.mxu0 %v17222_v42  ;;  %v12609_v19 = vld [vmem:[#allocation2 + $0xd4] ss:$16 sps:$4 sm:$0xff]   ;;  %v13614_v18 = vld [vmem:[#allocation2 + $0x218] ss:$16 sps:$4 sm:$0xff]  }
 0x10b   :  { %3525 = vmatprep.subr.bf16.mxu0 %v12605_v40  ;;  %v13606_v20 = vpop.f32.mrf.mxu0  ;;  %17257 = vst [vmem:[#allocation53_spill] sm:$0xff] %v13614_v18 }
 0x10c   :  { %3273 = vmatpush1.bf16.msra.mxu1 %v13608_v1  ;;  %v12611_v1 = vld [vmem:[#allocation2 + $0xd0] ss:$16 sps:$4 sm:$0xff]  }
 0x10d   :  { %v1670_v2 = vpop.f32.mrf.mxu0  ;;  %3274 = vmatprep.subr.bf16.mxu1 %v13611_v56  ;;  %v13657_v56 = vld [vmem:[#allocation2 + $0x328] ss:$16 sps:$4 sm:$0xff]  }
 0x10e   :  { %3526 = vmatpush1.bf16.msra.mxu0 %v12608_v49  ;;  %v12612_v2 = vld [vmem:[#allocation2 + $0xb4] ss:$16 sps:$4 sm:$0xff]   ;;  %17262 = vst [vmem:[#allocation58_spill] sm:$0xff] %v13657_v56 }
 0x10f   :  { %3527 = vmatprep.subr.bf16.mxu0 %v12609_v19  ;;  %v1671_v12 = vpop.f32.mrf.mxu0 }
 0x110   :  { %3275 = vmatpush1.bf16.msra.mxu1 %v13614_v18  ;;  %v13629_v12 = vld [vmem:[#allocation2 + $0x34c] ss:$16 sps:$4 sm:$0xff]  }
 0x111   :  { %10496 = vmatprep.subr.msk.bf16.mxu1 %vm1307_vm0, %v13187_v8  ;;  %17258 = vst [vmem:[#allocation54_spill] sm:$0xff] %v13629_v12  ;;  %v12614_v8 = vld [vmem:[#allocation2 + $0xb0] ss:$16 sps:$4 sm:$0xff]   ;;  %v13641_v18 = vld [vmem:[#allocation2 + $0x32c] ss:$16 sps:$4 sm:$0xff]  }
 0x112   :  { %v13617_v40 = vpop.f32.mrf.mxu1  ;;  %3528 = vmatpush1.bf16.msra.mxu0 %v12611_v1  ;;  %17261 = vst [vmem:[#allocation57_spill] sm:$0xff] %v13641_v18 }
 0x113   :  { %3529 = vmatprep.subr.bf16.mxu0 %v12612_v2  ;;  %10486 = vmatmul.mubr.msk.bf16.vlgmr.msra.gmra.mxu1 %vm1300_vm1, %v13436_v29  ;;  %v13636_v2 = vld [vmem:[#allocation2 + $0x348] ss:$16 sps:$4 sm:$0xff]  }
 0x114   :  { %v13623_v49 = vpop.f32.mrf.mxu1  ;;  %3457 = vmatpush1.bf16.msra.mxu1 %v13192_v41  ;;  %3302 = vmatprep.mubr.bf16.mxu1 %v17222_v42  ;;  %17260 = vst [vmem:[#allocation56_spill] sm:$0xff] %v13636_v2 }
 0x115   :  { %3458 = vmatprep.subr.bf16.mxu1 %v13629_v12 }
 0x116   :  { %v13627_v19 = vpop.f32.mrf.mxu1  ;;  %3530 = vmatpush1.bf16.msra.mxu0 %v12614_v8 }
 0x117   :  { %10505 = vmatprep.subr.msk.bf16.mxu0 %vm1307_vm0, %v12810_v4 }
 0x118   :  { %v13634_v1 = vpop.f32.mrf.mxu1  ;;  %3459 = vmatpush1.bf16.msra.mxu1 %v13636_v2 }
 0x119   :  { %17259 = vst [vmem:[#allocation55_spill] sm:$0xff] %v13634_v1  ;;  %v1981_v41 = vpop.f32.mrf.mxu0  ;;  %10500 = vmatmul.mubr.msk.bf16.vlgmr.msra.gmra.mxu0 %vm1300_vm1, %v13550_v7  ;;  %3460 = vmatprep.subr.bf16.mxu1 %v13641_v18  ;;  %v12617_v1 = vld [vmem:[#allocation2 + $0x84] ss:$16 sps:$4 sm:$0xff]  }
 0x11a   :  { %v13644_v12 = vpop.f32.mrf.mxu1  ;;  %v13647_v8 = vadd.f32 %v1981_v41, %v13571_v23  ;;  %3622 = vmatpush1.bf16.msra.mxu0 %v12820_v10  ;;  %3557 = vmatprep.mubr.bf16.mxu0 %v17222_v42  ;;  %v13661_v23 = vld [vmem:[#allocation2 + $0x30c] ss:$16 sps:$4 sm:$0xff]  }
 0x11b   :  { %v13651_v4 = vpop.f32.mrf.mxu0  ;;  %3623 = vmatprep.subr.bf16.mxu0 %v12617_v1  ;;  %10487 = vmatmul.mubr.msk.bf16.gmra.mxu1 %vm1300_vm1, %v13469_v35  ;;  %17263 = vst [vmem:[#allocation59_spill] sm:$0xff] %v13661_v23  ;;  %v12620_v1 = vld [vmem:[#allocation2 + $0x80] ss:$16 sps:$4 sm:$0xff]  }
 0x11c   :  { %v13655_v2 = vpop.f32.mrf.mxu1  ;;  %3461 = vmatpush1.bf16.msra.mxu1 %v13657_v56  ;;  %3484 = vmatprep.mubr.bf16.mxu1 %v17222_v42  ;;  %v2050_v51 = vadd.f32 %v13651_v4, %v1659_v17  ;;  %v12638_v17 = vld [vmem:[#allocation2 + $0x118] ss:$16 sps:$4 sm:$0xff]  }
 0x11d   :  { %v1985_v41 = vpop.f32.mrf.mxu0  ;;  %3462 = vmatprep.subr.bf16.mxu1 %v13661_v23 }
 0x11e   :  { %v1419_v10 = vpop.f32.mrf.mxu1  ;;  %v13665_v18 = vadd.f32 %v1985_v41, %v13591_v22  ;;  %3624 = vmatpush1.bf16.msra.mxu0 %v12620_v1  ;;  %v1669_v22 = vadd.f32 %v13606_v20, %v13579_v15  ;;  %v12625_v1 = vld [vmem:[#allocation2 + $0x44] ss:$16 sps:$4 sm:$0xff]  }
 0x11f   :  { %v13667_v0 = vpop.f32.mrf.mxu0  ;;  %3625 = vmatprep.subr.bf16.mxu0 %v12621_v60  ;;  %v12624_v60 = vld [vmem:[#allocation2 + $0x60] ss:$16 sps:$4 sm:$0xff]  }
 0x120   :  { %17264 = vst [vmem:[#allocation60_spill] sm:$0xff] %v13667_v0  ;;  %v1420_v37 = vpop.f32.mrf.mxu1  ;;  %3463 = vmatpush1.bf16.msra.mxu1 %v13669_v61  ;;  %v12629_v61 = vld [vmem:[#allocation2 + $0x24] ss:$16 sps:$4 sm:$0xff]  }
 0x121   :  { %v1991_v56 = vpop.f32.mrf.mxu0  ;;  %3464 = vmatprep.subr.bf16.mxu1 %v13672_v50  ;;  %10501 = vmatmul.mubr.msk.bf16.gmra.mxu0 %vm1300_vm1, %v13586_v9  ;;  %v10273_v37 = vld.sshfl [vmem:[%s17211_s2 + $0x58] sm:$0x33 pattern:$0x75316420] }
 0x122   :  { %v13680_v41 = vadd.f32 %v1991_v56, %v13603_v55  ;;  %3626 = vmatpush1.bf16.msra.mxu0 %v12624_v60  ;;  %3649 = vmatprep.mubr.bf16.mxu0 %v17222_v42  ;;  %v13688_v50 = vld [vmem:[#allocation2 + $0x2e8] ss:$16 sps:$4 sm:$0xff]   ;;  %v13691_v56 = vld [vmem:[#allocation2 + $0x2cc] ss:$16 sps:$4 sm:$0xff]   ;;  %v1020_v55 = vcombine.high %v10273_v37, %v10273_v37  ;;  %v1027_v20 = vrot.slane %v10273_v37, %v12827_v28  ;;  %v12628_v60 = vld [vmem:[#allocation2 + $0x40] ss:$16 sps:$4 sm:$0xff]  }
 0x123   :  { %v1993_v10 = vpop.f32.mrf.mxu0  ;;  %3627 = vmatprep.subr.bf16.mxu0 %v12625_v1  ;;  %17267 = vst [vmem:[#allocation63_spill] sm:$0xff] %v13688_v50  ;;  %17268 = vst [vmem:[#allocation64_spill] sm:$0xff] %v13691_v56  ;;  %v13695_v1 = vld [vmem:[#allocation2 + $0x2c8] ss:$16 sps:$4 sm:$0xff]   ;;  %v12631_v37 = vld [vmem:[#allocation2 + $0x20] ss:$16 sps:$4 sm:$0xff]  }
 0x124   :  { %v13686_v0 = vadd.f32 %v1993_v10, %v1669_v22  ;;  %3465 = vmatpush1.bf16.msra.mxu1 %v13688_v50  ;;  %17269 = vst [vmem:[#allocation65_spill] sm:$0xff] %v13695_v1  ;;  %v10271_v22 = vld.sshfl [vmem:[%s17211_s2 + $0x28] sm:$0x33 pattern:$0x75316420]  ;;  %v1034_v10 = vrot.slane %v1020_v55, %v12827_v28 }
 0x125   :  { %v1995_v15 = vpop.f32.mrf.mxu0  ;;  %3466 = vmatprep.subr.bf16.mxu1 %v13691_v56  ;;  %v982_v55 = vcombine.high %v10271_v22, %v10271_v22  ;;  %v12633_v56 = vld [vmem:[#allocation2 + $0x13c] ss:$16 sps:$4 sm:$0xff]  }
 0x126   :  { %3628 = vmatpush1.bf16.msra.mxu0 %v12628_v60  ;;  %v1035_v15 = vcombine.high %v1027_v20, %v1027_v20  ;;  %v13717_v62 = vcombine.high %v1034_v10, %v1034_v10 }
 0x127   :  { %3629 = vmatprep.subr.bf16.mxu0 %v12629_v61  ;;  %v1996_v23 = vpop.f32.mrf.mxu0  ;;  %v10272_v61 = vld.sshfl [vmem:[%s17211_s2 + $0x2c] sm:$0x1 pattern:$0x75316420]  ;;  %v996_v16 = vrot.slane %v982_v55, %v12827_v28 }
 0x128   :  { %3467 = vmatpush1.bf16.msra.mxu1 %v13695_v1  ;;  %v12632_v23 = vld [vmem:[#allocation2 + $0x4] ss:$16 sps:$4 sm:$0xff]   ;;  %v1012_v50 = vrot.slane %v10272_v61, %v12827_v28  ;;  %v989_v61 = vrot.slane %v10271_v22, %v12827_v28 }
 0x129   :  { %10502 = vmatprep.subr.msk.bf16.mxu1 %vm1307_vm0, %v12840_v38  ;;  %v12637_v22 = vld [vmem:[#allocation2 + $0x1e4] ss:$16 sps:$4 sm:$0xff]  }
 0x12a   :  { %3630 = vmatpush1.bf16.msra.mxu0 %v12631_v37  ;;  %v1061_v37 = vunpack.i.h.s16 %v1027_v20  ;;  %v10516_v55 = vcombine.high %v989_v61, %v996_v16 }
 0x12b   :  { %v1707_v60 = vpop.f32.mrf.mxu1  ;;  %3631 = vmatprep.subr.bf16.mxu0 %v12632_v23  ;;  %10497 = vmatmul.mubr.msk.bf16.vlgmr.msra.gmra.mxu1 %vm1300_vm1, %v13550_v7  ;;  %v1063_v23 = vunpack.i.h.s16 %v1034_v10 }
 0x12c   :  { %v13708_v1 = vadd.f32 %v1707_v60, %v13617_v40  ;;  %3571 = vmatpush1.bf16.msra.mxu1 %v12946_v6  ;;  %3494 = vmatprep.mubr.bf16.mxu1 %v17222_v42  ;;  %v1065_v40 = vunpack.i.h.s16 %v1035_v15  ;;  %v12634_v60 = vld [vmem:[#allocation2] ss:$16 sps:$4 sm:$0xff]   ;;  %v10512_v11 = vpack.i.b16 %v1034_v10, %v1061_v37 }
 0x12d   :  { %v13713_v38 = vpop.f32.mrf.mxu1  ;;  %3572 = vmatprep.subr.bf16.mxu1 %v12633_v56 }
 0x12e   :  { %3632 = vmatpush1.bf16.msra.mxu0 %v12634_v60  ;;  %v10514_v34 = vpack.i.b16 %v13717_v62, %v1065_v40 }
 0x12f   :  { %v1711_v58 = vpop.f32.mrf.mxu1  ;;  %10517 = vmatprep.subr.msk.bf16.mxu0 %vm1307_vm0, %v12850_v43  ;;  %v12636_v43 = vld [vmem:[#allocation2 + $0x11c] ss:$16 sps:$4 sm:$0xff]  }
 0x130   :  { %v13722_v6 = vadd.f32 %v1711_v58, %v13627_v19  ;;  %3573 = vmatpush1.bf16.msra.mxu1 %v12635_v48  ;;  %v10511_v58 = vpack.i.b16 %v1027_v20, %v1012_v50  ;;  %v10513_v19 = vpack.i.b16 %v1035_v15, %v1063_v23  ;;  %v12639_v15 = vld [vmem:[#allocation2 + $0xfc] ss:$16 sps:$4 sm:$0xff]  }
 0x131   :  { %v13726_v56 = vpop.f32.mrf.mxu1  ;;  %v2318_v60 = vpop.f32.mrf.mxu0  ;;  %10506 = vmatmul.mubr.msk.bf16.vlgmr.msra.gmra.mxu0 %vm1300_vm1, %v13436_v29  ;;  %3574 = vmatprep.subr.bf16.mxu1 %v12636_v43 }
 0x132   :  { %v13735_v48 = vadd.f32 %v2318_v60, %v13647_v8  ;;  %3802 = vmatpush1.bf16.msra.mxu0 %v12970_v30  ;;  %3659 = vmatprep.mubr.bf16.mxu0 %v17222_v42  ;;  %v3728_v8 = vcombine.low %v989_v61, %v996_v16  ;;  %v3730_v37 = vcombine.low %v10511_v58, %v10512_v11  ;;  %v12640_v60 = vld [vmem:[#allocation2 + $0x1e0] ss:$16 sps:$4 sm:$0xff]   ;;  %v12643_v11 = vld [vmem:[#allocation2 + $0xdc] ss:$16 sps:$4 sm:$0xff]  }
 0x133   :  { %v2320_v3 = vpop.f32.mrf.mxu0  ;;  %3803 = vmatprep.subr.bf16.mxu0 %v12637_v22  ;;  %v1717_v10 = vpop.f32.mrf.mxu1  ;;  %10498 = vmatmul.mubr.msk.bf16.gmra.mxu1 %vm1300_vm1, %v13586_v9  ;;  %v3731_v23 = vcombine.low %v10513_v19, %v10514_v34  ;;  %v12642_v22 = vld [vmem:[#allocation2 + $0xf8] ss:$16 sps:$4 sm:$0xff]   ;;  %v12644_v19 = vld [vmem:[#allocation2 + $0x1c0] ss:$16 sps:$4 sm:$0xff]  }
 0x134   :  { %v13741_v50 = vadd.f32 %v2320_v3, %v2050_v51  ;;  %v13744_v20 = vadd.f32 %v1717_v10, %v13644_v12  ;;  %3575 = vmatpush1.bf16.msra.mxu1 %v12638_v17  ;;  %3598 = vmatprep.mubr.bf16.mxu1 %v17222_v42  ;;  %v12641_v51 = vld [vmem:[#allocation2 + $0x1c4] ss:$16 sps:$4 sm:$0xff]   ;;  %v3738_v10 = vrot.slane %v3728_v8, %v12827_v28 }
 0x135   :  { %v2322_v30 = vpop.f32.mrf.mxu0  ;;  %v1719_v4 = vpop.f32.mrf.mxu1  ;;  %3576 = vmatprep.subr.bf16.mxu1 %v12639_v15  ;;  %v3759_v61 = vrot.slane %v3731_v23, %v12827_v28  ;;  %v12645_v8 = vld [vmem:[#allocation2 + $0x1a4] ss:$16 sps:$4 sm:$0xff]  }
 0x136   :  { %v13748_v40 = vadd.f32 %v2322_v30, %v13665_v18  ;;  %3804 = vmatpush1.bf16.msra.mxu0 %v12640_v60  ;;  %v13751_v12 = vadd.f32 %v1719_v4, %v13655_v2  ;;  %v3745_v18 = vrot.slane %v10516_v55, %v12827_v28  ;;  %v3752_v2 = vrot.slane %v3730_v37, %v12827_v28  ;;  %v12646_v4 = vld [vmem:[#allocation2 + $0xd8] ss:$16 sps:$4 sm:$0xff]   ;;  %v12647_v55 = vld [vmem:[#allocation2 + $0xbc] ss:$16 sps:$4 sm:$0xff]   ;;  %v12648_v60 = vld [vmem:[#allocation2 + $0x1a0] ss:$16 sps:$4 sm:$0xff]  }
 0x137   :  { %v13753_v43 = vpop.f32.mrf.mxu0  ;;  %3805 = vmatprep.subr.bf16.mxu0 %v12641_v51  ;;  %v1721_v3 = vpop.f32.mrf.mxu1  ;;  %v12649_v51 = vld [vmem:[#allocation2 + $0x184] ss:$16 sps:$4 sm:$0xff]  }
 0x138   :  { %3577 = vmatpush1.bf16.msra.mxu1 %v12642_v22  ;;  %v3760_v37 = vcombine.low %v3738_v10, %v3745_v18  ;;  %v3761_v23 = vcombine.low %v3752_v2, %v3759_v61  ;;  %v12650_v22 = vld [vmem:[#allocation2 + $0xb8] ss:$16 sps:$4 sm:$0xff]   ;;  %v12652_v18 = vld [vmem:[#allocation2 + $0x164] ss:$16 sps:$4 sm:$0xff]   ;;  %v1710_v61 = vadd.f32 %v13713_v38, %v13623_v49 }
 0x139   :  { %v2328_v16 = vpop.f32.mrf.mxu0  ;;  %3578 = vmatprep.subr.bf16.mxu1 %v12643_v11  ;;  %v1722_v34 = vpop.f32.mrf.mxu1  ;;  %10507 = vmatmul.mubr.msk.bf16.gmra.mxu0 %vm1300_vm1, %v13469_v35  ;;  %v1067_v11 = vunpack.i.h.s16 %v13717_v62 }
 0x13a   :  { %v13762_v58 = vadd.f32 %v2328_v16, %v13680_v41  ;;  %3806 = vmatpush1.bf16.msra.mxu0 %v12644_v19  ;;  %3829 = vmatprep.mubr.bf16.mxu0 %v17222_v42  ;;  %v10274_v41 = vld.sshfl [vmem:[%s17211_s2 + $0x5c] sm:$0x1 pattern:$0x75316420]  ;;  %v3775_v16 = vrot.slane %v3761_v23, %v12827_v28  ;;  %v12651_v34 = vld [vmem:[#allocation2 + $0x180] ss:$16 sps:$4 sm:$0xff]  }
 0x13b   :  { %v2330_v17 = vpop.f32.mrf.mxu0  ;;  %3807 = vmatprep.subr.bf16.mxu0 %v12645_v8  ;;  %v1050_v10 = vrot.slane %v10274_v41, %v12827_v28  ;;  %v17270_v19 = vld [vmem:[#allocation12_spill] sm:$0xff]  ;;  %v12653_v8 = vld [vmem:[#allocation2 + $0x8c] ss:$16 sps:$4 sm:$0xff]  }
 0x13c   :  { %v13766_v30 = vadd.f32 %v2330_v17, %v13686_v0  ;;  %3579 = vmatpush1.bf16.msra.mxu1 %v12646_v4  ;;  %v3768_v0 = vrot.slane %v3760_v37, %v12827_v28 }
 0x13d   :  { %v2332_v15 = vpop.f32.mrf.mxu0  ;;  %3580 = vmatprep.subr.bf16.mxu1 %v12647_v55  ;;  %v10515_v4 = vpack.i.b16 %v1050_v10, %v1067_v11  ;;  %v17281_v10 = vld [vmem:[#allocation14_spill] sm:$0xff]  ;;  %v17282_v11 = vld [vmem:[#allocation25_spill] sm:$0xff] }
 0x13e   :  { %3808 = vmatpush1.bf16.msra.mxu0 %v12648_v60  ;;  %v13786_v17 = vcombine.low %v3768_v0, %v3775_v16  ;;  %v12654_v15 = vld [vmem:[#allocation2 + $0x160] ss:$16 sps:$4 sm:$0xff]  }
 0x13f   :  { %3809 = vmatprep.subr.bf16.mxu0 %v12649_v51  ;;  %v2333_v3 = vpop.f32.mrf.mxu0  ;;  %v3783_v37 = vrot.slane %v10515_v4, %v12827_v28  ;;  %v17272_v60 = vld [vmem:[#allocation13_spill] sm:$0xff]  ;;  %v17279_v16 = vld [vmem:[#allocation23_spill] sm:$0xff] }
 0x140   :  { %3581 = vmatpush1.bf16.msra.mxu1 %v12650_v22  ;;  %v17276_v0 = vld [vmem:[#allocation21_spill] sm:$0xff] }
 0x141   :  { %10508 = vmatprep.subr.msk.bf16.mxu1 %vm1307_vm0, %v13031_v44  ;;  %v13814_v3 = vrot.slane %v3783_v37, %v12827_v28  ;;  %v17291_v37 = vld [vmem:[#allocation31_spill] sm:$0xff] }
 0x142   :  { %3810 = vmatpush1.bf16.msra.mxu0 %v12651_v34  ;;  %v17283_v34 = vld [vmem:[#allocation26_spill] sm:$0xff] }
 0x143   :  { %3811 = vmatprep.subr.bf16.mxu0 %v12652_v18  ;;  %v2032_v2 = vpop.f32.mrf.mxu1  ;;  %10503 = vmatmul.mubr.msk.bf16.vlgmr.msra.gmra.mxu1 %vm1300_vm1, %v13550_v7 }
 0x144   :  { %v13782_v44 = vadd.f32 %v2032_v2, %v13708_v1  ;;  %3673 = vmatpush1.bf16.msra.mxu1 %v17270_v19  ;;  %3608 = vmatprep.mubr.bf16.mxu1 %v17222_v42 }
 0x145   :  { %v2034_v62 = vpop.f32.mrf.mxu1  ;;  %3674 = vmatprep.subr.bf16.mxu1 %v12653_v8 }
 0x146   :  { %3812 = vmatpush1.bf16.msra.mxu0 %v12654_v15  ;;  %v2052_v55 = vadd.f32 %v2034_v62, %v1710_v61 }
 0x147   :  { %10528 = vmatprep.subr.msk.bf16.mxu0 %vm1307_vm0, %v13056_v13  ;;  %v2036_v7 = vpop.f32.mrf.mxu1 }
 0x148   :  { %v2055_v49 = vadd.f32 %v2036_v7, %v13722_v6  ;;  %3675 = vmatpush1.bf16.msra.mxu1 %v13304_v45  ;;  %v17273_v6 = vld [vmem:[#allocation20_spill] sm:$0xff]  ;;  %v17289_v7 = vld [vmem:[#allocation29_spill] sm:$0xff] }
 0x149   :  { %v2655_v1 = vpop.f32.mrf.mxu0  ;;  %10518 = vmatmul.mubr.msk.bf16.vlgmr.msra.gmra.mxu0 %vm1300_vm1, %v13786_v17  ;;  %v13794_v38 = vpop.f32.mrf.mxu1  ;;  %3676 = vmatprep.subr.bf16.mxu1 %v13311_v5 }
 0x14a   :  { %v13799_v23 = vadd.f32 %v2655_v1, %v13735_v48  ;;  %3994 = vmatpush1.bf16.msra.mxu0 %v17272_v60  ;;  %3839 = vmatprep.mubr.bf16.mxu0 %v17222_v42  ;;  %v17294_v60 = vld [vmem:[#allocation34_spill] sm:$0xff] }
 0x14b   :  { %v2657_v13 = vpop.f32.mrf.mxu0  ;;  %3995 = vmatprep.subr.bf16.mxu0 %v17273_v6  ;;  %v2042_v45 = vpop.f32.mrf.mxu1  ;;  %10504 = vmatmul.mubr.msk.bf16.gmra.mxu1 %vm1300_vm1, %v13586_v9  ;;  %v17295_v6 = vld [vmem:[#allocation35_spill] sm:$0xff] }
 0x14c   :  { %17271 = vst [vmem:[#allocation12_spill] sm:$0xff] %v13799_v23  ;;  %v13807_v41 = vadd.f32 %v2657_v13, %v13741_v50  ;;  %v2059_v5 = vadd.f32 %v2042_v45, %v13744_v20  ;;  %3677 = vmatpush1.bf16.msra.mxu1 %v13332_v14  ;;  %3700 = vmatprep.mubr.bf16.mxu1 %v17222_v42  ;;  %v17296_v45 = vld [vmem:[#allocation36_spill] sm:$0xff] }
 0x14d   :  { %v2659_v48 = vpop.f32.mrf.mxu0  ;;  %v2044_v51 = vpop.f32.mrf.mxu1  ;;  %3678 = vmatprep.subr.bf16.mxu1 %v13337_v21 }
 0x14e   :  { %17274 = vst [vmem:[#allocation13_spill] sm:$0xff] %v13807_v41  ;;  %v13817_v22 = vadd.f32 %v2659_v48, %v13748_v40  ;;  %3996 = vmatpush1.bf16.msra.mxu0 %v13344_v33  ;;  %v2060_v9 = vadd.f32 %v2044_v51, %v13751_v12  ;;  %v17278_v33 = vld [vmem:[#allocation22_spill] sm:$0xff]  ;;  %v17297_v48 = vld [vmem:[#allocation37_spill] sm:$0xff]  ;;  %v17298_v51 = vld [vmem:[#allocation16_spill] sm:$0xff] }
 0x14f   :  { %v13821_v50 = vpop.f32.mrf.mxu0  ;;  %3997 = vmatprep.subr.bf16.mxu0 %v13352_v53  ;;  %v2046_v14 = vpop.f32.mrf.mxu1 }
 0x150   :  { %17275 = vst [vmem:[#allocation20_spill] sm:$0xff] %v13817_v22  ;;  %3679 = vmatpush1.bf16.msra.mxu1 %v13361_v63  ;;  %v17300_v14 = vld [vmem:[#allocation40_spill] sm:$0xff] }
 0x151   :  { %v2665_v20 = vpop.f32.mrf.mxu0  ;;  %3680 = vmatprep.subr.bf16.mxu1 %v17276_v0  ;;  %10519 = vmatmul.mubr.msk.bf16.gmra.mxu0 %vm1300_vm1, %v13814_v3  ;;  %v2047_v21 = vpop.f32.mrf.mxu1 }
 0x152   :  { %v13829_v40 = vadd.f32 %v2665_v20, %v13762_v58  ;;  %3998 = vmatpush1.bf16.msra.mxu0 %v17278_v33  ;;  %4021 = vmatprep.mubr.bf16.mxu0 %v17222_v42  ;;  %v17301_v21 = vld [vmem:[#allocation17_spill] sm:$0xff] }
 0x153   :  { %v2667_v12 = vpop.f32.mrf.mxu0  ;;  %3999 = vmatprep.subr.bf16.mxu0 %v17279_v16  ;;  %v17303_v16 = vld [vmem:[#allocation42_spill] sm:$0xff] }
 0x154   :  { %17277 = vst [vmem:[#allocation21_spill] sm:$0xff] %v13829_v40  ;;  %v13835_v53 = vadd.f32 %v2667_v12, %v13766_v30  ;;  %3681 = vmatpush1.bf16.msra.mxu1 %v13388_v27  ;;  %v17302_v12 = vld [vmem:[#allocation41_spill] sm:$0xff] }
 0x155   :  { %3682 = vmatprep.subr.bf16.mxu1 %v13392_v31  ;;  %v2669_v63 = vpop.f32.mrf.mxu0  ;;  %v17284_v31 = vld [vmem:[#allocation15_spill] sm:$0xff] }
 0x156   :  { %17280 = vst [vmem:[#allocation22_spill] sm:$0xff] %v13835_v53  ;;  %4000 = vmatpush1.bf16.msra.mxu0 %v13396_v57 }
 0x157   :  { %4001 = vmatprep.subr.bf16.mxu0 %v13400_v36  ;;  %v2670_v58 = vpop.f32.mrf.mxu0  ;;  %v17285_v36 = vld [vmem:[#allocation27_spill] sm:$0xff] }
 0x158   :  { %3683 = vmatpush1.bf16.msra.mxu1 %v13404_v32 }
 0x159   :  { %10520 = vmatprep.subr.msk.bf16.mxu1 %vm1307_vm0, %v17281_v10  ;;  %v17304_v10 = vld [vmem:[#allocation44_spill] sm:$0xff] }
 0x15a   :  { %4002 = vmatpush1.bf16.msra.mxu0 %v17282_v11  ;;  %v17305_v11 = vld [vmem:[#allocation38_spill] sm:$0xff] }
 0x15b   :  { %4003 = vmatprep.subr.bf16.mxu0 %v17283_v34  ;;  %v2369_v30 = vpop.f32.mrf.mxu1  ;;  %10509 = vmatmul.mubr.msk.bf16.vlgmr.msra.gmra.mxu1 %vm1300_vm1, %v13436_v29  ;;  %v17286_v29 = vld [vmem:[#allocation24_spill] sm:$0xff]  ;;  %v17306_v34 = vld [vmem:[#allocation45_spill] sm:$0xff] }
 0x15c   :  { %v2388_v27 = vadd.f32 %v2369_v30, %v13782_v44  ;;  %3853 = vmatpush1.bf16.msra.mxu1 %v17284_v31  ;;  %3710 = vmatprep.mubr.bf16.mxu1 %v17222_v42  ;;  %v17287_v44 = vld [vmem:[#allocation11_spill] sm:$0xff]  ;;  %v17307_v30 = vld [vmem:[#allocation10_spill] sm:$0xff] }
 0x15d   :  { %v2371_v57 = vpop.f32.mrf.mxu1  ;;  %3854 = vmatprep.subr.bf16.mxu1 %v17285_v36  ;;  %v3975_v19 = vrot.slane %v17287_v44, %v12827_v28  ;;  %v17308_v44 = vld [vmem:[#allocation46_spill] sm:$0xff] }
 0x15e   :  { %4004 = vmatpush1.bf16.msra.mxu0 %v13441_v24  ;;  %v13853_v32 = vadd.f32 %v2371_v57, %v2052_v55 }
 0x15f   :  { %10538 = vmatprep.subr.msk.bf16.mxu0 %vm1307_vm0, %v13116_v47  ;;  %v2373_v18 = vpop.f32.mrf.mxu1  ;;  %v17288_v47 = vld [vmem:[#allocation28_spill] sm:$0xff] }
 0x160   :  { %v2392_v2 = vadd.f32 %v2373_v18, %v2055_v49  ;;  %3855 = vmatpush1.bf16.msra.mxu1 %v13446_v25 }
 0x161   :  { %10529 = vmatmul.mubr.msk.bf16.vlgmr.msra.gmra.mxu0 %vm1300_vm1, %v17286_v29  ;;  %v13860_v61 = vpop.f32.mrf.mxu1  ;;  %3856 = vmatprep.subr.bf16.mxu1 %v13453_v39  ;;  %v2769_v24 = vpop.f32.mrf.mxu0  ;;  %v13875_v39 = vrot.slane %v3975_v19, %v12827_v28 }
 0x162   :  { %4186 = vmatpush1.bf16.msra.mxu0 %v13128_v54  ;;  %4031 = vmatprep.mubr.bf16.mxu0 %v17222_v42 }
 0x163   :  { %4187 = vmatprep.subr.bf16.mxu0 %v17288_v47  ;;  %v2379_v62 = vpop.f32.mrf.mxu1  ;;  %10510 = vmatmul.mubr.msk.bf16.gmra.mxu1 %vm1300_vm1, %v13469_v35  ;;  %v13870_v25 = vpop.f32.mrf.mxu0 }
 0x164   :  { %v2396_v8 = vadd.f32 %v2379_v62, %v2059_v5  ;;  %3857 = vmatpush1.bf16.msra.mxu1 %v13464_v26  ;;  %3880 = vmatprep.mubr.bf16.mxu1 %v17222_v42  ;;  %v17290_v26 = vld [vmem:[#allocation30_spill] sm:$0xff]  ;;  %v17309_v62 = vld [vmem:[#allocation47_spill] sm:$0xff] }
 0x165   :  { %v2381_v4 = vpop.f32.mrf.mxu1  ;;  %3858 = vmatprep.subr.bf16.mxu1 %v13471_v46  ;;  %v2773_v54 = vpop.f32.mrf.mxu0 }
 0x166   :  { %4188 = vmatpush1.bf16.msra.mxu0 %v13474_v52  ;;  %v2397_v15 = vadd.f32 %v2381_v4, %v2060_v9  ;;  %v17292_v52 = vld [vmem:[#allocation32_spill] sm:$0xff]  ;;  %v17299_v9 = vld [vmem:[#allocation39_spill] sm:$0xff] }
 0x167   :  { %4189 = vmatprep.subr.bf16.mxu0 %v13477_v59  ;;  %v2383_v35 = vpop.f32.mrf.mxu1  ;;  %v13880_v55 = vpop.f32.mrf.mxu0  ;;  %v17293_v59 = vld [vmem:[#allocation33_spill] sm:$0xff] }
 0x168   :  { %3859 = vmatpush1.bf16.msra.mxu1 %v17289_v7 }
 0x169   :  { %10530 = vmatmul.mubr.msk.bf16.gmra.mxu0 %vm1300_vm1, %v13875_v39  ;;  %3860 = vmatprep.subr.bf16.mxu1 %v17290_v26  ;;  %v2384_v49 = vpop.f32.mrf.mxu1  ;;  %v2779_v1 = vpop.f32.mrf.mxu0 }
 0x16a   :  { %4190 = vmatpush1.bf16.msra.mxu0 %v17291_v37  ;;  %4213 = vmatprep.mubr.bf16.mxu0 %v17222_v42 }
 0x16b   :  { %4191 = vmatprep.subr.bf16.mxu0 %v17292_v52  ;;  %v2781_v46 = vpop.f32.mrf.mxu0 }
 0x16c   :  { %3861 = vmatpush1.bf16.msra.mxu1 %v17293_v59 }
 0x16d   :  { %3862 = vmatprep.subr.bf16.mxu1 %v17294_v60  ;;  %v2783_v13 = vpop.f32.mrf.mxu0  ;;  %v17312_v60 = vld [vmem:[#allocation51_spill] sm:$0xff] }
 0x16e   :  { %4192 = vmatpush1.bf16.msra.mxu0 %v17295_v6 }
 0x16f   :  { %4193 = vmatprep.subr.bf16.mxu0 %v17296_v45  ;;  %v2784_v5 = vpop.f32.mrf.mxu0  ;;  %v17314_v45 = vld [vmem:[#allocation53_spill] sm:$0xff] }
 0x170   :  { %3863 = vmatpush1.bf16.msra.mxu1 %v17297_v48  ;;  %v17315_v5 = vld [vmem:[#allocation18_spill] sm:$0xff] }
 0x171   :  { %10531 = vmatprep.subr.msk.bf16.mxu1 %vm1307_vm0, %v17298_v51  ;;  %v17316_v51 = vld [vmem:[#allocation19_spill] sm:$0xff] }
 0x172   :  { %4194 = vmatpush1.bf16.msra.mxu0 %v17299_v9  ;;  %v17317_v9 = vld [vmem:[#allocation54_spill] sm:$0xff] }
 0x173   :  { %4195 = vmatprep.subr.bf16.mxu0 %v17300_v14  ;;  %v2706_v20 = vpop.f32.mrf.mxu1  ;;  %10521 = vmatmul.mubr.msk.bf16.vlgmr.msra.gmra.mxu1 %vm1300_vm1, %v13786_v17 }
 0x174   :  { %v13900_v0 = vadd.f32 %v2706_v20, %v2388_v27  ;;  %4045 = vmatpush1.bf16.msra.mxu1 %v17301_v21  ;;  %3890 = vmatprep.mubr.bf16.mxu1 %v17222_v42  ;;  %v4167_v27 = vrot.slane %v17307_v30, %v12827_v28  ;;  %v17318_v20 = vld [vmem:[#allocation56_spill] sm:$0xff]  ;;  %v17320_v30 = vld [vmem:[#allocation58_spill] sm:$0xff] }
 0x175   :  { %v13904_v33 = vpop.f32.mrf.mxu1  ;;  %4046 = vmatprep.subr.bf16.mxu1 %v17302_v12 }
 0x176   :  { %4196 = vmatpush1.bf16.msra.mxu0 %v17303_v16  ;;  %v13926_v19 = vrot.slane %v4167_v27, %v12827_v28  ;;  %v17319_v16 = vld [vmem:[#allocation57_spill] sm:$0xff]  ;;  %v17321_v27 = vld [vmem:[#allocation59_spill] sm:$0xff] }
 0x177   :  { %v2710_v63 = vpop.f32.mrf.mxu1  ;;  %v14162_v28 = vld [vmem:[%s17049_s6 + $0x90] sm:$0xff] }
 0x178   :  { %v13908_v58 = vadd.f32 %v2710_v63, %v2392_v2  ;;  %4047 = vmatpush1.bf16.msra.mxu1 %v17304_v10  ;;  %17351 = vst [vmem:[#allocation44_spill] sm:$0xff] %v14162_v28 }
 0x179   :  { %10539 = vmatmul.mubr.msk.bf16.vlgmr.msra.gmra.mxu0 %vm1300_vm1, %v17305_v11  ;;  %v13913_v17 = vpop.f32.mrf.mxu1  ;;  %4048 = vmatprep.subr.bf16.mxu1 %v17306_v34  ;;  %v2871_v31 = vpop.f32.mrf.mxu0 }
 0x17a   :  { %4223 = vmatprep.mubr.bf16.mxu0 %v17222_v42  ;;  %v2872_v36 = vadd.f32 %v2871_v31, %v2769_v24  ;;  %v17310_v24 = vld [vmem:[#allocation49_spill] sm:$0xff] }
 0x17b   :  { %v2716_v57 = vpop.f32.mrf.mxu1  ;;  %10522 = vmatmul.mubr.msk.bf16.gmra.mxu1 %vm1300_vm1, %v13814_v3  ;;  %v2873_v18 = vpop.f32.mrf.mxu0 }
 0x17c   :  { %v13921_v2 = vadd.f32 %v2716_v57, %v2396_v8  ;;  %4049 = vmatpush1.bf16.msra.mxu1 %v17308_v44  ;;  %4072 = vmatprep.mubr.bf16.mxu1 %v17222_v42  ;;  %v17311_v8 = vld [vmem:[#allocation50_spill] sm:$0xff]  ;;  %v2874_v14 = vadd.f32 %v2873_v18, %v13870_v25 }
 0x17d   :  { %v2718_v47 = vpop.f32.mrf.mxu1  ;;  %4050 = vmatprep.subr.bf16.mxu1 %v17309_v62  ;;  %v2875_v4 = vpop.f32.mrf.mxu0  ;;  %v17323_v62 = vld [vmem:[#allocation62_spill] sm:$0xff] }
 0x17e   :  { %v13929_v35 = vadd.f32 %v2718_v47, %v2397_v15  ;;  %v2876_v26 = vadd.f32 %v2875_v4, %v2773_v54  ;;  %v17313_v15 = vld [vmem:[#allocation52_spill] sm:$0xff] }
 0x17f   :  { %v2720_v7 = vpop.f32.mrf.mxu1  ;;  %v13931_v3 = vpop.f32.mrf.mxu0 }
 0x180   :  { %4051 = vmatpush1.bf16.msra.mxu1 %v17310_v24  ;;  %v17324_v24 = vld [vmem:[#allocation63_spill] sm:$0xff] }
 0x181   :  { %10540 = vmatmul.mubr.msk.bf16.gmra.mxu0 %vm1300_vm1, %v13926_v19  ;;  %4052 = vmatprep.subr.bf16.mxu1 %v17311_v8  ;;  %v2721_v49 = vpop.f32.mrf.mxu1  ;;  %v2881_v37 = vpop.f32.mrf.mxu0 }
 0x182   :  { %v2882_v52 = vadd.f32 %v2881_v37, %v2779_v1  ;;  %v17325_v37 = vld [vmem:[#allocation64_spill] sm:$0xff] }
 0x183   :  { %v2883_v59 = vpop.f32.mrf.mxu0 }
 0x184   :  { %4053 = vmatpush1.bf16.msra.mxu1 %v17312_v60  ;;  %v2884_v13 = vadd.f32 %v2883_v59, %v2781_v46  ;;  %v17326_v60 = vld [vmem:[#allocation65_spill] sm:$0xff] }
 0x185   :  { %4054 = vmatprep.subr.bf16.mxu1 %v17313_v15  ;;  %v2885_v6 = vpop.f32.mrf.mxu0 }
 0x187   :  { %v2886_v54 = vpop.f32.mrf.mxu0 }
 0x188   :  { %4055 = vmatpush1.bf16.msra.mxu1 %v17314_v45 }
 0x189   :  { %10541 = vmatprep.subr.msk.bf16.mxu1 %vm1307_vm0, %v17315_v5 }
 0x18b   :  { %v2820_v48 = vpop.f32.mrf.mxu1  ;;  %10532 = vmatmul.mubr.msk.bf16.vlgmr.msra.gmra.mxu1 %vm1300_vm1, %v17286_v29 }
 0x18c   :  { %4237 = vmatpush1.bf16.msra.mxu1 %v17316_v51  ;;  %4082 = vmatprep.mubr.bf16.mxu1 %v17222_v42 }
 0x18d   :  { %v2822_v1 = vpop.f32.mrf.mxu1  ;;  %4238 = vmatprep.subr.bf16.mxu1 %v17317_v9 }
 0x18f   :  { %v2824_v46 = vpop.f32.mrf.mxu1 }
 0x190   :  { %4239 = vmatpush1.bf16.msra.mxu1 %v17318_v20 }
 0x191   :  { %v3051_v21 = vpop.f32.mrf.mxu0  ;;  %v13949_v12 = vpop.f32.mrf.mxu1  ;;  %4240 = vmatprep.subr.bf16.mxu1 %v17319_v16 }
 0x192   :  { %v3119_v63 = vadd.f32 %v3051_v21, %v2872_v36  ;;  %v17322_v36 = vld [vmem:[#allocation61_spill] sm:$0xff] }
 0x193   :  { %v3053_v10 = vpop.f32.mrf.mxu0  ;;  %10533 = vmatmul.mubr.msk.bf16.gmra.mxu1 %vm1300_vm1, %v13875_v39  ;;  %v2830_v29 = vpop.f32.mrf.mxu1 }
 0x194   :  { %v13954_v34 = vadd.f32 %v3053_v10, %v2874_v14  ;;  %4241 = vmatpush1.bf16.msra.mxu1 %v17320_v30  ;;  %4264 = vmatprep.mubr.bf16.mxu1 %v17222_v42 }
 0x195   :  { %v3055_v25 = vpop.f32.mrf.mxu0  ;;  %4242 = vmatprep.subr.bf16.mxu1 %v17321_v27  ;;  %v2832_v31 = vpop.f32.mrf.mxu1 }
 0x196   :  { %v3123_v57 = vadd.f32 %v3055_v25, %v2876_v26 }
 0x197   :  { %v13959_v18 = vpop.f32.mrf.mxu0  ;;  %v2834_v44 = vpop.f32.mrf.mxu1 }
 0x198   :  { %4243 = vmatpush1.bf16.msra.mxu1 %v17322_v36  ;;  %v14000_v44 = vld [vmem:[%s17049_s6 + $0x70] sm:$0xff]  ;;  %v14006_v36 = vld [vmem:[%s17049_s6 + $0xe8] sm:$0xff] }
 0x199   :  { %v3061_v47 = vpop.f32.mrf.mxu0  ;;  %4244 = vmatprep.subr.bf16.mxu1 %v17323_v62  ;;  %v2835_v39 = vpop.f32.mrf.mxu1  ;;  %17327 = vst [vmem:[#allocation23_spill] sm:$0xff] %v14006_v36  ;;  %v14012_v62 = vld [vmem:[%s17049_s6 + $0x68] sm:$0xff] }
 0x19a   :  { %v3127_v4 = vadd.f32 %v3061_v47, %v2882_v52  ;;  %17328 = vst [vmem:[#allocation14_spill] sm:$0xff] %v14012_v62 }
 0x19b   :  { %v3063_v7 = vpop.f32.mrf.mxu0 }
 0x19c   :  { %4245 = vmatpush1.bf16.msra.mxu1 %v17324_v24  ;;  %v3128_v8 = vadd.f32 %v3063_v7, %v2884_v13  ;;  %v14028_v24 = vld [vmem:[%s17049_s6 + $0x60] sm:$0xff] }
 0x19d   :  { %v3065_v49 = vpop.f32.mrf.mxu0  ;;  %4246 = vmatprep.subr.bf16.mxu1 %v17325_v37  ;;  %17330 = vst [vmem:[#allocation26_spill] sm:$0xff] %v14028_v24  ;;  %v14040_v37 = vld [vmem:[%s17049_s6 + $0x58] sm:$0xff] }
 0x19e   :  { %17332 = vst [vmem:[#allocation27_spill] sm:$0xff] %v14040_v37 }
 0x19f   :  { %v3066_v59 = vpop.f32.mrf.mxu0 }
 0x1a0   :  { %4247 = vmatpush1.bf16.msra.mxu1 %v17326_v60  ;;  %v14048_v60 = vld [vmem:[%s17049_s6 + $0xd0] sm:$0xff] }
 0x1a1   :  { %17333 = vst [vmem:[#allocation24_spill] sm:$0xff] %v14048_v60 }
 0x1a3   :  { %v2922_v26 = vpop.f32.mrf.mxu1  ;;  %10542 = vmatmul.mubr.msk.bf16.vlgmr.msra.gmra.mxu1 %vm1300_vm1, %v17305_v11 }
 0x1a4   :  { %v2923_v15 = vadd.f32 %v2922_v26, %v2820_v48  ;;  %4274 = vmatprep.mubr.bf16.mxu1 %v17222_v42 }
 0x1a5   :  { %v2924_v6 = vpop.f32.mrf.mxu1 }
 0x1a6   :  { %v13969_v54 = vadd.f32 %v2924_v6, %v2822_v1  ;;  %v14056_v6 = vld [vmem:[%s17049_s6 + $0x50] sm:$0xff] }
 0x1a7   :  { %v2926_v52 = vpop.f32.mrf.mxu1  ;;  %17334 = vst [vmem:[#allocation11_spill] sm:$0xff] %v14056_v6 }
 0x1a8   :  { %v2927_v45 = vadd.f32 %v2926_v52, %v2824_v46  ;;  %v13980_v46 = vld [vmem:[%s17049_s6 + $0xf8] sm:$0xff] }
 0x1a9   :  { %v3243_v5 = vpop.f32.mrf.mxu0  ;;  %v13971_v13 = vpop.f32.mrf.mxu1  ;;  %11311 = vmatprep.subr.mxu0 %v13980_v46 }
 0x1aa   :  { %v3311_v51 = vadd.f32 %v3243_v5, %v3119_v63  ;;  %v13985_v63 = vld [vmem:[%s17049_s6 + $0x78] sm:$0xff]  ;;  %v14065_v5 = vld [vmem:[%s17049_s6 + $0xc8] sm:$0xff] }
 0x1ab   :  { %v3245_v9 = vpop.f32.mrf.mxu0  ;;  %v2932_v14 = vpop.f32.mrf.mxu1  ;;  %10543 = vmatmul.mubr.msk.bf16.gmra.mxu1 %vm1300_vm1, %v13926_v19  ;;  %11312 = vmatpush3.msra.mxu0 %v13985_v63  ;;  %17335 = vst [vmem:[#allocation28_spill] sm:$0xff] %v14065_v5 }
 0x1ac   :  { %v2933_v20 = vadd.f32 %v2932_v14, %v2830_v29  ;;  %v3312_v52 = vadd.f32 %v3245_v9, %v13954_v34 }
 0x1ad   :  { %v3247_v21 = vpop.f32.mrf.mxu0  ;;  %v2934_v11 = vpop.f32.mrf.mxu1 }
 0x1ae   :  { %v3315_v48 = vadd.f32 %v3247_v21, %v3123_v57  ;;  %v2935_v16 = vadd.f32 %v2934_v11, %v2832_v31  ;;  %v13994_v57 = vld [vmem:[%s17049_s6 + $0xf0] sm:$0xff]  ;;  %v14071_v11 = vld [vmem:[%s17049_s6 + $0x48] sm:$0xff] }
 0x1af   :  { %v13975_v42 = vpop.f32.mrf.mxu0  ;;  %v2936_v1 = vpop.f32.mrf.mxu1  ;;  %11313 = vmatprep.subr.mxu0 %v13994_v57  ;;  %17336 = vst [vmem:[#allocation29_spill] sm:$0xff] %v14071_v11 }
 0x1b0   :  { %11314 = vmatpush3.msra.mxu0 %v14000_v44 }
 0x1b1   :  { %v3253_v19 = vpop.f32.mrf.mxu0  ;;  %v2937_v10 = vpop.f32.mrf.mxu1  ;;  %11315 = vmatprep.subr.mxu0 %v14006_v36 }
 0x1b2   :  { %v3319_v29 = vadd.f32 %v3253_v19, %v3127_v4  ;;  %11316 = vmatpush3.msra.mxu0 %v14012_v62  ;;  %v14020_v4 = vld [vmem:[%s17049_s6 + $0xe0] sm:$0xff] }
 0x1b3   :  { %v3255_v30 = vpop.f32.mrf.mxu0  ;;  %17329 = vst [vmem:[#allocation25_spill] sm:$0xff] %v14020_v4  ;;  %11317 = vmatprep.subr.mxu0 %v14020_v4  ;;  %v14087_v10 = vld [vmem:[%s17049_s6 + $0x40] sm:$0xff] }
 0x1b4   :  { %v13989_v25 = vadd.f32 %v3255_v30, %v3128_v8  ;;  %11318 = vmatpush3.msra.mxu0 %v14028_v24  ;;  %v14034_v8 = vld [vmem:[%s17049_s6 + $0xd8] sm:$0xff]  ;;  %17339 = vst [vmem:[#allocation32_spill] sm:$0xff] %v14087_v10 }
 0x1b5   :  { %v3257_v27 = vpop.f32.mrf.mxu0  ;;  %17331 = vst [vmem:[#allocation15_spill] sm:$0xff] %v14034_v8  ;;  %11319 = vmatprep.subr.mxu0 %v14034_v8 }
 0x1b6   :  { %11320 = vmatpush3.msra.mxu0 %v14040_v37  ;;  %v14095_v27 = vld [vmem:[%s17049_s6 + $0xb8] sm:$0xff] }
 0x1b7   :  { %v3258_v31 = vpop.f32.mrf.mxu0  ;;  %11321 = vmatprep.subr.mxu0 %v14048_v60  ;;  %17340 = vst [vmem:[#allocation33_spill] sm:$0xff] %v14095_v27 }
 0x1b8   :  { %11322 = vmatpush3.msra.mxu0 %v14056_v6 }
 0x1b9   :  { %11323 = vmatprep.subr.mxu0 %v14065_v5 }
 0x1ba   :  { %11324 = vmatpush3.msra.mxu0 %v14071_v11 }
 0x1bb   :  { %v3102_v47 = vpop.f32.mrf.mxu1 }
 0x1bc   :  { %v14014_v39 = vadd.f32 %v3102_v47, %v2923_v15 }
 0x1bd   :  { %v14022_v7 = vpop.f32.mrf.mxu1 }
 0x1bf   :  { %v3106_v49 = vpop.f32.mrf.mxu1 }
 0x1c0   :  { %v14042_v59 = vadd.f32 %v3106_v49, %v2927_v45  ;;  %v14103_v49 = vld [vmem:[%s17049_s6 + $0x38] sm:$0xff] }
 0x1c1   :  { %v3435_v26 = vpop.f32.mrf.mxu0  ;;  %v14050_v15 = vpop.f32.mrf.mxu1  ;;  %17341 = vst [vmem:[#allocation34_spill] sm:$0xff] %v14103_v49 }
 0x1c2   :  { %v14059_v45 = vadd.f32 %v3435_v26, %v3311_v51  ;;  %v14081_v51 = vld [vmem:[%s17049_s6 + $0xc0] sm:$0xff] }
 0x1c3   :  { %v3437_v14 = vpop.f32.mrf.mxu0  ;;  %v3112_v21 = vpop.f32.mrf.mxu1  ;;  %17338 = vst [vmem:[#allocation31_spill] sm:$0xff] %v14081_v51  ;;  %11325 = vmatprep.subr.mxu0 %v14081_v51 }
 0x1c4   :  { %v14073_v1 = vadd.f32 %v3437_v14, %v3312_v52  ;;  %v14075_v34 = vadd.f32 %v3112_v21, %v2933_v20  ;;  %11326 = vmatpush3.msra.mxu0 %v14087_v10  ;;  %v14115_v52 = vld [vmem:[%s17049_s6 + $0x30] sm:$0xff]  ;;  %v14123_v21 = vld [vmem:[%s17049_s6 + $0xa8] sm:$0xff] }
 0x1c5   :  { %v3439_v9 = vpop.f32.mrf.mxu0  ;;  %v3114_v19 = vpop.f32.mrf.mxu1  ;;  %11327 = vmatprep.subr.mxu0 %v14095_v27  ;;  %17343 = vst [vmem:[#allocation36_spill] sm:$0xff] %v14115_v52  ;;  %17344 = vst [vmem:[#allocation37_spill] sm:$0xff] %v14123_v21 }
 0x1c6   :  { %17337 = vst [vmem:[#allocation30_spill] sm:$0xff] %v14073_v1  ;;  %v14089_v30 = vadd.f32 %v3439_v9, %v3315_v48  ;;  %v3130_v20 = vadd.f32 %v3114_v19, %v2935_v16  ;;  %11328 = vmatpush3.msra.mxu0 %v14103_v49  ;;  %v14109_v48 = vld [vmem:[%s17049_s6 + $0xb0] sm:$0xff]  ;;  %v14129_v19 = vld [vmem:[%s17049_s6 + $0x28] sm:$0xff] }
 0x1c7   :  { %v14097_v31 = vpop.f32.mrf.mxu0  ;;  %v3116_v47 = vpop.f32.mrf.mxu1  ;;  %17342 = vst [vmem:[#allocation35_spill] sm:$0xff] %v14109_v48  ;;  %11329 = vmatprep.subr.mxu0 %v14109_v48  ;;  %17345 = vst [vmem:[#allocation16_spill] sm:$0xff] %v14129_v19 }
 0x1c8   :  { %11330 = vmatpush3.msra.mxu0 %v14115_v52 }
 0x1c9   :  { %v3445_v16 = vpop.f32.mrf.mxu0  ;;  %v3117_v26 = vpop.f32.mrf.mxu1  ;;  %11331 = vmatprep.subr.mxu0 %v14123_v21 }
 0x1ca   :  { %v14117_v14 = vadd.f32 %v3445_v16, %v3319_v29  ;;  %11332 = vmatpush3.msra.mxu0 %v14129_v19  ;;  %v14138_v29 = vld [vmem:[%s17049_s6 + $0xa0] sm:$0xff] }
 0x1cb   :  { %v3447_v9 = vpop.f32.mrf.mxu0  ;;  %17347 = vst [vmem:[#allocation40_spill] sm:$0xff] %v14138_v29  ;;  %11333 = vmatprep.subr.mxu0 %v14138_v29  ;;  %v14144_v26 = vld [vmem:[%s17049_s6 + $0x20] sm:$0xff]  ;;  %v3122_v29 = vadd.f32 %v14022_v7, %v13969_v54 }
 0x1cc   :  { %v14132_v47 = vadd.f32 %v3447_v9, %v13989_v25  ;;  %17348 = vst [vmem:[#allocation17_spill] sm:$0xff] %v14144_v26  ;;  %11334 = vmatpush3.msra.mxu0 %v14144_v26  ;;  %v14150_v25 = vld [vmem:[%s17049_s6 + $0x98] sm:$0xff]  ;;  %v14180_v26 = vld [vmem:[%s17049_s6 + $0x8] sm:$0xff] }
 0x1cd   :  { %v3449_v16 = vpop.f32.mrf.mxu0  ;;  %17349 = vst [vmem:[#allocation41_spill] sm:$0xff] %v14150_v25  ;;  %11335 = vmatprep.subr.mxu0 %v14150_v25  ;;  %v14174_v25 = vld [vmem:[%s17049_s6 + $0x88] sm:$0xff]  ;;  %17354 = vst [vmem:[#allocation10_spill] sm:$0xff] %v14180_v26 }
 0x1ce   :  { %17346 = vst [vmem:[#allocation39_spill] sm:$0xff] %v14132_v47  ;;  %v14156_v16 = vld [vmem:[%s17049_s6 + $0x18] sm:$0xff]  ;;  %17353 = vst [vmem:[#allocation45_spill] sm:$0xff] %v14174_v25 }
 0x1cf   :  { %v3450_v9 = vpop.f32.mrf.mxu0  ;;  %17350 = vst [vmem:[#allocation42_spill] sm:$0xff] %v14156_v16  ;;  %11336 = vmatpush3.msra.mxu0 %v14156_v16 }
 0x1d0   :  { %11337 = vmatprep.subr.mxu0 %v14162_v28  ;;  %v14168_v9 = vld [vmem:[%s17049_s6 + $0x10] sm:$0xff]  ;;  %v14185_v28 = vld [vmem:[%s17049_s6 + $0x80] sm:$0xff] }
 0x1d1   :  { %17352 = vst [vmem:[#allocation38_spill] sm:$0xff] %v14168_v9  ;;  %11338 = vmatpush3.msra.mxu0 %v14168_v9  ;;  %17355 = vst [vmem:[#allocation46_spill] sm:$0xff] %v14185_v28  ;;  %v14190_v9 = vld [vmem:[%s17049_s6] sm:$0xff] }
 0x1d2   :  { %11339 = vmatprep.subr.mxu0 %v14174_v25  ;;  %17356 = vst [vmem:[#allocation47_spill] sm:$0xff] %v14190_v9 }
 0x1d3   :  { %v3294_v16 = vpop.f32.mrf.mxu1  ;;  %11340 = vmatpush3.msra.mxu0 %v14180_v26 }
 0x1d4   :  { %v3313_v25 = vadd.f32 %v3294_v16, %v14014_v39  ;;  %11341 = vmatprep.subr.mxu0 %v14185_v28  ;;  %v14206_v39 = vld [vmem:[%s17049_s6 + $0x178] sm:$0xff] }
 0x1d5   :  { %v3296_v19 = vpop.f32.mrf.mxu1  ;;  %11342 = vmatpush3.msra.mxu0 %v14190_v9  ;;  %17357 = vst [vmem:[#allocation49_spill] sm:$0xff] %v14206_v39  ;;  %v14276_v9 = vld [vmem:[%s17049_s6 + $0x138] sm:$0xff] }
 0x1d6   :  { %v3314_v21 = vadd.f32 %v3296_v19, %v3122_v29  ;;  %11346 = vmatprep.subr.mxu0 %v13980_v46  ;;  %v17168_v29 = vmov 0.0   ;;  %17366 = vst [vmem:[#allocation57_spill] sm:$0xff] %v14276_v9 }
 0x1d7   :  { %v3298_v52 = vpop.f32.mrf.mxu1  ;;  %4714 = vmatprep.subr.mxu1 %v17168_v29 }
 0x1d8   :  { %v3317_v48 = vadd.f32 %v3298_v52, %v14042_v59  ;;  %4715 = vmatpush1.msra.mxu1 %v14206_v39  ;;  %v14217_v59 = vld [vmem:[%s17049_s6 + $0x170] sm:$0xff]  ;;  %v14226_v52 = vld [vmem:[%s17049_s6 + $0x168] sm:$0xff] }
 0x1d9   :  { %v3300_v49 = vpop.f32.mrf.mxu1  ;;  %v3549_v27 = vpop.f32.mrf.mxu0  ;;  %17358 = vst [vmem:[#allocation50_spill] sm:$0xff] %v14217_v59  ;;  %4716 = vmatprep.subr.mxu1 %v17168_v29  ;;  %17359 = vst [vmem:[#allocation51_spill] sm:$0xff] %v14226_v52 }
 0x1da   :  { %4717 = vmatpush1.msra.mxu1 %v14217_v59 }
 0x1db   :  { %v3304_v10 = vpop.f32.mrf.mxu1  ;;  %v14200_v51 = vpop.f32.mrf.mxu0  ;;  %4718 = vmatprep.subr.mxu1 %v17168_v29 }
 0x1dc   :  { %v3321_v54 = vadd.f32 %v3304_v10, %v14075_v34  ;;  %4719 = vmatpush1.msra.mxu1 %v14226_v52  ;;  %v14251_v52 = vld [vmem:[%s17049_s6 + $0x150] sm:$0xff] }
 0x1dd   :  { %v3306_v7 = vpop.f32.mrf.mxu1  ;;  %v14208_v19 = vpop.f32.mrf.mxu0  ;;  %4720 = vmatprep.subr.mxu1 %v17168_v29  ;;  %17362 = vst [vmem:[#allocation18_spill] sm:$0xff] %v14251_v52 }
 0x1de   :  { %v14211_v46 = vadd.f32 %v3306_v7, %v3130_v20  ;;  %v14235_v7 = vld [vmem:[%s17049_s6 + $0x160] sm:$0xff] }
 0x1df   :  { %v3308_v34 = vpop.f32.mrf.mxu1  ;;  %v14219_v10 = vpop.f32.mrf.mxu0  ;;  %17360 = vst [vmem:[#allocation52_spill] sm:$0xff] %v14235_v7  ;;  %4721 = vmatpush1.msra.mxu1 %v14235_v7  ;;  %v14258_v7 = vld [vmem:[%s17049_s6 + $0x148] sm:$0xff] }
 0x1e0   :  { %4722 = vmatprep.subr.mxu1 %v17168_v29  ;;  %17363 = vst [vmem:[#allocation19_spill] sm:$0xff] %v14258_v7 }
 0x1e1   :  { %v3309_v20 = vpop.f32.mrf.mxu1  ;;  %v14228_v16 = vpop.f32.mrf.mxu0 }
 0x1e2   :  { %v14244_v20 = vld [vmem:[%s17049_s6 + $0x158] sm:$0xff] }
 0x1e3   :  { %v14237_v34 = vpop.f32.mrf.mxu0  ;;  %17361 = vst [vmem:[#allocation53_spill] sm:$0xff] %v14244_v20  ;;  %4723 = vmatpush1.msra.mxu1 %v14244_v20 }
 0x1e4   :  { %4724 = vmatprep.subr.mxu1 %v17168_v29 }
 0x1e5   :  { %v3563_v59 = vpop.f32.mrf.mxu0  ;;  %4725 = vmatpush1.msra.mxu1 %v14251_v52 }
 0x1e6   :  { %4726 = vmatprep.subr.mxu1 %v17168_v29  ;;  %v14265_v59 = vld [vmem:[%s17049_s6 + $0x140] sm:$0xff] }
 0x1e7   :  { %v3564_v39 = vpop.f32.mrf.mxu0  ;;  %4727 = vmatpush1.msra.mxu1 %v14258_v7  ;;  %17364 = vst [vmem:[#allocation54_spill] sm:$0xff] %v14265_v59 }
 0x1e8   :  { %4728 = vmatprep.subr.mxu1 %v17168_v29  ;;  %v2929_v39 = vadd.f32 %v13971_v13, %v13949_v12  ;;  %v14286_v12 = vld [vmem:[%s17049_s6 + $0x130] sm:$0xff] }
 0x1e9   :  { %4729 = vmatpush1.msra.mxu1 %v14265_v59  ;;  %17367 = vst [vmem:[#allocation58_spill] sm:$0xff] %v14286_v12 }
 0x1ea   :  { %4730 = vmatprep.subr.mxu1 %v17168_v29  ;;  %v3126_v28 = vadd.f32 %v14050_v15, %v2929_v39  ;;  %v14295_v15 = vld [vmem:[%s17049_s6 + $0x128] sm:$0xff] }
 0x1eb   :  { %v3486_v20 = vpop.f32.mrf.mxu1  ;;  %4731 = vmatpush1.msra.mxu1 %v14276_v9  ;;  %17369 = vst [vmem:[#allocation61_spill] sm:$0xff] %v14295_v15 }
 0x1ec   :  { %v14270_v52 = vadd.f32 %v3486_v20, %v3313_v25  ;;  %4732 = vmatprep.subr.mxu1 %v17168_v29  ;;  %v3318_v25 = vadd.f32 %v3300_v49, %v3126_v28  ;;  %v14304_v28 = vld [vmem:[%s17049_s6 + $0x120] sm:$0xff] }
 0x1ed   :  { %v3488_v7 = vpop.f32.mrf.mxu1  ;;  %4733 = vmatpush1.msra.mxu1 %v14286_v12  ;;  %17370 = vst [vmem:[#allocation62_spill] sm:$0xff] %v14304_v28 }
 0x1ee   :  { %17365 = vst [vmem:[#allocation56_spill] sm:$0xff] %v14270_v52  ;;  %v14280_v26 = vadd.f32 %v3488_v7, %v3314_v21  ;;  %4734 = vmatprep.subr.mxu1 %v17168_v29 }
 0x1ef   :  { %v3490_v13 = vpop.f32.mrf.mxu1  ;;  %4735 = vmatpush1.msra.mxu1 %v14295_v15 }
 0x1f0   :  { %v14289_v20 = vadd.f32 %v3490_v13, %v3317_v48  ;;  %4736 = vmatprep.subr.mxu1 %v17168_v29 }
 0x1f1   :  { %v3492_v21 = vpop.f32.mrf.mxu1  ;;  %v3651_v7 = vpop.f32.mrf.mxu0  ;;  %4737 = vmatpush1.msra.mxu1 %v14304_v28 }
 0x1f2   :  { %17368 = vst [vmem:[#allocation59_spill] sm:$0xff] %v14289_v20  ;;  %v14298_v39 = vadd.f32 %v3492_v21, %v3318_v25  ;;  %v14306_v48 = vadd.f32 %v3651_v7, %v3549_v27  ;;  %v14315_v25 = vld [vmem:[%s17049_s6 + $0x118] sm:$0xff]  ;;  %4738 = vmatprep.subr.mxu1 %v17168_v29 }
 0x1f3   :  { %v3496_v49 = vpop.f32.mrf.mxu1  ;;  %v3653_v13 = vpop.f32.mrf.mxu0  ;;  %17372 = vst [vmem:[#allocation64_spill] sm:$0xff] %v14315_v25  ;;  %4739 = vmatpush1.msra.mxu1 %v14315_v25 }
 0x1f4   :  { %v14309_v12 = vadd.f32 %v3496_v49, %v3321_v54  ;;  %v14318_v15 = vadd.f32 %v3653_v13, %v14200_v51  ;;  %v14328_v54 = vld [vmem:[%s17049_s6 + $0x110] sm:$0xff]  ;;  %4740 = vmatprep.subr.mxu1 %v17168_v29 }
 0x1f5   :  { %v3498_v21 = vpop.f32.mrf.mxu1  ;;  %v3655_v9 = vpop.f32.mrf.mxu0  ;;  %17374 = vst [vmem:[#allocation66_spill] sm:$0xff] %v14328_v54  ;;  %4741 = vmatpush1.msra.mxu1 %v14328_v54 }
 0x1f6   :  { %17371 = vst [vmem:[#allocation63_spill] sm:$0xff] %v14309_v12  ;;  %v14322_v27 = vadd.f32 %v3498_v21, %v14211_v46  ;;  %v14331_v49 = vadd.f32 %v3655_v9, %v14208_v19  ;;  %v14341_v46 = vld [vmem:[%s17049_s6 + $0x108] sm:$0xff]  ;;  %4742 = vmatprep.subr.mxu1 %v17168_v29  ;;  %v14351_v19 = vld [vmem:[%s17049_s6 + $0x100] sm:$0xff] }
 0x1f7   :  { %v3500_v7 = vpop.f32.mrf.mxu1  ;;  %v3657_v28 = vpop.f32.mrf.mxu0  ;;  %17375 = vst [vmem:[#allocation67_spill] sm:$0xff] %v14341_v46  ;;  %4743 = vmatpush1.msra.mxu1 %v14341_v46  ;;  %17376 = vst [vmem:[#allocation68_spill] sm:$0xff] %v14351_v19 }
 0x1f8   :  { %17373 = vst [vmem:[#allocation65_spill] sm:$0xff] %v14322_v27  ;;  %v14335_v51 = vadd.f32 %v3657_v28, %v14219_v10  ;;  %4744 = vmatprep.subr.mxu1 %v17168_v29 }
 0x1f9   :  { %v3501_v13 = vpop.f32.mrf.mxu1  ;;  %v3661_v21 = vpop.f32.mrf.mxu0  ;;  %4745 = vmatpush1.msra.mxu1 %v14351_v19 }
 0x1fa   :  { %v14345_v9 = vadd.f32 %v3661_v21, %v14228_v16  ;;  %v14361_v16 = vld [vmem:[%s17049_s6 + $0x1a8] sm:$0xff]  ;;  %4766 = vmatprep.subr.mxu1 %v17168_v29  ;;  %v14367_v13 = vld [vmem:[%s17049_s6 + $0x1a0] sm:$0xff] }
 0x1fb   :  { %v3663_v10 = vpop.f32.mrf.mxu0  ;;  %17377 = vst [vmem:[#allocation69_spill] sm:$0xff] %v14361_v16  ;;  %17378 = vst [vmem:[#allocation70_spill] sm:$0xff] %v14367_v13  ;;  %4767 = vmatpush2.msra.mxu1 %v14361_v16  ;;  %v14395_v16 = vld [vmem:[%s17049_s6 + $0x180] sm:$0xff] }
 0x1fc   :  { %v14355_v28 = vadd.f32 %v3663_v10, %v14237_v34  ;;  %4768 = vmatprep.subr.mxu1 %v17168_v29  ;;  %v14374_v34 = vld [vmem:[%s17049_s6 + $0x198] sm:$0xff]  ;;  %v14381_v10 = vld [vmem:[%s17049_s6 + $0x190] sm:$0xff]  ;;  %17382 = vst [vmem:[#allocation74_spill] sm:$0xff] %v14395_v16 }
 0x1fd   :  { %v3665_v7 = vpop.f32.mrf.mxu0  ;;  %17379 = vst [vmem:[#allocation71_spill] sm:$0xff] %v14374_v34  ;;  %4769 = vmatpush2.msra.mxu1 %v14367_v13  ;;  %17380 = vst [vmem:[#allocation72_spill] sm:$0xff] %v14381_v10 }
 0x1fe   :  { %4770 = vmatprep.subr.mxu1 %v17168_v29 }
 0x1ff   :  { %v3666_v21 = vpop.f32.mrf.mxu0  ;;  %4771 = vmatpush2.msra.mxu1 %v14374_v34 }
 0x200   :  { %4772 = vmatprep.subr.mxu1 %v17168_v29  ;;  %v14388_v21 = vld [vmem:[%s17049_s6 + $0x188] sm:$0xff] }
 0x201   :  { %17381 = vst [vmem:[#allocation73_spill] sm:$0xff] %v14388_v21  ;;  %4773 = vmatpush2.msra.mxu1 %v14381_v10 }
 0x202   :  { %4774 = vmatprep.subr.mxu1 %v17168_v29 }
 0x203   :  { %v3600_v7 = vpop.f32.mrf.mxu1  ;;  %4775 = vmatpush2.msra.mxu1 %v14388_v21 }
 0x204   :  { %4776 = vmatprep.subr.mxu1 %v17168_v29 }
 0x205   :  { %v3602_v13 = vpop.f32.mrf.mxu1  ;;  %4777 = vmatpush2.msra.mxu1 %v14395_v16 }
 0x206   :  { %4858 = vmatprep.subr.mxu1 %v17168_v29 }
 0x207   :  { %v3604_v34 = vpop.f32.mrf.mxu1 }
 0x209   :  { %v14400_v19 = vpop.f32.mrf.mxu0  ;;  %v3606_v46 = vpop.f32.mrf.mxu1 }
 0x20b   :  { %v14403_v10 = vpop.f32.mrf.mxu0  ;;  %v3610_v54 = vpop.f32.mrf.mxu1 }
 0x20d   :  { %v14405_v25 = vpop.f32.mrf.mxu0  ;;  %v3612_v59 = vpop.f32.mrf.mxu1 }
 0x20f   :  { %v14407_v11 = vpop.f32.mrf.mxu0  ;;  %v3614_v5 = vpop.f32.mrf.mxu1 }
 0x211   :  { %v14409_v21 = vpop.f32.mrf.mxu0  ;;  %v3615_v6 = vpop.f32.mrf.mxu1 }
 0x213   :  { %v14411_v60 = vpop.f32.mrf.mxu0 }
 0x215   :  { %v3845_v16 = vpop.f32.mrf.mxu0 }
 0x216   :  { %v17388_v16 = vld [vmem:[#allocation43_spill] sm:$0xff] }
 0x217   :  { %v3846_v37 = vpop.f32.mrf.mxu0 }
 0x21b   :  { %v3702_v8 = vpop.f32.mrf.mxu1 }
 0x21c   :  { %v14413_v24 = vadd.f32 %v3702_v8, %v3600_v7  ;;  %v17389_v7 = vld [vmem:[#allocation48_spill] sm:$0xff] }
 0x21d   :  { %v3704_v29 = vpop.f32.mrf.mxu1 }
 0x21e   :  { %17383 = vst [vmem:[#allocation75_spill] sm:$0xff] %v14413_v24  ;;  %v14415_v4 = vadd.f32 %v3704_v29, %v3602_v13  ;;  %v1663_v29 = vadd.f32 %v17389_v7, %v17388_v16 }
 0x21f   :  { %v3706_v62 = vpop.f32.mrf.mxu1 }
 0x220   :  { %17384 = vst [vmem:[#allocation76_spill] sm:$0xff] %v14415_v4  ;;  %v14417_v20 = vadd.f32 %v3706_v62, %v3604_v34  ;;  %v2878_v62 = vadd.f32 %v13931_v3, %v13880_v55  ;;  %v4408_v3 = vmul.f32 %v13835_v53, %v13835_v53 }
 0x221   :  { %v14419_v52 = vpop.f32.mrf.mxu0  ;;  %v3708_v36 = vpop.f32.mrf.mxu1 }
 0x222   :  { %17385 = vst [vmem:[#allocation77_spill] sm:$0xff] %v14417_v20  ;;  %v14421_v5 = vadd.f32 %v3708_v36, %v3606_v46  ;;  %v17391_v46 = vld [vmem:[#allocation60_spill] sm:$0xff] }
 0x223   :  { %v14423_v27 = vpop.f32.mrf.mxu0  ;;  %v3712_v6 = vpop.f32.mrf.mxu1  ;;  %v2054_v24 = vadd.f32 %v17391_v46, %v1663_v29  ;;  %v4421_v29 = vsel %vm1307_vm0, %v4408_v3, 0.0 }
 0x224   :  { %17386 = vst [vmem:[#allocation78_spill] sm:$0xff] %v14421_v5  ;;  %v14425_v12 = vadd.f32 %v3712_v6, %v3610_v54 }
 0x225   :  { %v14427_v37 = vpop.f32.mrf.mxu0  ;;  %v3714_v8 = vpop.f32.mrf.mxu1  ;;  %v2391_v6 = vadd.f32 %v13753_v43, %v2054_v24  ;;  %v4500_v24 = vmul.f32 %v14132_v47, %v14132_v47 }
 0x226   :  { %17387 = vst [vmem:[#allocation79_spill] sm:$0xff] %v14425_v12  ;;  %v14431_v13 = vadd.f32 %v3714_v8, %v3612_v59  ;;  %v3124_v12 = vadd.f32 %v13959_v18, %v2878_v62  ;;  %v4360_v18 = vsel %vm1307_vm0, %v13829_v40, 0.0 }
 0x227   :  { %v14435_v34 = vpop.f32.mrf.mxu0  ;;  %v3716_v36 = vpop.f32.mrf.mxu1  ;;  %v14445_v59 = vadd.f32 %v13821_v50, %v2391_v6  ;;  %v4400_v50 = vmul.f32 %v13807_v41, %v13807_v41 }
 0x228   :  { %17390 = vst [vmem:[#allocation43_spill] sm:$0xff] %v14431_v13  ;;  %v3316_v8 = vadd.f32 %v13975_v42, %v3124_v12  ;;  %v4359_v42 = vadd.f32 %v13817_v22, %v13799_v23  ;;  %v4369_v12 = vsel %vm1307_vm0, %v13835_v53, 0.0  ;;  %v4450_v53 = vsel %vm1307_vm0, %v14117_v14, 0.0 }
 0x229   :  { %v14438_v5 = vpop.f32.mrf.mxu0  ;;  %v3717_v54 = vpop.f32.mrf.mxu1  ;;  %17392 = vst [vmem:[#allocation48_spill] sm:$0xff] %v14445_v59  ;;  %v4404_v43 = vmul.f32 %v14445_v59, %v14445_v59  ;;  %v4368_v46 = vadd.f32 %v14445_v59, %v13807_v41 }
 0x22a   :  { %v14451_v16 = vadd.f32 %v14097_v31, %v3316_v8  ;;  %v4403_v31 = vmul.f32 %v13817_v22, %v13817_v22  ;;  %v4361_v6 = vadd.f32 %v4360_v18, %v4359_v42  ;;  %v4459_v8 = vsel %vm1307_vm0, %v14132_v47, 0.0 }
 0x22b   :  { %v14442_v20 = vpop.f32.mrf.mxu0  ;;  %v4420_v54 = vadd.f32 %v4404_v43, %v4400_v50  ;;  %v4370_v59 = vadd.f32 %v4369_v12, %v4368_v46  ;;  %v4449_v18 = vadd.f32 %v14089_v30, %v14059_v45  ;;  %v4513_v50 = vsel %vm1307_vm0, %v4500_v24, 0.0 }
 0x22c   :  { %17393 = vst [vmem:[#allocation60_spill] sm:$0xff] %v14451_v16  ;;  %v4496_v62 = vmul.f32 %v14451_v16, %v14451_v16  ;;  %v4458_v3 = vadd.f32 %v14451_v16, %v14073_v1  ;;  %v4362_v16 = vrot.slane %v4361_v6, 4  ;;  %v3903_v24 = vadd.f32 %v14405_v25, %v14331_v49 }
 0x22d   :  { %v4037_v55 = vpop.f32.mrf.mxu0  ;;  %v4422_v43 = vadd.f32 %v4421_v29, %v4420_v54  ;;  %v4371_v46 = vrot.slane %v4370_v59, 4 }
 0x22e   :  { %v4407_v55 = vmul.f32 %v13829_v40, %v13829_v40  ;;  %v4460_v41 = vadd.f32 %v4459_v8, %v4458_v3  ;;  %v4399_v40 = vmul.f32 %v13799_v23, %v13799_v23 }
 0x22f   :  { %v4038_v7 = vpop.f32.mrf.mxu0  ;;  %v4423_v54 = vrot.slane %v4422_v43, 4  ;;  %v4372_v49 = vadd.f32 %v4371_v46, %v4370_v59 }
 0x230   :  { %v4492_v7 = vmul.f32 %v14073_v1, %v14073_v1  ;;  %v4451_v1 = vadd.f32 %v4450_v53, %v4449_v18  ;;  %v4412_v13 = vsel %vm1307_vm0, %v4407_v55, 0.0  ;;  %v4411_v29 = vadd.f32 %v4403_v31, %v4399_v40 }
 0x231   :  { %v4461_v4 = vrot.slane %v4460_v41, 4  ;;  %v3904_v53 = vadd.f32 %v14407_v11, %v14335_v51  ;;  %v3899_v18 = vadd.f32 %v14400_v19, %v14306_v48  ;;  %v3900_v40 = vadd.f32 %v14403_v10, %v14318_v15 }
 0x232   :  { %v4512_v42 = vadd.f32 %v4496_v62, %v4492_v7  ;;  %v4363_v7 = vadd.f32 %v4362_v16, %v4361_v6  ;;  %v4413_v3 = vadd.f32 %v4412_v13, %v4411_v29  ;;  %v4452_v23 = vrot.slane %v4451_v1, 4 }
 0x233   :  { %v14470_v36 = vpop.f32.mrf.mxu1  ;;  %v4095_v31 = vadd.f32 %v14427_v37, %v3903_v24  ;;  %v3907_v13 = vadd.f32 %v14409_v21, %v14345_v9  ;;  %v4096_v16 = vadd.f32 %v14435_v34, %v3904_v53  ;;  %v4462_v11 = vadd.f32 %v4461_v4, %v4460_v41 }
 0x234   :  { %17394 = vst [vmem:[#allocation80_spill] sm:$0xff] %v14470_v36  ;;  %v4514_v36 = vadd.f32 %v4513_v50, %v4512_v42  ;;  %v4424_v42 = vadd.f32 %v4423_v54, %v4422_v43  ;;  %v4091_v51 = vadd.f32 %v14419_v52, %v3899_v18  ;;  %v4092_v48 = vadd.f32 %v14423_v27, %v3900_v40 }
 0x235   :  { %v14484_v22 = vpop.f32.mrf.mxu1  ;;  %v4453_v37 = vadd.f32 %v4452_v23, %v4451_v1  ;;  %v3908_v6 = vadd.f32 %v14411_v60, %v14355_v28  ;;  %v4099_v59 = vadd.f32 %v14438_v5, %v3907_v13  ;;  %v4364_v27 = vrot.slane %v4363_v7, 2 }
 0x236   :  { %17395 = vst [vmem:[#allocation81_spill] sm:$0xff] %v14484_v22  ;;  %v4515_v55 = vrot.slane %v4514_v36, 4  ;;  %v4373_v34 = vrot.slane %v4372_v49, 2  ;;  %v4414_v23 = vrot.slane %v4413_v3, 4  ;;  %v4463_v1 = vrot.slane %v4462_v11, 2 }
 0x237   :  { %v14489_v47 = vpop.f32.mrf.mxu1  ;;  %v4100_v29 = vadd.f32 %v14442_v20, %v3908_v6  ;;  %v4454_v5 = vrot.slane %v4453_v37, 2  ;;  %v4425_v24 = vrot.slane %v4424_v42, 2  ;;  %v4365_v40 = vadd.f32 %v4364_v27, %v4363_v7 }
 0x238   :  { %v4516_v9 = vadd.f32 %v4515_v55, %v4514_v36  ;;  %v4374_v13 = vadd.f32 %v4373_v34, %v4372_v49  ;;  %v14544_v6 = vadd.f32 %v4414_v23, %v4413_v3 }
 0x239   :  { %v4215_v22 = vpop.f32.mrf.mxu0  ;;  %v14494_v12 = vpop.f32.mrf.mxu1 }
 0x23a   :  { %v14521_v21 = vadd.f32 %v4215_v22, %v4091_v51  ;;  %v4517_v55 = vrot.slane %v4516_v9, 2  ;;  %v4375_v49 = vrot.slane %v4374_v13, 1  ;;  %v4416_v23 = vrot.slane %v14544_v6, 2 }
 0x23b   :  { %v4217_v62 = vpop.f32.mrf.mxu0  ;;  %v14498_v8 = vpop.f32.mrf.mxu1 }
 0x23c   :  { %v14523_v41 = vadd.f32 %v4217_v62, %v4092_v48 }
 0x23d   :  { %v4219_v50 = vpop.f32.mrf.mxu0  ;;  %v14507_v25 = vpop.f32.mrf.mxu1 }
 0x23e   :  { %v14514_v19 = vadd.f32 %v4219_v50, %v4095_v31  ;;  %v4588_v20 = vmul.f32 %v14523_v41, %v14523_v41 }
 0x23f   :  { %v4221_v15 = vpop.f32.mrf.mxu0  ;;  %v3896_v10 = vpop.f32.mrf.mxu1 }
 0x240   :  { %v14519_v43 = vadd.f32 %v4221_v15, %v4096_v16  ;;  %v4545_v60 = vadd.f32 %v14514_v19, %v14521_v21  ;;  %v4464_v15 = vadd.f32 %v4463_v1, %v4462_v11 }
 0x241   :  { %v4225_v4 = vpop.f32.mrf.mxu0  ;;  %v3897_v52 = vpop.f32.mrf.mxu1 }
 0x242   :  { %v14526_v46 = vadd.f32 %v4225_v4, %v4099_v59  ;;  %v4592_v28 = vmul.f32 %v14519_v43, %v14519_v43  ;;  %v4554_v62 = vadd.f32 %v14519_v43, %v14523_v41  ;;  %v4455_v59 = vadd.f32 %v4454_v5, %v4453_v37 }
 0x243   :  { %v4227_v22 = vpop.f32.mrf.mxu0  ;;  %v4426_v52 = vadd.f32 %v4425_v24, %v4424_v42  ;;  %v4465_v3 = vrot.slane %v4464_v15, 1 }
 0x244   :  { %v4546_v36 = vsel %vm1307_vm0, %v14526_v46, 0.0  ;;  %v14534_v54 = vadd.f32 %v4227_v22, %v4100_v29  ;;  %v4608_v16 = vadd.f32 %v4592_v28, %v4588_v20  ;;  %v17396_v22 = vld [vmem:[#allocation55_spill] sm:$0xff]  ;;  %v4456_v42 = vrot.slane %v4455_v59, 1 }
 0x245   :  { %v4547_v53 = vadd.f32 %v4546_v36, %v4545_v60  ;;  %v4229_v18 = vpop.f32.mrf.mxu0  ;;  %v4518_v60 = vadd.f32 %v4517_v55, %v4516_v9  ;;  %v1714_v36 = vadd.f32 %v13726_v56, %v17396_v22  ;;  %v4427_v1 = vrot.slane %v4426_v52, 1 }
 0x246   :  { %v4555_v31 = vsel %vm1307_vm0, %v14534_v54, 0.0  ;;  %v4596_v50 = vmul.f32 %v14534_v54, %v14534_v54  ;;  %v4366_v18 = vrot.slane %v4365_v40, 1 }
 0x247   :  { %v4548_v51 = vrot.slane %v4547_v53, 4  ;;  %v4556_v48 = vadd.f32 %v4555_v31, %v4554_v62  ;;  %v4230_v10 = vpop.f32.mrf.mxu0  ;;  %v2056_v37 = vadd.f32 %v13794_v38, %v1714_v36  ;;  %v4519_v56 = vrot.slane %v4518_v60, 1 }
 0x248   :  { %v4609_v4 = vsel %vm1307_vm0, %v4596_v50, 0.0  ;;  %v4499_v31 = vmul.f32 %v14117_v14, %v14117_v14  ;;  %v4376_v50 = vadd.f32 %v4375_v49, %v4374_v13 }
 0x249   :  { %v4549_v29 = vadd.f32 %v4548_v51, %v4547_v53  ;;  %v4557_v7 = vrot.slane %v4556_v48, 4  ;;  %v4610_v27 = vadd.f32 %v4609_v4, %v4608_v16  ;;  %v4367_v53 = vadd.f32 %v4366_v18, %v4365_v40 }
 0x24a   :  { %v2393_v55 = vadd.f32 %v13860_v61, %v2056_v37  ;;  %v4466_v51 = vadd.f32 %v4465_v3, %v4464_v15  ;;  %v14562_v4 = vadd.f32 %v13904_v33, %v13853_v32  ;;  %v4495_v40 = vmul.f32 %v14089_v30, %v14089_v30 }
 0x24b   :  { %v4550_v34 = vrot.slane %v4549_v29, 2  ;;  %v4558_v28 = vadd.f32 %v4557_v7, %v4556_v48  ;;  %v4611_v20 = vrot.slane %v4610_v27, 4  ;;  %v14549_v11 = vpop.f32.mrf.mxu1  ;;  %v4428_v61 = vadd.f32 %v4427_v1, %v4426_v52 }
 0x24c   :  { %v14567_v7 = vadd.f32 %v13913_v17, %v2393_v55  ;;  %v4520_v22 = vadd.f32 %v4519_v56, %v4518_v60  ;;  %v4491_v15 = vmul.f32 %v14059_v45, %v14059_v45  ;;  %v4504_v18 = vsel %vm1307_vm0, %v4499_v31, 0.0 }
 0x24d   :  { %v4551_v5 = vadd.f32 %v4550_v34, %v4549_v29  ;;  %v14553_v9 = vpop.f32.mrf.mxu1  ;;  %v4559_v24 = vrot.slane %v4558_v28, 2  ;;  %v4612_v62 = vadd.f32 %v4611_v20, %v4610_v27  ;;  %v4457_v29 = vadd.f32 %v4456_v42, %v4455_v59 }
 0x24e   :  { %v4595_v33 = vmul.f32 %v14526_v46, %v14526_v46  ;;  %v4591_v59 = vmul.f32 %v14514_v19, %v14514_v19  ;;  %v4488_v52 = vadd.f32 %v4466_v51, %v4376_v50  ;;  %v4377_v60 = vadd.f32 %v13908_v58, %v13900_v0 }
 0x24f   :  { %v4552_v38 = vrot.slane %v4551_v5, 1  ;;  %v14558_v16 = vpop.f32.mrf.mxu1  ;;  %v4560_v48 = vadd.f32 %v4559_v24, %v4558_v28  ;;  %v4613_v10 = vrot.slane %v4612_v62, 2  ;;  %v4378_v28 = vsel %vm1307_vm0, %v13921_v2, 0.0 }
 0x250   :  { %v4503_v20 = vadd.f32 %v4495_v40, %v4491_v15  ;;  %v4487_v3 = vadd.f32 %v4457_v29, %v4367_v53  ;;  %v4587_v37 = vmul.f32 %v14521_v21, %v14521_v21  ;;  %v4542_v1 = vadd.f32 %v4520_v22, %v4428_v61 }
 0x251   :  { %v14569_v27 = vpop.f32.mrf.mxu1  ;;  %v4561_v13 = vrot.slane %v4560_v48, 1  ;;  %v4614_v36 = vadd.f32 %v4613_v10, %v4612_v62  ;;  %v4553_v32 = vadd.f32 %v4552_v38, %v4551_v5  ;;  %v4388_v56 = vsel %vm4386_vm2, %v14567_v7, 0.0 }
 0x252   :  { %v4505_v62 = vadd.f32 %v4504_v18, %v4503_v20  ;;  %v4600_v31 = vsel %vm1307_vm0, %v4595_v33, 0.0  ;;  %v4406_v50 = vmul.f32 %v14567_v7, %v14567_v7  ;;  %v4379_v38 = vadd.f32 %v4378_v28, %v4377_v60  ;;  %v17399_v60 = vld [vmem:[#allocation23_spill] sm:$0xff]  ;;  %v17400_v20 = vld [vmem:[#allocation56_spill] sm:$0xff] }
 0x253   :  { %v4562_v17 = vadd.f32 %v4561_v13, %v4560_v48  ;;  %v14578_v49 = vpop.f32.mrf.mxu1  ;;  %v4615_v34 = vrot.slane %v4614_v36, 1  ;;  %v4583_v55 = vadd.f32 %v4553_v32, %v4487_v3  ;;  %v4599_v53 = vadd.f32 %v4591_v59, %v4587_v37  ;;  %v17401_v3 = vld [vmem:[#allocation59_spill] sm:$0xff] }
 0x254   :  { %v4417_v10 = vadd.f32 %v4416_v23, %v14544_v6  ;;  %v4387_v40 = vsel %vm4386_vm2, %v14562_v4, 0.0  ;;  %v4391_v29 = vsel %vm4390_vm3, %v13929_v35, 0.0  ;;  %v4402_v22 = vmul.f32 %v14562_v4, %v14562_v4 }
 0x255   :  { %v4584_v42 = vadd.f32 %v4562_v17, %v4488_v52  ;;  %v4616_v5 = vadd.f32 %v4615_v34, %v4614_v36  ;;  %v14586_v24 = vpop.f32.mrf.mxu1  ;;  %v4601_v61 = vadd.f32 %v4600_v31, %v4599_v53  ;;  %v4389_v36 = vadd.f32 %v4388_v56, %v4387_v40  ;;  %v17397_v52 = vld [vmem:[#allocation63_spill] sm:$0xff]  ;;  %v17398_v34 = vld [vmem:[#allocation65_spill] sm:$0xff]  ;;  %v17404_v40 = vld [vmem:[#allocation26_spill] sm:$0xff] }
 0x256   :  { %v4506_v15 = vrot.slane %v4505_v62, 4  ;;  %v4498_v18 = vmul.f32 %v14298_v39, %v14298_v39  ;;  %v4439_v6 = vsel %vm4386_vm2, %v4406_v50, 0.0  ;;  %v4380_v23 = vrot.slane %v4379_v38, 4  ;;  %v17403_v31 = vld [vmem:[#allocation25_spill] sm:$0xff] }
 0x257   :  { %4708 = vmatprep.mubr.f32.mxu0 %v4584_v42  ;;  %v4638_v51 = vadd.f32 %v4616_v5, %v4542_v1  ;;  %v4088_v48 = vpop.f32.mrf.mxu1  ;;  %v4410_v32 = vmul.f32 %v13929_v35, %v13929_v35  ;;  %v4392_v33 = vadd.f32 %v4391_v29, %v4389_v36  ;;  %v4494_v59 = vmul.f32 %v14280_v26, %v14280_v26  ;;  %v17402_v1 = vld [vmem:[#allocation14_spill] sm:$0xff] }
 0x258   :  { %4709 = vmatmul.mubr.f32.vlgmr.msra.gmra.mxu0 %v4583_v55  ;;  %v4468_v17 = vsel %vm1307_vm0, %v17397_v52, 0.0  ;;  %v4476_v28 = vsel %vm4386_vm2, %v14280_v26, 0.0  ;;  %v4467_v37 = vadd.f32 %v17401_v3, %v17400_v20  ;;  %v4602_v42 = vrot.slane %v4601_v61, 4 }
 0x259   :  { %11347 = vmatpush3.msra.mxu0 %v13985_v63  ;;  %4852 = vmatprep.mubr.f32.mxu0 %v4638_v51  ;;  %v4089_v13 = vpop.f32.mrf.mxu1  ;;  %v4477_v63 = vsel %vm4386_vm2, %v14298_v39, 0.0  ;;  %v4507_v5 = vadd.f32 %v4506_v15, %v4505_v62  ;;  %v4531_v55 = vsel %vm4386_vm2, %v4498_v18, 0.0  ;;  %v4418_v50 = vrot.slane %v4417_v10, 1  ;;  %v17405_v62 = vld [vmem:[#allocation15_spill] sm:$0xff] }
 0x25a   :  { %11348 = vmatprep.subr.mxu0 %v13994_v57  ;;  %v4502_v57 = vmul.f32 %v17398_v34, %v17398_v34  ;;  %v4478_v56 = vadd.f32 %v4477_v63, %v4476_v28  ;;  %v4438_v53 = vsel %vm4386_vm2, %v4402_v22, 0.0  ;;  %v4441_v51 = vsel %vm4390_vm3, %v4410_v32, 0.0 }
 0x25b   :  { %11349 = vmatpush3.msra.mxu0 %v14000_v44  ;;  %v4479_v44 = vsel %vm4390_vm3, %v17398_v34, 0.0  ;;  %v4469_v48 = vadd.f32 %v4468_v17, %v4467_v37  ;;  %v4440_v29 = vadd.f32 %v4439_v6, %v4438_v53  ;;  %v4530_v13 = vsel %vm4386_vm2, %v4494_v59, 0.0  ;;  %v17407_v17 = vld [vmem:[#allocation24_spill] sm:$0xff] }
 0x25c   :  { %11350 = vmatprep.subr.mxu0 %v17399_v60  ;;  %v4480_v36 = vadd.f32 %v4479_v44, %v4478_v56  ;;  %v4533_v60 = vsel %vm4390_vm3, %v4502_v57, 0.0  ;;  %v14632_v15 = vadd.f32 %v4380_v23, %v4379_v38  ;;  %v4393_v18 = vrot.slane %v4392_v33, 4  ;;  %v17409_v56 = vld [vmem:[#allocation76_spill] sm:$0xff]  ;;  %v17410_v38 = vld [vmem:[#allocation81_spill] sm:$0xff] }
 0x25d   :  { %11351 = vmatpush3.msra.mxu0 %v17402_v1  ;;  %v4532_v63 = vadd.f32 %v4531_v55, %v4530_v13  ;;  %v4603_v28 = vadd.f32 %v4602_v42, %v4601_v61  ;;  %v17406_v1 = vld [vmem:[#allocation27_spill] sm:$0xff]  ;;  %v4442_v22 = vadd.f32 %v4441_v51, %v4440_v29  ;;  %v4508_v32 = vrot.slane %v4507_v5, 2  ;;  %v17411_v53 = vld [vmem:[#allocation28_spill] sm:$0xff]  ;;  %v17412_v55 = vld [vmem:[#allocation77_spill] sm:$0xff] }
 0x25e   :  { %11352 = vmatprep.subr.mxu0 %v17403_v31  ;;  %v4470_v37 = vrot.slane %v4469_v48, 4  ;;  %v17408_v31 = vld [vmem:[#allocation11_spill] sm:$0xff]  ;;  %v14637_v44 = vadd.f32 %v4418_v50, %v4417_v10  ;;  %v4481_v57 = vrot.slane %v4480_v36, 4  ;;  %v3902_v23 = vadd.f32 %v17410_v38, %v17409_v56  ;;  %v17413_v29 = vld [vmem:[#allocation29_spill] sm:$0xff]  ;;  %v17414_v50 = vld [vmem:[#allocation78_spill] sm:$0xff] }
 0x25f   :  { %11353 = vmatpush3.msra.mxu0 %v17404_v40  ;;  %v4534_v6 = vadd.f32 %v4533_v60, %v4532_v63  ;;  %v4382_v61 = vrot.slane %v14632_v15, 2  ;;  %v14643_v42 = vadd.f32 %v4393_v18, %v4392_v33  ;;  %v3905_v51 = vadd.f32 %v14489_v47, %v17412_v55  ;;  %v17416_v33 = vld [vmem:[#allocation75_spill] sm:$0xff]  ;;  %v17417_v18 = vld [vmem:[#allocation80_spill] sm:$0xff] }
 0x260   :  { %11354 = vmatprep.subr.mxu0 %v17405_v62  ;;  %v4604_v40 = vrot.slane %v4603_v28, 2  ;;  %v4443_v60 = vrot.slane %v4442_v22, 4  ;;  %v4509_v10 = vadd.f32 %v4508_v32, %v4507_v5  ;;  %v3906_v62 = vadd.f32 %v14494_v12, %v17414_v50  ;;  %v17418_v38 = vld [vmem:[#allocation32_spill] sm:$0xff]  ;;  %v17420_v32 = vld [vmem:[#allocation33_spill] sm:$0xff] }
 0x261   :  { %11355 = vmatpush3.msra.mxu0 %v17406_v1  ;;  %v4094_v63 = vadd.f32 %v14553_v9, %v3902_v23  ;;  %v17415_v1 = vld [vmem:[#allocation31_spill] sm:$0xff]  ;;  %v3901_v56 = vadd.f32 %v17417_v18, %v17416_v33  ;;  %v4097_v47 = vadd.f32 %v14558_v16, %v3905_v51  ;;  %v4482_v55 = vadd.f32 %v4481_v57, %v4480_v36  ;;  %v17422_v16 = vld [vmem:[#allocation34_spill] sm:$0xff]  ;;  %v17425_v18 = vld [vmem:[#allocation37_spill] sm:$0xff] }
 0x262   :  { %11356 = vmatprep.subr.mxu0 %v17407_v17  ;;  %v4471_v17 = vadd.f32 %v4470_v37, %v4469_v48  ;;  %v4098_v12 = vadd.f32 %v14569_v27, %v3906_v62  ;;  %v4605_v48 = vadd.f32 %v4604_v40, %v4603_v28  ;;  %v17421_v37 = vld [vmem:[#allocation43_spill] sm:$0xff]  ;;  %v4395_v57 = vrot.slane %v14643_v42, 2 }
 0x263   :  { %11357 = vmatpush3.msra.mxu0 %v17408_v31  ;;  %v4266_v59 = vpop.f32.mrf.mxu1  ;;  %v4535_v31 = vrot.slane %v4534_v6, 4  ;;  %v3910_v23 = vadd.f32 %v14507_v25, %v17421_v37  ;;  %v4093_v50 = vadd.f32 %v14549_v11, %v3901_v56  ;;  %v17423_v62 = vld [vmem:[#allocation35_spill] sm:$0xff]  ;;  %v4510_v28 = vrot.slane %v4509_v10, 1  ;;  %v17424_v11 = vld [vmem:[#allocation36_spill] sm:$0xff] }
 0x264   :  { %11358 = vmatprep.subr.mxu0 %v17411_v53 }
 0x265   :  { %11359 = vmatpush3.msra.mxu0 %v17413_v29  ;;  %v4268_v13 = vpop.f32.mrf.mxu1  ;;  %v17419_v29 = vld [vmem:[#allocation79_spill] sm:$0xff]  ;;  %v4536_v40 = vadd.f32 %v4535_v31, %v4534_v6  ;;  %v4102_v25 = vadd.f32 %v14586_v24, %v3910_v23  ;;  %v4472_v6 = vrot.slane %v4471_v17, 2  ;;  %v4483_v24 = vrot.slane %v4482_v55, 2  ;;  %v17426_v31 = vld [vmem:[#allocation16_spill] sm:$0xff]  ;;  %v17428_v23 = vld [vmem:[#allocation17_spill] sm:$0xff] }
 0x266   :  { %11360 = vmatprep.subr.mxu0 %v17415_v1  ;;  %v3909_v5 = vadd.f32 %v14498_v8, %v17419_v29  ;;  %v14660_v9 = vadd.f32 %v4268_v13, %v4094_v63  ;;  %v4444_v8 = vadd.f32 %v4443_v60, %v4442_v22  ;;  %v14674_v63 = vadd.f32 %v4266_v59, %v4093_v50 }
 0x267   :  { %11361 = vmatpush3.msra.mxu0 %v17418_v38  ;;  %v4270_v53 = vpop.f32.mrf.mxu1  ;;  %v4606_v59 = vrot.slane %v4605_v48, 1  ;;  %v4537_v37 = vrot.slane %v4536_v40, 2 }
 0x268   :  { %11362 = vmatprep.subr.mxu0 %v17420_v32  ;;  %v14666_v51 = vadd.f32 %v4270_v53, %v4097_v47  ;;  %v4101_v27 = vadd.f32 %v14578_v49, %v3909_v5  ;;  %v4590_v33 = vmul.f32 %v14660_v9, %v14660_v9  ;;  %v4572_v38 = vsel %vm4386_vm2, %v14660_v9, 0.0  ;;  %v17427_v53 = vld [vmem:[#allocation40_spill] sm:$0xff] }
 0x269   :  { %11363 = vmatpush3.msra.mxu0 %v17422_v16  ;;  %v4272_v36 = vpop.f32.mrf.mxu1  ;;  %v4445_v32 = vrot.slane %v4444_v8, 2 }
 0x26a   :  { %11364 = vmatprep.subr.mxu0 %v17423_v62  ;;  %v14671_v13 = vadd.f32 %v4272_v36, %v4098_v12  ;;  %v4563_v56 = vadd.f32 %v14666_v51, %v14674_v63  ;;  %v4626_v62 = vsel %vm4386_vm2, %v4590_v33, 0.0 }
 0x26b   :  { %11365 = vmatpush3.msra.mxu0 %v17424_v11  ;;  %v4276_v1 = vpop.f32.mrf.mxu1  ;;  %v17429_v11 = vld [vmem:[#allocation41_spill] sm:$0xff] }
 0x26c   :  { %11366 = vmatprep.subr.mxu0 %v17425_v18  ;;  %v4573_v49 = vsel %vm4386_vm2, %v14671_v13, 0.0  ;;  %v4594_v22 = vmul.f32 %v14671_v13, %v14671_v13  ;;  %v14684_v60 = vadd.f32 %v4276_v1, %v4101_v27  ;;  %v4511_v27 = vadd.f32 %v4510_v28, %v4509_v10  ;;  %v17431_v28 = vld [vmem:[#allocation44_spill] sm:$0xff] }
 0x26d   :  { %11367 = vmatpush3.msra.mxu0 %v17426_v31  ;;  %v4278_v47 = vpop.f32.mrf.mxu1  ;;  %v4574_v50 = vadd.f32 %v4573_v49, %v4572_v38  ;;  %v17430_v31 = vld [vmem:[#allocation42_spill] sm:$0xff]  ;;  %v4473_v10 = vadd.f32 %v4472_v6, %v4471_v17  ;;  %v4607_v38 = vadd.f32 %v4606_v59, %v4605_v48 }
 0x26e   :  { %11368 = vmatprep.subr.mxu0 %v17427_v53  ;;  %v4627_v29 = vsel %vm4386_vm2, %v4594_v22, 0.0  ;;  %v4564_v5 = vsel %vm1307_vm0, %v14684_v60, 0.0  ;;  %v14695_v12 = vadd.f32 %v4278_v47, %v4102_v25  ;;  %v4484_v25 = vadd.f32 %v4483_v24, %v4482_v55  ;;  %v17434_v48 = vld [vmem:[#allocation10_spill] sm:$0xff] }
 0x26f   :  { %11369 = vmatpush3.msra.mxu0 %v17428_v23  ;;  %v4565_v16 = vadd.f32 %v4564_v5, %v4563_v56  ;;  %v4280_v36 = vpop.f32.mrf.mxu1  ;;  %v4628_v22 = vadd.f32 %v4627_v29, %v4626_v62  ;;  %v4396_v56 = vadd.f32 %v4395_v57, %v14643_v42  ;;  %v4538_v5 = vadd.f32 %v4537_v37, %v4536_v40  ;;  %v17435_v37 = vld [vmem:[#allocation46_spill] sm:$0xff] }
 0x270   :  { %11370 = vmatprep.subr.mxu0 %v17429_v11  ;;  %v4575_v1 = vsel %vm4390_vm3, %v14695_v12, 0.0  ;;  %v4598_v18 = vmul.f32 %v14695_v12, %v14695_v12  ;;  %v17432_v36 = vld [vmem:[#allocation38_spill] sm:$0xff]  ;;  %v4383_v24 = vadd.f32 %v4382_v61, %v14632_v15  ;;  %v4446_v29 = vadd.f32 %v4445_v32, %v4444_v8  ;;  %v17436_v15 = vld [vmem:[#allocation47_spill] sm:$0xff] }
 0x271   :  { %11371 = vmatpush3.msra.mxu0 %v17430_v31  ;;  %v4566_v47 = vrot.slane %v4565_v16, 4  ;;  %v4576_v53 = vadd.f32 %v4575_v1, %v4574_v50  ;;  %v4281_v49 = vpop.f32.mrf.mxu1  ;;  %v17433_v50 = vld [vmem:[#allocation45_spill] sm:$0xff]  ;;  %v4541_v42 = vadd.f32 %v4511_v27, %v14637_v44  ;;  %v4485_v17 = vrot.slane %v4484_v25, 1 }
 0x272   :  { %11372 = vmatprep.subr.mxu0 %v17431_v28  ;;  %v4629_v33 = vsel %vm4390_vm3, %v4598_v18, 0.0  ;;  %v4397_v40 = vrot.slane %v4396_v56, 1  ;;  %v4474_v59 = vrot.slane %v4473_v10, 1  ;;  %v4539_v61 = vrot.slane %v4538_v5, 1 }
 0x273   :  { %v4567_v23 = vadd.f32 %v4566_v47, %v4565_v16  ;;  %11373 = vmatpush3.msra.mxu0 %v17432_v36  ;;  %v4577_v11 = vrot.slane %v4576_v53, 4  ;;  %v4630_v55 = vadd.f32 %v4629_v33, %v4628_v22  ;;  %v4637_v16 = vadd.f32 %v4607_v38, %v4541_v42 }
 0x274   :  { %11374 = vmatprep.subr.mxu0 %v17433_v50  ;;  %v4384_v8 = vrot.slane %v4383_v24, 1  ;;  %v4447_v44 = vrot.slane %v4446_v29, 1  ;;  %v4486_v47 = vadd.f32 %v4485_v17, %v4484_v25  ;;  %v4475_v49 = vadd.f32 %v4474_v59, %v4473_v10  ;;  %v17438_v10 = vld [vmem:[#allocation49_spill] sm:$0xff]  ;;  %v17441_v59 = vld [vmem:[#allocation52_spill] sm:$0xff] }
 0x275   :  { %v4568_v57 = vrot.slane %v4567_v23, 2  ;;  %v4578_v6 = vadd.f32 %v4577_v11, %v4576_v53  ;;  %v4631_v62 = vrot.slane %v4630_v55, 4  ;;  %11375 = vmatpush3.msra.mxu0 %v17434_v48  ;;  %v17437_v53 = vmov 0.0  }
 0x276   :  { %11376 = vmatprep.subr.mxu0 %v17435_v37  ;;  %v4398_v28 = vadd.f32 %v4397_v40, %v4396_v56  ;;  %v4540_v36 = vadd.f32 %v4539_v61, %v4538_v5  ;;  %v4448_v42 = vadd.f32 %v4447_v44, %v4446_v29  ;;  %v17439_v56 = vld [vmem:[#allocation50_spill] sm:$0xff]  ;;  %v4501_v5 = vmul.f32 %v17397_v52, %v17397_v52  ;;  %v17442_v61 = vld [vmem:[#allocation53_spill] sm:$0xff] }
 0x277   :  { %v4569_v1 = vadd.f32 %v4568_v57, %v4567_v23  ;;  %v4579_v18 = vrot.slane %v4578_v6, 2  ;;  %v4632_v22 = vadd.f32 %v4631_v62, %v4630_v55  ;;  %11377 = vmatpush3.msra.mxu0 %v17436_v15  ;;  %v4385_v23 = vadd.f32 %v4384_v8, %v4383_v24  ;;  %v17440_v24 = vld [vmem:[#allocation51_spill] sm:$0xff] }
 0x278   :  { %4853 = vmatmul.mubr.f32.vlgmr.msra.gmra.mxu0 %v4637_v16  ;;  %v4490_v55 = vadd.f32 %v4486_v47, %v4398_v28  ;;  %v4544_v37 = vadd.f32 %v4540_v36, %v4448_v42  ;;  %v4497_v29 = vmul.f32 %v17401_v3, %v17401_v3  ;;  %v4409_v17 = vmul.f32 %v13921_v2, %v13921_v2  ;;  %v17443_v47 = vld [vmem:[#allocation18_spill] sm:$0xff]  ;;  %v17444_v36 = vld [vmem:[#allocation19_spill] sm:$0xff] }
 0x279   :  { %v4570_v32 = vrot.slane %v4569_v1, 1  ;;  %v4580_v27 = vadd.f32 %v4579_v18, %v4578_v6  ;;  %v4633_v31 = vrot.slane %v4632_v22, 2  ;;  %5004 = vmatprep.mubr.f32.mxu0 %v17437_v53  ;;  %v4489_v62 = vadd.f32 %v4475_v49, %v4385_v23 }
 0x27a   :  { %v4597_v40 = vmul.f32 %v14684_v60, %v14684_v60  ;;  %v4493_v18 = vmul.f32 %v17400_v20, %v17400_v20  ;;  %v4522_v15 = vsel %vm1307_vm0, %v4501_v5, 0.0  ;;  %v4401_v8 = vmul.f32 %v13900_v0, %v13900_v0 }
 0x27b   :  { %v4581_v33 = vrot.slane %v4580_v27, 1  ;;  %v4634_v38 = vadd.f32 %v4633_v31, %v4632_v22  ;;  %v4571_v11 = vadd.f32 %v4570_v32, %v4569_v1  ;;  %v4405_v1 = vmul.f32 %v13908_v58, %v13908_v58 }
 0x27c   :  { %v4593_v22 = vmul.f32 %v14666_v51, %v14666_v51  ;;  %v4521_v44 = vadd.f32 %v4497_v29, %v4493_v18  ;;  %v4589_v32 = vmul.f32 %v14674_v63, %v14674_v63  ;;  %v4618_v31 = vsel %vm1307_vm0, %v4597_v40, 0.0  ;;  %v17451_v29 = vld [vmem:[#allocation66_spill] sm:$0xff]  ;;  %v17452_v40 = vld [vmem:[#allocation67_spill] sm:$0xff]  ;;  %v17453_v18 = vld [vmem:[#allocation68_spill] sm:$0xff] }
 0x27d   :  { %v4582_v50 = vadd.f32 %v4581_v33, %v4580_v27  ;;  %v4635_v57 = vrot.slane %v4634_v38, 1  ;;  %v4585_v6 = vadd.f32 %v4571_v11, %v4489_v62  ;;  %v4430_v27 = vsel %vm1307_vm0, %v4409_v17, 0.0  ;;  %v17445_v11 = vld [vmem:[#allocation54_spill] sm:$0xff] }
 0x27e   :  { %v4429_v49 = vadd.f32 %v4405_v1, %v4401_v8  ;;  %v4523_v28 = vadd.f32 %v4522_v15, %v4521_v44  ;;  %v4617_v33 = vadd.f32 %v4593_v22, %v4589_v32  ;;  %v17447_v62 = vld [vmem:[#allocation58_spill] sm:$0xff]  ;;  %v17454_v15 = vld [vmem:[#allocation69_spill] sm:$0xff] }
 0x27f   :  { %v4586_v48 = vadd.f32 %v4582_v50, %v4490_v55  ;;  %v4636_v16 = vadd.f32 %v4635_v57, %v4634_v38  ;;  %v17446_v50 = vld [vmem:[#allocation57_spill] sm:$0xff]  ;;  %v17455_v44 = vld [vmem:[#allocation70_spill] sm:$0xff] }
 0x280   :  { %v4431_v38 = vadd.f32 %v4430_v27, %v4429_v49  ;;  %v4619_v23 = vadd.f32 %v4618_v31, %v4617_v33  ;;  %v4524_v55 = vrot.slane %v4523_v28, 4  ;;  %v17456_v27 = vld [vmem:[#allocation71_spill] sm:$0xff]  ;;  %v17457_v49 = vld [vmem:[#allocation72_spill] sm:$0xff]  ;;  %v17458_v33 = vld [vmem:[#allocation73_spill] sm:$0xff] }
 0x281   :  { %10544 = vmatprep.mubr.msk.f32.mxu1 %vm4386_vm2, %v4586_v48  ;;  %v4640_v25 = vadd.f32 %v4636_v16, %v4544_v37  ;;  %v17448_v37 = vld [vmem:[#allocation61_spill] sm:$0xff] }
 0x282   :  { %4779 = vmatmul.mubr.f32.vlgmr.msra.gmra.mxu1 %v4585_v6  ;;  %v4432_v42 = vrot.slane %v4431_v38, 4  ;;  %v4620_v57 = vrot.slane %v4619_v23, 4  ;;  %v4525_v48 = vadd.f32 %v4524_v55, %v4523_v28  ;;  %v4350_v55 = vld [vmem:[%s17050_s7 + $0x8] sm:$0xff] }
 0x283   :  { %4859 = vmatpush1.msra.mxu1 %v17438_v10  ;;  %10545 = vmatprep.mubr.msk.f32.mxu1 %vm4386_vm2, %v4640_v25  ;;  %v17449_v25 = vld [vmem:[#allocation62_spill] sm:$0xff] }
 0x284   :  { %4860 = vmatprep.subr.mxu1 %v17437_v53  ;;  %v4433_v16 = vadd.f32 %v4432_v42, %v4431_v38  ;;  %v4621_v6 = vadd.f32 %v4620_v57, %v4619_v23  ;;  %v4526_v10 = vrot.slane %v4525_v48, 2  ;;  %v17459_v38 = vld [vmem:[#allocation74_spill] sm:$0xff]  ;;  %v4354_v23 = vld [vmem:[%s17050_s7 + $0x28] sm:$0xff] }
 0x285   :  { %4861 = vmatpush1.msra.mxu1 %v17439_v56  ;;  %v17450_v56 = vld [vmem:[#allocation64_spill] sm:$0xff]  ;;  %4968 = vmatprep.subr.mxu0 %v4354_v23  ;;  %v4356_v42 = vld [vmem:[%s17050_s7 + $0x38] sm:$0xff] }
 0x286   :  { %4862 = vmatprep.subr.mxu1 %v17437_v53  ;;  %v4434_v5 = vrot.slane %v4433_v16, 2  ;;  %v4527_v17 = vadd.f32 %v4526_v10, %v4525_v48 }
 0x287   :  { %4863 = vmatpush1.msra.mxu1 %v17440_v24  ;;  %v4622_v24 = vrot.slane %v4621_v6, 2 }
 0x288   :  { %4864 = vmatprep.subr.mxu1 %v17437_v53  ;;  %v4528_v22 = vrot.slane %v4527_v17, 1 }
 0x289   :  { %4865 = vmatpush1.msra.mxu1 %v17441_v59  ;;  %v4435_v59 = vadd.f32 %v4434_v5, %v4433_v16  ;;  %v4623_v1 = vadd.f32 %v4622_v24, %v4621_v6 }
 0x28a   :  { %4866 = vmatprep.subr.mxu1 %v17437_v53  ;;  %v4529_v32 = vadd.f32 %v4528_v22, %v4527_v17  ;;  %v4357_v22 = vld [vmem:[%s17051_s8] sm:$0x1]  ;;  %s12705_s8 = smov 64  }
 0x28b   :  { %4867 = vmatpush1.msra.mxu1 %v17442_v61  ;;  %v4436_v61 = vrot.slane %v4435_v59, 1  ;;  %v4624_v8 = vrot.slane %v4623_v1, 1 }
 0x28c   :  { %4868 = vmatprep.subr.mxu1 %v17437_v53 }
 0x28d   :  { %4869 = vmatpush1.msra.mxu1 %v17443_v47  ;;  %v4437_v31 = vadd.f32 %v4436_v61, %v4435_v59  ;;  %v4625_v47 = vadd.f32 %v4624_v8, %v4623_v1  ;;  %v4355_v8 = vld [vmem:[%s17050_s7 + $0x30] sm:$0xff] }
 0x28e   :  { %4870 = vmatprep.subr.mxu1 %v17437_v53 }
 0x28f   :  { %4871 = vmatpush1.msra.mxu1 %v17444_v36  ;;  %v4543_v28 = vadd.f32 %v4529_v32, %v4437_v31  ;;  %v4351_v32 = vld [vmem:[%s17050_s7 + $0x10] sm:$0xff]  ;;  %v4358_v31 = vld [vmem:[%s17052_s9] sm:$0x1] }
 0x290   :  { %4872 = vmatprep.subr.mxu1 %v17437_v53 }
 0x291   :  { %4873 = vmatpush1.msra.mxu1 %v17445_v11  ;;  %v4639_v36 = vadd.f32 %v4625_v47, %v4543_v28  ;;  %v4353_v11 = vld [vmem:[%s17050_s7 + $0x20] sm:$0xff] }
 0x292   :  { %4874 = vmatprep.subr.mxu1 %v17437_v53  ;;  %4969 = vmatpush1.msra.mxu0 %v4353_v11  ;;  %v12015_v28 = vld [vmem:[%s17460_s28 + $0x220] ss:$8 sps:$4 sm:$0xff]  }
 0x293   :  { %4875 = vmatpush1.msra.mxu1 %v17446_v50  ;;  %v4349_v50 = vld [vmem:[%s17050_s7] sm:$0xff]  ;;  %4970 = vmatprep.subr.mxu0 %v4350_v55 }
 0x294   :  { %4876 = vmatprep.subr.mxu1 %v17437_v53  ;;  %4971 = vmatpush1.msra.mxu0 %v4349_v50 }
 0x295   :  { %4877 = vmatpush1.msra.mxu1 %v17447_v62  ;;  %5039 = vmatprep.subr.mxu0 %v4356_v42 }
 0x296   :  { %4878 = vmatprep.subr.mxu1 %v17437_v53 }
 0x297   :  { %4879 = vmatpush1.msra.mxu1 %v17448_v37 }
 0x298   :  { %4880 = vmatprep.subr.mxu1 %v17437_v53 }
 0x299   :  { %4881 = vmatpush1.msra.mxu1 %v17449_v25 }
 0x29a   :  { %4882 = vmatprep.subr.mxu1 %v17437_v53 }
 0x29b   :  { %4883 = vmatpush1.msra.mxu1 %v17450_v56 }
 0x29c   :  { %4884 = vmatprep.subr.mxu1 %v17437_v53 }
 0x29d   :  { %4885 = vmatpush1.msra.mxu1 %v17451_v29 }
 0x29e   :  { %4886 = vmatprep.subr.mxu1 %v17437_v53 }
 0x29f   :  { %4887 = vmatpush1.msra.mxu1 %v17452_v40 }
 0x2a0   :  { %4888 = vmatprep.subr.mxu1 %v17437_v53 }
 0x2a1   :  { %4889 = vmatpush1.msra.mxu1 %v17453_v18 }
 0x2a2   :  { %4910 = vmatprep.subr.mxu1 %v17437_v53 }
 0x2a3   :  { %4911 = vmatpush2.msra.mxu1 %v17454_v15 }
 0x2a4   :  { %4912 = vmatprep.subr.mxu1 %v17437_v53 }
 0x2a5   :  { %4913 = vmatpush2.msra.mxu1 %v17455_v44  ;;  %v4352_v44 = vld [vmem:[%s17050_s7 + $0x18] sm:$0xff] }
 0x2a6   :  { %4914 = vmatprep.subr.mxu1 %v17437_v53 }
 0x2a7   :  { %4915 = vmatpush2.msra.mxu1 %v17456_v27 }
 0x2a8   :  { %4916 = vmatprep.subr.mxu1 %v17437_v53 }
 0x2a9   :  { %4917 = vmatpush2.msra.mxu1 %v17457_v49  ;;  %v12017_v49 = vld [vmem:[%s17460_s28 + $0x224] ss:$8 sps:$4 sm:$0xff]  }
 0x2aa   :  { %4918 = vmatprep.subr.mxu1 %v17437_v53 }
 0x2ab   :  { %4919 = vmatpush2.msra.mxu1 %v17458_v33  ;;  %v12020_v33 = vld [vmem:[%s17460_s28 + $0x214] ss:$8 sps:$4 sm:$0xff]  }
 0x2ac   :  { %4920 = vmatprep.subr.mxu1 %v17437_v53 }
 0x2ad   :  { %4921 = vmatpush2.msra.mxu1 %v17459_v38  ;;  %v12023_v38 = vld [vmem:[%s17460_s28 + $0x204] ss:$8 sps:$4 sm:$0xff]  }
 0x2ae   :  { %4923 = vmatmul.mubr.f32.vlgmr.msra.gmra.mxu1 %v4639_v36  ;;  %v12018_v36 = vld [vmem:[%s17460_s28 + $0x210] ss:$8 sps:$4 sm:$0xff]  }
 0x318   :  { %v11343_v48 = vpop.f32.mrf.mxu0 }
 0x31a   :  { %v11344_v37 = vpop.f32.mrf.mxu0 }
 0x31b   :  { %v11345_v6 = vadd.f32 %v11344_v37, %v11343_v48  ;;  %v12033_v48 = vld [vmem:[%s17460_s28 + $0x320] ss:$8 sps:$4 sm:$0xff]   ;;  %v12035_v37 = vld [vmem:[%s17460_s28 + $0x324] ss:$8 sps:$4 sm:$0xff]  }
 0x31c   :  { %6247 = vmatprep.subr.bf16.mxu1 %v12035_v37  ;;  %v12087_v37 = vld [vmem:[%s17460_s28 + $0x340] ss:$8 sps:$4 sm:$0xff]  }
 0x31d   :  { %6248 = vmatpush1.bf16.msra.mxu1 %v12033_v48  ;;  %v12084_v48 = vld [vmem:[%s17460_s28 + $0x240] ss:$8 sps:$4 sm:$0xff]  }
 0x338   :  { %v11378_v16 = vpop.f32.mrf.mxu0 }
 0x33a   :  { %v11379_v10 = vpop.f32.mrf.mxu0 }
 0x33b   :  { %v11380_v56 = vadd.f32 %v11379_v10, %v11378_v16  ;;  %v12036_v16 = vld [vmem:[%s17460_s28 + $0x1c0] ss:$8 sps:$4 sm:$0xff]   ;;  %v12041_v10 = vld [vmem:[%s17460_s28 + $0x314] ss:$8 sps:$4 sm:$0xff]  }
 0x33c   :  { %6249 = vmatprep.subr.bf16.mxu1 %v12041_v10  ;;  %v12093_v10 = vld [vmem:[%s17460_s28 + $0x330] ss:$8 sps:$4 sm:$0xff]  }
 0x342   :  { %v4780_v57 = vpop.f32.mrf.mxu1 }
 0x343   :  { %v4781_v25 = vadd.f32 %v11345_v6, %v4780_v57  ;;  %v12030_v57 = vld [vmem:[%s17460_s28 + $0x1d0] ss:$8 sps:$4 sm:$0xff]   ;;  %v12038_v6 = vld [vmem:[%s17460_s28 + $0x1c4] ss:$8 sps:$4 sm:$0xff]  }
 0x344   :  { %v4782_v62 = vpop.f32.mrf.mxu1 }
 0x345   :  { %v4784_v5 = vmul.f32 0.00068587105, %v4781_v25  ;;  %v12032_v62 = vld [vmem:[%s17460_s28 + $0x1d4] ss:$8 sps:$4 sm:$0xff]   ;;  %v12039_v25 = vld [vmem:[%s17460_s28 + $0x310] ss:$8 sps:$4 sm:$0xff]  }
 0x346   :  { %6250 = vmatpush1.bf16.msra.mxu1 %v12039_v25  ;;  %v12090_v25 = vld [vmem:[%s17460_s28 + $0x230] ss:$8 sps:$4 sm:$0xff]  }
 0x347   :  { %v4929_v40 = vmul.f32 %v4784_v5, %v4784_v5 }
 0x36e   :  { %v4924_v24 = vpop.f32.mrf.mxu1 }
 0x36f   :  { %v4925_v29 = vadd.f32 %v11380_v56, %v4924_v24  ;;  %v12042_v56 = vld [vmem:[%s17460_s28 + $0x1b0] ss:$8 sps:$4 sm:$0xff]   ;;  %v12045_v24 = vld [vmem:[%s17460_s28 + $0x300] ss:$8 sps:$4 sm:$0xff]  }
 0x370   :  { %v4926_v17 = vpop.f32.mrf.mxu1 }
 0x371   :  { %v4928_v59 = vmul.f32 0.00068587105, %v4925_v29  ;;  %v12047_v29 = vld [vmem:[%s17460_s28 + $0x304] ss:$8 sps:$4 sm:$0xff]   ;;  %v12048_v17 = vld [vmem:[%s17460_s28 + $0x2a0] ss:$8 sps:$4 sm:$0xff]  }
 0x372   :  { %6251 = vmatprep.subr.bf16.mxu1 %v12047_v29 }
 0x373   :  { %v4930_v1 = vsub.f32 %v4928_v59, %v4929_v40  ;;  %6252 = vmatpush1.bf16.msra.mxu1 %v12045_v24  ;;  %v12050_v40 = vld [vmem:[%s17460_s28 + $0x2a4] ss:$8 sps:$4 sm:$0xff]   ;;  %v12051_v59 = vld [vmem:[%s17460_s28 + $0x2f0] ss:$8 sps:$4 sm:$0xff]  }
 0x374   :  { %v17461_v24 = vld [vmem:[#allocation8_spill] sm:$0xff] }
 0x375   :  { %v4931_v18 = vadd.f32 1e-05, %v4930_v1  ;;  %v12053_v1 = vld [vmem:[%s17460_s28 + $0x2f4] ss:$8 sps:$4 sm:$0xff]   ;;  %v14990_v29 = vsub.s32 0, %v17461_v24 }
 0x376   :  { %6253 = vmatprep.subr.bf16.mxu1 %v12053_v1 }
 0x377   :  { %12508 = vrsqrt.f32 %v4931_v18  ;;  %v12056_v18 = vld [vmem:[%s17460_s28 + $0x294] ss:$8 sps:$4 sm:$0xff]   ;;  %6254 = vmatpush1.bf16.msra.mxu1 %v12051_v59  ;;  %17462 = vst [vmem:[#allocation55_spill] sm:$0xff] %v14990_v29 }
 0x384   :  { %v12509_v15 = vpop.eup %12508 }
 0x385   :  { %v4933_v61 = vmul.f32 %v12509_v15, %v4357_v22  ;;  %v12054_v22 = vld [vmem:[%s17460_s28 + $0x290] ss:$8 sps:$4 sm:$0xff]   ;;  %v12059_v15 = vld [vmem:[%s17460_s28 + $0x2e4] ss:$8 sps:$4 sm:$0xff]  }
 0x386   :  { %6255 = vmatprep.subr.bf16.mxu1 %v12059_v15 }
 0x387   :  { %10546 = vmatmul.mubr.msk.f32.vlgmr.msra.gmra.mxu0 %vm4936_vm4, %v4933_v61  ;;  %v4934_v27 = vmul.f32 %v4933_v61, %v4784_v5  ;;  %v12044_v5 = vld [vmem:[%s17460_s28 + $0x1b4] ss:$8 sps:$4 sm:$0xff]  }
 0x388   :  { %5040 = vmatpush1.msra.mxu0 %v4355_v8  ;;  %5075 = vmatprep.mubr.f32.mxu0 %v17437_v53 }
 0x389   :  { %5041 = vmatprep.subr.mxu0 %v4352_v44  ;;  %v4935_v47 = vsub.f32 %v4358_v31, %v4934_v27  ;;  %v12063_v27 = vld [vmem:[%s17460_s28 + $0x2d0] ss:$8 sps:$4 sm:$0xff]   ;;  %v12068_v31 = vld [vmem:[%s17460_s28 + $0x274] ss:$8 sps:$4 sm:$0xff]  }
 0x38a   :  { %5042 = vmatpush1.msra.mxu0 %v4351_v32 }
 0x38b   :  { %5113 = vmatprep.subr.mxu0 %v4354_v23  ;;  %10547 = vmatmul.mubr.msk.f32.vlgmr.msra.gmra.mxu0 %vm4936_vm4, %v4933_v61  ;;  %v12021_v23 = vld [vmem:[%s17460_s28 + $0x200] ss:$8 sps:$4 sm:$0xff]  }
 0x38c   :  { %5114 = vmatpush1.msra.mxu0 %v4353_v11  ;;  %5149 = vmatprep.mubr.f32.mxu0 %v17437_v53  ;;  %v12026_v11 = vld [vmem:[%s17460_s28 + $0x1f4] ss:$8 sps:$4 sm:$0xff]   ;;  %v12057_v61 = vld [vmem:[%s17460_s28 + $0x2e0] ss:$8 sps:$4 sm:$0xff]  }
 0x38d   :  { %5115 = vmatprep.subr.mxu0 %v4350_v55  ;;  %v12024_v55 = vld [vmem:[%s17460_s28 + $0x1f0] ss:$8 sps:$4 sm:$0xff]   ;;  %6256 = vmatpush1.bf16.msra.mxu1 %v12057_v61 }
 0x38e   :  { %5116 = vmatpush1.msra.mxu0 %v4349_v50  ;;  %v12029_v50 = vld [vmem:[%s17460_s28 + $0x1e4] ss:$8 sps:$4 sm:$0xff]  }
 0x38f   :  { %5184 = vmatprep.subr.mxu0 %v4356_v42  ;;  %10548 = vmatmul.mubr.msk.f32.vlgmr.msra.gmra.mxu0 %vm4936_vm4, %v4935_v47  ;;  %v12027_v42 = vld [vmem:[%s17460_s28 + $0x1e0] ss:$8 sps:$4 sm:$0xff]  }
 0x390   :  { %5185 = vmatpush1.msra.mxu0 %v4355_v8  ;;  %5220 = vmatprep.mubr.f32.mxu0 %v17437_v53  ;;  %v12062_v8 = vld [vmem:[%s17460_s28 + $0x284] ss:$8 sps:$4 sm:$0xff]  }
 0x391   :  { %5186 = vmatprep.subr.mxu0 %v4352_v44  ;;  %v12065_v44 = vld [vmem:[%s17460_s28 + $0x2d4] ss:$8 sps:$4 sm:$0xff]  }
 0x392   :  { %5187 = vmatpush1.msra.mxu0 %v4351_v32  ;;  %v12060_v32 = vld [vmem:[%s17460_s28 + $0x280] ss:$8 sps:$4 sm:$0xff]   ;;  %6257 = vmatprep.subr.bf16.mxu1 %v12065_v44 }
 0x393   :  { %10549 = vmatmul.mubr.msk.f32.vlgmr.msra.gmra.mxu0 %vm4936_vm4, %v4935_v47  ;;  %6204 = vmatprep.subr.bf16.mxu0 %v12017_v49  ;;  %v12071_v47 = vld [vmem:[%s17460_s28 + $0x2c4] ss:$8 sps:$4 sm:$0xff]   ;;  %v12066_v49 = vld [vmem:[%s17460_s28 + $0x270] ss:$8 sps:$4 sm:$0xff]  }
 0x394   :  { %6205 = vmatpush1.bf16.msra.mxu0 %v12015_v28  ;;  %6258 = vmatpush1.bf16.msra.mxu1 %v12063_v27  ;;  %v12069_v28 = vld [vmem:[%s17460_s28 + $0x2c0] ss:$8 sps:$4 sm:$0xff]  }
 0x395   :  { %6206 = vmatprep.subr.bf16.mxu0 %v12020_v33  ;;  %v12074_v33 = vld [vmem:[%s17460_s28 + $0x264] ss:$8 sps:$4 sm:$0xff]   ;;  %6259 = vmatprep.subr.bf16.mxu1 %v12071_v47 }
 0x396   :  { %v17463_v44 = vld [vmem:[#allocation12_spill] sm:$0xff]  ;;  %v17465_v47 = vld [vmem:[#allocation21_spill] sm:$0xff] }
 0x397   :  { %v17464_v27 = vld [vmem:[#allocation20_spill] sm:$0xff] }
 0x398   :  { %6207 = vmatpush1.bf16.msra.mxu0 %v12018_v36  ;;  %v12077_v36 = vld [vmem:[%s17460_s28 + $0x2b4] ss:$8 sps:$4 sm:$0xff]   ;;  %6260 = vmatpush1.bf16.msra.mxu1 %v12069_v28 }
 0x399   :  { %6208 = vmatprep.subr.bf16.mxu0 %v12023_v38  ;;  %v12072_v38 = vld [vmem:[%s17460_s28 + $0x260] ss:$8 sps:$4 sm:$0xff]   ;;  %6261 = vmatprep.subr.bf16.mxu1 %v12077_v36 }
 0x39c   :  { %6209 = vmatpush1.bf16.msra.mxu0 %v12021_v23  ;;  %v12075_v23 = vld [vmem:[%s17460_s28 + $0x2b0] ss:$8 sps:$4 sm:$0xff]  }
 0x39d   :  { %6210 = vmatprep.subr.bf16.mxu0 %v12026_v11  ;;  %v12080_v11 = vld [vmem:[%s17460_s28 + $0x254] ss:$8 sps:$4 sm:$0xff]   ;;  %6262 = vmatpush1.bf16.msra.mxu1 %v12075_v23 }
 0x3a0   :  { %6211 = vmatpush1.bf16.msra.mxu0 %v12024_v55  ;;  %v12083_v55 = vld [vmem:[%s17460_s28 + $0x354] ss:$8 sps:$4 sm:$0xff]  }
 0x3a1   :  { %6212 = vmatprep.subr.bf16.mxu0 %v12029_v50  ;;  %v12078_v50 = vld [vmem:[%s17460_s28 + $0x250] ss:$8 sps:$4 sm:$0xff]   ;;  %6273 = vmatprep.subr.bf16.mxu1 %v12083_v55 }
 0x3a2   :  { %v17469_v55 = vld [vmem:[#allocation13_spill] sm:$0xff] }
 0x3a4   :  { %6213 = vmatpush1.bf16.msra.mxu0 %v12027_v42  ;;  %v12081_v42 = vld [vmem:[%s17460_s28 + $0x350] ss:$8 sps:$4 sm:$0xff]  }
 0x3a5   :  { %6214 = vmatprep.subr.bf16.mxu0 %v12032_v62  ;;  %v12089_v62 = vld [vmem:[%s17460_s28 + $0x344] ss:$8 sps:$4 sm:$0xff]   ;;  %6274 = vmatpush2.bf16.msra.mxu1 %v12081_v42 }
 0x3a6   :  { %6275 = vmatprep.subr.bf16.mxu1 %v12089_v62  ;;  %v17470_v42 = vld [vmem:[#allocation48_spill] sm:$0xff]  ;;  %v17471_v62 = vld [vmem:[#allocation22_spill] sm:$0xff] }
 0x3a8   :  { %6215 = vmatpush1.bf16.msra.mxu0 %v12030_v57  ;;  %v12086_v57 = vld [vmem:[%s17460_s28 + $0x244] ss:$8 sps:$4 sm:$0xff]  }
 0x3a9   :  { %6216 = vmatprep.subr.bf16.mxu0 %v12038_v6  ;;  %v12095_v6 = vld [vmem:[%s17460_s28 + $0x334] ss:$8 sps:$4 sm:$0xff]   ;;  %6276 = vmatpush2.bf16.msra.mxu1 %v12087_v37 }
 0x3aa   :  { %6277 = vmatprep.subr.bf16.mxu1 %v12095_v6 }
 0x3ac   :  { %6217 = vmatpush1.bf16.msra.mxu0 %v12036_v16  ;;  %v12092_v16 = vld [vmem:[%s17460_s28 + $0x234] ss:$8 sps:$4 sm:$0xff]  }
 0x3ad   :  { %6218 = vmatprep.subr.bf16.mxu0 %v12044_v5  ;;  %6278 = vmatpush2.bf16.msra.mxu1 %v12093_v10  ;;  %v12101_v5 = vld [vmem:[%s17460_s28 + $0x174] ss:$8 sps:$4 sm:$0xff]  }
 0x3b0   :  { %6219 = vmatpush1.bf16.msra.mxu0 %v12042_v56  ;;  %v12098_v56 = vld [vmem:[%s17460_s28 + $0x74] ss:$8 sps:$4 sm:$0xff]  }
 0x3b1   :  { %6220 = vmatprep.subr.bf16.mxu0 %v12050_v40  ;;  %6642 = vmatprep.subr.bf16.mxu1 %v12098_v56 }
 0x3b4   :  { %6221 = vmatpush2.bf16.msra.mxu0 %v12048_v17 }
 0x3b5   :  { %6222 = vmatprep.subr.bf16.mxu0 %v12056_v18 }
 0x3b8   :  { %6223 = vmatpush2.bf16.msra.mxu0 %v12054_v22 }
 0x3b9   :  { %6224 = vmatprep.subr.bf16.mxu0 %v12062_v8 }
 0x3bc   :  { %6225 = vmatpush2.bf16.msra.mxu0 %v12060_v32 }
 0x3bd   :  { %6226 = vmatprep.subr.bf16.mxu0 %v12068_v31 }
 0x3c0   :  { %6227 = vmatpush2.bf16.msra.mxu0 %v12066_v49 }
 0x3c1   :  { %6228 = vmatprep.subr.bf16.mxu0 %v12074_v33 }
 0x3c4   :  { %6229 = vmatpush2.bf16.msra.mxu0 %v12072_v38 }
 0x3c5   :  { %6230 = vmatprep.subr.bf16.mxu0 %v12080_v11 }
 0x3c8   :  { %6231 = vmatpush2.bf16.msra.mxu0 %v12078_v50 }
 0x3c9   :  { %6232 = vmatprep.subr.bf16.mxu0 %v12086_v57 }
 0x3cc   :  { %6233 = vmatpush2.bf16.msra.mxu0 %v12084_v48 }
 0x3cd   :  { %6234 = vmatprep.subr.bf16.mxu0 %v12092_v16 }
 0x3d0   :  { %6235 = vmatpush2.bf16.msra.mxu0 %v12090_v25 }
 0x3d1   :  { %6685 = vmatprep.subr.bf16.mxu0 %v12101_v5 }
 0x447   :  { %v5006_v17 = vpop.f32.mrf.mxu0 }
 0x448   :  { %v14993_v40 = vrot.slane %v5006_v17, %v14990_v29 }
 0x449   :  { %v5008_v59 = vpop.f32.mrf.mxu0 }
 0x44a   :  { %v14996_v1 = vrot.slane %v5008_v59, %v14990_v29  ;;  %v5295_v22 = vmul.f32 %v14993_v40, %v14059_v45  ;;  %v5299_v15 = vmul.f32 %v14993_v40, %v14089_v30  ;;  %v5303_v61 = vmul.f32 %v14993_v40, %v14117_v14  ;;  %v17466_v45 = vld [vmem:[#allocation30_spill] sm:$0xff]  ;;  %v17467_v30 = vld [vmem:[#allocation60_spill] sm:$0xff]  ;;  %v17468_v14 = vld [vmem:[#allocation39_spill] sm:$0xff] }
 0x44b   :  { %v5077_v18 = vpop.f32.mrf.mxu0  ;;  %v5243_v32 = vmul.f32 %v14993_v40, %v17463_v44  ;;  %v5247_v31 = vmul.f32 %v14993_v40, %v17464_v27  ;;  %v5251_v49 = vmul.f32 %v14993_v40, %v17465_v47  ;;  %v15021_v23 = vmul.f32 %v14993_v40, %v14521_v21 }
 0x44c   :  { %v15005_v8 = vrot.slane %v5077_v18, %v14990_v29  ;;  %v5296_v33 = vmul.f32 %v14996_v1, %v17466_v45  ;;  %v5300_v36 = vmul.f32 %v14996_v1, %v17467_v30  ;;  %v5304_v38 = vmul.f32 %v14996_v1, %v17468_v14 }
 0x44d   :  { %v5079_v28 = vpop.f32.mrf.mxu0  ;;  %v5244_v50 = vmul.f32 %v14996_v1, %v17469_v55  ;;  %v15030_v57 = vmul.f32 %v14996_v1, %v17470_v42  ;;  %v15034_v48 = vmul.f32 %v14996_v1, %v17471_v62  ;;  %v15044_v25 = vmul.f32 %v14996_v1, %v14523_v41 }
 0x44e   :  { %v15024_v11 = vrot.slane %v5079_v28, %v14990_v29  ;;  %v5297_v16 = vmul.f32 %v15005_v8, %v17400_v20  ;;  %v5301_v21 = vmul.f32 %v15005_v8, %v17401_v3  ;;  %v5305_v6 = vmul.f32 %v15005_v8, %v17397_v52 }
 0x44f   :  { %v5151_v37 = vpop.f32.mrf.mxu0  ;;  %v5245_v56 = vmul.f32 %v15005_v8, %v13900_v0  ;;  %v5249_v5 = vmul.f32 %v15005_v8, %v13908_v58  ;;  %v5253_v20 = vmul.f32 %v15005_v8, %v13921_v2  ;;  %v15063_v17 = vmul.f32 %v15005_v8, %v14674_v63 }
 0x450   :  { %v15047_v10 = vrot.slane %v5151_v37, %v14990_v29  ;;  %v5298_v52 = vmul.f32 %v15024_v11, %v14280_v26  ;;  %v5302_v41 = vmul.f32 %v15024_v11, %v14298_v39  ;;  %v5306_v24 = vmul.f32 %v15024_v11, %v17398_v34 }
 0x451   :  { %v5153_v3 = vpop.f32.mrf.mxu0  ;;  %v5246_v26 = vmul.f32 %v15024_v11, %v14562_v4  ;;  %v5250_v34 = vmul.f32 %v15024_v11, %v14567_v7  ;;  %v5254_v63 = vmul.f32 %v15024_v11, %v13929_v35 }
 0x452   :  { %v15066_v0 = vrot.slane %v5153_v3, %v14990_v29  ;;  %v5307_v58 = vadd.f32 %v5295_v22, %v15047_v10  ;;  %v5311_v2 = vadd.f32 %v5299_v15, %v15047_v10  ;;  %v5315_v39 = vadd.f32 %v5303_v61, %v15047_v10 }
 0x453   :  { %v5222_v59 = vpop.f32.mrf.mxu0  ;;  %v15078_v18 = vadd.f32 %v15047_v10, %v5243_v32  ;;  %v15087_v7 = vadd.f32 %v15047_v10, %v5247_v31  ;;  %v15090_v35 = vadd.f32 %v15047_v10, %v5251_v49 }
 0x454   :  { %v15081_v44 = vrot.slane %v5222_v59, %v14990_v29  ;;  %v5308_v22 = vadd.f32 %v5296_v33, %v15066_v0  ;;  %v5312_v15 = vadd.f32 %v5300_v36, %v15066_v0  ;;  %v5316_v4 = vadd.f32 %v5304_v38, %v15066_v0 }
 0x455   :  { %v5224_v27 = vpop.f32.mrf.mxu0  ;;  %v5319_v61 = vmax.f32 %v5307_v58, 0.0  ;;  %v5323_v47 = vmax.f32 %v5311_v2, 0.0  ;;  %v5327_v14 = vmax.f32 %v5315_v39, 0.0 }
 0x456   :  { %v15093_v32 = vrot.slane %v5224_v27, %v14990_v29  ;;  %v5309_v28 = vadd.f32 %v5297_v16, %v15081_v44  ;;  %v5313_v45 = vadd.f32 %v5301_v21, %v15081_v44  ;;  %v5317_v33 = vadd.f32 %v5305_v6, %v15081_v44  ;;  %v17472_v6 = vld [vmem:[#allocation9_spill] sm:$0xff] }
 0x457   :  { %v5320_v30 = vmax.f32 %v5308_v22, 0.0  ;;  %v5324_v36 = vmax.f32 %v5312_v15, 0.0  ;;  %v5328_v38 = vmax.f32 %v5316_v4, 0.0  ;;  %v5272_v15 = vadd.f32 %v15066_v0, %v5244_v50 }
 0x458   :  { %v5310_v55 = vadd.f32 %v5298_v52, %v15093_v32  ;;  %v5314_v31 = vadd.f32 %v5302_v41, %v15093_v32  ;;  %v5318_v49 = vadd.f32 %v5306_v24, %v15093_v32  ;;  %v5321_v42 = vmax.f32 %v5309_v28, 0.0 }
 0x459   :  { %v5325_v62 = vmax.f32 %v5313_v45, 0.0  ;;  %v5329_v37 = vmax.f32 %v5317_v33, 0.0  ;;  %v10556_v3 = vpack.c.bf16 %v5320_v30, %v5319_v61  ;;  %v10557_v58 = vpack.c.bf16 %v5324_v36, %v5323_v47 }
 0x45a   :  { %v5322_v16 = vmax.f32 %v5310_v55, 0.0  ;;  %v5326_v2 = vmax.f32 %v5314_v31, 0.0  ;;  %v5330_v21 = vmax.f32 %v5318_v49, 0.0  ;;  %v10560_v59 = vpack.c.bf16 %v5328_v38, %v5327_v14 }
 0x45b   :  { %v5519_v22 = vrot.slane %v10556_v3, %v17472_v6  ;;  %v5526_v39 = vrot.slane %v10557_v58, %v17472_v6  ;;  %v5273_v52 = vadd.f32 %v15081_v44, %v5245_v56  ;;  %v5274_v27 = vadd.f32 %v15093_v32, %v5246_v26 }
 0x45c   :  { %v10558_v41 = vpack.c.bf16 %v5322_v16, %v5321_v42  ;;  %v10559_v4 = vpack.c.bf16 %v5326_v2, %v5325_v62  ;;  %v10561_v24 = vpack.c.bf16 %v5330_v21, %v5329_v37  ;;  %v5585_v61 = vrot.slane %v10560_v59, %v17472_v6 }
 0x45d   :  { %v5276_v47 = vadd.f32 %v15066_v0, %v15030_v57  ;;  %v5277_v28 = vadd.f32 %v15081_v44, %v5249_v5  ;;  %v5278_v45 = vadd.f32 %v15093_v32, %v5250_v34  ;;  %v5280_v30 = vadd.f32 %v15066_v0, %v15034_v48 }
 0x45e   :  { %v5533_v33 = vrot.slane %v10558_v41, %v17472_v6  ;;  %v5540_v50 = vrot.slane %v10559_v4, %v17472_v6  ;;  %v5592_v56 = vrot.slane %v10561_v24, %v17472_v6  ;;  %v5281_v26 = vadd.f32 %v15081_v44, %v5253_v20 }
 0x45f   :  { %v5282_v36 = vadd.f32 %v15093_v32, %v5254_v63  ;;  %v5283_v14 = vmax.f32 %v15078_v18, 0.0  ;;  %v5284_v57 = vmax.f32 %v5272_v15, 0.0  ;;  %v5285_v49 = vmax.f32 %v5273_v52, 0.0 }
 0x460   :  { %v5541_v38 = vcombine.low %v5519_v22, %v5533_v33  ;;  %v5542_v5 = vcombine.high %v5519_v22, %v5533_v33  ;;  %v5543_v55 = vcombine.low %v5526_v39, %v5540_v50  ;;  %v5544_v34 = vcombine.high %v5526_v39, %v5540_v50 }
 0x461   :  { %v5593_v31 = vcombine.low %v5585_v61, %v5592_v56  ;;  %v5286_v42 = vmax.f32 %v5274_v27, 0.0  ;;  %v5287_v62 = vmax.f32 %v15087_v7, 0.0  ;;  %v5288_v3 = vmax.f32 %v5276_v47, 0.0 }
 0x462   :  { %v15121_v37 = vrot.slane %v5541_v38, %v17472_v6  ;;  %v15124_v48 = vrot.slane %v5543_v55, %v17472_v6  ;;  %v15127_v20 = vrot.slane %v5542_v5, %v17472_v6  ;;  %v15130_v63 = vrot.slane %v5544_v34, %v17472_v6 }
 0x463   :  { %v15133_v18 = vrot.slane %v5593_v31, %v17472_v6  ;;  %v5289_v58 = vmax.f32 %v5277_v28, 0.0  ;;  %v5290_v16 = vmax.f32 %v5278_v45, 0.0  ;;  %v5292_v15 = vmax.f32 %v5280_v30, 0.0 }
 0x464   :  { %v15137_v7 = vcombine.high %v15124_v48, %v15124_v48  ;;  %v15141_v2 = vcombine.high %v15130_v63, %v15130_v63  ;;  %v5610_v21 = vunpack.i.h.s16 %v15124_v48  ;;  %v5612_v59 = vunpack.i.h.s16 %v15130_v63 }
 0x465   :  { %v5860_v22 = vcombine.low %v15121_v37, %v15127_v20  ;;  %v10626_v39 = vcombine.high %v15121_v37, %v15127_v20  ;;  %v5294_v52 = vmax.f32 %v5282_v36, 0.0  ;;  %v10550_v28 = vpack.c.bf16 %v5284_v57, %v5283_v14 }
 0x466   :  { %v5614_v41 = vunpack.i.h.s16 %v15137_v7  ;;  %v5616_v4 = vunpack.i.h.s16 %v15141_v2  ;;  %v10622_v24 = vpack.i.b16 %v15130_v63, %v5610_v21  ;;  %v10623_v27 = vpack.i.b16 %v15137_v7, %v5612_v59 }
 0x467   :  { %v5870_v61 = vrot.slane %v5860_v22, %v17472_v6  ;;  %v5877_v47 = vrot.slane %v10626_v39, %v17472_v6  ;;  %v10551_v45 = vpack.c.bf16 %v5288_v3, %v5287_v62  ;;  %v10552_v30 = vpack.c.bf16 %v5286_v42, %v5285_v49 }
 0x468   :  { %v10624_v33 = vpack.i.b16 %v15141_v2, %v5614_v41  ;;  %v10625_v50 = vpack.i.b16 %v15133_v18, %v5616_v4  ;;  %v5862_v56 = vcombine.low %v10622_v24, %v10623_v27  ;;  %v5291_v5 = vmax.f32 %v15090_v35, 0.0 }
 0x469   :  { %v5892_v36 = vcombine.low %v5870_v61, %v5877_v47  ;;  %v5893_v38 = vcombine.high %v5870_v61, %v5877_v47  ;;  %v10553_v55 = vpack.c.bf16 %v5290_v16, %v5289_v58  ;;  %v5293_v31 = vmax.f32 %v5281_v26, 0.0 }
 0x46a   :  { %v5863_v34 = vcombine.low %v10624_v33, %v10625_v50  ;;  %v5393_v21 = vrot.slane %v10550_v28, %v17472_v6  ;;  %v5407_v59 = vrot.slane %v10552_v30, %v17472_v6  ;;  %v5884_v14 = vrot.slane %v5862_v56, %v17472_v6 }
 0x46b   :  { %v5400_v57 = vrot.slane %v10551_v45, %v17472_v6  ;;  %v5414_v62 = vrot.slane %v10553_v55, %v17472_v6  ;;  %v10554_v3 = vpack.c.bf16 %v5292_v15, %v5291_v5  ;;  %v10555_v39 = vpack.c.bf16 %v5294_v52, %v5293_v31  ;;  %v12099_v31 = vld [vmem:[%s17460_s28 + $0x170] ss:$8 sps:$4 sm:$0xff]  }
 0x46c   :  { %v5891_v49 = vrot.slane %v5863_v34, %v17472_v6  ;;  %v5415_v42 = vcombine.low %v5393_v21, %v5407_v59  ;;  %v5416_v22 = vcombine.high %v5393_v21, %v5407_v59  ;;  %v5909_v35 = vrot.slane %v5893_v38, %v17472_v6  ;;  %v12096_v34 = vld [vmem:[%s17460_s28 + $0x70] ss:$8 sps:$4 sm:$0xff]  }
 0x46d   :  { %v5902_v26 = vrot.slane %v5892_v36, %v17472_v6  ;;  %v5417_v58 = vcombine.low %v5400_v57, %v5414_v62  ;;  %v5418_v16 = vcombine.high %v5400_v57, %v5414_v62  ;;  %v5459_v52 = vrot.slane %v10554_v3, %v17472_v6 }
 0x46e   :  { %v5894_v41 = vcombine.low %v5884_v14, %v5891_v49  ;;  %v5895_v4 = vcombine.high %v5884_v14, %v5891_v49  ;;  %v15167_v24 = vrot.slane %v5415_v42, %v17472_v6  ;;  %v15170_v27 = vrot.slane %v5416_v22, %v17472_v6  ;;  %v12104_v49 = vld [vmem:[%s17460_s28 + $0x64] ss:$8 sps:$4 sm:$0xff]  }
 0x46f   :  { %v15173_v15 = vrot.slane %v5417_v58, %v17472_v6  ;;  %v15176_v61 = vrot.slane %v5418_v16, %v17472_v6  ;;  %v5466_v47 = vrot.slane %v10555_v39, %v17472_v6  ;;  %v12107_v42 = vld [vmem:[%s17460_s28 + $0x164] ss:$8 sps:$4 sm:$0xff]  }
 0x470   :  { %v5923_v28 = vrot.slane %v5895_v4, %v17472_v6  ;;  %v5916_v45 = vrot.slane %v5894_v41, %v17472_v6  ;;  %v6298_v33 = vcombine.low %v15167_v24, %v15170_v27  ;;  %v10686_v50 = vcombine.high %v15167_v24, %v15170_v27  ;;  %v12102_v41 = vld [vmem:[%s17460_s28 + $0x60] ss:$8 sps:$4 sm:$0xff]  }
 0x471   :  { %v15188_v56 = vcombine.high %v15173_v15, %v15173_v15  ;;  %v15192_v30 = vcombine.high %v15176_v61, %v15176_v61  ;;  %v5467_v36 = vcombine.low %v5459_v52, %v5466_v47  ;;  %v5484_v38 = vunpack.i.h.s16 %v15173_v15  ;;  %v12105_v4 = vld [vmem:[%s17460_s28 + $0x160] ss:$8 sps:$4 sm:$0xff]  }
 0x472   :  { %v5926_v5 = vcombine.low %v5909_v35, %v5923_v28  ;;  %v5927_v55 = vcombine.high %v5909_v35, %v5923_v28  ;;  %v5924_v21 = vcombine.low %v5902_v26, %v5916_v45  ;;  %v5925_v59 = vcombine.high %v5902_v26, %v5916_v45 }
 0x473   :  { %v15202_v14 = vrot.slane %v5467_v36, %v17472_v6  ;;  %v5486_v57 = vunpack.i.h.s16 %v15176_v61  ;;  %v5488_v62 = vunpack.i.h.s16 %v15188_v56  ;;  %v5490_v3 = vunpack.i.h.s16 %v15192_v30  ;;  %v12113_v36 = vld [vmem:[%s17460_s28 + $0x154] ss:$8 sps:$4 sm:$0xff]  }
 0x474   :  { %6236 = vmatprep.mubr.bf16.mxu0 %v5926_v5  ;;  %10681 = vmatprep.mubr.msk.bf16.mxu1 %vm4386_vm2, %v5927_v55  ;;  %v10682_v22 = vpack.i.b16 %v15176_v61, %v5484_v38  ;;  %v15216_v39 = vrot.slane %v6298_v33, %v17472_v6  ;;  %v15219_v35 = vrot.slane %v10686_v50, %v17472_v6  ;;  %v12110_v50 = vld [vmem:[%s17460_s28 + $0x54] ss:$8 sps:$4 sm:$0xff]  }
 0x475   :  { %6237 = vmatmul.mubr.bf16.vlgmr.msra.gmra.mxu0 %v5924_v21  ;;  %6280 = vmatmul.mubr.bf16.vlgmr.msra.gmra.mxu1 %v5925_v59  ;;  %v10683_v26 = vpack.i.b16 %v15188_v56, %v5486_v57  ;;  %v10684_v58 = vpack.i.b16 %v15192_v30, %v5488_v62  ;;  %v10685_v16 = vpack.i.b16 %v15202_v14, %v5490_v3 }
 0x476   :  { %6643 = vmatpush1.bf16.msra.mxu1 %v12096_v34  ;;  %6686 = vmatpush1.bf16.msra.mxu0 %v12099_v31  ;;  %v5334_v52 = vmul.f32 %v15024_v11, %v14660_v9  ;;  %v5335_v47 = vmul.f32 %v14993_v40, %v14514_v19  ;;  %v5336_v28 = vmul.f32 %v14996_v1, %v14519_v43 }
 0x477   :  { %v6300_v45 = vcombine.low %v10682_v22, %v10683_v26  ;;  %v6301_v33 = vcombine.low %v10684_v58, %v10685_v16  ;;  %6644 = vmatprep.subr.bf16.mxu1 %v12104_v49  ;;  %6687 = vmatprep.subr.bf16.mxu0 %v12107_v42  ;;  %v5337_v9 = vmul.f32 %v15005_v8, %v14666_v51  ;;  %v12114_v49 = vld [vmem:[%s17460_s28 + $0x40] ss:$8 sps:$4 sm:$0xff]  }
 0x478   :  { %v6331_v19 = vcombine.high %v15216_v39, %v15219_v35  ;;  %v5338_v43 = vmul.f32 %v15024_v11, %v14671_v13  ;;  %v5339_v38 = vmul.f32 %v14993_v40, %v14526_v46  ;;  %v5340_v5 = vmul.f32 %v14996_v1, %v14534_v54  ;;  %v12108_v46 = vld [vmem:[%s17460_s28 + $0x50] ss:$8 sps:$4 sm:$0xff]   ;;  %v12116_v1 = vld [vmem:[%s17460_s28 + $0x44] ss:$8 sps:$4 sm:$0xff]   ;;  %v12117_v22 = vld [vmem:[%s17460_s28 + $0x140] ss:$8 sps:$4 sm:$0xff]  }
 0x479   :  { %v15253_v55 = vrot.slane %v6300_v45, %v17472_v6  ;;  %v15256_v34 = vrot.slane %v6301_v33, %v17472_v6  ;;  %v5341_v51 = vmul.f32 %v15005_v8, %v14684_v60  ;;  %v5342_v31 = vmul.f32 %v15024_v11, %v14695_v12  ;;  %v12111_v54 = vld [vmem:[%s17460_s28 + $0x150] ss:$8 sps:$4 sm:$0xff]   ;;  %v12119_v8 = vld [vmem:[%s17460_s28 + $0x144] ss:$8 sps:$4 sm:$0xff]  }
 0x47a   :  { %6645 = vmatpush1.bf16.msra.mxu1 %v12102_v41  ;;  %6688 = vmatpush1.bf16.msra.mxu0 %v12105_v4  ;;  %v5343_v13 = vadd.f32 %v15021_v23, %v15047_v10  ;;  %v5344_v40 = vadd.f32 %v15044_v25, %v15066_v0  ;;  %v5346_v60 = vadd.f32 %v5334_v52, %v15093_v32 }
 0x47b   :  { %v6333_v12 = vcombine.high %v15253_v55, %v15256_v34  ;;  %6646 = vmatprep.subr.bf16.mxu1 %v12110_v50  ;;  %6689 = vmatprep.subr.bf16.mxu0 %v12113_v36  ;;  %v5345_v23 = vadd.f32 %v15063_v17, %v15081_v44  ;;  %v5347_v11 = vadd.f32 %v5335_v47, %v15047_v10 }
 0x47c   :  { %v5348_v25 = vadd.f32 %v5336_v28, %v15066_v0  ;;  %v5349_v21 = vadd.f32 %v5337_v9, %v15081_v44  ;;  %v5350_v59 = vadd.f32 %v5338_v43, %v15093_v32  ;;  %v5351_v57 = vadd.f32 %v5339_v38, %v15047_v10  ;;  %v12120_v43 = vld [vmem:[%s17460_s28 + $0x30] ss:$8 sps:$4 sm:$0xff]  }
 0x47d   :  { %v6347_v62 = vrot.slane %v6331_v19, %v17472_v6  ;;  %v6361_v3 = vrot.slane %v6333_v12, %v17472_v6  ;;  %v5352_v17 = vadd.f32 %v5340_v5, %v15066_v0  ;;  %v5353_v42 = vadd.f32 %v5341_v51, %v15081_v44  ;;  %v12122_v0 = vld [vmem:[%s17460_s28 + $0x34] ss:$8 sps:$4 sm:$0xff]   ;;  %v12123_v38 = vld [vmem:[%s17460_s28 + $0x130] ss:$8 sps:$4 sm:$0xff]  }
 0x47e   :  { %6647 = vmatpush1.bf16.msra.mxu1 %v12108_v46  ;;  %6690 = vmatpush1.bf16.msra.mxu0 %v12111_v54  ;;  %v5354_v10 = vadd.f32 %v5342_v31, %v15093_v32  ;;  %v5355_v26 = vmax.f32 %v5343_v13, 0.0  ;;  %v5356_v58 = vmax.f32 %v5344_v40, 0.0  ;;  %v5358_v16 = vmax.f32 %v5346_v60, 0.0  ;;  %v12125_v44 = vld [vmem:[%s17460_s28 + $0x134] ss:$8 sps:$4 sm:$0xff]  }
 0x47f   :  { %v6364_v41 = vcombine.low %v6347_v62, %v6361_v3  ;;  %v6365_v4 = vcombine.high %v6347_v62, %v6361_v3  ;;  %6648 = vmatprep.subr.bf16.mxu1 %v12116_v1  ;;  %6691 = vmatprep.subr.bf16.mxu0 %v12119_v8  ;;  %v5357_v52 = vmax.f32 %v5345_v23, 0.0  ;;  %v5359_v47 = vmax.f32 %v5347_v11, 0.0  ;;  %v12128_v46 = vld [vmem:[%s17460_s28 + $0x24] ss:$8 sps:$4 sm:$0xff]  }
 0x480   :  { %v5360_v28 = vmax.f32 %v5348_v25, 0.0  ;;  %v5361_v45 = vmax.f32 %v5349_v21, 0.0  ;;  %v5362_v32 = vmax.f32 %v5350_v59, 0.0  ;;  %v5363_v33 = vmax.f32 %v5351_v57, 0.0  ;;  %v12131_v54 = vld [vmem:[%s17460_s28 + $0x124] ss:$8 sps:$4 sm:$0xff]  }
 0x481   :  { %6674 = vmatprep.mubr.bf16.mxu1 %v6364_v41  ;;  %10741 = vmatprep.mubr.msk.bf16.mxu0 %vm4386_vm2, %v6365_v4  ;;  %v5364_v50 = vmax.f32 %v5352_v17, 0.0  ;;  %v5365_v36 = vmax.f32 %v5353_v42, 0.0  ;;  %v5366_v9 = vmax.f32 %v5354_v10, 0.0  ;;  %v10562_v19 = vpack.c.bf16 %v5356_v58, %v5355_v26  ;;  %v12126_v59 = vld [vmem:[%s17460_s28 + $0x20] ss:$8 sps:$4 sm:$0xff]  }
 0x482   :  { %6649 = vmatpush1.bf16.msra.mxu1 %v12114_v49  ;;  %6692 = vmatpush1.bf16.msra.mxu0 %v12117_v22  ;;  %v10563_v5 = vpack.c.bf16 %v5360_v28, %v5359_v47  ;;  %v10564_v51 = vpack.c.bf16 %v5358_v16, %v5357_v52  ;;  %v10565_v31 = vpack.c.bf16 %v5362_v32, %v5361_v45  ;;  %v5476_v8 = vunpack.i.h.s16 %v15167_v24  ;;  %v12129_v57 = vld [vmem:[%s17460_s28 + $0x120] ss:$8 sps:$4 sm:$0xff]   ;;  %v12137_v49 = vld [vmem:[%s17460_s28 + $0x114] ss:$8 sps:$4 sm:$0xff]   ;;  %v12132_v47 = vld [vmem:[%s17460_s28 + $0x10] ss:$8 sps:$4 sm:$0xff]  }
 0x483   :  { %6650 = vmatprep.subr.bf16.mxu1 %v12122_v0  ;;  %6693 = vmatprep.subr.bf16.mxu0 %v12125_v44  ;;  %v10566_v13 = vpack.c.bf16 %v5364_v50, %v5363_v33  ;;  %v10567_v40 = vpack.c.bf16 %v5366_v9, %v5365_v36  ;;  %v5447_v11 = vcombine.high %v15167_v24, %v15167_v24  ;;  %v5478_v21 = vunpack.i.h.s16 %v15170_v27  ;;  %v12134_v24 = vld [vmem:[%s17460_s28 + $0x14] ss:$8 sps:$4 sm:$0xff]   ;;  %v12135_v28 = vld [vmem:[%s17460_s28 + $0x110] ss:$8 sps:$4 sm:$0xff]   ;;  %v12143_v33 = vld [vmem:[%s17460_s28 + $0x104] ss:$8 sps:$4 sm:$0xff]  }
 0x484   :  { %v5652_v60 = vrot.slane %v10563_v5, %v17472_v6  ;;  %v5659_v12 = vrot.slane %v10564_v51, %v17472_v6  ;;  %v5666_v1 = vrot.slane %v10565_v31, %v17472_v6  ;;  %v5449_v25 = vcombine.high %v15170_v27, %v15170_v27 }
 0x485   :  { %v5718_v23 = vrot.slane %v10567_v40, %v17472_v6  ;;  %v5645_v62 = vrot.slane %v10562_v19, %v17472_v6  ;;  %v5711_v42 = vrot.slane %v10566_v13, %v17472_v6  ;;  %v5480_v22 = vunpack.i.h.s16 %v5447_v11  ;;  %v12141_v13 = vld [vmem:[%s17460_s28 + $0x100] ss:$8 sps:$4 sm:$0xff]  }
 0x486   :  { %6651 = vmatpush1.bf16.msra.mxu1 %v12120_v43  ;;  %6694 = vmatpush1.bf16.msra.mxu0 %v12123_v38  ;;  %v5669_v3 = vcombine.low %v5652_v60, %v5666_v1  ;;  %v5670_v17 = vcombine.high %v5652_v60, %v5666_v1  ;;  %v5482_v10 = vunpack.i.h.s16 %v5449_v25  ;;  %v10910_v41 = vpack.i.b16 %v15170_v27, %v5476_v8  ;;  %v12140_v27 = vld [vmem:[%s17460_s28 + $0x4] ss:$8 sps:$4 sm:$0xff]  }
 0x487   :  { %6652 = vmatprep.subr.bf16.mxu1 %v12128_v46  ;;  %6695 = vmatprep.subr.bf16.mxu0 %v12131_v54  ;;  %v5667_v26 = vcombine.low %v5645_v62, %v5659_v12  ;;  %v5668_v58 = vcombine.high %v5645_v62, %v5659_v12  ;;  %v5719_v0 = vcombine.low %v5711_v42, %v5718_v23  ;;  %v12146_v12 = vld [vmem:[%s17460_s28 + $0xf4] ss:$8 sps:$4 sm:$0xff]   ;;  %v5602_v23 = vunpack.i.h.s16 %v15121_v37  ;;  %v12152_v42 = vld [vmem:[%s17460_s28 + $0xe4] ss:$8 sps:$4 sm:$0xff]  }
 0x488   :  { %v5684_v16 = vrot.slane %v5669_v3, %v17472_v6  ;;  %v5698_v4 = vrot.slane %v5670_v17, %v17472_v6  ;;  %v10911_v44 = vpack.i.b16 %v5447_v11, %v5478_v21  ;;  %v10912_v52 = vpack.i.b16 %v5449_v25, %v5480_v22  ;;  %v12155_v22 = vld [vmem:[%s17460_s28 + $0x194] ss:$8 sps:$4 sm:$0xff]  }
 0x489   :  { %v10913_v9 = vpack.i.b16 %v15173_v15, %v5482_v10  ;;  %v15359_v43 = vrot.slane %v5667_v26, %v17472_v6  ;;  %v15362_v38 = vrot.slane %v5668_v58, %v17472_v6  ;;  %v5726_v51 = vrot.slane %v5719_v0, %v17472_v6  ;;  %v12138_v15 = vld [vmem:[%s17460_s28] ss:$8 sps:$4 sm:$0xff]  }
 0x48a   :  { %6653 = vmatpush1.bf16.msra.mxu1 %v12126_v59  ;;  %6696 = vmatpush1.bf16.msra.mxu0 %v12129_v57  ;;  %v5700_v45 = vcombine.high %v5684_v16, %v5684_v16  ;;  %v5735_v32 = vunpack.i.h.s16 %v5684_v16  ;;  %v5702_v50 = vcombine.high %v5698_v4, %v5698_v4  ;;  %v5737_v36 = vunpack.i.h.s16 %v5698_v4 }
 0x48b   :  { %6654 = vmatprep.subr.bf16.mxu1 %v12134_v24  ;;  %6697 = vmatprep.subr.bf16.mxu0 %v12137_v49  ;;  %v7288_v19 = vcombine.low %v10910_v41, %v10911_v44  ;;  %v7289_v46 = vcombine.low %v10912_v52, %v10913_v9  ;;  %v7290_v54 = vcombine.low %v15176_v61, %v15188_v56  ;;  %v12149_v61 = vld [vmem:[%s17460_s28 + $0x1a4] ss:$8 sps:$4 sm:$0xff]   ;;  %v5604_v17 = vunpack.i.h.s16 %v15127_v20 }
 0x48c   :  { %v5739_v5 = vunpack.i.h.s16 %v5700_v45  ;;  %v5741_v31 = vunpack.i.h.s16 %v5702_v50  ;;  %v10796_v40 = vpack.i.b16 %v5698_v4, %v5735_v32  ;;  %v10797_v56 = vpack.i.b16 %v5700_v45, %v5737_v36  ;;  %v12153_v45 = vld [vmem:[%s17460_s28 + $0x190] ss:$8 sps:$4 sm:$0xff]   ;;  %v12158_v36 = vld [vmem:[%s17460_s28 + $0xd4] ss:$8 sps:$4 sm:$0xff]   ;;  %v12161_v9 = vld [vmem:[%s17460_s28 + $0x184] ss:$8 sps:$4 sm:$0xff]  }
 0x48d   :  { %v7291_v8 = vcombine.low %v15192_v30, %v15202_v14  ;;  %v6332_v11 = vcombine.low %v15253_v55, %v15256_v34  ;;  %v6791_v25 = vcombine.low %v15359_v43, %v15362_v38  ;;  %v7298_v21 = vrot.slane %v7288_v19, %v17472_v6  ;;  %v12144_v14 = vld [vmem:[%s17460_s28 + $0xf0] ss:$8 sps:$4 sm:$0xff]   ;;  %v12147_v55 = vld [vmem:[%s17460_s28 + $0x1a0] ss:$8 sps:$4 sm:$0xff]  }
 0x48e   :  { %6655 = vmatpush1.bf16.msra.mxu1 %v12132_v47  ;;  %6698 = vmatpush1.bf16.msra.mxu0 %v12135_v28  ;;  %v10798_v60 = vpack.i.b16 %v5702_v50, %v5739_v5  ;;  %v10799_v1 = vpack.i.b16 %v5726_v51, %v5741_v31  ;;  %v7305_v59 = vrot.slane %v7289_v46, %v17472_v6  ;;  %v12150_v28 = vld [vmem:[%s17460_s28 + $0xe0] ss:$8 sps:$4 sm:$0xff]  }
 0x48f   :  { %6656 = vmatprep.subr.bf16.mxu1 %v12140_v27  ;;  %6699 = vmatprep.subr.bf16.mxu0 %v12143_v33  ;;  %v10800_v57 = vcombine.high %v15359_v43, %v15362_v38  ;;  %v7312_v3 = vrot.slane %v7290_v54, %v17472_v6  ;;  %v7319_v30 = vrot.slane %v7291_v8, %v17472_v6 }
 0x490   :  { %v6794_v62 = vcombine.low %v10798_v60, %v10799_v1  ;;  %v7320_v34 = vcombine.low %v7298_v21, %v7305_v59  ;;  %v7321_v24 = vcombine.high %v7298_v21, %v7305_v59  ;;  %v5573_v49 = vcombine.high %v15121_v37, %v15121_v37 }
 0x491   :  { %v6793_v10 = vcombine.low %v10796_v40, %v10797_v56  ;;  %v7322_v26 = vcombine.low %v7312_v3, %v7319_v30  ;;  %v7323_v58 = vcombine.high %v7312_v3, %v7319_v30  ;;  %v5575_v41 = vcombine.high %v15127_v20, %v15127_v20  ;;  %v12170_v3 = vld [vmem:[%s17460_s28 + $0xb4] ss:$8 sps:$4 sm:$0xff]  }
 0x492   :  { %6657 = vmatpush1.bf16.msra.mxu1 %v12138_v15  ;;  %6700 = vmatpush1.bf16.msra.mxu0 %v12141_v13  ;;  %v15408_v16 = vrot.slane %v7321_v24, %v17472_v6  ;;  %v15411_v37 = vrot.slane %v7320_v34, %v17472_v6  ;;  %v5606_v4 = vunpack.i.h.s16 %v5573_v49  ;;  %v15416_v0 = vrot.slane %v6791_v25, %v17472_v6  ;;  %v12156_v15 = vld [vmem:[%s17460_s28 + $0xd0] ss:$8 sps:$4 sm:$0xff]   ;;  %v12159_v13 = vld [vmem:[%s17460_s28 + $0x180] ss:$8 sps:$4 sm:$0xff]  }
 0x493   :  { %6658 = vmatprep.subr.bf16.mxu1 %v12146_v12  ;;  %6711 = vmatprep.subr.bf16.mxu0 %v12149_v61  ;;  %v15419_v44 = vrot.slane %v6794_v62, %v17472_v6  ;;  %v15422_v52 = vrot.slane %v7323_v58, %v17472_v6  ;;  %v15425_v47 = vrot.slane %v7322_v26, %v17472_v6  ;;  %v5608_v32 = vunpack.i.h.s16 %v5575_v41  ;;  %v12167_v12 = vld [vmem:[%s17460_s28 + $0x3d4] ss:$8 sps:$4 sm:$0xff]   ;;  %v12176_v58 = vld [vmem:[%s17460_s28 + $0xa4] ss:$8 sps:$4 sm:$0xff]  }
 0x494   :  { %v11023_v27 = vpack.i.b16 %v15127_v20, %v5602_v23  ;;  %v11024_v33 = vpack.i.b16 %v5573_v49, %v5604_v17  ;;  %v11025_v50 = vpack.i.b16 %v5575_v41, %v5606_v4  ;;  %v15441_v19 = vrot.slane %v10800_v57, %v17472_v6  ;;  %v12162_v23 = vld [vmem:[%s17460_s28 + $0xc0] ss:$8 sps:$4 sm:$0xff]   ;;  %v12179_v41 = vld [vmem:[%s17460_s28 + $0x3b4] ss:$8 sps:$4 sm:$0xff]  }
 0x495   :  { %v15444_v43 = vrot.slane %v6793_v10, %v17472_v6  ;;  %v7354_v20 = vcombine.low %v15408_v16, %v15422_v52  ;;  %v7355_v38 = vcombine.high %v15408_v16, %v15422_v52  ;;  %v7353_v5 = vcombine.high %v15411_v37, %v15425_v47  ;;  %v12270_v16 = vld [vmem:[%s17460_s28 + $0x560] ss:$8 sps:$4 sm:$0xff]  }
 0x496   :  { %6659 = vmatpush2.bf16.msra.mxu1 %v12144_v14  ;;  %6712 = vmatpush2.bf16.msra.mxu0 %v12147_v55  ;;  %v11026_v51 = vpack.i.b16 %v15124_v48, %v5608_v32  ;;  %v7785_v31 = vcombine.low %v11023_v27, %v11024_v33  ;;  %v6330_v46 = vcombine.low %v15216_v39, %v15219_v35  ;;  %v12164_v35 = vld [vmem:[%s17460_s28 + $0xc4] ss:$8 sps:$4 sm:$0xff]   ;;  %v12177_v32 = vld [vmem:[%s17460_s28 + $0x3b0] ss:$8 sps:$4 sm:$0xff]   ;;  %v12182_v27 = vld [vmem:[%s17460_s28 + $0x94] ss:$8 sps:$4 sm:$0xff]  }
 0x497   :  { %6660 = vmatprep.subr.bf16.mxu1 %v12152_v42  ;;  %6713 = vmatprep.subr.bf16.mxu0 %v12155_v22  ;;  %v6826_v54 = vcombine.high %v15444_v43, %v15419_v44  ;;  %v7787_v48 = vcombine.low %v15130_v63, %v15137_v7  ;;  %v7788_v39 = vcombine.low %v15141_v2, %v15133_v18  ;;  %v12173_v14 = vld [vmem:[%s17460_s28 + $0x3c4] ss:$8 sps:$4 sm:$0xff]   ;;  %v12168_v42 = vld [vmem:[%s17460_s28 + $0xb0] ss:$8 sps:$4 sm:$0xff]   ;;  %v12171_v22 = vld [vmem:[%s17460_s28 + $0x3c0] ss:$8 sps:$4 sm:$0xff]  }
 0x498   :  { %v7786_v40 = vcombine.low %v11025_v50, %v11026_v51  ;;  %v15471_v60 = vrot.slane %v6332_v11, %v17472_v6  ;;  %v6824_v61 = vcombine.high %v15416_v0, %v15441_v19  ;;  %v7352_v63 = vcombine.low %v15411_v37, %v15425_v47  ;;  %v12165_v11 = vld [vmem:[%s17460_s28 + $0x3d0] ss:$8 sps:$4 sm:$0xff]   ;;  %v12185_v33 = vld [vmem:[%s17460_s28 + $0x3a4] ss:$8 sps:$4 sm:$0xff]   ;;  %v12191_v51 = vld [vmem:[%s17460_s28 + $0x394] ss:$8 sps:$4 sm:$0xff]  }
 0x499   :  { %v7795_v18 = vrot.slane %v7785_v31, %v17472_v6  ;;  %v7809_v2 = vrot.slane %v7787_v48, %v17472_v6  ;;  %v7816_v56 = vrot.slane %v7788_v39, %v17472_v6  ;;  %v15485_v1 = vrot.slane %v6330_v46, %v17472_v6  ;;  %v12180_v50 = vld [vmem:[%s17460_s28 + $0x90] ss:$8 sps:$4 sm:$0xff]   ;;  %v12186_v31 = vld [vmem:[%s17460_s28 + $0x80] ss:$8 sps:$4 sm:$0xff]   ;;  %v12200_v39 = vld [vmem:[%s17460_s28 + $0x374] ss:$8 sps:$4 sm:$0xff]  }
 0x49a   :  { %6661 = vmatpush2.bf16.msra.mxu1 %v12150_v28  ;;  %6714 = vmatpush2.bf16.msra.mxu0 %v12153_v45  ;;  %v7802_v7 = vrot.slane %v7786_v40, %v17472_v6  ;;  %v15488_v8 = vrot.slane %v6826_v54, %v17472_v6  ;;  %v15499_v62 = vrot.slane %v6824_v61, %v17472_v6  ;;  %v12174_v45 = vld [vmem:[%s17460_s28 + $0xa0] ss:$8 sps:$4 sm:$0xff]   ;;  %v12189_v46 = vld [vmem:[%s17460_s28 + $0x390] ss:$8 sps:$4 sm:$0xff]   ;;  %v12194_v54 = vld [vmem:[%s17460_s28 + $0x384] ss:$8 sps:$4 sm:$0xff]  }
 0x49b   :  { %6662 = vmatprep.subr.bf16.mxu1 %v12158_v36  ;;  %6715 = vmatprep.subr.bf16.mxu0 %v12161_v9  ;;  %v7819_v59 = vcombine.low %v7809_v2, %v7816_v56  ;;  %v6363_v57 = vcombine.high %v15485_v1, %v15471_v60  ;;  %v7820_v30 = vcombine.high %v7809_v2, %v7816_v56  ;;  %v12183_v36 = vld [vmem:[%s17460_s28 + $0x3a0] ss:$8 sps:$4 sm:$0xff]   ;;  %v12188_v9 = vld [vmem:[%s17460_s28 + $0x84] ss:$8 sps:$4 sm:$0xff]   ;;  %v12195_v40 = vld [vmem:[%s17460_s28 + $0x4d0] ss:$8 sps:$4 sm:$0xff]  }
 0x49c   :  { %v7817_v25 = vcombine.low %v7795_v18, %v7802_v7  ;;  %v7818_v21 = vcombine.high %v7795_v18, %v7802_v7  ;;  %v6857_v49 = vcombine.low %v15499_v62, %v15488_v8  ;;  %v6362_v48 = vcombine.low %v15485_v1, %v15471_v60  ;;  %v12198_v60 = vld [vmem:[%s17460_s28 + $0x370] ss:$8 sps:$4 sm:$0xff]   ;;  %v12201_v61 = vld [vmem:[%s17460_s28 + $0x4c0] ss:$8 sps:$4 sm:$0xff]   ;;  %v12206_v18 = vld [vmem:[%s17460_s28 + $0x364] ss:$8 sps:$4 sm:$0xff]  }
 0x49d   :  { %v15514_v24 = vrot.slane %v7819_v59, %v17472_v6  ;;  %v15519_v17 = vrot.slane %v7820_v30, %v17472_v6  ;;  %v12209_v7 = vld [vmem:[%s17460_s28 + $0x4b4] ss:$8 sps:$4 sm:$0xff]   ;;  %v12204_v2 = vld [vmem:[%s17460_s28 + $0x360] ss:$8 sps:$4 sm:$0xff]   ;;  %v12207_v56 = vld [vmem:[%s17460_s28 + $0x4b0] ss:$8 sps:$4 sm:$0xff]  }
 0x49e   :  { %6663 = vmatpush2.bf16.msra.mxu1 %v12156_v15  ;;  %6716 = vmatpush2.bf16.msra.mxu0 %v12159_v13  ;;  %v15508_v55 = vrot.slane %v7818_v21, %v17472_v6  ;;  %v15511_v34 = vrot.slane %v7817_v25, %v17472_v6  ;;  %v12197_v15 = vld [vmem:[%s17460_s28 + $0x4d4] ss:$8 sps:$4 sm:$0xff]   ;;  %v12192_v13 = vld [vmem:[%s17460_s28 + $0x380] ss:$8 sps:$4 sm:$0xff]   ;;  %v12218_v25 = vld [vmem:[%s17460_s28 + $0x444] ss:$8 sps:$4 sm:$0xff]  }
 0x49f   :  { %6664 = vmatprep.subr.bf16.mxu1 %v12164_v35  ;;  %7135 = vmatprep.subr.bf16.mxu0 %v12167_v12  ;;  %v12203_v35 = vld [vmem:[%s17460_s28 + $0x4c4] ss:$8 sps:$4 sm:$0xff]   ;;  %v6858_v12 = vcombine.high %v15499_v62, %v15488_v8  ;;  %v12212_v1 = vld [vmem:[%s17460_s28 + $0x454] ss:$8 sps:$4 sm:$0xff]   ;;  %v12216_v59 = vld [vmem:[%s17460_s28 + $0x440] ss:$8 sps:$4 sm:$0xff]  }
 0x4a0   :  { %v7849_v10 = vcombine.low %v15511_v34, %v15514_v24  ;;  %v7850_v26 = vcombine.high %v15511_v34, %v15514_v24  ;;  %v7851_v4 = vcombine.low %v15508_v55, %v15519_v17  ;;  %v7852_v28 = vcombine.high %v15508_v55, %v15519_v17  ;;  %v12215_v8 = vld [vmem:[%s17460_s28 + $0x4a4] ss:$8 sps:$4 sm:$0xff]   ;;  %v12221_v21 = vld [vmem:[%s17460_s28 + $0x494] ss:$8 sps:$4 sm:$0xff]   ;;  %v12222_v30 = vld [vmem:[%s17460_s28 + $0x430] ss:$8 sps:$4 sm:$0xff]  }
 0x4a1   :  { %6718 = vmatmul.mubr.bf16.vlgmr.msra.gmra.mxu0 %v6363_v57  ;;  %v12219_v57 = vld [vmem:[%s17460_s28 + $0x490] ss:$8 sps:$4 sm:$0xff]   ;;  %v12224_v62 = vld [vmem:[%s17460_s28 + $0x434] ss:$8 sps:$4 sm:$0xff]   ;;  %v12273_v52 = vld [vmem:[%s17460_s28 + $0x660] ss:$8 sps:$4 sm:$0xff]  }
 0x4a2   :  { %6665 = vmatpush2.bf16.msra.mxu1 %v12162_v23  ;;  %7136 = vmatpush1.bf16.msra.mxu0 %v12165_v11  ;;  %v12210_v23 = vld [vmem:[%s17460_s28 + $0x450] ss:$8 sps:$4 sm:$0xff]   ;;  %v12213_v11 = vld [vmem:[%s17460_s28 + $0x4a0] ss:$8 sps:$4 sm:$0xff]   ;;  %v12371_v37 = vld [vmem:[%s17460_s28 + $0x814] ss:$8 sps:$4 sm:$0xff]  }
 0x4a3   :  { %7167 = vmatprep.mubr.bf16.mxu0 %v6857_v49  ;;  %6666 = vmatprep.subr.bf16.mxu1 %v12170_v3  ;;  %v12227_v3 = vld [vmem:[%s17460_s28 + $0x484] ss:$8 sps:$4 sm:$0xff]   ;;  %v12366_v55 = vld [vmem:[%s17460_s28 + $0x6c0] ss:$8 sps:$4 sm:$0xff]  }
 0x4a4   :  { %7137 = vmatprep.subr.bf16.mxu0 %v12173_v14  ;;  %v12225_v14 = vld [vmem:[%s17460_s28 + $0x480] ss:$8 sps:$4 sm:$0xff]   ;;  %v12230_v49 = vld [vmem:[%s17460_s28 + $0x424] ss:$8 sps:$4 sm:$0xff]  }
 0x4a5   :  { %v12368_v47 = vld [vmem:[%s17460_s28 + $0x6c4] ss:$8 sps:$4 sm:$0xff]  }
 0x4a6   :  { %6667 = vmatpush2.bf16.msra.mxu1 %v12168_v42  ;;  %7138 = vmatpush1.bf16.msra.mxu0 %v12171_v22  ;;  %v12233_v42 = vld [vmem:[%s17460_s28 + $0x474] ss:$8 sps:$4 sm:$0xff]   ;;  %v12228_v22 = vld [vmem:[%s17460_s28 + $0x420] ss:$8 sps:$4 sm:$0xff]   ;;  %v12377_v17 = vld [vmem:[%s17460_s28 + $0x804] ss:$8 sps:$4 sm:$0xff]  }
 0x4a7   :  { %6668 = vmatprep.subr.bf16.mxu1 %v12176_v58  ;;  %7139 = vmatprep.subr.bf16.mxu0 %v12179_v41  ;;  %v12231_v58 = vld [vmem:[%s17460_s28 + $0x470] ss:$8 sps:$4 sm:$0xff]   ;;  %v12236_v41 = vld [vmem:[%s17460_s28 + $0x414] ss:$8 sps:$4 sm:$0xff]   ;;  %v8248_v34 = vld [vmem:[%s17053_s10 + $0xe8] sm:$0xff] }
 0x4a8   :  { %v8232_v24 = vld [vmem:[%s17053_s10 + $0x68] sm:$0xff] }
 0x4aa   :  { %6669 = vmatpush2.bf16.msra.mxu1 %v12174_v45  ;;  %7140 = vmatpush1.bf16.msra.mxu0 %v12177_v32  ;;  %v12239_v45 = vld [vmem:[%s17460_s28 + $0x464] ss:$8 sps:$4 sm:$0xff]   ;;  %v12234_v32 = vld [vmem:[%s17460_s28 + $0x410] ss:$8 sps:$4 sm:$0xff]  }
 0x4ab   :  { %6670 = vmatprep.subr.bf16.mxu1 %v12182_v27  ;;  %7141 = vmatprep.subr.bf16.mxu0 %v12185_v33  ;;  %v12237_v27 = vld [vmem:[%s17460_s28 + $0x460] ss:$8 sps:$4 sm:$0xff]   ;;  %v12242_v33 = vld [vmem:[%s17460_s28 + $0x404] ss:$8 sps:$4 sm:$0xff]  }
 0x4ae   :  { %6671 = vmatpush2.bf16.msra.mxu1 %v12180_v50  ;;  %7142 = vmatpush1.bf16.msra.mxu0 %v12183_v36  ;;  %v12245_v50 = vld [vmem:[%s17460_s28 + $0x504] ss:$8 sps:$4 sm:$0xff]   ;;  %v12240_v36 = vld [vmem:[%s17460_s28 + $0x400] ss:$8 sps:$4 sm:$0xff]  }
 0x4af   :  { %6672 = vmatprep.subr.bf16.mxu1 %v12188_v9  ;;  %7143 = vmatprep.subr.bf16.mxu0 %v12191_v51  ;;  %v12243_v9 = vld [vmem:[%s17460_s28 + $0x500] ss:$8 sps:$4 sm:$0xff]   ;;  %v12248_v51 = vld [vmem:[%s17460_s28 + $0x3f4] ss:$8 sps:$4 sm:$0xff]  }
 0x4b2   :  { %6673 = vmatpush2.bf16.msra.mxu1 %v12186_v31  ;;  %7144 = vmatpush1.bf16.msra.mxu0 %v12189_v46  ;;  %v12251_v31 = vld [vmem:[%s17460_s28 + $0x4f4] ss:$8 sps:$4 sm:$0xff]   ;;  %v12246_v46 = vld [vmem:[%s17460_s28 + $0x3f0] ss:$8 sps:$4 sm:$0xff]  }
 0x4b3   :  { %7145 = vmatprep.subr.bf16.mxu0 %v12194_v54  ;;  %7178 = vmatprep.subr.bf16.mxu1 %v12197_v15  ;;  %v12249_v54 = vld [vmem:[%s17460_s28 + $0x4f0] ss:$8 sps:$4 sm:$0xff]   ;;  %v6825_v15 = vcombine.low %v15444_v43, %v15419_v44  ;;  %v12255_v44 = vld [vmem:[%s17460_s28 + $0x4e0] ss:$8 sps:$4 sm:$0xff]  }
 0x4b5   :  { %6675 = vmatmul.mubr.bf16.vlgmr.msra.gmra.mxu1 %v6362_v48  ;;  %v6823_v48 = vcombine.low %v15416_v0, %v15441_v19  ;;  %v6847_v43 = vrot.slane %v6825_v15, %v17472_v6  ;;  %v12263_v0 = vld [vmem:[%s17460_s28 + $0x684] ss:$8 sps:$4 sm:$0xff]  }
 0x4b6   :  { %7146 = vmatpush1.bf16.msra.mxu0 %v12192_v13  ;;  %7179 = vmatpush1.bf16.msra.mxu1 %v12195_v40  ;;  %v12254_v13 = vld [vmem:[%s17460_s28 + $0x3e4] ss:$8 sps:$4 sm:$0xff]  }
 0x4b7   :  { %10855 = vmatprep.mubr.msk.bf16.mxu1 %vm4386_vm2, %v6858_v12  ;;  %7147 = vmatprep.subr.bf16.mxu0 %v12200_v39  ;;  %v12257_v40 = vld [vmem:[%s17460_s28 + $0x4e4] ss:$8 sps:$4 sm:$0xff]   ;;  %v12252_v39 = vld [vmem:[%s17460_s28 + $0x3e0] ss:$8 sps:$4 sm:$0xff]   ;;  %v6833_v19 = vrot.slane %v6823_v48, %v17472_v6  ;;  %v12269_v6 = vld [vmem:[%s17460_s28 + $0x674] ss:$8 sps:$4 sm:$0xff]  }
 0x4b8   :  { %7180 = vmatprep.subr.bf16.mxu1 %v12203_v35  ;;  %v12260_v35 = vld [vmem:[%s17460_s28 + $0x584] ss:$8 sps:$4 sm:$0xff]   ;;  %v12258_v12 = vld [vmem:[%s17460_s28 + $0x580] ss:$8 sps:$4 sm:$0xff]   ;;  %v12321_v48 = vld [vmem:[%s17460_s28 + $0x690] ss:$8 sps:$4 sm:$0xff]  }
 0x4b9   :  { %v12320_v15 = vld [vmem:[%s17460_s28 + $0x5e4] ss:$8 sps:$4 sm:$0xff]  }
 0x4ba   :  { %7148 = vmatpush1.bf16.msra.mxu0 %v12198_v60  ;;  %7181 = vmatpush1.bf16.msra.mxu1 %v12201_v61  ;;  %v6855_v60 = vcombine.low %v6833_v19, %v6847_v43  ;;  %v6856_v61 = vcombine.high %v6833_v19, %v6847_v43  ;;  %v12324_v43 = vld [vmem:[%s17460_s28 + $0x5d0] ss:$8 sps:$4 sm:$0xff]   ;;  %v12335_v19 = vld [vmem:[%s17460_s28 + $0x724] ss:$8 sps:$4 sm:$0xff]  }
 0x4bb   :  { %7149 = vmatprep.subr.bf16.mxu0 %v12206_v18  ;;  %7182 = vmatprep.subr.bf16.mxu1 %v12209_v7  ;;  %v12261_v18 = vld [vmem:[%s17460_s28 + $0x680] ss:$8 sps:$4 sm:$0xff]   ;;  %v12266_v7 = vld [vmem:[%s17460_s28 + $0x574] ss:$8 sps:$4 sm:$0xff]  }
 0x4be   :  { %7150 = vmatpush1.bf16.msra.mxu0 %v12204_v2  ;;  %7183 = vmatpush1.bf16.msra.mxu1 %v12207_v56  ;;  %v12264_v2 = vld [vmem:[%s17460_s28 + $0x570] ss:$8 sps:$4 sm:$0xff]  }
 0x4bf   :  { %7151 = vmatprep.subr.bf16.mxu0 %v12212_v1  ;;  %7184 = vmatprep.subr.bf16.mxu1 %v12215_v8  ;;  %v12267_v56 = vld [vmem:[%s17460_s28 + $0x670] ss:$8 sps:$4 sm:$0xff]   ;;  %v12272_v1 = vld [vmem:[%s17460_s28 + $0x564] ss:$8 sps:$4 sm:$0xff]   ;;  %v12281_v8 = vld [vmem:[%s17460_s28 + $0x654] ss:$8 sps:$4 sm:$0xff]  }
 0x4c2   :  { %7152 = vmatpush2.bf16.msra.mxu0 %v12210_v23  ;;  %7185 = vmatpush1.bf16.msra.mxu1 %v12213_v11  ;;  %v12276_v23 = vld [vmem:[%s17460_s28 + $0x550] ss:$8 sps:$4 sm:$0xff]  }
 0x4c3   :  { %7153 = vmatprep.subr.bf16.mxu0 %v12218_v25  ;;  %7186 = vmatprep.subr.bf16.mxu1 %v12221_v21  ;;  %v12279_v11 = vld [vmem:[%s17460_s28 + $0x650] ss:$8 sps:$4 sm:$0xff]   ;;  %v12284_v25 = vld [vmem:[%s17460_s28 + $0x544] ss:$8 sps:$4 sm:$0xff]  }
 0x4c4   :  { %v12287_v21 = vld [vmem:[%s17460_s28 + $0x644] ss:$8 sps:$4 sm:$0xff]  }
 0x4c6   :  { %7154 = vmatpush2.bf16.msra.mxu0 %v12216_v59  ;;  %7187 = vmatpush1.bf16.msra.mxu1 %v12219_v57  ;;  %v12282_v59 = vld [vmem:[%s17460_s28 + $0x540] ss:$8 sps:$4 sm:$0xff]  }
 0x4c7   :  { %7155 = vmatprep.subr.bf16.mxu0 %v12224_v62  ;;  %7188 = vmatprep.subr.bf16.mxu1 %v12227_v3  ;;  %v12285_v57 = vld [vmem:[%s17460_s28 + $0x640] ss:$8 sps:$4 sm:$0xff]   ;;  %v12290_v62 = vld [vmem:[%s17460_s28 + $0x534] ss:$8 sps:$4 sm:$0xff]  }
 0x4c8   :  { %v12293_v3 = vld [vmem:[%s17460_s28 + $0x634] ss:$8 sps:$4 sm:$0xff]  }
 0x4ca   :  { %7156 = vmatpush2.bf16.msra.mxu0 %v12222_v30  ;;  %7189 = vmatpush1.bf16.msra.mxu1 %v12225_v14  ;;  %v12288_v30 = vld [vmem:[%s17460_s28 + $0x530] ss:$8 sps:$4 sm:$0xff]  }
 0x4cb   :  { %7157 = vmatprep.subr.bf16.mxu0 %v12230_v49  ;;  %7190 = vmatprep.subr.bf16.mxu1 %v12233_v42  ;;  %v12291_v14 = vld [vmem:[%s17460_s28 + $0x630] ss:$8 sps:$4 sm:$0xff]   ;;  %v12296_v49 = vld [vmem:[%s17460_s28 + $0x524] ss:$8 sps:$4 sm:$0xff]  }
 0x4cc   :  { %v12299_v42 = vld [vmem:[%s17460_s28 + $0x624] ss:$8 sps:$4 sm:$0xff]  }
 0x4ce   :  { %7158 = vmatpush2.bf16.msra.mxu0 %v12228_v22  ;;  %7191 = vmatpush1.bf16.msra.mxu1 %v12231_v58  ;;  %v12294_v22 = vld [vmem:[%s17460_s28 + $0x520] ss:$8 sps:$4 sm:$0xff]  }
 0x4cf   :  { %7159 = vmatprep.subr.bf16.mxu0 %v12236_v41  ;;  %7192 = vmatprep.subr.bf16.mxu1 %v12239_v45  ;;  %v12297_v58 = vld [vmem:[%s17460_s28 + $0x620] ss:$8 sps:$4 sm:$0xff]   ;;  %v12302_v41 = vld [vmem:[%s17460_s28 + $0x514] ss:$8 sps:$4 sm:$0xff]  }
 0x4d0   :  { %v12305_v45 = vld [vmem:[%s17460_s28 + $0x614] ss:$8 sps:$4 sm:$0xff]  }
 0x4d2   :  { %7160 = vmatpush2.bf16.msra.mxu0 %v12234_v32  ;;  %7193 = vmatpush1.bf16.msra.mxu1 %v12237_v27  ;;  %v12300_v32 = vld [vmem:[%s17460_s28 + $0x510] ss:$8 sps:$4 sm:$0xff]  }
 0x4d3   :  { %7161 = vmatprep.subr.bf16.mxu0 %v12242_v33  ;;  %7204 = vmatprep.subr.bf16.mxu1 %v12245_v50  ;;  %v12303_v27 = vld [vmem:[%s17460_s28 + $0x610] ss:$8 sps:$4 sm:$0xff]   ;;  %v12308_v33 = vld [vmem:[%s17460_s28 + $0x604] ss:$8 sps:$4 sm:$0xff]   ;;  %v12311_v50 = vld [vmem:[%s17460_s28 + $0x6b4] ss:$8 sps:$4 sm:$0xff]  }
 0x4d6   :  { %7162 = vmatpush2.bf16.msra.mxu0 %v12240_v36  ;;  %7205 = vmatpush2.bf16.msra.mxu1 %v12243_v9  ;;  %v12306_v36 = vld [vmem:[%s17460_s28 + $0x600] ss:$8 sps:$4 sm:$0xff]   ;;  %v12309_v9 = vld [vmem:[%s17460_s28 + $0x6b0] ss:$8 sps:$4 sm:$0xff]  }
 0x4d7   :  { %7163 = vmatprep.subr.bf16.mxu0 %v12248_v51  ;;  %7206 = vmatprep.subr.bf16.mxu1 %v12251_v31  ;;  %v12314_v51 = vld [vmem:[%s17460_s28 + $0x5f4] ss:$8 sps:$4 sm:$0xff]   ;;  %v12317_v31 = vld [vmem:[%s17460_s28 + $0x6a4] ss:$8 sps:$4 sm:$0xff]  }
 0x4da   :  { %7164 = vmatpush2.bf16.msra.mxu0 %v12246_v46  ;;  %7207 = vmatpush2.bf16.msra.mxu1 %v12249_v54  ;;  %v12312_v46 = vld [vmem:[%s17460_s28 + $0x5f0] ss:$8 sps:$4 sm:$0xff]   ;;  %v12315_v54 = vld [vmem:[%s17460_s28 + $0x6a0] ss:$8 sps:$4 sm:$0xff]  }
 0x4db   :  { %7165 = vmatprep.subr.bf16.mxu0 %v12254_v13  ;;  %7208 = vmatprep.subr.bf16.mxu1 %v12257_v40  ;;  %v12323_v13 = vld [vmem:[%s17460_s28 + $0x694] ss:$8 sps:$4 sm:$0xff]   ;;  %v12318_v40 = vld [vmem:[%s17460_s28 + $0x5e0] ss:$8 sps:$4 sm:$0xff]  }
 0x4de   :  { %7166 = vmatpush2.bf16.msra.mxu0 %v12252_v39  ;;  %7209 = vmatpush2.bf16.msra.mxu1 %v12255_v44  ;;  %v12326_v39 = vld [vmem:[%s17460_s28 + $0x5d4] ss:$8 sps:$4 sm:$0xff]  }
 0x4df   :  { %7632 = vmatprep.subr.bf16.mxu1 %v12260_v35  ;;  %7675 = vmatprep.subr.bf16.mxu0 %v12263_v0  ;;  %v12329_v44 = vld [vmem:[%s17460_s28 + $0x734] ss:$8 sps:$4 sm:$0xff]   ;;  %v12327_v35 = vld [vmem:[%s17460_s28 + $0x730] ss:$8 sps:$4 sm:$0xff]   ;;  %v12332_v0 = vld [vmem:[%s17460_s28 + $0x5c4] ss:$8 sps:$4 sm:$0xff]  }
 0x4e1   :  { %7168 = vmatmul.mubr.bf16.vlgmr.msra.gmra.mxu0 %v6855_v60  ;;  %7211 = vmatmul.mubr.bf16.vlgmr.msra.gmra.mxu1 %v6856_v61  ;;  %v12333_v60 = vld [vmem:[%s17460_s28 + $0x720] ss:$8 sps:$4 sm:$0xff]   ;;  %v12338_v61 = vld [vmem:[%s17460_s28 + $0x5b4] ss:$8 sps:$4 sm:$0xff]  }
 0x4e2   :  { %7633 = vmatpush1.bf16.msra.mxu1 %v12258_v12  ;;  %7664 = vmatprep.mubr.bf16.mxu1 %v7354_v20  ;;  %v12275_v20 = vld [vmem:[%s17460_s28 + $0x664] ss:$8 sps:$4 sm:$0xff]   ;;  %v12330_v12 = vld [vmem:[%s17460_s28 + $0x5c0] ss:$8 sps:$4 sm:$0xff]  }
 0x4e3   :  { %7676 = vmatpush1.bf16.msra.mxu0 %v12261_v18  ;;  %10968 = vmatprep.mubr.msk.bf16.mxu0 %vm4386_vm2, %v7355_v38  ;;  %v12278_v38 = vld [vmem:[%s17460_s28 + $0x554] ss:$8 sps:$4 sm:$0xff]   ;;  %v12336_v18 = vld [vmem:[%s17460_s28 + $0x5b0] ss:$8 sps:$4 sm:$0xff]  }
 0x4e4   :  { %7634 = vmatprep.subr.bf16.mxu1 %v12266_v7  ;;  %7677 = vmatprep.subr.bf16.mxu0 %v12269_v6  ;;  %v12344_v7 = vld [vmem:[%s17460_s28 + $0x5a4] ss:$8 sps:$4 sm:$0xff]  }
 0x4e5   :  { %v12347_v6 = vld [vmem:[%s17460_s28 + $0x704] ss:$8 sps:$4 sm:$0xff]  }
 0x4e6   :  { %7635 = vmatpush1.bf16.msra.mxu1 %v12264_v2  ;;  %v12342_v2 = vld [vmem:[%s17460_s28 + $0x5a0] ss:$8 sps:$4 sm:$0xff]  }
 0x4e7   :  { %7678 = vmatpush1.bf16.msra.mxu0 %v12267_v56  ;;  %7636 = vmatprep.subr.bf16.mxu1 %v12272_v1  ;;  %v12345_v56 = vld [vmem:[%s17460_s28 + $0x700] ss:$8 sps:$4 sm:$0xff]   ;;  %v12350_v1 = vld [vmem:[%s17460_s28 + $0x594] ss:$8 sps:$4 sm:$0xff]  }
 0x4e8   :  { %7679 = vmatprep.subr.bf16.mxu0 %v12275_v20  ;;  %v12353_v20 = vld [vmem:[%s17460_s28 + $0x6f4] ss:$8 sps:$4 sm:$0xff]  }
 0x4ea   :  { %7637 = vmatpush1.bf16.msra.mxu1 %v12270_v16  ;;  %v12348_v16 = vld [vmem:[%s17460_s28 + $0x590] ss:$8 sps:$4 sm:$0xff]  }
 0x4eb   :  { %7680 = vmatpush1.bf16.msra.mxu0 %v12273_v52  ;;  %7638 = vmatprep.subr.bf16.mxu1 %v12278_v38  ;;  %v12351_v52 = vld [vmem:[%s17460_s28 + $0x6f0] ss:$8 sps:$4 sm:$0xff]   ;;  %v12359_v38 = vld [vmem:[%s17460_s28 + $0x834] ss:$8 sps:$4 sm:$0xff]  }
 0x4ec   :  { %7681 = vmatprep.subr.bf16.mxu0 %v12281_v8  ;;  %v12356_v8 = vld [vmem:[%s17460_s28 + $0x6e4] ss:$8 sps:$4 sm:$0xff]  }
 0x4ee   :  { %7639 = vmatpush1.bf16.msra.mxu1 %v12276_v23  ;;  %v12357_v23 = vld [vmem:[%s17460_s28 + $0x830] ss:$8 sps:$4 sm:$0xff]  }
 0x4ef   :  { %7682 = vmatpush1.bf16.msra.mxu0 %v12279_v11  ;;  %7640 = vmatprep.subr.bf16.mxu1 %v12284_v25  ;;  %v12354_v11 = vld [vmem:[%s17460_s28 + $0x6e0] ss:$8 sps:$4 sm:$0xff]   ;;  %v12365_v25 = vld [vmem:[%s17460_s28 + $0x824] ss:$8 sps:$4 sm:$0xff]  }
 0x4f0   :  { %7683 = vmatprep.subr.bf16.mxu0 %v12287_v21  ;;  %v12362_v21 = vld [vmem:[%s17460_s28 + $0x6d4] ss:$8 sps:$4 sm:$0xff]  }
 0x4f2   :  { %7641 = vmatpush1.bf16.msra.mxu1 %v12282_v59  ;;  %v12363_v59 = vld [vmem:[%s17460_s28 + $0x820] ss:$8 sps:$4 sm:$0xff]  }
 0x4f3   :  { %7684 = vmatpush1.bf16.msra.mxu0 %v12285_v57  ;;  %7642 = vmatprep.subr.bf16.mxu1 %v12290_v62  ;;  %v12360_v57 = vld [vmem:[%s17460_s28 + $0x6d0] ss:$8 sps:$4 sm:$0xff]   ;;  %v12375_v62 = vld [vmem:[%s17460_s28 + $0x800] ss:$8 sps:$4 sm:$0xff]  }
 0x4f4   :  { %7685 = vmatprep.subr.bf16.mxu0 %v12293_v3  ;;  %v12372_v3 = vld [vmem:[%s17460_s28 + $0x7b0] ss:$8 sps:$4 sm:$0xff]  }
 0x4f6   :  { %7643 = vmatpush1.bf16.msra.mxu1 %v12288_v30  ;;  %v12383_v30 = vld [vmem:[%s17460_s28 + $0x7f4] ss:$8 sps:$4 sm:$0xff]  }
 0x4f7   :  { %7686 = vmatpush1.bf16.msra.mxu0 %v12291_v14  ;;  %7644 = vmatprep.subr.bf16.mxu1 %v12296_v49  ;;  %v12380_v14 = vld [vmem:[%s17460_s28 + $0x7a4] ss:$8 sps:$4 sm:$0xff]   ;;  %v12381_v49 = vld [vmem:[%s17460_s28 + $0x7f0] ss:$8 sps:$4 sm:$0xff]  }
 0x4f8   :  { %7687 = vmatprep.subr.bf16.mxu0 %v12299_v42  ;;  %v12378_v42 = vld [vmem:[%s17460_s28 + $0x7a0] ss:$8 sps:$4 sm:$0xff]  }
 0x4fa   :  { %7645 = vmatpush1.bf16.msra.mxu1 %v12294_v22  ;;  %v12389_v22 = vld [vmem:[%s17460_s28 + $0x7e4] ss:$8 sps:$4 sm:$0xff]  }
 0x4fb   :  { %7688 = vmatpush1.bf16.msra.mxu0 %v12297_v58  ;;  %7646 = vmatprep.subr.bf16.mxu1 %v12302_v41  ;;  %v12386_v58 = vld [vmem:[%s17460_s28 + $0x794] ss:$8 sps:$4 sm:$0xff]   ;;  %v12387_v41 = vld [vmem:[%s17460_s28 + $0x7e0] ss:$8 sps:$4 sm:$0xff]  }
 0x4fc   :  { %7689 = vmatprep.subr.bf16.mxu0 %v12305_v45  ;;  %v12384_v45 = vld [vmem:[%s17460_s28 + $0x790] ss:$8 sps:$4 sm:$0xff]  }
 0x4fe   :  { %7647 = vmatpush1.bf16.msra.mxu1 %v12300_v32  ;;  %v12395_v32 = vld [vmem:[%s17460_s28 + $0x7d4] ss:$8 sps:$4 sm:$0xff]  }
 0x4ff   :  { %7690 = vmatpush1.bf16.msra.mxu0 %v12303_v27  ;;  %7648 = vmatprep.subr.bf16.mxu1 %v12308_v33  ;;  %v12392_v27 = vld [vmem:[%s17460_s28 + $0x784] ss:$8 sps:$4 sm:$0xff]   ;;  %v12393_v33 = vld [vmem:[%s17460_s28 + $0x7d0] ss:$8 sps:$4 sm:$0xff]  }
 0x500   :  { %7701 = vmatprep.subr.bf16.mxu0 %v12311_v50  ;;  %v12390_v50 = vld [vmem:[%s17460_s28 + $0x780] ss:$8 sps:$4 sm:$0xff]  }
 0x502   :  { %7649 = vmatpush2.bf16.msra.mxu1 %v12306_v36  ;;  %v12401_v36 = vld [vmem:[%s17460_s28 + $0x7c4] ss:$8 sps:$4 sm:$0xff]  }
 0x503   :  { %7702 = vmatpush2.bf16.msra.mxu0 %v12309_v9  ;;  %7650 = vmatprep.subr.bf16.mxu1 %v12314_v51  ;;  %v12398_v9 = vld [vmem:[%s17460_s28 + $0x774] ss:$8 sps:$4 sm:$0xff]   ;;  %v12399_v51 = vld [vmem:[%s17460_s28 + $0x7c0] ss:$8 sps:$4 sm:$0xff]  }
 0x504   :  { %7703 = vmatprep.subr.bf16.mxu0 %v12317_v31  ;;  %v12396_v31 = vld [vmem:[%s17460_s28 + $0x770] ss:$8 sps:$4 sm:$0xff]  }
 0x506   :  { %7651 = vmatpush2.bf16.msra.mxu1 %v12312_v46  ;;  %v12407_v46 = vld [vmem:[%s17460_s28 + $0x864] ss:$8 sps:$4 sm:$0xff]  }
 0x507   :  { %7704 = vmatpush2.bf16.msra.mxu0 %v12315_v54  ;;  %7652 = vmatprep.subr.bf16.mxu1 %v12320_v15  ;;  %v12404_v54 = vld [vmem:[%s17460_s28 + $0x764] ss:$8 sps:$4 sm:$0xff]   ;;  %v12405_v15 = vld [vmem:[%s17460_s28 + $0x860] ss:$8 sps:$4 sm:$0xff]  }
 0x508   :  { %7705 = vmatprep.subr.bf16.mxu0 %v12323_v13  ;;  %v12402_v13 = vld [vmem:[%s17460_s28 + $0x760] ss:$8 sps:$4 sm:$0xff]  }
 0x50a   :  { %7653 = vmatpush2.bf16.msra.mxu1 %v12318_v40  ;;  %v12413_v40 = vld [vmem:[%s17460_s28 + $0x854] ss:$8 sps:$4 sm:$0xff]  }
 0x50b   :  { %7706 = vmatpush2.bf16.msra.mxu0 %v12321_v48  ;;  %7654 = vmatprep.subr.bf16.mxu1 %v12326_v39  ;;  %v12410_v48 = vld [vmem:[%s17460_s28 + $0x754] ss:$8 sps:$4 sm:$0xff]   ;;  %v12411_v39 = vld [vmem:[%s17460_s28 + $0x850] ss:$8 sps:$4 sm:$0xff]  }
 0x50c   :  { %8129 = vmatprep.subr.bf16.mxu0 %v12329_v44  ;;  %v12408_v44 = vld [vmem:[%s17460_s28 + $0x750] ss:$8 sps:$4 sm:$0xff]  }
 0x50e   :  { %7708 = vmatmul.mubr.bf16.vlgmr.msra.gmra.mxu0 %v7353_v5  ;;  %7655 = vmatpush2.bf16.msra.mxu1 %v12324_v43  ;;  %v12341_v5 = vld [vmem:[%s17460_s28 + $0x714] ss:$8 sps:$4 sm:$0xff]   ;;  %v12419_v43 = vld [vmem:[%s17460_s28 + $0x844] ss:$8 sps:$4 sm:$0xff]  }
 0x50f   :  { %8130 = vmatpush1.bf16.msra.mxu0 %v12327_v35  ;;  %8161 = vmatprep.mubr.bf16.mxu0 %v7851_v4  ;;  %v12339_v4 = vld [vmem:[%s17460_s28 + $0x710] ss:$8 sps:$4 sm:$0xff]   ;;  %v12416_v35 = vld [vmem:[%s17460_s28 + $0x744] ss:$8 sps:$4 sm:$0xff]  }
 0x510   :  { %7656 = vmatprep.subr.bf16.mxu1 %v12332_v0  ;;  %8131 = vmatprep.subr.bf16.mxu0 %v12335_v19  ;;  %v12417_v0 = vld [vmem:[%s17460_s28 + $0x840] ss:$8 sps:$4 sm:$0xff]  }
 0x511   :  { %v12414_v19 = vld [vmem:[%s17460_s28 + $0x740] ss:$8 sps:$4 sm:$0xff]  }
 0x512   :  { %7657 = vmatpush2.bf16.msra.mxu1 %v12330_v12  ;;  %v8250_v12 = vld [vmem:[%s17053_s10 + $0xf8] sm:$0xff] }
 0x513   :  { %8132 = vmatpush1.bf16.msra.mxu0 %v12333_v60  ;;  %7658 = vmatprep.subr.bf16.mxu1 %v12338_v61  ;;  %v8234_v60 = vld [vmem:[%s17053_s10 + $0x78] sm:$0xff]  ;;  %v8249_v61 = vld [vmem:[%s17053_s10 + $0xf0] sm:$0xff] }
 0x514   :  { %8133 = vmatprep.subr.bf16.mxu0 %v12341_v5  ;;  %v8231_v5 = vld [vmem:[%s17053_s10 + $0x60] sm:$0xff] }
 0x516   :  { %7659 = vmatpush2.bf16.msra.mxu1 %v12336_v18  ;;  %v8246_v18 = vld [vmem:[%s17053_s10 + $0xd8] sm:$0xff] }
 0x517   :  { %8134 = vmatpush1.bf16.msra.mxu0 %v12339_v4  ;;  %7660 = vmatprep.subr.bf16.mxu1 %v12344_v7  ;;  %v8230_v4 = vld [vmem:[%s17053_s10 + $0x58] sm:$0xff]  ;;  %v8245_v7 = vld [vmem:[%s17053_s10 + $0xd0] sm:$0xff] }
 0x518   :  { %8135 = vmatprep.subr.bf16.mxu0 %v12347_v6  ;;  %v8229_v6 = vld [vmem:[%s17053_s10 + $0x50] sm:$0xff] }
 0x51a   :  { %7661 = vmatpush2.bf16.msra.mxu1 %v12342_v2  ;;  %v8244_v2 = vld [vmem:[%s17053_s10 + $0xc8] sm:$0xff] }
 0x51b   :  { %8136 = vmatpush1.bf16.msra.mxu0 %v12345_v56  ;;  %7662 = vmatprep.subr.bf16.mxu1 %v12350_v1  ;;  %v8228_v56 = vld [vmem:[%s17053_s10 + $0x48] sm:$0xff]  ;;  %v8243_v1 = vld [vmem:[%s17053_s10 + $0xc0] sm:$0xff] }
 0x51c   :  { %8137 = vmatprep.subr.bf16.mxu0 %v12353_v20  ;;  %v8227_v20 = vld [vmem:[%s17053_s10 + $0x40] sm:$0xff] }
 0x51e   :  { %7663 = vmatpush2.bf16.msra.mxu1 %v12348_v16  ;;  %v8242_v16 = vld [vmem:[%s17053_s10 + $0xb8] sm:$0xff] }
 0x51f   :  { %8138 = vmatpush1.bf16.msra.mxu0 %v12351_v52  ;;  %8172 = vmatprep.subr.bf16.mxu1 %v12359_v38  ;;  %v8226_v52 = vld [vmem:[%s17053_s10 + $0x38] sm:$0xff]  ;;  %v8241_v38 = vld [vmem:[%s17053_s10 + $0xb0] sm:$0xff] }
 0x520   :  { %8139 = vmatprep.subr.bf16.mxu0 %v12356_v8  ;;  %v8225_v8 = vld [vmem:[%s17053_s10 + $0x30] sm:$0xff] }
 0x521   :  { %7665 = vmatmul.mubr.bf16.vlgmr.msra.gmra.mxu1 %v7352_v63  ;;  %v12369_v63 = vld [vmem:[%s17460_s28 + $0x810] ss:$8 sps:$4 sm:$0xff]  }
 0x522   :  { %8173 = vmatpush1.bf16.msra.mxu1 %v12357_v23  ;;  %11081 = vmatprep.mubr.msk.bf16.mxu1 %vm4386_vm2, %v7852_v28  ;;  %v12374_v28 = vld [vmem:[%s17460_s28 + $0x7b4] ss:$8 sps:$4 sm:$0xff]   ;;  %v8240_v23 = vld [vmem:[%s17053_s10 + $0xa8] sm:$0xff] }
 0x523   :  { %8140 = vmatpush1.bf16.msra.mxu0 %v12354_v11  ;;  %8174 = vmatprep.subr.bf16.mxu1 %v12365_v25  ;;  %v8224_v11 = vld [vmem:[%s17053_s10 + $0x28] sm:$0xff]  ;;  %v8239_v25 = vld [vmem:[%s17053_s10 + $0xa0] sm:$0xff] }
 0x524   :  { %8141 = vmatprep.subr.bf16.mxu0 %v12362_v21  ;;  %v8223_v21 = vld [vmem:[%s17053_s10 + $0x20] sm:$0xff] }
 0x526   :  { %8175 = vmatpush1.bf16.msra.mxu1 %v12363_v59  ;;  %v8238_v59 = vld [vmem:[%s17053_s10 + $0x98] sm:$0xff] }
 0x527   :  { %8142 = vmatpush1.bf16.msra.mxu0 %v12360_v57  ;;  %8176 = vmatprep.subr.bf16.mxu1 %v12371_v37  ;;  %v8222_v57 = vld [vmem:[%s17053_s10 + $0x18] sm:$0xff]  ;;  %v8237_v37 = vld [vmem:[%s17053_s10 + $0x90] sm:$0xff] }
 0x528   :  { %8143 = vmatprep.subr.bf16.mxu0 %v12368_v47  ;;  %v8221_v47 = vld [vmem:[%s17053_s10 + $0x10] sm:$0xff] }
 0x52a   :  { %8177 = vmatpush1.bf16.msra.mxu1 %v12369_v63  ;;  %v8236_v63 = vld [vmem:[%s17053_s10 + $0x88] sm:$0xff] }
 0x52b   :  { %8144 = vmatpush1.bf16.msra.mxu0 %v12366_v55  ;;  %8178 = vmatprep.subr.bf16.mxu1 %v12377_v17  ;;  %v8220_v55 = vld [vmem:[%s17053_s10 + $0x8] sm:$0xff]  ;;  %v8235_v17 = vld [vmem:[%s17053_s10 + $0x80] sm:$0xff] }
 0x52c   :  { %8145 = vmatprep.subr.bf16.mxu0 %v12374_v28  ;;  %v8219_v28 = vld [vmem:[%s17053_s10] sm:$0xff] }
 0x52e   :  { %8179 = vmatpush1.bf16.msra.mxu1 %v12375_v62 }
 0x52f   :  { %8146 = vmatpush2.bf16.msra.mxu0 %v12372_v3  ;;  %8180 = vmatprep.subr.bf16.mxu1 %v12383_v30 }
 0x530   :  { %8147 = vmatprep.subr.bf16.mxu0 %v12380_v14 }
 0x532   :  { %8181 = vmatpush1.bf16.msra.mxu1 %v12381_v49 }
 0x533   :  { %8148 = vmatpush2.bf16.msra.mxu0 %v12378_v42  ;;  %8182 = vmatprep.subr.bf16.mxu1 %v12389_v22 }
 0x534   :  { %8149 = vmatprep.subr.bf16.mxu0 %v12386_v58 }
 0x535   :  { %v6281_v62 = vpop.f32.mrf.mxu1  ;;  %v6238_v3 = vpop.f32.mrf.mxu0 }
 0x536   :  { %8183 = vmatpush1.bf16.msra.mxu1 %v12387_v41 }
 0x537   :  { %8150 = vmatpush2.bf16.msra.mxu0 %v12384_v45  ;;  %8184 = vmatprep.subr.bf16.mxu1 %v12395_v32  ;;  %v6283_v30 = vpop.f32.mrf.mxu1  ;;  %v6240_v14 = vpop.f32.mrf.mxu0 }
 0x538   :  { %8151 = vmatprep.subr.bf16.mxu0 %v12392_v27 }
 0x539   :  { %v6285_v49 = vpop.f32.mrf.mxu1  ;;  %v6242_v42 = vpop.f32.mrf.mxu0 }
 0x53a   :  { %8185 = vmatpush1.bf16.msra.mxu1 %v12393_v33 }
 0x53b   :  { %8152 = vmatpush2.bf16.msra.mxu0 %v12390_v50  ;;  %8186 = vmatprep.subr.bf16.mxu1 %v12401_v36  ;;  %v6287_v22 = vpop.f32.mrf.mxu1  ;;  %v6244_v58 = vpop.f32.mrf.mxu0 }
 0x53c   :  { %8153 = vmatprep.subr.bf16.mxu0 %v12398_v9 }
 0x53e   :  { %8187 = vmatpush1.bf16.msra.mxu1 %v12399_v51 }
 0x53f   :  { %8154 = vmatpush2.bf16.msra.mxu0 %v12396_v31  ;;  %8198 = vmatprep.subr.bf16.mxu1 %v12407_v46 }
 0x540   :  { %8155 = vmatprep.subr.bf16.mxu0 %v12404_v54 }
 0x542   :  { %8199 = vmatpush2.bf16.msra.mxu1 %v12405_v15 }
 0x543   :  { %8156 = vmatpush2.bf16.msra.mxu0 %v12402_v13  ;;  %8200 = vmatprep.subr.bf16.mxu1 %v12413_v40 }
 0x544   :  { %8157 = vmatprep.subr.bf16.mxu0 %v12410_v48 }
 0x546   :  { %8201 = vmatpush2.bf16.msra.mxu1 %v12411_v39 }
 0x547   :  { %8158 = vmatpush2.bf16.msra.mxu0 %v12408_v44  ;;  %8202 = vmatprep.subr.bf16.mxu1 %v12419_v43 }
 0x548   :  { %8159 = vmatprep.subr.bf16.mxu0 %v12416_v35 }
 0x54a   :  { %8203 = vmatpush2.bf16.msra.mxu1 %v12417_v0  ;;  %v6282_v0 = vadd.f32 %v6281_v62, %v6238_v3 }
 0x54b   :  { %8160 = vmatpush2.bf16.msra.mxu0 %v12414_v19  ;;  %11381 = vmatprep.subr.mxu1 %v8250_v12 }
 0x54c   :  { %11416 = vmatprep.subr.mxu0 %v8250_v12  ;;  %v6284_v12 = vadd.f32 %v6283_v30, %v6240_v14 }
 0x54d   :  { %8205 = vmatmul.mubr.bf16.vlgmr.msra.gmra.mxu1 %v7850_v26  ;;  %v8233_v26 = vld [vmem:[%s17053_s10 + $0x70] sm:$0xff] }
 0x54e   :  { %8162 = vmatmul.mubr.bf16.vlgmr.msra.gmra.mxu0 %v7849_v10  ;;  %11382 = vmatpush3.msra.mxu1 %v8234_v60  ;;  %v8247_v10 = vld [vmem:[%s17053_s10 + $0xe0] sm:$0xff] }
 0x54f   :  { %11417 = vmatpush3.msra.mxu0 %v8234_v60  ;;  %11383 = vmatprep.subr.mxu1 %v8249_v61  ;;  %v6286_v60 = vadd.f32 %v6285_v49, %v6242_v42 }
 0x550   :  { %11418 = vmatprep.subr.mxu0 %v8249_v61  ;;  %11384 = vmatpush3.msra.mxu1 %v8233_v26 }
 0x551   :  { %11419 = vmatpush3.msra.mxu0 %v8233_v26  ;;  %11385 = vmatprep.subr.mxu1 %v8248_v34 }
 0x552   :  { %11420 = vmatprep.subr.mxu0 %v8248_v34  ;;  %11386 = vmatpush3.msra.mxu1 %v8232_v24  ;;  %v6288_v34 = vadd.f32 %v6287_v22, %v6244_v58 }
 0x553   :  { %11421 = vmatpush3.msra.mxu0 %v8232_v24  ;;  %11387 = vmatprep.subr.mxu1 %v8247_v10 }
 0x554   :  { %11422 = vmatprep.subr.mxu0 %v8247_v10  ;;  %11388 = vmatpush3.msra.mxu1 %v8231_v5 }
 0x555   :  { %11423 = vmatpush3.msra.mxu0 %v8231_v5  ;;  %11389 = vmatprep.subr.mxu1 %v8246_v18 }
 0x556   :  { %11424 = vmatprep.subr.mxu0 %v8246_v18  ;;  %11390 = vmatpush3.msra.mxu1 %v8230_v4 }
 0x557   :  { %11425 = vmatpush3.msra.mxu0 %v8230_v4  ;;  %11391 = vmatprep.subr.mxu1 %v8245_v7 }
 0x558   :  { %11426 = vmatprep.subr.mxu0 %v8245_v7  ;;  %11392 = vmatpush3.msra.mxu1 %v8229_v6 }
 0x559   :  { %11427 = vmatpush3.msra.mxu0 %v8229_v6  ;;  %11393 = vmatprep.subr.mxu1 %v8244_v2 }
 0x55a   :  { %11428 = vmatprep.subr.mxu0 %v8244_v2  ;;  %11394 = vmatpush3.msra.mxu1 %v8228_v56 }
 0x55b   :  { %11429 = vmatpush3.msra.mxu0 %v8228_v56  ;;  %11395 = vmatprep.subr.mxu1 %v8243_v1 }
 0x55c   :  { %11430 = vmatprep.subr.mxu0 %v8243_v1  ;;  %11396 = vmatpush3.msra.mxu1 %v8227_v20 }
 0x55d   :  { %11431 = vmatpush3.msra.mxu0 %v8227_v20  ;;  %11397 = vmatprep.subr.mxu1 %v8242_v16 }
 0x55e   :  { %11432 = vmatprep.subr.mxu0 %v8242_v16  ;;  %11398 = vmatpush3.msra.mxu1 %v8226_v52 }
 0x55f   :  { %11433 = vmatpush3.msra.mxu0 %v8226_v52  ;;  %11399 = vmatprep.subr.mxu1 %v8241_v38 }
 0x560   :  { %11434 = vmatprep.subr.mxu0 %v8241_v38  ;;  %11400 = vmatpush3.msra.mxu1 %v8225_v8 }
 0x561   :  { %11435 = vmatpush3.msra.mxu0 %v8225_v8  ;;  %11401 = vmatprep.subr.mxu1 %v8240_v23  ;;  %v6719_v45 = vpop.f32.mrf.mxu0 }
 0x562   :  { %11436 = vmatprep.subr.mxu0 %v8240_v23  ;;  %11402 = vmatpush3.msra.mxu1 %v8224_v11 }
 0x563   :  { %11437 = vmatpush3.msra.mxu0 %v8224_v11  ;;  %11403 = vmatprep.subr.mxu1 %v8239_v25  ;;  %v6721_v27 = vpop.f32.mrf.mxu0 }
 0x564   :  { %11438 = vmatprep.subr.mxu0 %v8239_v25  ;;  %11404 = vmatpush3.msra.mxu1 %v8223_v21 }
 0x565   :  { %11439 = vmatpush3.msra.mxu0 %v8223_v21  ;;  %11405 = vmatprep.subr.mxu1 %v8238_v59  ;;  %v6723_v50 = vpop.f32.mrf.mxu0 }
 0x566   :  { %11440 = vmatprep.subr.mxu0 %v8238_v59  ;;  %11406 = vmatpush3.msra.mxu1 %v8222_v57 }
 0x567   :  { %11441 = vmatpush3.msra.mxu0 %v8222_v57  ;;  %11407 = vmatprep.subr.mxu1 %v8237_v37  ;;  %v6725_v9 = vpop.f32.mrf.mxu0 }
 0x568   :  { %11442 = vmatprep.subr.mxu0 %v8237_v37  ;;  %11408 = vmatpush3.msra.mxu1 %v8221_v47 }
 0x569   :  { %11443 = vmatpush3.msra.mxu0 %v8221_v47  ;;  %11409 = vmatprep.subr.mxu1 %v8236_v63 }
 0x56a   :  { %11444 = vmatprep.subr.mxu0 %v8236_v63  ;;  %11410 = vmatpush3.msra.mxu1 %v8220_v55 }
 0x56b   :  { %11445 = vmatpush3.msra.mxu0 %v8220_v55  ;;  %11411 = vmatprep.subr.mxu1 %v8235_v17 }
 0x56c   :  { %11446 = vmatprep.subr.mxu0 %v8235_v17  ;;  %11412 = vmatpush3.msra.mxu1 %v8219_v28 }
 0x56d   :  { %11447 = vmatpush3.msra.mxu0 %v8219_v28 }
 0x575   :  { %v6676_v41 = vpop.f32.mrf.mxu1 }
 0x576   :  { %v6677_v26 = vadd.f32 %v6676_v41, %v6282_v0 }
 0x577   :  { %v6678_v32 = vpop.f32.mrf.mxu1 }
 0x578   :  { %v6679_v24 = vadd.f32 %v6678_v32, %v6284_v12  ;;  %v6720_v2 = vadd.f32 %v6719_v45, %v6677_v26 }
 0x579   :  { %v6680_v33 = vpop.f32.mrf.mxu1 }
 0x57a   :  { %v6681_v10 = vadd.f32 %v6680_v33, %v6286_v60  ;;  %v6722_v16 = vadd.f32 %v6721_v27, %v6679_v24 }
 0x57b   :  { %v6682_v36 = vpop.f32.mrf.mxu1 }
 0x57c   :  { %v6683_v4 = vadd.f32 %v6682_v36, %v6288_v34  ;;  %v6724_v52 = vadd.f32 %v6723_v50, %v6681_v10 }
 0x57e   :  { %v6726_v57 = vadd.f32 %v6725_v9, %v6683_v4 }
 0x5a1   :  { %v7212_v51 = vpop.f32.mrf.mxu1  ;;  %v7169_v31 = vpop.f32.mrf.mxu0 }
 0x5a2   :  { %v7213_v5 = vadd.f32 %v7212_v51, %v7169_v31 }
 0x5a3   :  { %v7214_v46 = vpop.f32.mrf.mxu1  ;;  %v7171_v54 = vpop.f32.mrf.mxu0 }
 0x5a4   :  { %v7215_v7 = vadd.f32 %v7214_v46, %v7171_v54  ;;  %v7221_v23 = vadd.f32 %v7213_v5, %v6720_v2 }
 0x5a5   :  { %v7216_v15 = vpop.f32.mrf.mxu1  ;;  %v7173_v13 = vpop.f32.mrf.mxu0 }
 0x5a6   :  { %v7217_v56 = vadd.f32 %v7216_v15, %v7173_v13  ;;  %v7222_v37 = vadd.f32 %v7215_v7, %v6722_v16  ;;  %v8258_v16 = vld [vmem:[%s17054_s11 + $0x38] sm:$0xff] }
 0x5a7   :  { %v7218_v40 = vpop.f32.mrf.mxu1  ;;  %v7175_v48 = vpop.f32.mrf.mxu0  ;;  %8470 = vmatprep.subr.mxu0 %v8258_v16  ;;  %8544 = vmatprep.subr.mxu1 %v8258_v16  ;;  %v16412_v16 = vld [vmem:[%s17046_s3 + $0x1f8] sm:$0xff]  }
 0x5a8   :  { %v7219_v11 = vadd.f32 %v7218_v40, %v7175_v48  ;;  %v7223_v63 = vadd.f32 %v7217_v56, %v6724_v52  ;;  %v8257_v52 = vld [vmem:[%s17054_s11 + $0x30] sm:$0xff]  ;;  %17474 = vst [vmem:[#allocation65_spill] sm:$0xff] %v16412_v16 }
 0x5aa   :  { %v7224_v14 = vadd.f32 %v7219_v11, %v6726_v57  ;;  %v8253_v11 = vld [vmem:[%s17054_s11 + $0x10] sm:$0xff]  ;;  %v16214_v57 = vld [vmem:[%s17046_s3 + $0x78] sm:$0xff]  }
 0x5ce   :  { %v7709_v44 = vpop.f32.mrf.mxu0 }
 0x5d0   :  { %v7711_v35 = vpop.f32.mrf.mxu0 }
 0x5d2   :  { %v7713_v61 = vpop.f32.mrf.mxu0 }
 0x5d4   :  { %v7715_v6 = vpop.f32.mrf.mxu0 }
 0x5e1   :  { %v7666_v39 = vpop.f32.mrf.mxu1 }
 0x5e2   :  { %v7710_v1 = vadd.f32 %v7709_v44, %v7666_v39 }
 0x5e3   :  { %v7668_v43 = vpop.f32.mrf.mxu1 }
 0x5e4   :  { %v7712_v38 = vadd.f32 %v7711_v35, %v7668_v43  ;;  %v7718_v55 = vadd.f32 %v7710_v1, %v7221_v23  ;;  %v8254_v23 = vld [vmem:[%s17054_s11 + $0x18] sm:$0xff] }
 0x5e5   :  { %v7670_v19 = vpop.f32.mrf.mxu1 }
 0x5e6   :  { %v7714_v25 = vadd.f32 %v7713_v61, %v7670_v19  ;;  %v7719_v3 = vadd.f32 %v7712_v38, %v7222_v37  ;;  %v8256_v38 = vld [vmem:[%s17054_s11 + $0x28] sm:$0xff] }
 0x5e7   :  { %v7672_v18 = vpop.f32.mrf.mxu1 }
 0x5e8   :  { %v7716_v17 = vadd.f32 %v7715_v6, %v7672_v18  ;;  %v7720_v49 = vadd.f32 %v7714_v25, %v7223_v63  ;;  %v8252_v25 = vld [vmem:[%s17054_s11 + $0x8] sm:$0xff] }
 0x5ea   :  { %v7721_v32 = vadd.f32 %v7716_v17, %v7224_v14 }
 0x60d   :  { %v8206_v20 = vpop.f32.mrf.mxu1 }
 0x60e   :  { %v8163_v8 = vpop.f32.mrf.mxu0 }
 0x60f   :  { %v8207_v21 = vadd.f32 %v8206_v20, %v8163_v8  ;;  %v8208_v59 = vpop.f32.mrf.mxu1  ;;  %v8255_v8 = vld [vmem:[%s17054_s11 + $0x20] sm:$0xff] }
 0x610   :  { %v8165_v47 = vpop.f32.mrf.mxu0 }
 0x611   :  { %v8209_v28 = vadd.f32 %v8208_v59, %v8165_v47  ;;  %v8210_v62 = vpop.f32.mrf.mxu1  ;;  %v16160_v42 = vadd.f32 %v8207_v21, %v7718_v55  ;;  %v8251_v21 = vld [vmem:[%s17054_s11] sm:$0xff]  ;;  %v16209_v59 = vld [vmem:[%s17046_s3 + $0xf8] sm:$0xff]  }
 0x612   :  { %v8167_v30 = vpop.f32.mrf.mxu0 }
 0x613   :  { %v8211_v22 = vadd.f32 %v8210_v62, %v8167_v30  ;;  %v8212_v58 = vpop.f32.mrf.mxu1  ;;  %v16162_v41 = vadd.f32 %v8209_v28, %v7719_v3  ;;  %v8275_v50 = vmul.f32 %v16160_v42, %v16160_v42 }
 0x614   :  { %v8169_v45 = vpop.f32.mrf.mxu0 }
 0x615   :  { %v16164_v27 = vadd.f32 %v8211_v22, %v7720_v49  ;;  %v8213_v33 = vadd.f32 %v8212_v58, %v8169_v45  ;;  %v8276_v31 = vmul.f32 %v16162_v41, %v16162_v41  ;;  %v8259_v22 = vld [vmem:[%s17055_s12] sm:$0x1]  ;;  %v16224_v45 = vld [vmem:[%s17046_s3 + $0xb8] sm:$0xff]  }
 0x617   :  { %v8261_v36 = vadd.f32 %v16164_v27, %v16160_v42  ;;  %v8277_v9 = vmul.f32 %v16164_v27, %v16164_v27  ;;  %v16172_v51 = vadd.f32 %v8213_v33, %v7721_v32  ;;  %v16229_v33 = vld [vmem:[%s17046_s3 + $0xf0] sm:$0xff]  }
 0x619   :  { %v8262_v46 = vrot.slane %v8261_v36, 4  ;;  %v8279_v54 = vadd.f32 %v8277_v9, %v8275_v50  ;;  %v8268_v15 = vadd.f32 %v16172_v51, %v16162_v41  ;;  %v8278_v13 = vmul.f32 %v16172_v51, %v16172_v51  ;;  %v8260_v50 = vld [vmem:[%s17056_s13] sm:$0x1]  ;;  %v16239_v9 = vld [vmem:[%s17046_s3 + $0x38] sm:$0xff]  }
 0x61b   :  { %v8263_v40 = vadd.f32 %v8262_v46, %v8261_v36  ;;  %v8280_v48 = vrot.slane %v8279_v54, 4  ;;  %v8269_v39 = vrot.slane %v8268_v15, 4  ;;  %v8286_v44 = vadd.f32 %v8278_v13, %v8276_v31  ;;  %v16244_v31 = vld [vmem:[%s17046_s3 + $0xb0] sm:$0xff]  }
 0x61c   :  { %v16263_v13 = vld [vmem:[%s17046_s3 + $0x30] sm:$0xff]  }
 0x61d   :  { %v8264_v43 = vrot.slane %v8263_v40, 2  ;;  %v8281_v35 = vadd.f32 %v8280_v48, %v8279_v54  ;;  %v8270_v0 = vadd.f32 %v8269_v39, %v8268_v15  ;;  %v8287_v19 = vrot.slane %v8286_v44, 4  ;;  %v16250_v54 = vld [vmem:[%s17046_s3 + $0x70] sm:$0xff]   ;;  %v16255_v15 = vld [vmem:[%s17046_s3 + $0xe8] sm:$0xff]  }
 0x61e   :  { %v16275_v48 = vld [vmem:[%s17046_s3 + $0x68] sm:$0xff]  }
 0x61f   :  { %v8265_v12 = vadd.f32 %v8264_v43, %v8263_v40  ;;  %v8282_v60 = vrot.slane %v8281_v35, 2  ;;  %v8271_v61 = vrot.slane %v8270_v0, 2  ;;  %v8288_v26 = vadd.f32 %v8287_v19, %v8286_v44  ;;  %v16268_v40 = vld [vmem:[%s17046_s3 + $0xa8] sm:$0xff]   ;;  %v16289_v44 = vld [vmem:[%s17046_s3 + $0xe0] sm:$0xff]   ;;  %v16313_v19 = vld [vmem:[%s17046_s3 + $0xd8] sm:$0xff]  }
 0x620   :  { %v16282_v39 = vld [vmem:[%s17046_s3 + $0x28] sm:$0xff]   ;;  %v16294_v43 = vld [vmem:[%s17046_s3 + $0x60] sm:$0xff]  }
 0x621   :  { %v8283_v34 = vadd.f32 %v8282_v60, %v8281_v35  ;;  %v8272_v24 = vadd.f32 %v8271_v61, %v8270_v0  ;;  %v8289_v10 = vrot.slane %v8288_v26, 2  ;;  %v8266_v5 = vrot.slane %v8265_v12, 1  ;;  %v16299_v35 = vld [vmem:[%s17046_s3 + $0xa0] sm:$0xff]   ;;  %v16323_v60 = vld [vmem:[%s17046_s3 + $0x98] sm:$0xff]  }
 0x622   :  { %v16304_v0 = vld [vmem:[%s17046_s3 + $0x20] sm:$0xff]   ;;  %v16328_v61 = vld [vmem:[%s17046_s3 + $0x18] sm:$0xff]  }
 0x623   :  { %v8273_v18 = vrot.slane %v8272_v24, 1  ;;  %v8290_v4 = vadd.f32 %v8289_v10, %v8288_v26  ;;  %v8284_v7 = vrot.slane %v8283_v34, 1  ;;  %v8267_v56 = vadd.f32 %v8266_v5, %v8265_v12  ;;  %v16318_v12 = vld [vmem:[%s17046_s3 + $0x58] sm:$0xff]   ;;  %v16333_v26 = vld [vmem:[%s17046_s3 + $0xd0] sm:$0xff]   ;;  %v16359_v5 = vld [vmem:[%s17046_s3 + $0xc8] sm:$0xff]  }
 0x624   :  { %v16352_v10 = vld [vmem:[%s17046_s3 + $0x10] sm:$0xff]  }
 0x625   :  { %v8274_v6 = vadd.f32 %v8273_v18, %v8272_v24  ;;  %v8291_v2 = vrot.slane %v8290_v4, 1  ;;  %v8285_v20 = vadd.f32 %v8284_v7, %v8283_v34  ;;  %v16338_v34 = vld [vmem:[%s17046_s3 + $0x50] sm:$0xff]   ;;  %v16364_v18 = vld [vmem:[%s17046_s3 + $0x48] sm:$0xff]  }
 0x626   :  { %v16347_v24 = vld [vmem:[%s17046_s3 + $0x90] sm:$0xff]   ;;  %v16376_v7 = vld [vmem:[%s17046_s3 + $0x8] sm:$0xff]  }
 0x627   :  { %8357 = vmatprep.mubr.f32.mxu1 %v8274_v6  ;;  %v8292_v1 = vadd.f32 %v8291_v2, %v8290_v4  ;;  %v16371_v4 = vld [vmem:[%s17046_s3 + $0x88] sm:$0xff]   ;;  %v16383_v6 = vld [vmem:[%s17046_s3 + $0xc0] sm:$0xff]  }
 0x628   :  { %8358 = vmatmul.mubr.f32.vlgmr.msra.gmra.mxu1 %v8267_v56  ;;  %v16388_v2 = vld [vmem:[%s17046_s3 + $0x40] sm:$0xff]  }
 0x629   :  { %8428 = vmatprep.mubr.f32.mxu0 %v8292_v1  ;;  %8584 = vmatprep.mubr.f32.mxu1 %v17437_v53  ;;  %v16395_v56 = vld [vmem:[%s17046_s3 + $0x80] sm:$0xff]  }
 0x62a   :  { %8429 = vmatmul.mubr.f32.vlgmr.msra.gmra.mxu0 %v8285_v20  ;;  %8545 = vmatpush1.msra.mxu1 %v8257_v52  ;;  %v16400_v1 = vld [vmem:[%s17046_s3] sm:$0xff]   ;;  %v16407_v20 = vld [vmem:[%s17046_s3 + $0x178] sm:$0xff]  }
 0x62b   :  { %8510 = vmatprep.mubr.f32.mxu0 %v17437_v53  ;;  %8471 = vmatpush1.msra.mxu0 %v8257_v52  ;;  %17473 = vst [vmem:[#allocation63_spill] sm:$0xff] %v16400_v1 }
 0x62c   :  { %8472 = vmatprep.subr.mxu0 %v8256_v38  ;;  %8546 = vmatprep.subr.mxu1 %v8256_v38 }
 0x62d   :  { %8473 = vmatpush1.msra.mxu0 %v8255_v8  ;;  %8547 = vmatpush1.msra.mxu1 %v8255_v8 }
 0x62e   :  { %8474 = vmatprep.subr.mxu0 %v8254_v23  ;;  %8548 = vmatprep.subr.mxu1 %v8254_v23 }
 0x62f   :  { %8475 = vmatpush1.msra.mxu0 %v8253_v11  ;;  %8549 = vmatpush1.msra.mxu1 %v8253_v11 }
 0x630   :  { %8476 = vmatprep.subr.mxu0 %v8252_v25  ;;  %8550 = vmatprep.subr.mxu1 %v8252_v25 }
 0x631   :  { %8477 = vmatpush1.msra.mxu0 %v8251_v21  ;;  %8551 = vmatpush1.msra.mxu1 %v8251_v21 }
 0x632   :  { %11451 = vmatprep.subr.bf16.mxu0 %v16209_v59  ;;  %11473 = vmatprep.subr.bf16.mxu1 %v16214_v57 }
 0x6e8   :  { %v11413_v37 = vpop.f32.mrf.mxu1 }
 0x6ea   :  { %v11414_v47 = vpop.f32.mrf.mxu1  ;;  %v11448_v63 = vpop.f32.mrf.mxu0 }
 0x6eb   :  { %v11415_v55 = vadd.f32 %v11414_v47, %v11413_v37 }
 0x6ec   :  { %v11449_v17 = vpop.f32.mrf.mxu0 }
 0x6ed   :  { %v8363_v28 = vmul.f32 0.0078125, %v11415_v55  ;;  %v11450_v62 = vadd.f32 %v11449_v17, %v11448_v63 }
 0x6ef   :  { %v8435_v3 = vmul.f32 %v8363_v28, %v8363_v28  ;;  %v8434_v30 = vmul.f32 0.0078125, %v11450_v62 }
 0x6f1   :  { %v8436_v14 = vsub.f32 %v8434_v30, %v8435_v3 }
 0x6f3   :  { %v8437_v49 = vadd.f32 1e-05, %v8436_v14 }
 0x6f5   :  { %12510 = vrsqrt.f32 %v8437_v49 }
 0x702   :  { %v12511_v58 = vpop.eup %12510 }
 0x703   :  { %v8439_v32 = vmul.f32 %v12511_v58, %v8259_v22 }
 0x705   :  { %11082 = vmatmul.mubr.msk.f32.vlgmr.msra.gmra.mxu0 %vm8442_vm5, %v8439_v32  ;;  %v8440_v36 = vmul.f32 %v8439_v32, %v8363_v28 }
 0x706   :  { %11452 = vmatpush3.bf16.msra.mxu0 %v16224_v45 }
 0x707   :  { %v8441_v46 = vsub.f32 %v8260_v50, %v8440_v36  ;;  %11453 = vmatprep.subr.bf16.mxu0 %v16229_v33 }
 0x709   :  { %11083 = vmatmul.mubr.msk.f32.vlgmr.msra.gmra.mxu1 %vm8442_vm5, %v8441_v46 }
 0x70a   :  { %11474 = vmatpush3.bf16.msra.mxu1 %v16239_v9  ;;  %11454 = vmatpush3.bf16.msra.mxu0 %v16244_v31 }
 0x70b   :  { %11475 = vmatprep.subr.bf16.mxu1 %v16250_v54  ;;  %11455 = vmatprep.subr.bf16.mxu0 %v16255_v15 }
 0x70e   :  { %11476 = vmatpush3.bf16.msra.mxu1 %v16263_v13  ;;  %11456 = vmatpush3.bf16.msra.mxu0 %v16268_v40 }
 0x70f   :  { %11477 = vmatprep.subr.bf16.mxu1 %v16275_v48  ;;  %11457 = vmatprep.subr.bf16.mxu0 %v16289_v44 }
 0x712   :  { %11478 = vmatpush3.bf16.msra.mxu1 %v16282_v39  ;;  %11458 = vmatpush3.bf16.msra.mxu0 %v16299_v35 }
 0x713   :  { %11479 = vmatprep.subr.bf16.mxu1 %v16294_v43  ;;  %11459 = vmatprep.subr.bf16.mxu0 %v16313_v19 }
 0x716   :  { %11480 = vmatpush3.bf16.msra.mxu1 %v16304_v0  ;;  %11460 = vmatpush3.bf16.msra.mxu0 %v16323_v60 }
 0x717   :  { %11481 = vmatprep.subr.bf16.mxu1 %v16318_v12  ;;  %11461 = vmatprep.subr.bf16.mxu0 %v16333_v26 }
 0x71a   :  { %11482 = vmatpush3.bf16.msra.mxu1 %v16328_v61  ;;  %11462 = vmatpush3.bf16.msra.mxu0 %v16347_v24 }
 0x71b   :  { %11483 = vmatprep.subr.bf16.mxu1 %v16338_v34  ;;  %11463 = vmatprep.subr.bf16.mxu0 %v16359_v5 }
 0x71e   :  { %11484 = vmatpush3.bf16.msra.mxu1 %v16352_v10  ;;  %11464 = vmatpush3.bf16.msra.mxu0 %v16371_v4 }
 0x71f   :  { %11485 = vmatprep.subr.bf16.mxu1 %v16364_v18  ;;  %11465 = vmatprep.subr.bf16.mxu0 %v16383_v6 }
 0x722   :  { %11486 = vmatpush3.bf16.msra.mxu1 %v16376_v7  ;;  %11466 = vmatpush3.bf16.msra.mxu0 %v16395_v56 }
 0x723   :  { %11487 = vmatprep.subr.bf16.mxu1 %v16388_v2  ;;  %11495 = vmatprep.subr.bf16.mxu0 %v16407_v20 }
 0x726   :  { %11488 = vmatpush3.bf16.msra.mxu1 %v16400_v1 }
 0x727   :  { %11517 = vmatprep.subr.bf16.mxu1 %v16412_v16  ;;  %v16670_v16 = vld [vmem:[%s17046_s3 + $0x180] sm:$0xff]  }
 0x7c5   :  { %v8512_v52 = vpop.f32.mrf.mxu0 }
 0x7c6   :  { %v8594_v38 = vrot.slane %v8512_v52, %v14990_v29 }
 0x7c7   :  { %v8514_v8 = vpop.f32.mrf.mxu0 }
 0x7c8   :  { %v8598_v23 = vrot.slane %v8514_v8, %v14990_v29  ;;  %v8599_v25 = vmul.f32 %v8594_v38, %v16160_v42  ;;  %v8601_v21 = vmul.f32 %v8594_v38, %v16164_v27 }
 0x7c9   :  { %v8586_v11 = vpop.f32.mrf.mxu1 }
 0x7ca   :  { %v8606_v37 = vrot.slane %v8586_v11, %v14990_v29  ;;  %v8600_v47 = vmul.f32 %v8598_v23, %v16162_v41  ;;  %v8602_v55 = vmul.f32 %v8598_v23, %v16172_v51 }
 0x7cb   :  { %v8588_v63 = vpop.f32.mrf.mxu1 }
 0x7cc   :  { %v8611_v17 = vadd.f32 %v8606_v37, %v8599_v25  ;;  %v8613_v28 = vadd.f32 %v8606_v37, %v8601_v21  ;;  %v8610_v62 = vrot.slane %v8588_v63, %v14990_v29 }
 0x7ce   :  { %v8615_v3 = vmax.f32 %v8611_v17, 0.0  ;;  %v8617_v30 = vmax.f32 %v8613_v28, 0.0  ;;  %v8612_v14 = vadd.f32 %v8610_v62, %v8600_v47  ;;  %v8614_v49 = vadd.f32 %v8610_v62, %v8602_v55 }
 0x7d0   :  { %v11307_v22 = vpack.c.bf16 %v8615_v3, %v8615_v3  ;;  %v11309_v58 = vpack.c.bf16 %v8617_v30, %v8617_v30  ;;  %v8616_v42 = vmax.f32 %v8612_v14, 0.0  ;;  %v8618_v32 = vmax.f32 %v8614_v49, 0.0  ;;  %v16453_v3 = vld [vmem:[%s17046_s3 + $0x138] sm:$0xff]  }
 0x7d1   :  { %v16458_v30 = vld [vmem:[%s17046_s3 + $0x1b8] sm:$0xff]  }
 0x7d2   :  { %v16426_v27 = vunpack.c.l.b16 %v11307_v22  ;;  %v16428_v50 = vunpack.c.l.b16 %v11309_v58  ;;  %v11308_v41 = vpack.c.bf16 %v8616_v42, %v8616_v42  ;;  %v11310_v36 = vpack.c.bf16 %v8618_v32, %v8618_v32  ;;  %17475 = vst [vmem:[#allocation23_spill] sm:$0xff] %v16458_v30 }
 0x7d4   :  { %v16430_v51 = vunpack.c.l.b16 %v11308_v41  ;;  %v16432_v46 = vunpack.c.l.b16 %v11310_v36  ;;  %v8700_v52 = vrot.slane %v16426_v27, 1  ;;  %v8845_v38 = vrot.slane %v16428_v50, 7  ;;  %v16467_v41 = vld [vmem:[%s17046_s3 + $0x170] sm:$0xff]  }
 0x7d5   :  { %v16472_v36 = vld [vmem:[%s17046_s3 + $0x1f0] sm:$0xff]  }
 0x7d6   :  { %v8703_v8 = vrot.slane %v16430_v51, 1  ;;  %v8847_v23 = vrot.slane %v16432_v46, 7  ;;  %v8702_v11 = vsel %vm8701_vm6, %v16428_v50, %v8700_v52  ;;  %v8846_v25 = vsel %vm8701_vm6, %v8845_v38, %v16426_v27  ;;  %17476 = vst [vmem:[#allocation56_spill] sm:$0xff] %v16472_v36 }
 0x7d7   :  { %v9025_v21 = vrot.slane %v16430_v51, 2  ;;  %v9026_v37 = vrot.slane %v16432_v46, 1  ;;  %v9205_v55 = vrot.slane %v16430_v51, 3  ;;  %v9206_v17 = vrot.slane %v16432_v46, 2 }
 0x7d8   :  { %v8704_v47 = vsel %vm8701_vm6, %v16432_v46, %v8703_v8  ;;  %v8848_v63 = vsel %vm8701_vm6, %v8847_v23, %v16430_v51  ;;  %v8705_v49 = vpack.c.b16 %v8702_v11, %v8702_v11  ;;  %v8849_v22 = vpack.c.b16 %v8846_v25, %v8846_v25  ;;  %v16483_v11 = vld [vmem:[%s17046_s3 + $0x130] sm:$0xff]  }
 0x7d9   :  { %v8706_v28 = vpack.c.b16 %v8704_v47, %v8704_v47  ;;  %v8850_v62 = vpack.c.b16 %v8848_v63, %v8848_v63  ;;  %v9027_v14 = vsel %vm8701_vm6, %v9026_v37, %v9025_v21  ;;  %v9207_v58 = vsel %vm8701_vm6, %v9206_v17, %v9205_v55  ;;  %v16488_v25 = vld [vmem:[%s17046_s3 + $0x1b0] sm:$0xff]   ;;  %v16497_v63 = vld [vmem:[%s17046_s3 + $0x168] sm:$0xff]  }
 0x7da   :  { %v9029_v42 = vpack.c.b16 %v9027_v14, %v9027_v14  ;;  %v16462_v32 = vpack.c.b16 %v9207_v58, %v9207_v58  ;;  %v9382_v52 = vrot.slane %v16426_v27, 4  ;;  %v9383_v38 = vrot.slane %v16428_v50, 3  ;;  %17477 = vst [vmem:[#allocation59_spill] sm:$0xff] %v16488_v25  ;;  %v16502_v55 = vld [vmem:[%s17046_s3 + $0x1e8] sm:$0xff]  }
 0x7db   :  { %8837 = vmatprep.mubr.bf16.mxu0 %v8706_v28  ;;  %8981 = vmatprep.mubr.bf16.mxu1 %v8850_v62  ;;  %v9612_v8 = vrot.slane %v16430_v51, 5  ;;  %v9613_v23 = vrot.slane %v16432_v46, 4  ;;  %v9609_v21 = vrot.slane %v16426_v27, 5  ;;  %v9610_v37 = vrot.slane %v16428_v50, 4  ;;  %17478 = vst [vmem:[#allocation14_spill] sm:$0xff] %v16502_v55 }
 0x7dc   :  { %8838 = vmatmul.mubr.bf16.vlgmr.msra.gmra.mxu0 %v8705_v49  ;;  %8982 = vmatmul.mubr.bf16.vlgmr.msra.gmra.mxu1 %v8849_v22  ;;  %v9663_v47 = vrot.slane %v16430_v51, 6  ;;  %v16505_v17 = vsel %vm8701_vm6, %v9383_v38, %v9382_v52  ;;  %v9664_v62 = vrot.slane %v16432_v46, 5  ;;  %v9714_v49 = vrot.slane %v16430_v51, 7  ;;  %v16527_v52 = vld [vmem:[%s17046_s3 + $0x128] sm:$0xff]  }
 0x7dd   :  { %11496 = vmatpush3.bf16.msra.mxu0 %v16453_v3  ;;  %11518 = vmatpush3.bf16.msra.mxu1 %v16458_v30  ;;  %v16508_v28 = vsel %vm8701_vm6, %v9613_v23, %v9612_v8  ;;  %v16514_v14 = vsel %vm8701_vm6, %v9610_v37, %v9609_v21  ;;  %v9715_v58 = vrot.slane %v16432_v46, 6  ;;  %v16532_v38 = vld [vmem:[%s17046_s3 + $0x1a8] sm:$0xff]   ;;  %v9661_v8 = vrot.slane %v16428_v50, 5  ;;  %v16542_v37 = vld [vmem:[%s17046_s3 + $0x160] sm:$0xff]  }
 0x7de   :  { %9160 = vmatprep.mubr.bf16.mxu0 %v9029_v42  ;;  %9340 = vmatprep.mubr.bf16.mxu1 %v16462_v32  ;;  %17479 = vst [vmem:[#allocation25_spill] sm:$0xff] %v16514_v14  ;;  %v16518_v22 = vsel %vm8701_vm6, %v9664_v62, %v9663_v47  ;;  %v9660_v42 = vrot.slane %v16426_v27, 6  ;;  %17481 = vst [vmem:[#allocation15_spill] sm:$0xff] %v16532_v38  ;;  %v9711_v23 = vrot.slane %v16426_v27, 7  ;;  %v9712_v21 = vrot.slane %v16428_v50, 6  ;;  %v16547_v47 = vld [vmem:[%s17046_s3 + $0x1e0] sm:$0xff]  }
 0x7df   :  { %11497 = vmatprep.subr.bf16.mxu0 %v16467_v41  ;;  %11519 = vmatprep.subr.bf16.mxu1 %v16472_v36  ;;  %17480 = vst [vmem:[#allocation26_spill] sm:$0xff] %v16518_v22  ;;  %17482 = vst [vmem:[#allocation27_spill] sm:$0xff] %v16547_v47  ;;  %v16550_v62 = vsel %vm8701_vm6, %v9715_v58, %v9714_v49  ;;  %v16568_v49 = vld [vmem:[%s17046_s3 + $0x1a0] sm:$0xff]   ;;  %v16575_v58 = vld [vmem:[%s17046_s3 + $0x158] sm:$0xff]   ;;  %v9023_v36 = vrot.slane %v16428_v50, 1  ;;  %v9203_v30 = vrot.slane %v16428_v50, 2 }
 0x7e0   :  { %17483 = vst [vmem:[#allocation24_spill] sm:$0xff] %v16550_v62  ;;  %v16553_v29 = vsel %vm8701_vm6, %v9661_v8, %v9660_v42  ;;  %v16556_v53 = vsel %vm8701_vm6, %v9712_v21, %v9711_v23  ;;  %17486 = vst [vmem:[#allocation81_spill] sm:$0xff] %v16568_v49  ;;  %v16580_v42 = vld [vmem:[%s17046_s3 + $0x1d8] sm:$0xff]   ;;  %v16599_v21 = vld [vmem:[%s17046_s3 + $0x150] sm:$0xff]   ;;  %v9202_v62 = vrot.slane %v16426_v27, 3  ;;  %v9386_v22 = vrot.slane %v16432_v46, 3 }
 0x7e1   :  { %11498 = vmatpush3.bf16.msra.mxu0 %v16483_v11  ;;  %11520 = vmatpush3.bf16.msra.mxu1 %v16488_v25  ;;  %17484 = vst [vmem:[#allocation11_spill] sm:$0xff] %v16553_v29  ;;  %17485 = vst [vmem:[#allocation76_spill] sm:$0xff] %v16556_v53  ;;  %v16587_v8 = vld [vmem:[%s17046_s3 + $0x118] sm:$0xff]   ;;  %v16604_v53 = vld [vmem:[%s17046_s3 + $0x1d0] sm:$0xff]   ;;  %v9022_v25 = vrot.slane %v16426_v27, 2 }
 0x7e2   :  { %11499 = vmatprep.subr.bf16.mxu0 %v16497_v63  ;;  %11521 = vmatprep.subr.bf16.mxu1 %v16502_v55  ;;  %v16563_v55 = vld [vmem:[%s17046_s3 + $0x120] sm:$0xff]   ;;  %17487 = vst [vmem:[#allocation28_spill] sm:$0xff] %v16580_v42  ;;  %v16592_v23 = vld [vmem:[%s17046_s3 + $0x198] sm:$0xff]   ;;  %17489 = vst [vmem:[#allocation29_spill] sm:$0xff] %v16604_v53 }
 0x7e3   :  { %17488 = vst [vmem:[#allocation77_spill] sm:$0xff] %v16592_v23  ;;  %v16611_v29 = vld [vmem:[%s17046_s3 + $0x110] sm:$0xff]   ;;  %v16665_v14 = vld [vmem:[%s17046_s3 + $0x100] sm:$0xff]   ;;  %v16677_v27 = vld [vmem:[%s17046_s3 + $0x278] sm:$0xff]   ;;  %v9024_v50 = vsel %vm8701_vm6, %v9023_v36, %v9022_v25 }
 0x7e4   :  { %v16703_v25 = vld [vmem:[%s17046_s3 + $0x230] sm:$0xff]  }
 0x7e5   :  { %11500 = vmatpush3.bf16.msra.mxu0 %v16527_v52  ;;  %11522 = vmatpush3.bf16.msra.mxu1 %v16532_v38  ;;  %v16647_v38 = vld [vmem:[%s17046_s3 + $0x140] sm:$0xff]  }
 0x7e6   :  { %11501 = vmatprep.subr.bf16.mxu0 %v16542_v37  ;;  %11523 = vmatprep.subr.bf16.mxu1 %v16547_v47  ;;  %v16635_v47 = vld [vmem:[%s17046_s3 + $0x108] sm:$0xff]  }
 0x7e9   :  { %11502 = vmatpush3.bf16.msra.mxu0 %v16563_v55  ;;  %11524 = vmatpush3.bf16.msra.mxu1 %v16568_v49  ;;  %v16623_v49 = vld [vmem:[%s17046_s3 + $0x148] sm:$0xff]  }
 0x7ea   :  { %11503 = vmatprep.subr.bf16.mxu0 %v16575_v58  ;;  %11525 = vmatprep.subr.bf16.mxu1 %v16580_v42  ;;  %v16616_v42 = vld [vmem:[%s17046_s3 + $0x190] sm:$0xff]  }
 0x7eb   :  { %17490 = vst [vmem:[#allocation78_spill] sm:$0xff] %v16616_v42 }
 0x7ed   :  { %11504 = vmatpush3.bf16.msra.mxu0 %v16587_v8  ;;  %11526 = vmatpush3.bf16.msra.mxu1 %v16592_v23  ;;  %v16628_v23 = vld [vmem:[%s17046_s3 + $0x1c8] sm:$0xff]  }
 0x7ee   :  { %11505 = vmatprep.subr.bf16.mxu0 %v16599_v21  ;;  %11527 = vmatprep.subr.bf16.mxu1 %v16604_v53  ;;  %17491 = vst [vmem:[#allocation31_spill] sm:$0xff] %v16628_v23  ;;  %v16640_v53 = vld [vmem:[%s17046_s3 + $0x188] sm:$0xff]  }
 0x7ef   :  { %17492 = vst [vmem:[#allocation75_spill] sm:$0xff] %v16640_v53 }
 0x7f1   :  { %11506 = vmatpush3.bf16.msra.mxu0 %v16611_v29  ;;  %11528 = vmatpush3.bf16.msra.mxu1 %v16616_v42  ;;  %v16652_v42 = vld [vmem:[%s17046_s3 + $0x1c0] sm:$0xff]  }
 0x7f2   :  { %11507 = vmatprep.subr.bf16.mxu0 %v16623_v49  ;;  %11529 = vmatprep.subr.bf16.mxu1 %v16628_v23  ;;  %17493 = vst [vmem:[#allocation80_spill] sm:$0xff] %v16652_v42  ;;  %v9385_v23 = vrot.slane %v16430_v51, 4  ;;  %v9204_v51 = vsel %vm8701_vm6, %v9203_v30, %v9202_v62  ;;  %v16696_v30 = vld [vmem:[%s17046_s3 + $0x270] sm:$0xff]  }
 0x7f3   :  { %v16689_v1 = vpack.c.b16 %v9204_v51, %v9204_v51  ;;  %v9776_v51 = vld [vmem:[%s17057_s14 + $0x40] sm:$0xff] }
 0x7f4   :  { %v9387_v46 = vsel %vm8701_vm6, %v9386_v22, %v9385_v23  ;;  %v16717_v22 = vld [vmem:[%s17046_s3 + $0x228] sm:$0xff]   ;;  %v9780_v23 = vld [vmem:[%s17057_s14 + $0x60] sm:$0xff] }
 0x7f5   :  { %11508 = vmatpush3.bf16.msra.mxu0 %v16635_v47  ;;  %11530 = vmatpush3.bf16.msra.mxu1 %v16640_v53  ;;  %v16687_v53 = vld [vmem:[%s17046_s3 + $0x238] sm:$0xff]   ;;  %v9389_v36 = vpack.c.b16 %v9387_v46, %v9387_v46 }
 0x7f6   :  { %11509 = vmatprep.subr.bf16.mxu0 %v16647_v38  ;;  %11531 = vmatprep.subr.bf16.mxu1 %v16652_v42  ;;  %v9028_v42 = vpack.c.b16 %v9024_v50, %v9024_v50  ;;  %v9777_v50 = vld [vmem:[%s17057_s14 + $0x48] sm:$0xff] }
 0x7f9   :  { %11510 = vmatpush3.bf16.msra.mxu0 %v16665_v14  ;;  %11532 = vmatpush3.bf16.msra.mxu1 %v16670_v16 }
 0x7fa   :  { %11539 = vmatprep.subr.bf16.mxu0 %v16677_v27  ;;  %11561 = vmatprep.subr.bf16.mxu1 %v16209_v59  ;;  %v16709_v59 = vld [vmem:[%s17046_s3 + $0x268] sm:$0xff]  }
 0x7fc   :  { %9161 = vmatmul.mubr.bf16.vlgmr.msra.gmra.mxu0 %v9028_v42  ;;  %9341 = vmatmul.mubr.bf16.vlgmr.msra.gmra.mxu1 %v16689_v1  ;;  %v9782_v42 = vld [vmem:[%s17057_s14 + $0x70] sm:$0xff] }
 0x7fd   :  { %11540 = vmatpush3.bf16.msra.mxu0 %v16687_v53  ;;  %9520 = vmatprep.mubr.bf16.mxu0 %v9389_v36 }
 0x7fe   :  { %11562 = vmatpush3.bf16.msra.mxu1 %v16224_v45  ;;  %9561 = vmatprep.mubr.bf16.mxu1 %v9389_v36  ;;  %v16724_v45 = vld [vmem:[%s17046_s3 + $0x260] sm:$0xff]  }
 0x7ff   :  { %11541 = vmatprep.subr.bf16.mxu0 %v16696_v30  ;;  %11563 = vmatprep.subr.bf16.mxu1 %v16229_v33  ;;  %v16731_v33 = vld [vmem:[%s17046_s3 + $0x220] sm:$0xff]  }
 0x801   :  { %11542 = vmatpush3.bf16.msra.mxu0 %v16703_v25 }
 0x802   :  { %11564 = vmatpush3.bf16.msra.mxu1 %v16244_v31  ;;  %11543 = vmatprep.subr.bf16.mxu0 %v16709_v59  ;;  %v16738_v31 = vld [vmem:[%s17046_s3 + $0x258] sm:$0xff]  }
 0x803   :  { %11565 = vmatprep.subr.bf16.mxu1 %v16255_v15  ;;  %v16745_v15 = vld [vmem:[%s17046_s3 + $0x218] sm:$0xff]  }
 0x805   :  { %11544 = vmatpush3.bf16.msra.mxu0 %v16717_v22 }
 0x806   :  { %11566 = vmatpush3.bf16.msra.mxu1 %v16268_v40  ;;  %11545 = vmatprep.subr.bf16.mxu0 %v16724_v45  ;;  %v16752_v40 = vld [vmem:[%s17046_s3 + $0x250] sm:$0xff]  }
 0x807   :  { %11567 = vmatprep.subr.bf16.mxu1 %v16289_v44  ;;  %v16759_v44 = vld [vmem:[%s17046_s3 + $0x210] sm:$0xff]  }
 0x809   :  { %11546 = vmatpush3.bf16.msra.mxu0 %v16731_v33 }
 0x80a   :  { %11568 = vmatpush3.bf16.msra.mxu1 %v16299_v35  ;;  %11547 = vmatprep.subr.bf16.mxu0 %v16738_v31  ;;  %v16766_v35 = vld [vmem:[%s17046_s3 + $0x248] sm:$0xff]  }
 0x80b   :  { %11569 = vmatprep.subr.bf16.mxu1 %v16313_v19  ;;  %v16773_v19 = vld [vmem:[%s17046_s3 + $0x208] sm:$0xff]  }
 0x80d   :  { %11548 = vmatpush3.bf16.msra.mxu0 %v16745_v15 }
 0x80e   :  { %11570 = vmatpush3.bf16.msra.mxu1 %v16323_v60  ;;  %11549 = vmatprep.subr.bf16.mxu0 %v16752_v40  ;;  %v16780_v60 = vld [vmem:[%s17046_s3 + $0x240] sm:$0xff]  }
 0x80f   :  { %11571 = vmatprep.subr.bf16.mxu1 %v16333_v26  ;;  %v16787_v26 = vld [vmem:[%s17046_s3 + $0x200] sm:$0xff]  }
 0x811   :  { %11550 = vmatpush3.bf16.msra.mxu0 %v16759_v44 }
 0x812   :  { %11572 = vmatpush3.bf16.msra.mxu1 %v16347_v24  ;;  %11551 = vmatprep.subr.bf16.mxu0 %v16766_v35  ;;  %v9388_v24 = vpack.c.b16 %v16505_v17, %v16505_v17 }
 0x813   :  { %11573 = vmatprep.subr.bf16.mxu1 %v16359_v5  ;;  %v9616_v5 = vpack.c.b16 %v16508_v28, %v16508_v28 }
 0x815   :  { %11552 = vmatpush3.bf16.msra.mxu0 %v16773_v19 }
 0x816   :  { %11574 = vmatpush3.bf16.msra.mxu1 %v16371_v4  ;;  %11553 = vmatprep.subr.bf16.mxu0 %v16780_v60  ;;  %v17506_v4 = vld [vmem:[#allocation28_spill] sm:$0xff] }
 0x817   :  { %11575 = vmatprep.subr.bf16.mxu1 %v16383_v6  ;;  %v17508_v6 = vld [vmem:[#allocation29_spill] sm:$0xff] }
 0x819   :  { %11554 = vmatpush3.bf16.msra.mxu0 %v16787_v26 }
 0x81a   :  { %11576 = vmatpush3.bf16.msra.mxu1 %v16395_v56  ;;  %11583 = vmatprep.subr.bf16.mxu0 %v16214_v57  ;;  %v17494_v57 = vld [vmem:[#allocation63_spill] sm:$0xff] }
 0x81b   :  { %11605 = vmatprep.subr.bf16.mxu1 %v16407_v20  ;;  %v17510_v56 = vld [vmem:[#allocation31_spill] sm:$0xff]  ;;  %v17512_v20 = vld [vmem:[#allocation80_spill] sm:$0xff] }
 0x81c   :  { %9521 = vmatmul.mubr.bf16.vlgmr.msra.gmra.mxu0 %v9388_v24 }
 0x81d   :  { %9562 = vmatmul.mubr.bf16.vlgmr.msra.gmra.mxu1 %v9388_v24  ;;  %11584 = vmatpush3.bf16.msra.mxu0 %v16239_v9  ;;  %v17495_v9 = vld [vmem:[#allocation65_spill] sm:$0xff] }
 0x81e   :  { %9601 = vmatprep.mubr.bf16.mxu0 %v16462_v32  ;;  %11606 = vmatpush3.bf16.msra.mxu1 %v16453_v3  ;;  %v17513_v3 = vld [vmem:[#allocation11_spill] sm:$0xff] }
 0x81f   :  { %9651 = vmatprep.mubr.bf16.mxu1 %v9616_v5  ;;  %11585 = vmatprep.subr.bf16.mxu0 %v16250_v54  ;;  %v17496_v54 = vld [vmem:[#allocation25_spill] sm:$0xff]  ;;  %v9666_v32 = vpack.c.b16 %v17513_v3, %v17513_v3 }
 0x820   :  { %11607 = vmatprep.subr.bf16.mxu1 %v16467_v41  ;;  %v17514_v41 = vmov 0.0  }
 0x821   :  { %11586 = vmatpush3.bf16.msra.mxu0 %v16263_v13  ;;  %v17497_v13 = vld [vmem:[#allocation26_spill] sm:$0xff] }
 0x822   :  { %11608 = vmatpush3.bf16.msra.mxu1 %v16483_v11  ;;  %11587 = vmatprep.subr.bf16.mxu0 %v16275_v48  ;;  %v9667_v48 = vpack.c.b16 %v17497_v13, %v17497_v13  ;;  %v17515_v11 = vld [vmem:[#allocation76_spill] sm:$0xff] }
 0x823   :  { %11609 = vmatprep.subr.bf16.mxu1 %v16497_v63  ;;  %v9717_v63 = vpack.c.b16 %v17515_v11, %v17515_v11 }
 0x825   :  { %11588 = vmatpush3.bf16.msra.mxu0 %v16282_v39  ;;  %v17498_v39 = vld [vmem:[#allocation23_spill] sm:$0xff] }
 0x826   :  { %11610 = vmatpush3.bf16.msra.mxu1 %v16527_v52  ;;  %11589 = vmatprep.subr.bf16.mxu0 %v16294_v43  ;;  %v17499_v43 = vld [vmem:[#allocation24_spill] sm:$0xff] }
 0x827   :  { %11611 = vmatprep.subr.bf16.mxu1 %v16542_v37 }
 0x829   :  { %11590 = vmatpush3.bf16.msra.mxu0 %v16304_v0  ;;  %v9718_v0 = vpack.c.b16 %v17499_v43, %v17499_v43 }
 0x82a   :  { %11612 = vmatpush3.bf16.msra.mxu1 %v16563_v55  ;;  %11591 = vmatprep.subr.bf16.mxu0 %v16318_v12  ;;  %v17500_v12 = vld [vmem:[#allocation56_spill] sm:$0xff] }
 0x82b   :  { %11613 = vmatprep.subr.bf16.mxu1 %v16575_v58  ;;  %v9783_v58 = vld [vmem:[%s17057_s14 + $0x78] sm:$0xff] }
 0x82d   :  { %11592 = vmatpush3.bf16.msra.mxu0 %v16328_v61  ;;  %v17501_v61 = vld [vmem:[#allocation59_spill] sm:$0xff] }
 0x82e   :  { %11614 = vmatpush3.bf16.msra.mxu1 %v16587_v8  ;;  %11593 = vmatprep.subr.bf16.mxu0 %v16338_v34  ;;  %v17502_v34 = vld [vmem:[#allocation14_spill] sm:$0xff]  ;;  %v9781_v8 = vld [vmem:[%s17057_s14 + $0x68] sm:$0xff] }
 0x82f   :  { %11615 = vmatprep.subr.bf16.mxu1 %v16599_v21  ;;  %v9779_v21 = vld [vmem:[%s17057_s14 + $0x58] sm:$0xff] }
 0x831   :  { %11594 = vmatpush3.bf16.msra.mxu0 %v16352_v10  ;;  %v17503_v10 = vld [vmem:[#allocation15_spill] sm:$0xff] }
 0x832   :  { %11616 = vmatpush3.bf16.msra.mxu1 %v16611_v29  ;;  %11595 = vmatprep.subr.bf16.mxu0 %v16364_v18  ;;  %v9615_v29 = vpack.c.b16 %v17496_v54, %v17496_v54  ;;  %v17504_v18 = vld [vmem:[#allocation27_spill] sm:$0xff] }
 0x833   :  { %11617 = vmatprep.subr.bf16.mxu1 %v16623_v49 }
 0x835   :  { %11596 = vmatpush3.bf16.msra.mxu0 %v16376_v7  ;;  %v17507_v7 = vld [vmem:[#allocation77_spill] sm:$0xff] }
 0x836   :  { %11618 = vmatpush3.bf16.msra.mxu1 %v16635_v47  ;;  %11597 = vmatprep.subr.bf16.mxu0 %v16388_v2  ;;  %v17509_v2 = vld [vmem:[#allocation78_spill] sm:$0xff] }
 0x837   :  { %11619 = vmatprep.subr.bf16.mxu1 %v16647_v38 }
 0x839   :  { %11598 = vmatpush3.bf16.msra.mxu0 %v17494_v57 }
 0x83a   :  { %11620 = vmatpush3.bf16.msra.mxu1 %v16665_v14  ;;  %11627 = vmatprep.subr.bf16.mxu0 %v17495_v9 }
 0x83b   :  { %11649 = vmatprep.subr.bf16.mxu1 %v16677_v27  ;;  %v9778_v27 = vld [vmem:[%s17057_s14 + $0x50] sm:$0xff] }
 0x83c   :  { %9602 = vmatmul.mubr.bf16.vlgmr.msra.gmra.mxu0 %v16689_v1  ;;  %v17511_v1 = vld [vmem:[#allocation75_spill] sm:$0xff] }
 0x83d   :  { %9652 = vmatmul.mubr.bf16.vlgmr.msra.gmra.mxu1 %v9615_v29  ;;  %11628 = vmatpush3.bf16.msra.mxu0 %v17498_v39 }
 0x83e   :  { %9702 = vmatprep.mubr.bf16.mxu0 %v9667_v48  ;;  %11650 = vmatpush3.bf16.msra.mxu1 %v16687_v53  ;;  %v17505_v53 = vld [vmem:[#allocation81_spill] sm:$0xff] }
 0x83f   :  { %9753 = vmatprep.mubr.bf16.mxu1 %v9718_v0  ;;  %11629 = vmatprep.subr.bf16.mxu0 %v17500_v12 }
 0x840   :  { %11651 = vmatprep.subr.bf16.mxu1 %v16696_v30 }
 0x841   :  { %11630 = vmatpush3.bf16.msra.mxu0 %v17501_v61 }
 0x842   :  { %11652 = vmatpush3.bf16.msra.mxu1 %v16703_v25  ;;  %11631 = vmatprep.subr.bf16.mxu0 %v17502_v34 }
 0x843   :  { %11653 = vmatprep.subr.bf16.mxu1 %v16709_v59 }
 0x845   :  { %11632 = vmatpush3.bf16.msra.mxu0 %v17503_v10 }
 0x846   :  { %11654 = vmatpush3.bf16.msra.mxu1 %v16717_v22  ;;  %11633 = vmatprep.subr.bf16.mxu0 %v17504_v18 }
 0x847   :  { %11655 = vmatprep.subr.bf16.mxu1 %v16724_v45 }
 0x849   :  { %11634 = vmatpush3.bf16.msra.mxu0 %v17505_v53 }
 0x84a   :  { %11656 = vmatpush3.bf16.msra.mxu1 %v16731_v33  ;;  %11635 = vmatprep.subr.bf16.mxu0 %v17506_v4 }
 0x84b   :  { %11657 = vmatprep.subr.bf16.mxu1 %v16738_v31 }
 0x84d   :  { %11636 = vmatpush3.bf16.msra.mxu0 %v17507_v7 }
 0x84e   :  { %11658 = vmatpush3.bf16.msra.mxu1 %v16745_v15  ;;  %11637 = vmatprep.subr.bf16.mxu0 %v17508_v6 }
 0x84f   :  { %11659 = vmatprep.subr.bf16.mxu1 %v16752_v40 }
 0x851   :  { %11638 = vmatpush3.bf16.msra.mxu0 %v17509_v2 }
 0x852   :  { %11660 = vmatpush3.bf16.msra.mxu1 %v16759_v44  ;;  %11639 = vmatprep.subr.bf16.mxu0 %v17510_v56 }
 0x853   :  { %11661 = vmatprep.subr.bf16.mxu1 %v16766_v35 }
 0x855   :  { %11640 = vmatpush3.bf16.msra.mxu0 %v17511_v1 }
 0x856   :  { %11662 = vmatpush3.bf16.msra.mxu1 %v16773_v19  ;;  %11641 = vmatprep.subr.bf16.mxu0 %v17512_v20 }
 0x857   :  { %11663 = vmatprep.subr.bf16.mxu1 %v16780_v60 }
 0x859   :  { %11642 = vmatpush3.bf16.msra.mxu0 %v16670_v16 }
 0x85a   :  { %11664 = vmatpush3.bf16.msra.mxu1 %v16787_v26  ;;  %11724 = vmatprep.subr.mxu0 %v17514_v41 }
 0x85b   :  { %11759 = vmatprep.subr.mxu1 %v17514_v41 }
 0x85c   :  { %9703 = vmatmul.mubr.bf16.vlgmr.msra.gmra.mxu0 %v9666_v32 }
 0x85d   :  { %9754 = vmatmul.mubr.bf16.vlgmr.msra.gmra.mxu1 %v9717_v63  ;;  %11725 = vmatpush3.msra.mxu0 %v9783_v58 }
 0x85e   :  { %11760 = vmatpush3.msra.mxu1 %v9783_v58  ;;  %11726 = vmatprep.subr.mxu0 %v17514_v41 }
 0x85f   :  { %11761 = vmatprep.subr.mxu1 %v17514_v41  ;;  %11727 = vmatpush3.msra.mxu0 %v9782_v42 }
 0x860   :  { %11762 = vmatpush3.msra.mxu1 %v9782_v42  ;;  %11728 = vmatprep.subr.mxu0 %v17514_v41 }
 0x861   :  { %11763 = vmatprep.subr.mxu1 %v17514_v41  ;;  %11729 = vmatpush3.msra.mxu0 %v9781_v8 }
 0x862   :  { %11764 = vmatpush3.msra.mxu1 %v9781_v8  ;;  %11730 = vmatprep.subr.mxu0 %v17514_v41 }
 0x863   :  { %11765 = vmatprep.subr.mxu1 %v17514_v41  ;;  %11731 = vmatpush3.msra.mxu0 %v9780_v23 }
 0x864   :  { %11766 = vmatpush3.msra.mxu1 %v9780_v23  ;;  %11732 = vmatprep.subr.mxu0 %v17514_v41 }
 0x865   :  { %11767 = vmatprep.subr.mxu1 %v17514_v41  ;;  %11733 = vmatpush3.msra.mxu0 %v9779_v21 }
 0x866   :  { %11768 = vmatpush3.msra.mxu1 %v9779_v21  ;;  %11734 = vmatprep.subr.mxu0 %v17514_v41 }
 0x867   :  { %11769 = vmatprep.subr.mxu1 %v17514_v41  ;;  %11735 = vmatpush3.msra.mxu0 %v9778_v27 }
 0x868   :  { %11770 = vmatpush3.msra.mxu1 %v9778_v27  ;;  %11736 = vmatprep.subr.mxu0 %v17514_v41 }
 0x869   :  { %11771 = vmatprep.subr.mxu1 %v17514_v41  ;;  %11737 = vmatpush3.msra.mxu0 %v9777_v50 }
 0x86a   :  { %11772 = vmatpush3.msra.mxu1 %v9777_v50  ;;  %11738 = vmatprep.subr.mxu0 %v17514_v41 }
 0x86b   :  { %11773 = vmatprep.subr.mxu1 %v17514_v41  ;;  %11739 = vmatpush3.msra.mxu0 %v9776_v51 }
 0x86c   :  { %11774 = vmatpush3.msra.mxu1 %v9776_v51  ;;  %11740 = vmatprep.subr.mxu0 %v17514_v41 }
 0x86d   :  { %11775 = vmatprep.subr.mxu1 %v17514_v41  ;;  %11756 = vmatprep.mubr.msk.f32.mxu0 %vm12706_vm7, %v17514_v41 }
 0x86e   :  { %11791 = vmatprep.mubr.msk.f32.mxu1 %vm12706_vm7, %v17514_v41 }
 0x89c   :  { %v11467_v55 = vpop.f32.mrf.mxu0  ;;  %v11489_v17 = vpop.f32.mrf.mxu1 }
 0x89e   :  { %v11468_v28 = vpop.f32.mrf.mxu0  ;;  %v11490_v14 = vpop.f32.mrf.mxu1 }
 0x89f   :  { %v11469_v52 = vadd.f32 %v11468_v28, %v11467_v55  ;;  %v11491_v16 = vadd.f32 %v11490_v14, %v11489_v17  ;;  %v9775_v14 = vld [vmem:[%s17057_s14 + $0x38] sm:$0xff] }
 0x8a0   :  { %v11470_v38 = vpop.f32.mrf.mxu0  ;;  %v11492_v37 = vpop.f32.mrf.mxu1  ;;  %11741 = vmatpush3.msra.mxu0 %v9775_v14  ;;  %11776 = vmatpush3.msra.mxu1 %v9775_v14  ;;  %v11298_v14 = vld [vmem:[%s17048_s5] ss:$0 sm:$0xff] }
 0x8a1   :  { %v8984_v47 = vadd.f32 %v11491_v16, %v11469_v52  ;;  %v9774_v52 = vld [vmem:[%s17057_s14 + $0x30] sm:$0xff]  ;;  %11742 = vmatprep.subr.mxu0 %v17514_v41  ;;  %11777 = vmatprep.subr.mxu1 %v17514_v41  ;;  %v9773_v16 = vld [vmem:[%s17057_s14 + $0x28] sm:$0xff]  ;;  %v9772_v38 = vld [vmem:[%s17057_s14 + $0x20] sm:$0xff] }
 0x8a2   :  { %v11471_v62 = vpop.f32.mrf.mxu0  ;;  %v11493_v49 = vpop.f32.mrf.mxu1  ;;  %11743 = vmatpush3.msra.mxu0 %v9774_v52  ;;  %11778 = vmatpush3.msra.mxu1 %v9774_v52  ;;  %v9771_v37 = vld [vmem:[%s17057_s14 + $0x18] sm:$0xff] }
 0x8a3   :  { %11744 = vmatprep.subr.mxu0 %v17514_v41  ;;  %11779 = vmatprep.subr.mxu1 %v17514_v41  ;;  %v9769_v62 = vld [vmem:[%s17057_s14 + $0x8] sm:$0xff]  ;;  %v9768_v49 = vld [vmem:[%s17057_s14] sm:$0xff] }
 0x8a4   :  { %11745 = vmatpush3.msra.mxu0 %v9773_v16  ;;  %11780 = vmatpush3.msra.mxu1 %v9773_v16 }
 0x8a5   :  { %11746 = vmatprep.subr.mxu0 %v17514_v41  ;;  %11781 = vmatprep.subr.mxu1 %v17514_v41 }
 0x8a6   :  { %11747 = vmatpush3.msra.mxu0 %v9772_v38  ;;  %11782 = vmatpush3.msra.mxu1 %v9772_v38 }
 0x8a7   :  { %11748 = vmatprep.subr.mxu0 %v17514_v41  ;;  %11783 = vmatprep.subr.mxu1 %v17514_v41 }
 0x8a8   :  { %11749 = vmatpush3.msra.mxu0 %v9771_v37  ;;  %11784 = vmatpush3.msra.mxu1 %v9771_v37 }
 0x8a9   :  { %11750 = vmatprep.subr.mxu0 %v17514_v41  ;;  %11785 = vmatprep.subr.mxu1 %v17514_v41 }
 0x8bc   :  { %v11511_v46 = vpop.f32.mrf.mxu0  ;;  %v11533_v36 = vpop.f32.mrf.mxu1 }
 0x8be   :  { %v11512_v30 = vpop.f32.mrf.mxu0  ;;  %v11534_v25 = vpop.f32.mrf.mxu1 }
 0x8bf   :  { %v11513_v59 = vadd.f32 %v11512_v30, %v11511_v46  ;;  %v11535_v22 = vadd.f32 %v11534_v25, %v11533_v36 }
 0x8c0   :  { %v11514_v45 = vpop.f32.mrf.mxu0  ;;  %v11536_v33 = vpop.f32.mrf.mxu1 }
 0x8c1   :  { %v9168_v31 = vadd.f32 %v11513_v59, %v8984_v47  ;;  %v9770_v47 = vld [vmem:[%s17057_s14 + $0x10] sm:$0xff] }
 0x8c2   :  { %v11515_v15 = vpop.f32.mrf.mxu0  ;;  %v11537_v40 = vpop.f32.mrf.mxu1  ;;  %11751 = vmatpush3.msra.mxu0 %v9770_v47  ;;  %11786 = vmatpush3.msra.mxu1 %v9770_v47 }
 0x8c3   :  { %v9348_v44 = vadd.f32 %v11535_v22, %v9168_v31  ;;  %11752 = vmatprep.subr.mxu0 %v17514_v41  ;;  %11787 = vmatprep.subr.mxu1 %v17514_v41  ;;  %v9787_v15 = vld [vmem:[%s17058_s15 + $0x18] sm:$0xff]  ;;  %v9786_v40 = vld [vmem:[%s17058_s15 + $0x10] sm:$0xff] }
 0x8c4   :  { %11753 = vmatpush3.msra.mxu0 %v9769_v62  ;;  %11788 = vmatpush3.msra.mxu1 %v9769_v62 }
 0x8c5   :  { %11754 = vmatprep.subr.mxu0 %v17514_v41  ;;  %11789 = vmatprep.subr.mxu1 %v17514_v41 }
 0x8c6   :  { %11755 = vmatpush3.msra.mxu0 %v9768_v49  ;;  %11790 = vmatpush3.msra.mxu1 %v9768_v49 }
 0x8c7   :  { %11794 = vmatprep.subr.mxu0 %v17514_v41  ;;  %11805 = vmatprep.subr.mxu1 %v17514_v41 }
 0x8dc   :  { %v11555_v35 = vpop.f32.mrf.mxu0 }
 0x8dd   :  { %v11577_v19 = vpop.f32.mrf.mxu1 }
 0x8de   :  { %v11556_v60 = vpop.f32.mrf.mxu0 }
 0x8df   :  { %v11557_v26 = vadd.f32 %v11556_v60, %v11555_v35  ;;  %v11578_v24 = vpop.f32.mrf.mxu1  ;;  %v9784_v35 = vld [vmem:[%s17058_s15] sm:$0xff] }
 0x8e0   :  { %v11558_v5 = vpop.f32.mrf.mxu0  ;;  %v11579_v18 = vadd.f32 %v11578_v24, %v11577_v19 }
 0x8e1   :  { %v16916_v57 = vadd.f32 %v11557_v26, %v9348_v44  ;;  %v11580_v9 = vpop.f32.mrf.mxu1  ;;  %v9785_v44 = vld [vmem:[%s17058_s15 + $0x8] sm:$0xff] }
 0x8e2   :  { %v11559_v54 = vpop.f32.mrf.mxu0 }
 0x8e3   :  { %v11581_v29 = vpop.f32.mrf.mxu1 }
 0x8fc   :  { %v11599_v13 = vpop.f32.mrf.mxu0 }
 0x8fd   :  { %v11621_v48 = vpop.f32.mrf.mxu1 }
 0x8fe   :  { %v11600_v39 = vpop.f32.mrf.mxu0 }
 0x8ff   :  { %v11622_v43 = vpop.f32.mrf.mxu1  ;;  %v11601_v10 = vadd.f32 %v11600_v39, %v11599_v13  ;;  %v9788_v13 = vld [vmem:[%s17059_s16] sm:$0x1]  ;;  %v12500_v39 = vld [vmem:[%s17047_s4 + $0x38] sm:$0xff]  }
 0x900   :  { %v11602_v0 = vpop.f32.mrf.mxu0  ;;  %v11623_v7 = vadd.f32 %v11622_v43, %v11621_v48 }
 0x901   :  { %v11624_v12 = vpop.f32.mrf.mxu1  ;;  %v9604_v53 = vadd.f32 %v11601_v10, %v11579_v18  ;;  %v9789_v0 = vld [vmem:[%s17060_s17] sm:$0x1]  ;;  %v12502_v10 = vld [vmem:[%s17047_s4 + $0x28] sm:$0xff]  }
 0x902   :  { %v11603_v61 = vpop.f32.mrf.mxu0  ;;  %v12503_v18 = vld [vmem:[%s17047_s4 + $0x20] sm:$0xff]  }
 0x903   :  { %v11625_v34 = vpop.f32.mrf.mxu1  ;;  %v9659_v56 = vadd.f32 %v11623_v7, %v9604_v53  ;;  %v12501_v61 = vld [vmem:[%s17047_s4 + $0x30] sm:$0xff]   ;;  %v12504_v53 = vld [vmem:[%s17047_s4 + $0x18] sm:$0xff]   ;;  %v12506_v7 = vld [vmem:[%s17047_s4 + $0x8] sm:$0xff]  }
 0x91c   :  { %v11643_v4 = vpop.f32.mrf.mxu0 }
 0x91d   :  { %v11665_v6 = vpop.f32.mrf.mxu1 }
 0x91e   :  { %v11644_v2 = vpop.f32.mrf.mxu0 }
 0x91f   :  { %v11645_v1 = vadd.f32 %v11644_v2, %v11643_v4  ;;  %v11666_v20 = vpop.f32.mrf.mxu1  ;;  %v12505_v4 = vld [vmem:[%s17047_s4 + $0x10] sm:$0xff]  }
 0x920   :  { %v11646_v3 = vpop.f32.mrf.mxu0  ;;  %v11667_v11 = vadd.f32 %v11666_v20, %v11665_v6  ;;  %v12507_v6 = vld [vmem:[%s17047_s4] sm:$0xff]   ;;  %s12707_s4 = smov [#allocation5]  }
 0x921   :  { %v9710_v32 = vadd.f32 %v11645_v1, %v9659_v56  ;;  %v11668_v63 = vpop.f32.mrf.mxu1  ;;  %v17516_v56 = vld [vmem:[#allocation55_spill] sm:$0xff]  ;;  %s10230_s12 = sshll.u32 %s12707_s4, 4  ;;  %s10231_s12 = int_to_ptr.vmem [resolvable:$true] %s10230_s12 }
 0x922   :  { %v11647_v55 = vpop.f32.mrf.mxu0  ;;  %s12675_s23 = scalar_lea.vmem %s10231_s12, 32  ;;  %p12680_p6 = scmp.lt.s32.totalorder %s10231_s12, %s10231_s12 }
 0x923   :  { %v11669_v17 = vpop.f32.mrf.mxu1  ;;  %v9761_v28 = vadd.f32 %v11667_v11, %v9710_v32  ;;  %p12676_p5 = scmp.ne.s32.totalorder %s10231_s12, %s12675_s23  ;;  %p12681_p7 = scmp.lt.s32.totalorder %s12675_s23, %s12675_s23 }
 0x925   :  { %9763 = vrot.lane.b32.xlu0 %v9761_v28, %s12705_s8  ;;  %p12682_p8 = por %p12681_p7, %p12680_p6 }
 0x927   :  { %p12683_p9 = pnand %p12682_p8, %p12676_p5 }
 0x997   :  { %v9764_v58 = vpop.permute.xlu0 %9763 }
 0x998   :  { %v16963_v42 = vsel %vm9766_vm8, %v16916_v57, %v9764_v58 }
 0x999   :  { %v9790_v8 = vsel %vm1307_vm0, %v16963_v42, 0.0  ;;  %v9797_v23 = vmul.f32 %v16963_v42, %v16963_v42 }
 0x99a   :  { %v9791_v21 = vrot.slane %v9790_v8, 4 }
 0x99b   :  { %v9798_v27 = vsel %vm1307_vm0, %v9797_v23, 0.0 }
 0x99c   :  { %v9792_v50 = vadd.f32 %v9791_v21, %v9790_v8  ;;  %v9799_v51 = vrot.slane %v9798_v27, 4 }
 0x99e   :  { %v9793_v46 = vrot.slane %v9792_v50, 2  ;;  %v9800_v36 = vadd.f32 %v9799_v51, %v9798_v27 }
 0x9a0   :  { %v9794_v30 = vadd.f32 %v9793_v46, %v9792_v50  ;;  %v9801_v25 = vrot.slane %v9800_v36, 2 }
 0x9a2   :  { %v9795_v59 = vrot.slane %v9794_v30, 1  ;;  %v9802_v22 = vadd.f32 %v9801_v25, %v9800_v36 }
 0x9a4   :  { %v9796_v45 = vadd.f32 %v9795_v59, %v9794_v30  ;;  %v9803_v33 = vrot.slane %v9802_v22, 1 }
 0x9a6   :  { %v9804_v31 = vadd.f32 %v9803_v33, %v9802_v22  ;;  %11757 = vmatmul.mubr.f32.vlgmr.msra.gmra.mxu0 %v9796_v45 }
 0x9a7   :  { %11802 = vmatprep.mubr.msk.f32.mxu0 %vm12706_vm7, %v17514_v41  ;;  %11795 = vmatpush3.msra.mxu0 %v9787_v15 }
 0x9a8   :  { %11792 = vmatmul.mubr.f32.vlgmr.msra.gmra.mxu1 %v9804_v31  ;;  %11796 = vmatprep.subr.mxu0 %v17514_v41 }
 0x9a9   :  { %11813 = vmatprep.mubr.msk.f32.mxu1 %vm12706_vm7, %v17514_v41  ;;  %11806 = vmatpush3.msra.mxu1 %v9787_v15 }
 0x9aa   :  { %11807 = vmatprep.subr.mxu1 %v17514_v41  ;;  %11797 = vmatpush3.msra.mxu0 %v9786_v40 }
 0x9ab   :  { %11808 = vmatpush3.msra.mxu1 %v9786_v40  ;;  %11798 = vmatprep.subr.mxu0 %v17514_v41 }
 0x9ac   :  { %11809 = vmatprep.subr.mxu1 %v17514_v41  ;;  %11799 = vmatpush3.msra.mxu0 %v9785_v44 }
 0x9ad   :  { %11810 = vmatpush3.msra.mxu1 %v9785_v44  ;;  %11800 = vmatprep.subr.mxu0 %v17514_v41 }
 0x9ae   :  { %11811 = vmatprep.subr.mxu1 %v17514_v41  ;;  %11801 = vmatpush3.msra.mxu0 %v9784_v35 }
 0x9af   :  { %11812 = vmatpush3.msra.mxu1 %v9784_v35  ;;  %11816 = vmatprep.subr.bf16.mxu0 %v17514_v41 }
 0xa66   :  { %v9871_v19 = vpop.f32.mrf.mxu0 }
 0xa67   :  { %v9875_v60 = vmul.f32 0.125, %v9871_v19 }
 0xa68   :  { %v11758_v26 = vpop.f32.mrf.mxu0  ;;  %v9942_v24 = vpop.f32.mrf.mxu1 }
 0xa69   :  { %v9947_v5 = vmul.f32 %v9875_v60, %v9875_v60  ;;  %v9946_v57 = vmul.f32 0.125, %v9942_v24 }
 0xa6a   :  { %v11793_v9 = vpop.f32.mrf.mxu1 }
 0xa6b   :  { %v9948_v54 = vsub.f32 %v9946_v57, %v9947_v5 }
 0xa6d   :  { %v9949_v29 = vadd.f32 1e-05, %v9948_v54 }
 0xa6f   :  { %12512 = vrsqrt.f32 %v9949_v29 }
 0xa7c   :  { %v12513_v48 = vpop.eup %12512 }
 0xa7d   :  { %v9951_v43 = vmul.f32 %v12513_v48, %v9788_v13 }
 0xa7f   :  { %11803 = vmatmul.mubr.msk.f32.vlgmr.msra.gmra.mxu0 %vm8442_vm5, %v9951_v43  ;;  %v9952_v12 = vmul.f32 %v9951_v43, %v9875_v60 }
 0xa80   :  { %11817 = vmatpush3.bf16.msra.mxu0 %v12500_v39  ;;  %11832 = vmatprep.mubr.msk.bf16.mxu0 %vm12706_vm7, %v17514_v41 }
 0xa81   :  { %v9953_v34 = vsub.f32 %v9789_v0, %v9952_v12  ;;  %11818 = vmatprep.subr.bf16.mxu0 %v17514_v41 }
 0xa83   :  { %11814 = vmatmul.mubr.msk.f32.vlgmr.msra.gmra.mxu1 %vm8442_vm5, %v9953_v34 }
 0xa84   :  { %11819 = vmatpush3.bf16.msra.mxu0 %v12501_v61 }
 0xa85   :  { %11820 = vmatprep.subr.bf16.mxu0 %v17514_v41 }
 0xa88   :  { %11821 = vmatpush3.bf16.msra.mxu0 %v12502_v10 }
 0xa89   :  { %11822 = vmatprep.subr.bf16.mxu0 %v17514_v41 }
 0xa8c   :  { %11823 = vmatpush3.bf16.msra.mxu0 %v12503_v18 }
 0xa8d   :  { %11824 = vmatprep.subr.bf16.mxu0 %v17514_v41 }
 0xa90   :  { %11825 = vmatpush3.bf16.msra.mxu0 %v12504_v53 }
 0xa91   :  { %11826 = vmatprep.subr.bf16.mxu0 %v17514_v41 }
 0xa94   :  { %11827 = vmatpush3.bf16.msra.mxu0 %v12505_v4 }
 0xa95   :  { %11828 = vmatprep.subr.bf16.mxu0 %v17514_v41 }
 0xa98   :  { %11829 = vmatpush3.bf16.msra.mxu0 %v12506_v7 }
 0xa99   :  { %11830 = vmatprep.subr.bf16.mxu0 %v17514_v41 }
 0xa9c   :  { %11831 = vmatpush3.bf16.msra.mxu0 %v12507_v6 }
 0xb3f   :  { %v10023_v2 = vpop.f32.mrf.mxu0 }
 0xb40   :  { %v10103_v1 = vrot.slane %v10023_v2, %v17516_v56 }
 0xb41   :  { %v11804_v20 = vpop.f32.mrf.mxu0 }
 0xb42   :  { %v10104_v32 = vmul.f32 %v10103_v1, %v16963_v42 }
 0xb43   :  { %v10096_v3 = vpop.f32.mrf.mxu1 }
 0xb44   :  { %v10108_v11 = vrot.slane %v10096_v3, %v17516_v56 }
 0xb45   :  { %v11815_v63 = vpop.f32.mrf.mxu1 }
 0xb46   :  { %v10109_v55 = vadd.f32 %v10108_v11, %v10104_v32 }
 0xb48   :  { %v10110_v17 = vmax.f32 %v10109_v55, 0.0 }
 0xb4a   :  { %v10111_v28 = vpack.c.bf16 %v10110_v17, %v10110_v17 }
 0xb4c   :  { %11833 = vmatmul.mubr.bf16.vlgmr.msra.gmra.mxu0 %v10111_v28 }
 0xc0c   :  { %v10217_v41 = vpop.f32.mrf.mxu0 }
 0xc0d   :  { %v10218_v52 = vadd.f32 %v11298_v14, %v10217_v41 }
 0xc0e   :  { %v11834_v16 = vpop.f32.mrf.mxu0 }
 0xc0f   :  { %10223 = vst [vmem:[#allocation5] sm:$0x3] %v10218_v52 }
 0xc10   :  { %v10220_v38 = vpop.f32.mrf.mxu0 }
 0xc11   :  { %12686 = shalt.err (!%p12683_p9)
}
 0xc12   :  { %10233 = dma.vmem_to_hbm [thread:$0]  %s10231_s12, 32, %s17061_s18, [#allocation4]   ;;  %v11835_v37 = vpop.f32.mrf.mxu0 }
 0xc13   :  { %12697 = dma.done.wait [#allocation4], 32  }
 0xc14   :  { %12698 = vsyncadd [#allocation4], 4294967264 }
 0xc15   :  { %10237 = vsyncpa [#allocation3], 1 }
 0xc16   :  { %10238 = vsyncpa [#allocation4], 1 }

</bundles_post_ra>
